<compile_context>
chip_gen: v7x
topology: tpu7x:2x2x1
jax: 0.10.0
libtpu: 0.0.40
codegen_flags: <defaults>
</compile_context>

<pallas_src>
import jax
import jax.numpy as jnp
from jax import lax
from jax.experimental import pallas as pl
from jax.experimental.pallas import tpu as pltpu

LRELU_SLOPE = 0.2
BN_EPS = 1e-5
VMEM_LIMIT = 48 * 1024 * 1024  # explicit limit; tiles here stay far below it


# ----------------------------------------------------------------------------
# Pallas kernels
# ----------------------------------------------------------------------------
def _conv_gemm_kernel(a_ref, w_ref, scale_ref, bias_ref, o_ref):
    """One M-tile of: (folded patches @ block-diag W) * scale + bias -> LeakyReLU.

    a_ref     : (tq, 4*K)  bf16  -- 4 consecutive im2col rows packed per row
    w_ref     : (4*K, 128) bf16  -- kron(I4, W): 4 packed rows -> 128 lanes
    scale/bias: (1, 128)   f32   -- folded BatchNorm, tiled 4x over lanes
    o_ref     : (tq, 128)  out dtype (lane-dense store)
    """
    y = jnp.dot(a_ref[...], w_ref[...], preferred_element_type=jnp.float32)
    y = y * scale_ref[...] + bias_ref[...]          # folded BN (eval), f32 VPU
    y = jnp.where(y > 0, y, LRELU_SLOPE * y)        # LeakyReLU(0.2)
    o_ref[...] = y.astype(o_ref.dtype)


def _fc_sigmoid_kernel(x_ref, w_ref, b_ref, o_ref):
    """sigmoid(sum(x * w, -1) + b): VPU multiply + lane reduce, no MXU matvec."""
    y = jnp.sum(x_ref[...] * w_ref[...], axis=-1, keepdims=True) + b_ref[...]
    o_ref[...] = jax.nn.sigmoid(y)


# ----------------------------------------------------------------------------
# Pallas wrappers
# ----------------------------------------------------------------------------
def _pick_tq(mq, cap=512):
    """Largest row-tile (multiple of 8, <= cap) dividing mq, preferring >=2 steps."""
    cands = [t for t in range(8, min(cap, mq) + 1, 8) if mq % t == 0]
    multi = [t for t in cands if mq // t >= 2]
    if multi:
        return max(multi)
    return max(cands) if cands else mq


def _pallas_conv_gemm(patches_folded, w_big, scale_w, bias_w, *, tq, out_dtype):
    Mq, K4 = patches_folded.shape
    _, Cw = w_big.shape                          # Cw == 128
    assert Mq % tq == 0
    cost = pl.CostEstimate(
        flops=2 * Mq * K4 * Cw,
        transcendentals=0,
        bytes_accessed=(Mq * K4 * patches_folded.dtype.itemsize
                        + K4 * Cw * w_big.dtype.itemsize
                        + Mq * Cw * jnp.dtype(out_dtype).itemsize),
    )
    return pl.pallas_call(
        _conv_gemm_kernel,
        out_shape=jax.ShapeDtypeStruct((Mq, Cw), out_dtype),
        grid=(Mq // tq,),
        in_specs=[
            pl.BlockSpec((tq, K4), lambda i: (i, 0)),
            pl.BlockSpec((K4, Cw), lambda i: (0, 0)),   # weight stays resident
            pl.BlockSpec((1, Cw), lambda i: (0, 0)),
            pl.BlockSpec((1, Cw), lambda i: (0, 0)),
        ],
        out_specs=pl.BlockSpec((tq, Cw), lambda i: (i, 0)),
        compiler_params=pltpu.CompilerParams(
            dimension_semantics=("parallel",),
            vmem_limit_bytes=VMEM_LIMIT),
        cost_estimate=cost,
    )(patches_folded, w_big, scale_w, bias_w)


def _pallas_fc_sigmoid(x, w_col, b):
    N, K = x.shape
    tn = N
    if N > 512:                                   # tile big batches (v7x VMEM)
        divs = [t for t in range(8, 513, 8) if N % t == 0]
        if divs:
            tn = max(divs)
    cost = pl.CostEstimate(flops=2 * N * K, transcendentals=N,
                           bytes_accessed=(N * K + K + N) * 4)
    return pl.pallas_call(
        _fc_sigmoid_kernel,
        out_shape=jax.ShapeDtypeStruct((N, 1), jnp.float32),
        grid=(N // tn,),
        in_specs=[
            pl.BlockSpec((tn, K), lambda i: (i, 0)),
            pl.BlockSpec((1, K), lambda i: (0, 0)),
            pl.BlockSpec((1, 1), lambda i: (0, 0)),
        ],
        out_specs=pl.BlockSpec((tn, 1), lambda i: (i, 0)),
        compiler_params=pltpu.CompilerParams(
            dimension_semantics=("parallel",),
            vmem_limit_bytes=VMEM_LIMIT),
        cost_estimate=cost,
    )(x.astype(jnp.float32), w_col.reshape(1, K).astype(jnp.float32),
      b.reshape(1, 1).astype(jnp.float32))


# ----------------------------------------------------------------------------
# JAX glue: im2col, BN folding, parameter init
# ----------------------------------------------------------------------------
def _im2col(x_nhwc, kh=4, kw=4, stride=2, pad=1):
    """x: (N,H,W,C) -> patches (N*OH*OW, kh*kw*C), patch order (kh, kw, c)."""
    N, H, W, C = x_nhwc.shape
    OH = (H + 2 * pad - kh) // stride + 1
    OW = (W + 2 * pad - kw) // stride + 1
    xp = jnp.pad(x_nhwc, ((0, 0), (pad, pad), (pad, pad), (0, 0)))
    cols = []
    for i in range(kh):
        for j in range(kw):
            cols.append(xp[:, i:i + stride * OH:stride,
                           j:j + stride * OW:stride, :])
    patches = jnp.stack(cols, axis=3)            # (N, OH, OW, kh*kw, C)
    return patches.reshape(N * OH * OW, kh * kw * C), (N, OH, OW)


def _fold_bn(gamma, beta, mean, var):
    scale = gamma / jnp.sqrt(var + BN_EPS)
    bias = beta - mean * scale
    return scale, bias


def _conv_bn_lrelu(x_nhwc, w_oihw, gamma, beta, mean, var, *,
                   out_dtype=jnp.bfloat16, tq_cap=512):
    cout, _, kh, kw = w_oihw.shape
    assert 4 * cout == 128, "lane-fold factor hardcoded for Cout=32"
    # TODO(synk): fuse im2col patch extraction into the Pallas kernel with a
    # manual halo DMA (memory_space=pl.ANY + make_async_copy) to avoid
    # materializing the 4x-inflated patches matrix in HBM; for now it is
    # emitted in bf16, which halves that traffic.
    patches, (N, OH, OW) = _im2col(x_nhwc.astype(jnp.bfloat16), kh, kw, 2, 1)
    M, K = patches.shape
    patches_folded = patches.reshape(M // 4, 4 * K)        # lane-dense A slab
    # torch weight (O,I,KH,KW) -> [(kh,kw,cin), cout], block-diag x4 so the
    # packed 4-row layout yields a 128-lane-dense output tile.
    w_mat = jnp.transpose(w_oihw, (2, 3, 1, 0)).reshape(K, cout)
    w_big = jnp.kron(jnp.eye(4, dtype=w_mat.dtype), w_mat).astype(jnp.bfloat16)
    scale, bias = _fold_bn(gamma, beta, mean, var)
    scale_w = jnp.tile(scale, 4).reshape(1, 4 * cout).astype(jnp.float32)
    bias_w = jnp.tile(bias, 4).reshape(1, 4 * cout).astype(jnp.float32)
    tq = _pick_tq(M // 4, cap=tq_cap)
    y = _pallas_conv_gemm(patches_folded, w_big, scale_w, bias_w,
                          tq=tq, out_dtype=out_dtype)
    # (M/4, 128) -> (N, OH, OW, 32): pure row-major reinterpretation.
    return y.reshape(N, OH, OW, cout)


def init_params(key):
    keys = jax.random.split(key, 16)
    p = {}
    # conv weights (Cout, Cin, KH, KW), bias=False
    p["w1"] = 0.1 * jax.random.normal(keys[0], (32, 4, 4, 4), jnp.float32)
    p["w2"] = 0.05 * jax.random.normal(keys[1], (32, 32, 4, 4), jnp.float32)
    p["w3"] = 0.05 * jax.random.normal(keys[2], (32, 32, 4, 4), jnp.float32)
    k = 3
    for i in range(1, 4):                       # BatchNorm (eval: running stats)
        p[f"gamma{i}"] = 1.0 + 0.1 * jax.random.normal(keys[k], (32,), jnp.float32); k += 1
        p[f"beta{i}"] = 0.1 * jax.random.normal(keys[k], (32,), jnp.float32); k += 1
        p[f"mean{i}"] = 0.05 * jax.random.normal(keys[k], (32,), jnp.float32); k += 1
        p[f"var{i}"] = 1.0 + 0.1 * jnp.abs(
            jax.random.normal(keys[k], (32,), jnp.float32)); k += 1
    # fc: Linear(8192, 1)
    p["w_fc"] = 0.01 * jax.random.normal(keys[k], (8192, 1), jnp.float32)
    p["b_fc"] = jnp.zeros((1,), jnp.float32)
    return p


# ----------------------------------------------------------------------------
# Forward passes
# ----------------------------------------------------------------------------
@jax.jit
def discriminator_forward(x_nhwc, params):
    p = params
    y = _conv_bn_lrelu(x_nhwc, p["w1"], p["gamma1"], p["beta1"],
                       p["mean1"], p["var1"], out_dtype=jnp.bfloat16)
    y = _conv_bn_lrelu(y, p["w2"], p["gamma2"], p["beta2"],
                       p["mean2"], p["var2"], out_dtype=jnp.bfloat16)
    y = _conv_bn_lrelu(y, p["w3"], p["gamma3"], p["beta3"],
                       p["mean3"], p["var3"], out_dtype=jnp.float32)
    N, H, W, C = y.shape
    # torch flattens NCHW; instead of transposing the feature map, permute the
    # rows of the tiny (8192,1) FC weight so it consumes the NHWC flatten.
    y_flat = y.reshape(N, H * W * C)                       # free reshape
    w_fc_nhwc = jnp.transpose(p["w_fc"].reshape(C, H, W), (1, 2, 0)).reshape(-1, 1)
    # TODO(synk): for larger problems, fuse this FC reduction into conv3's
    # epilogue to skip the HBM round trip of the 8192-wide activation.
    return _pallas_fc_sigmoid(y_flat, w_fc_nhwc, p["b_fc"])


@jax.jit
def discriminator_reference(x_nhwc, params):
    """Pure-JAX (XLA, f32) reference for validation."""
    p = params
    y = jnp.transpose(x_nhwc, (0, 3, 1, 2))  # NCHW
    for i, w in enumerate([p["w1"], p["w2"], p["w3"]], 1):
        y = lax.conv_general_dilated(
            y, w, window_strides=(2, 2), padding=((1, 1), (1, 1)),
            dimension_numbers=("NCHW", "OIHW", "NCHW"))
        s, b = _fold_bn(p[f"gamma{i}"], p[f"beta{i}"],
                        p[f"mean{i}"], p[f"var{i}"])
        y = y * s.reshape(1, -1, 1, 1) + b.reshape(1, -1, 1, 1)
        y = jnp.where(y > 0, y, LRELU_SLOPE * y)
    y = y.reshape(y.shape[0], -1)
    return jax.nn.sigmoid(y @ p["w_fc"] + p["b_fc"].reshape(1, -1))


if __name__ == "__main__":
    key = jax.random.PRNGKey(0)
    k_x, k_p = jax.random.split(key)
    # fc is Linear(8192, 1) => input spatial must be 128x128 with 4 channels.
    x = jax.random.normal(k_x, (2, 128, 128, 4), jnp.float32)
    params = init_params(k_p)

    out = jax.block_until_ready(discriminator_forward(x, params))
    assert out.shape == (2, 1), out.shape

    ref = jax.block_until_ready(discriminator_reference(x, params))
    # bf16 MXU inputs vs f32 XLA reference -> loosened tolerance.
    assert jnp.allclose(out, ref, rtol=2e-2, atol=2e-2), (out, ref)

    print("KERNEL_OK")
</pallas_src>

<mosaic_0001>
module attributes {stable_mosaic.version = 11 : i64} {
  func.func @_conv_gemm_kernel(%arg0: i32, %arg1: memref<512x256xbf16, #tpu.memory_space<vmem>>, %arg2: memref<256x128xbf16, #tpu.memory_space<vmem>>, %arg3: memref<1x128xf32, #tpu.memory_space<vmem>>, %arg4: memref<1x128xf32, #tpu.memory_space<vmem>>, %arg5: memref<512x128xbf16, #tpu.memory_space<vmem>>) attributes {dimension_semantics = [#tpu.dimension_semantics<parallel>], iteration_bounds = array<i64: 4>, scalar_prefetch = 0 : i64, scratch_operands = 0 : i64, tpu.core_type = #tpu.core_type<tc>, window_params = [{transform_indices = @transform_0, window_bounds = array<i64: 512, 256>}, {pipeline_mode = #tpu.pipeline_mode<synchronous>, transform_indices = @transform_1, window_bounds = array<i64: 256, 128>}, {pipeline_mode = #tpu.pipeline_mode<synchronous>, transform_indices = @transform_2, window_bounds = array<i64: 1, 128>}, {pipeline_mode = #tpu.pipeline_mode<synchronous>, transform_indices = @transform_3, window_bounds = array<i64: 1, 128>}, {transform_indices = @transform_4, window_bounds = array<i64: 512, 128>}]} {
    %c0 = arith.constant 0 : index
    %c0_0 = arith.constant 0 : index
    %0 = vector.load %arg1[%c0, %c0_0] : memref<512x256xbf16, #tpu.memory_space<vmem>>, vector<512x256xbf16>
    %c0_1 = arith.constant 0 : index
    %c0_2 = arith.constant 0 : index
    %1 = vector.load %arg2[%c0_1, %c0_2] : memref<256x128xbf16, #tpu.memory_space<vmem>>, vector<256x128xbf16>
    %cst = arith.constant dense<0.000000e+00> : vector<512x128xf32>
    %2 = tpu.matmul %0, %1, %cst {dimension_numbers = #tpu.dot_dimension_numbers<[1], [0], [0], [1], [0, 0, 1, 1], [], []>} : vector<512x256xbf16>, vector<256x128xbf16>, vector<512x128xf32> -> vector<512x128xf32>
    %c0_3 = arith.constant 0 : index
    %c0_4 = arith.constant 0 : index
    %3 = vector.load %arg3[%c0_3, %c0_4] : memref<1x128xf32, #tpu.memory_space<vmem>>, vector<1x128xf32>
    %4 = vector.broadcast %3 : vector<1x128xf32> to vector<512x128xf32>
    %5 = arith.mulf %2, %4 : vector<512x128xf32>
    %c0_5 = arith.constant 0 : index
    %c0_6 = arith.constant 0 : index
    %6 = vector.load %arg4[%c0_5, %c0_6] : memref<1x128xf32, #tpu.memory_space<vmem>>, vector<1x128xf32>
    %7 = vector.broadcast %6 : vector<1x128xf32> to vector<512x128xf32>
    %8 = arith.addf %5, %7 : vector<512x128xf32>
    %cst_7 = arith.constant 0.000000e+00 : f32
    %9 = vector.broadcast %cst_7 : f32 to vector<512x128xf32>
    %10 = arith.cmpf ogt, %8, %9 : vector<512x128xf32>
    %cst_8 = arith.constant 2.000000e-01 : f32
    %11 = vector.broadcast %cst_8 : f32 to vector<512x128xf32>
    %12 = arith.mulf %11, %8 : vector<512x128xf32>
    %13 = arith.select %10, %8, %12 : vector<512x128xi1>, vector<512x128xf32>
    %14 = arith.truncf %13 : vector<512x128xf32> to vector<512x128xbf16>
    %c0_9 = arith.constant 0 : index
    %c0_10 = arith.constant 0 : index
    %15 = vector.load %arg5[%c0_9, %c0_10] : memref<512x128xbf16, #tpu.memory_space<vmem>>, vector<512x128xbf16>
    tpu.vector_store %arg5[%c0_9, %c0_10], %14 {strides = array<i32>} : memref<512x128xbf16, #tpu.memory_space<vmem>>, vector<512x128xbf16>,
    return
  }
  func.func @transform_0(%arg0: i32) -> (i32, i32) {
    %c0_i32 = arith.constant 0 : i32
    %c0_i32_0 = arith.constant 0 : i32
    return %arg0, %c0_i32 : i32, i32
  }
  func.func @transform_1(%arg0: i32) -> (i32, i32) {
    %c0_i32 = arith.constant 0 : i32
    %c0_i32_0 = arith.constant 0 : i32
    %c0_i32_1 = arith.constant 0 : i32
    return %c0_i32, %c0_i32_0 : i32, i32
  }
  func.func @transform_2(%arg0: i32) -> (i32, i32) {
    %c0_i32 = arith.constant 0 : i32
    %c0_i32_0 = arith.constant 0 : i32
    %c0_i32_1 = arith.constant 0 : i32
    return %c0_i32, %c0_i32_0 : i32, i32
  }
  func.func @transform_3(%arg0: i32) -> (i32, i32) {
    %c0_i32 = arith.constant 0 : i32
    %c0_i32_0 = arith.constant 0 : i32
    %c0_i32_1 = arith.constant 0 : i32
    return %c0_i32, %c0_i32_0 : i32, i32
  }
  func.func @transform_4(%arg0: i32) -> (i32, i32) {
    %c0_i32 = arith.constant 0 : i32
    %c0_i32_0 = arith.constant 0 : i32
    return %arg0, %c0_i32 : i32, i32
  }
}

module attributes {stable_mosaic.version = 11 : i64} {
  func.func @_conv_gemm_kernel(%arg0: i32, %arg1: memref<256x2048xbf16, #tpu.memory_space<vmem>>, %arg2: memref<2048x128xbf16, #tpu.memory_space<vmem>>, %arg3: memref<1x128xf32, #tpu.memory_space<vmem>>, %arg4: memref<1x128xf32, #tpu.memory_space<vmem>>, %arg5: memref<256x128xbf16, #tpu.memory_space<vmem>>) attributes {dimension_semantics = [#tpu.dimension_semantics<parallel>], iteration_bounds = array<i64: 2>, scalar_prefetch = 0 : i64, scratch_operands = 0 : i64, tpu.core_type = #tpu.core_type<tc>, window_params = [{transform_indices = @transform_0, window_bounds = array<i64: 256, 2048>}, {pipeline_mode = #tpu.pipeline_mode<synchronous>, transform_indices = @transform_1, window_bounds = array<i64: 2048, 128>}, {pipeline_mode = #tpu.pipeline_mode<synchronous>, transform_indices = @transform_2, window_bounds = array<i64: 1, 128>}, {pipeline_mode = #tpu.pipeline_mode<synchronous>, transform_indices = @transform_3, window_bounds = array<i64: 1, 128>}, {transform_indices = @transform_4, window_bounds = array<i64: 256, 128>}]} {
    %c0 = arith.constant 0 : index
    %c0_0 = arith.constant 0 : index
    %0 = vector.load %arg1[%c0, %c0_0] : memref<256x2048xbf16, #tpu.memory_space<vmem>>, vector<256x2048xbf16>
    %c0_1 = arith.constant 0 : index
    %c0_2 = arith.constant 0 : index
    %1 = vector.load %arg2[%c0_1, %c0_2] : memref<2048x128xbf16, #tpu.memory_space<vmem>>, vector<2048x128xbf16>
    %cst = arith.constant dense<0.000000e+00> : vector<256x128xf32>
    %2 = tpu.matmul %0, %1, %cst {dimension_numbers = #tpu.dot_dimension_numbers<[1], [0], [0], [1], [0, 0, 1, 1], [], []>} : vector<256x2048xbf16>, vector<2048x128xbf16>, vector<256x128xf32> -> vector<256x128xf32>
    %c0_3 = arith.constant 0 : index
    %c0_4 = arith.constant 0 : index
    %3 = vector.load %arg3[%c0_3, %c0_4] : memref<1x128xf32, #tpu.memory_space<vmem>>, vector<1x128xf32>
    %4 = vector.broadcast %3 : vector<1x128xf32> to vector<256x128xf32>
    %5 = arith.mulf %2, %4 : vector<256x128xf32>
    %c0_5 = arith.constant 0 : index
    %c0_6 = arith.constant 0 : index
    %6 = vector.load %arg4[%c0_5, %c0_6] : memref<1x128xf32, #tpu.memory_space<vmem>>, vector<1x128xf32>
    %7 = vector.broadcast %6 : vector<1x128xf32> to vector<256x128xf32>
    %8 = arith.addf %5, %7 : vector<256x128xf32>
    %cst_7 = arith.constant 0.000000e+00 : f32
    %9 = vector.broadcast %cst_7 : f32 to vector<256x128xf32>
    %10 = arith.cmpf ogt, %8, %9 : vector<256x128xf32>
    %cst_8 = arith.constant 2.000000e-01 : f32
    %11 = vector.broadcast %cst_8 : f32 to vector<256x128xf32>
    %12 = arith.mulf %11, %8 : vector<256x128xf32>
    %13 = arith.select %10, %8, %12 : vector<256x128xi1>, vector<256x128xf32>
    %14 = arith.truncf %13 : vector<256x128xf32> to vector<256x128xbf16>
    %c0_9 = arith.constant 0 : index
    %c0_10 = arith.constant 0 : index
    %15 = vector.load %arg5[%c0_9, %c0_10] : memref<256x128xbf16, #tpu.memory_space<vmem>>, vector<256x128xbf16>
    tpu.vector_store %arg5[%c0_9, %c0_10], %14 {strides = array<i32>} : memref<256x128xbf16, #tpu.memory_space<vmem>>, vector<256x128xbf16>,
    return
  }
  func.func @transform_0(%arg0: i32) -> (i32, i32) {
    %c0_i32 = arith.constant 0 : i32
    %c0_i32_0 = arith.constant 0 : i32
    return %arg0, %c0_i32 : i32, i32
  }
  func.func @transform_1(%arg0: i32) -> (i32, i32) {
    %c0_i32 = arith.constant 0 : i32
    %c0_i32_0 = arith.constant 0 : i32
    %c0_i32_1 = arith.constant 0 : i32
    return %c0_i32, %c0_i32_0 : i32, i32
  }
  func.func @transform_2(%arg0: i32) -> (i32, i32) {
    %c0_i32 = arith.constant 0 : i32
    %c0_i32_0 = arith.constant 0 : i32
    %c0_i32_1 = arith.constant 0 : i32
    return %c0_i32, %c0_i32_0 : i32, i32
  }
  func.func @transform_3(%arg0: i32) -> (i32, i32) {
    %c0_i32 = arith.constant 0 : i32
    %c0_i32_0 = arith.constant 0 : i32
    %c0_i32_1 = arith.constant 0 : i32
    return %c0_i32, %c0_i32_0 : i32, i32
  }
  func.func @transform_4(%arg0: i32) -> (i32, i32) {
    %c0_i32 = arith.constant 0 : i32
    %c0_i32_0 = arith.constant 0 : i32
    return %arg0, %c0_i32 : i32, i32
  }
}

module attributes {stable_mosaic.version = 11 : i64} {
  func.func @_conv_gemm_kernel(%arg0: i32, %arg1: memref<64x2048xbf16, #tpu.memory_space<vmem>>, %arg2: memref<2048x128xbf16, #tpu.memory_space<vmem>>, %arg3: memref<1x128xf32, #tpu.memory_space<vmem>>, %arg4: memref<1x128xf32, #tpu.memory_space<vmem>>, %arg5: memref<64x128xf32, #tpu.memory_space<vmem>>) attributes {dimension_semantics = [#tpu.dimension_semantics<parallel>], iteration_bounds = array<i64: 2>, scalar_prefetch = 0 : i64, scratch_operands = 0 : i64, tpu.core_type = #tpu.core_type<tc>, window_params = [{transform_indices = @transform_0, window_bounds = array<i64: 64, 2048>}, {pipeline_mode = #tpu.pipeline_mode<synchronous>, transform_indices = @transform_1, window_bounds = array<i64: 2048, 128>}, {pipeline_mode = #tpu.pipeline_mode<synchronous>, transform_indices = @transform_2, window_bounds = array<i64: 1, 128>}, {pipeline_mode = #tpu.pipeline_mode<synchronous>, transform_indices = @transform_3, window_bounds = array<i64: 1, 128>}, {transform_indices = @transform_4, window_bounds = array<i64: 64, 128>}]} {
    %c0 = arith.constant 0 : index
    %c0_0 = arith.constant 0 : index
    %0 = vector.load %arg1[%c0, %c0_0] : memref<64x2048xbf16, #tpu.memory_space<vmem>>, vector<64x2048xbf16>
    %c0_1 = arith.constant 0 : index
    %c0_2 = arith.constant 0 : index
    %1 = vector.load %arg2[%c0_1, %c0_2] : memref<2048x128xbf16, #tpu.memory_space<vmem>>, vector<2048x128xbf16>
    %cst = arith.constant dense<0.000000e+00> : vector<64x128xf32>
    %2 = tpu.matmul %0, %1, %cst {dimension_numbers = #tpu.dot_dimension_numbers<[1], [0], [0], [1], [0, 0, 1, 1], [], []>} : vector<64x2048xbf16>, vector<2048x128xbf16>, vector<64x128xf32> -> vector<64x128xf32>
    %c0_3 = arith.constant 0 : index
    %c0_4 = arith.constant 0 : index
    %3 = vector.load %arg3[%c0_3, %c0_4] : memref<1x128xf32, #tpu.memory_space<vmem>>, vector<1x128xf32>
    %4 = vector.broadcast %3 : vector<1x128xf32> to vector<64x128xf32>
    %5 = arith.mulf %2, %4 : vector<64x128xf32>
    %c0_5 = arith.constant 0 : index
    %c0_6 = arith.constant 0 : index
    %6 = vector.load %arg4[%c0_5, %c0_6] : memref<1x128xf32, #tpu.memory_space<vmem>>, vector<1x128xf32>
    %7 = vector.broadcast %6 : vector<1x128xf32> to vector<64x128xf32>
    %8 = arith.addf %5, %7 : vector<64x128xf32>
    %cst_7 = arith.constant 0.000000e+00 : f32
    %9 = vector.broadcast %cst_7 : f32 to vector<64x128xf32>
    %10 = arith.cmpf ogt, %8, %9 : vector<64x128xf32>
    %cst_8 = arith.constant 2.000000e-01 : f32
    %11 = vector.broadcast %cst_8 : f32 to vector<64x128xf32>
    %12 = arith.mulf %11, %8 : vector<64x128xf32>
    %13 = arith.select %10, %8, %12 : vector<64x128xi1>, vector<64x128xf32>
    %c0_9 = arith.constant 0 : index
    %c0_10 = arith.constant 0 : index
    %14 = vector.load %arg5[%c0_9, %c0_10] : memref<64x128xf32, #tpu.memory_space<vmem>>, vector<64x128xf32>
    tpu.vector_store %arg5[%c0_9, %c0_10], %13 {strides = array<i32>} : memref<64x128xf32, #tpu.memory_space<vmem>>, vector<64x128xf32>,
    return
  }
  func.func @transform_0(%arg0: i32) -> (i32, i32) {
    %c0_i32 = arith.constant 0 : i32
    %c0_i32_0 = arith.constant 0 : i32
    return %arg0, %c0_i32 : i32, i32
  }
  func.func @transform_1(%arg0: i32) -> (i32, i32) {
    %c0_i32 = arith.constant 0 : i32
    %c0_i32_0 = arith.constant 0 : i32
    %c0_i32_1 = arith.constant 0 : i32
    return %c0_i32, %c0_i32_0 : i32, i32
  }
  func.func @transform_2(%arg0: i32) -> (i32, i32) {
    %c0_i32 = arith.constant 0 : i32
    %c0_i32_0 = arith.constant 0 : i32
    %c0_i32_1 = arith.constant 0 : i32
    return %c0_i32, %c0_i32_0 : i32, i32
  }
  func.func @transform_3(%arg0: i32) -> (i32, i32) {
    %c0_i32 = arith.constant 0 : i32
    %c0_i32_0 = arith.constant 0 : i32
    %c0_i32_1 = arith.constant 0 : i32
    return %c0_i32, %c0_i32_0 : i32, i32
  }
  func.func @transform_4(%arg0: i32) -> (i32, i32) {
    %c0_i32 = arith.constant 0 : i32
    %c0_i32_0 = arith.constant 0 : i32
    return %arg0, %c0_i32 : i32, i32
  }
}

module attributes {stable_mosaic.version = 11 : i64} {
  func.func @_fc_sigmoid_kernel(%arg0: i32, %arg1: memref<2x8192xf32, #tpu.memory_space<vmem>>, %arg2: memref<1x8192xf32, #tpu.memory_space<vmem>>, %arg3: memref<1x1xf32, #tpu.memory_space<vmem>>, %arg4: memref<2x1xf32, #tpu.memory_space<vmem>>) attributes {dimension_semantics = [#tpu.dimension_semantics<parallel>], iteration_bounds = array<i64: 1>, scalar_prefetch = 0 : i64, scratch_operands = 0 : i64, tpu.core_type = #tpu.core_type<tc>, window_params = [{transform_indices = @transform_0, window_bounds = array<i64: 2, 8192>}, {pipeline_mode = #tpu.pipeline_mode<synchronous>, transform_indices = @transform_1, window_bounds = array<i64: 1, 8192>}, {pipeline_mode = #tpu.pipeline_mode<synchronous>, transform_indices = @transform_2, window_bounds = array<i64: 1, 1>}, {transform_indices = @transform_3, window_bounds = array<i64: 2, 1>}]} {
    %c0 = arith.constant 0 : index
    %c0_0 = arith.constant 0 : index
    %0 = vector.load %arg1[%c0, %c0_0] : memref<2x8192xf32, #tpu.memory_space<vmem>>, vector<2x8192xf32>
    %c0_1 = arith.constant 0 : index
    %c0_2 = arith.constant 0 : index
    %1 = vector.load %arg2[%c0_1, %c0_2] : memref<1x8192xf32, #tpu.memory_space<vmem>>, vector<1x8192xf32>
    %2 = vector.broadcast %1 : vector<1x8192xf32> to vector<2x8192xf32>
    %3 = arith.mulf %0, %2 : vector<2x8192xf32>
    %cst = arith.constant dense<0.000000e+00> : vector<2xf32>
    %4 = vector.multi_reduction <add>, %3, %cst [1] : vector<2x8192xf32> to vector<2xf32>
    %5 = vector.shape_cast %4 : vector<2xf32> to vector<2x1xf32>
    %c0_3 = arith.constant 0 : index
    %c0_4 = arith.constant 0 : index
    %6 = vector.load %arg3[%c0_3, %c0_4] : memref<1x1xf32, #tpu.memory_space<vmem>>, vector<1x1xf32>
    %7 = vector.broadcast %6 : vector<1x1xf32> to vector<2x1xf32>
    %8 = arith.addf %5, %7 : vector<2x1xf32>
    %9 = arith.negf %8 : vector<2x1xf32>
    %10 = math.exp %9 : vector<2x1xf32>
    %cst_5 = arith.constant 1.000000e+00 : f32
    %11 = vector.broadcast %cst_5 : f32 to vector<2x1xf32>
    %12 = arith.addf %11, %10 : vector<2x1xf32>
    %13 = arith.divf %11, %12 : vector<2x1xf32>
    %c0_6 = arith.constant 0 : index
    %c0_7 = arith.constant 0 : index
    %14 = vector.load %arg4[%c0_6, %c0_7] : memref<2x1xf32, #tpu.memory_space<vmem>>, vector<2x1xf32>
    tpu.vector_store %arg4[%c0_6, %c0_7], %13 {strides = array<i32>} : memref<2x1xf32, #tpu.memory_space<vmem>>, vector<2x1xf32>,
    return
  }
  func.func @transform_0(%arg0: i32) -> (i32, i32) {
    %c0_i32 = arith.constant 0 : i32
    %c0_i32_0 = arith.constant 0 : i32
    return %arg0, %c0_i32 : i32, i32
  }
  func.func @transform_1(%arg0: i32) -> (i32, i32) {
    %c0_i32 = arith.constant 0 : i32
    %c0_i32_0 = arith.constant 0 : i32
    %c0_i32_1 = arith.constant 0 : i32
    return %c0_i32, %c0_i32_0 : i32, i32
  }
  func.func @transform_2(%arg0: i32) -> (i32, i32) {
    %c0_i32 = arith.constant 0 : i32
    %c0_i32_0 = arith.constant 0 : i32
    %c0_i32_1 = arith.constant 0 : i32
    return %c0_i32, %c0_i32_0 : i32, i32
  }
  func.func @transform_3(%arg0: i32) -> (i32, i32) {
    %c0_i32 = arith.constant 0 : i32
    %c0_i32_0 = arith.constant 0 : i32
    return %arg0, %c0_i32 : i32, i32
  }
}

</mosaic_0001>

<bundles_post_ra>
// kernel: tile.33
= control target key start
LH: loop header
LB: loop body
LE: loop exit
PB: predicated region body
PF: predicated region fallthrough
CT: control target
= control target key end

     0   :  { %s22_s0 = inlined_call_operand.vmem [shape: f32[32], index: 0, kind: input, shape index: {}]   ;;  %s23_s1 = inlined_call_operand.vmem [shape: f32[4,32], index: 1, kind: output, shape index: {}]  }
   0x1   :  { %v4_v0 = vld [vmem:[%s22_s0] ss:$0 sm:$0xff] }
   0x2   :  { %5 = vst [vmem:[%s23_s1] sm:$0xf] %v4_v0 }

// kernel: tile.34
= control target key start
LH: loop header
LB: loop body
LE: loop exit
PB: predicated region body
PF: predicated region fallthrough
CT: control target
= control target key end

     0   :  { %vm7_vm0 = vcmask 261120   ;;  %s37_s8 = smov 32   ;;  %s38_s9 = smov 64   ;;  %vm13_vm1 = vcmask 1048320   ;;  %vm19_vm2 = vcmask 785920   ;;  %vm25_vm3 = vcmask 523520   ;;  %s55_s0 = inlined_call_operand.vmem [shape: f32[4,32], index: 0, kind: input, shape index: {}]   ;;  %s56_s1 = inlined_call_operand.vmem [shape: f32[1,128], index: 1, kind: output, shape index: {}]  }
   0x1   :  { %v4_v0 = vld [vmem:[%s55_s0] sm:$0xf]  ;;  %s36_s0 = smov 96  }
   0x2   :  { %5 = vst [vmem:[#allocation1] sm:$0xf] %v4_v0 }
   0x9   :  { %v10_v1 = vld [vmem:[#allocation1 + $0x3] sm:$0x1]   ;;  %v22_v2 = vld [vmem:[#allocation1 + $0x1] sm:$0x1]   ;;  %v6_v3 = vld [vmem:[#allocation1] sm:$0x1]  }
   0xa   :  { %11 = vrot.lane.b32.xlu0 %v10_v1, %s36_s0  ;;  %23 = vrot.lane.b32.xlu1 %v22_v2, %s37_s8  ;;  %v16_v4 = vld [vmem:[#allocation1 + $0x2] sm:$0x1]   ;;  %8 = vst.msk [vmem:[#allocation0] sm:$0x1] %vm7_vm0, %v6_v3  }
   0xe   :  { %17 = vrot.lane.b32.xlu0 %v16_v4, %s38_s9 }
  0x7c   :  { %v12_v5 = vpop.permute.xlu0 %11   ;;  %v24_v6 = vpop.permute.xlu1 %23  }
  0x7d   :  { %14 = vst.msk [vmem:[#allocation0] sm:$0x1] %vm13_vm1, %v12_v5  }
  0x80   :  { %v18_v7 = vpop.permute.xlu0 %17  }
  0x81   :  { %20 = vst.msk [vmem:[#allocation0] sm:$0x1] %vm19_vm2, %v18_v7  }
  0x82   :  { %26 = vst.msk [vmem:[#allocation0] sm:$0x1] %vm25_vm3, %v24_v6  }
  0x89   :  { %v30_v8 = vld [vmem:[#allocation0] sm:$0x1] }
  0x8a   :  { %32 = vst [vmem:[%s56_s1] sm:$0x1] %v30_v8 }

// kernel: discriminator_forward.4
= control target key start
LH: loop header
LB: loop body
LE: loop exit
PB: predicated region body
PF: predicated region fallthrough
CT: control target
= control target key end

     0   :  { %9 = vsyncpa [#allocation3], 0  ;;  %s2867_s0 = inlined_call_operand.hbm [shape: bf16[2048,256], index: 0, kind: input, shape index: {}]   ;;  %s2868_s1 = inlined_call_operand.vmem [shape: bf16[256,128], index: 1, kind: input, shape index: {}]   ;;  %s2869_s2 = inlined_call_operand.vmem [shape: f32[1,128], index: 2, kind: input, shape index: {}]   ;;  %s2870_s3 = inlined_call_operand.vmem [shape: f32[1,128], index: 3, kind: input, shape index: {}]   ;;  %s2871_s4 = inlined_call_operand.vmem [shape: bf16[2048,128], index: 4, kind: output, shape index: {}]  }
   0x1   :  { %11 = vsyncpa [#allocation3 + $0x1], 0  ;;  %s2442_s15 = smov 0   ;;  %s2444_s16 = smov 0  }
   0x2   :  { %s2446_s17 = smov 0   ;;  %s2448_s18 = smov 0  }
   0x3 LB: > { %s1744_s19 = sadd.s32 4294967295, %s2411_s18   ;;  %s2462_s20 = sadd.s32 1, %s2411_s18   ;;  %s2411_s18 = sphi %s2448_s18, %s2878_s18   ;;  %s2407_s17 = sphi %s2446_s17, %s2877_s17   ;;  %s2403_s16 = sphi %s2444_s16, %s2876_s16   ;;  %s2399_s15 = sphi %s2442_s15, %s2875_s15  }
   0x4   : > { %s21_s21 = ssub.s32 %s2411_s18, %s2462_s20  ;;  %s24_s22 = sadd.s32 1, %s2407_s17 }
   0x5   : > { %p22_p0 = scmp.eq.s32.totalorder %s21_s21, 0  ;;  %p31_p1 = scmp.ne.s32.totalorder %s2407_s17, %s2403_s16 }
   0x6   : > { %p32_p2 = scmp.eq.s32.totalorder %s2411_s18, 0  ;;  %p37_p3 = scmp.ne.s32.totalorder %s2403_s16, %s2399_s15 }
   0x7   : > { %s2472_s23 = scalar_select %p22_p0, %s2407_s17, %s24_s22  }
   0x8   : > { %p33_p4 = por %p32_p2, %p31_p1  ;;  %p38_p5 = scmp.eq.s32.totalorder %s1744_s19, 0 }
   0x9   : > { %p2199_p6 = scmp.lt.s32.totalorder %s2411_s18, 4  ;;  %s159_s25 = sand.u32 1, %s2407_s17  }
   0xa   : > { %p2477_p7 = por %p38_p5, %p37_p3  ;;  %s1748_s26 = sshll.u32 %s159_s25, 9 }
   0xb   : > { %s1905_s27 = sshll.u32 %s2411_s18, 13  ;;  %s163_s5 = scalar_lea.vmem [#allocation2], %s1748_s26 }
   0xc   : > { %s2486_s30 = scalar_lea.hbm %s2867_s0, %s1905_s27  ;;  %s171_s6 = sshll.u32 %s163_s5, 4  ;;  %s2488_s6 = int_to_ptr.vmem [resolvable:$true] %s171_s6 }
   0xd   : > { %p2490_p8 = pnand %p2199_p6, %p33_p4  ;;  %s2495_s8 = scalar_lea.sflag [#allocation3], %s159_s25 }
   0xe   : > { %s2347_s9 = scalar_lea.hbm %s2486_s30, 8192  ;;  %s2352_s12 = scalar_lea.hbm %s2867_s0, 32768 }
   0xf   : > { %p2348_p10 = scmp.ne.s32.totalorder %s2486_s30, %s2347_s9  ;;  %p2349_p11 = pneg %p2490_p8 }
  0x10   : > { %p2353_p0 = scmp.lt.u32.totalorder %s2486_s30, %s2867_s0  ;;  %p2354_p1 = scmp.lt.u32.totalorder %s2352_s12, %s2347_s9 }
  0x11   : > { %p2350_p12 = pnand %p2349_p11, %p2348_p10  ;;  %p2356_p3 = scmp.lt.u32.totalorder %s2347_s9, %s2486_s30 }
  0x12   : > { %p2355_p2 = por %p2354_p1, %p2353_p0 }
  0x13   : > { %p2351_p13 = pneg %p2350_p12 }
  0x14   : > { %p2357_p4 = por %p2356_p3, %p2355_p2 }
  0x16   : > { %p2358_p5 = pnand %p2357_p4, %p2351_p13 }
  0x18   : > { %2361 = shalt.err (!%p2358_p5)
}
  0x19   : > { %s2362_s15 = scalar_lea.vmem %s2488_s6, 8192  ;;  %s2413_s21 = smov [#allocation2]  }
  0x1a   : > { %p2363_p6 = scmp.ne.s32.totalorder %s2488_s6, %s2362_s15  ;;  %s2367_s22 = sshll.u32 %s2413_s21, 4  ;;  %s2368_s22 = int_to_ptr.vmem [resolvable:$false] %s2367_s22 }
  0x1b   : > { %s2369_s25 = scalar_lea.vmem %s2368_s22, 16384  ;;  %p2370_p9 = scmp.lt.s32.totalorder %s2488_s6, %s2368_s22 }
  0x1c   : > { %p2365_p10 = pnand %p2363_p6, %p2349_p11  ;;  %p2371_p0 = scmp.lt.s32.totalorder %s2369_s25, %s2362_s15 }
  0x1e   : > { %p2366_p12 = pneg %p2365_p10  ;;  %p2372_p1 = por %p2371_p0, %p2370_p9 }
  0x20   : > { %p2373_p2 = pnand %p2372_p1, %p2366_p12 }
  0x22   : > { %2376 = shalt.err (!%p2373_p2)
}
  0x23   : > { %s2414_s26 = smov 128   ;;  %s2415_s27 = smov 8  }
  0x24   : > { %2198 = dma.hbm_to_vmem [thread:$0]  (!%p2490_p8), %s2486_s30, 8192, %s2488_s6, %s2495_s8, %s2414_s26, %s2414_s26, %s2415_s27  }
  0x25   : > { %p179_p11 = scmp.lt.s32.totalorder %s2411_s18, 5  ;;  %p2874_p13 = scmp.ge.s32.totalorder %s2411_s18, 1 }
  0x27   : > { %p180_p3 = pnand %p2874_p13, %p179_p11 }
  0x28   : > { %s185_s28 = sand.u32 (!%p180_p3), 1, %s2403_s16  }
  0x29   : > { %183 = sbr.rel (%p180_p3) target bundleno = 459 (0x1cb), region = 36  ;;  %s1753_s29 = sshll.u32 (!%p180_p3), %s185_s28, 9 }
  0x2a   : > { %s186_s5 = scalar_lea.sflag (!%p180_p3), [#allocation3], %s185_s28  ;;  %s2527_s9 = scalar_lea.vmem (!%p180_p3), [#allocation2], %s1753_s29 }
  0x30   : > { %2394 = dma.done.wait (%p2477_p7), %s186_s5, 8192  }
  0x31   : > { %2396 = vsyncadd (%p2477_p7), %s186_s5, 4294959104  ;;  %v2416_v0 = vmov 0   ;;  %v2235_v1 = vld [vmem:[%s2868_s1] sm:$0xff]   ;;  %v2236_v2 = vld [vmem:[%s2868_s1 + $0x8] sm:$0xff]   ;;  %s1754_s25 = sshll.u32 %s1744_s19, 6 }
  0x32   : > { %734 = vmatprep.subr.bf16.mxu0 %v2416_v0  ;;  %2161 = vmatprep.subr.bf16.mxu1 %v2416_v0  ;;  %v2237_v3 = vld [vmem:[%s2868_s1 + $0x10] sm:$0xff]   ;;  %v2238_v4 = vld [vmem:[%s2868_s1 + $0x18] sm:$0xff]   ;;  %v2239_v5 = vld [vmem:[%s2868_s1 + $0x20] sm:$0xff]   ;;  %p216_p7 = scmp.lt.s32.totalorder %s1754_s25, 255 }
  0x33   : > { %735 = vmatpush1.bf16.msra.mxu0 %v2235_v1  ;;  %2177 = vmatpush1.bf16.msra.mxu1 %v2235_v1  ;;  %v2253_v6 = vld [vmem:[%s2527_s9 + $0x4] ss:$8 sps:$4 sm:$0xff]   ;;  %v2241_v9 = vld [vmem:[%s2868_s1 + $0x30] sm:$0xff]   ;;  %v2242_v10 = vld [vmem:[%s2868_s1 + $0x38] sm:$0xff]  }
  0x34   : > { %736 = vmatprep.subr.bf16.mxu0 %v2416_v0  ;;  %2162 = vmatprep.subr.bf16.mxu1 %v2416_v0  ;;  %v2240_v7 = vld [vmem:[%s2868_s1 + $0x28] sm:$0xff]   ;;  %v2243_v11 = vld [vmem:[%s2868_s1 + $0x40] sm:$0xff]   ;;  %v2245_v13 = vld [vmem:[%s2868_s1 + $0x50] sm:$0xff]   ;;  %s2880_s25 = smov (!%p216_p7, %s1754_s25), 255 }
  0x35   : > { %v2256_v8 = vld [vmem:[%s2527_s9 + $0x104] ss:$8 sps:$4 sm:$0xff]   ;;  %766 = vmatprep.mubr.bf16.mxu0 %v2253_v6  ;;  %v2246_v14 = vld [vmem:[%s2868_s1 + $0x58] sm:$0xff]   ;;  %v2249_v17 = vld [vmem:[%s2868_s1 + $0x70] sm:$0xff]   ;;  %s1755_s18 = sshll.u32 %s2880_s25, 2 }
  0x36   : > { %894 = vmatprep.mubr.bf16.mxu1 %v2256_v8  ;;  %v2244_v12 = vld [vmem:[%s2868_s1 + $0x48] sm:$0xff]   ;;  %v2247_v15 = vld [vmem:[%s2868_s1 + $0x60] sm:$0xff]   ;;  %v2250_v18 = vld [vmem:[%s2868_s1 + $0x78] sm:$0xff]   ;;  %s2700_s5 = scalar_lea.vmem %s2871_s4, %s1755_s18 }
  0x37   : > { %737 = vmatpush1.bf16.msra.mxu0 %v2236_v2  ;;  %2178 = vmatpush1.bf16.msra.mxu1 %v2236_v2  ;;  %v2248_v16 = vld [vmem:[%s2868_s1 + $0x68] sm:$0xff]   ;;  %v2257_v21 = vld [vmem:[%s2527_s9 + $0x14] ss:$8 sps:$4 sm:$0xff]   ;;  %v2261_v23 = vld [vmem:[%s2527_s9 + $0x10] ss:$8 sps:$4 sm:$0xff]  }
  0x38   : > { %738 = vmatprep.subr.bf16.mxu0 %v2416_v0  ;;  %2163 = vmatprep.subr.bf16.mxu1 %v2416_v0  ;;  %v2251_v19 = vld [vmem:[%s2527_s9] ss:$8 sps:$4 sm:$0xff]   ;;  %v2259_v22 = vld [vmem:[%s2527_s9 + $0x114] ss:$8 sps:$4 sm:$0xff]   ;;  %v2262_v24 = vld [vmem:[%s2527_s9 + $0x110] ss:$8 sps:$4 sm:$0xff]  }
  0x39   : > { %v2254_v20 = vld [vmem:[%s2527_s9 + $0x100] ss:$8 sps:$4 sm:$0xff]   ;;  %v2263_v25 = vld [vmem:[%s2527_s9 + $0x24] ss:$8 sps:$4 sm:$0xff]   ;;  %v2269_v29 = vld [vmem:[%s2527_s9 + $0x34] ss:$8 sps:$4 sm:$0xff]  }
  0x3a   : > { %v2265_v26 = vld [vmem:[%s2527_s9 + $0x124] ss:$8 sps:$4 sm:$0xff]   ;;  %v2267_v27 = vld [vmem:[%s2527_s9 + $0x20] ss:$8 sps:$4 sm:$0xff]   ;;  %v2271_v30 = vld [vmem:[%s2527_s9 + $0x134] ss:$8 sps:$4 sm:$0xff]  }
  0x3b   : > { %739 = vmatpush1.bf16.msra.mxu0 %v2237_v3  ;;  %2179 = vmatpush1.bf16.msra.mxu1 %v2237_v3  ;;  %v2268_v28 = vld [vmem:[%s2527_s9 + $0x120] ss:$8 sps:$4 sm:$0xff]   ;;  %v2273_v31 = vld [vmem:[%s2527_s9 + $0x30] ss:$8 sps:$4 sm:$0xff]   ;;  %v2275_v33 = vld [vmem:[%s2527_s9 + $0x44] ss:$8 sps:$4 sm:$0xff]  }
  0x3c   : > { %740 = vmatprep.subr.bf16.mxu0 %v2416_v0  ;;  %2164 = vmatprep.subr.bf16.mxu1 %v2416_v0  ;;  %v2274_v32 = vld [vmem:[%s2527_s9 + $0x130] ss:$8 sps:$4 sm:$0xff]   ;;  %v2277_v34 = vld [vmem:[%s2527_s9 + $0x144] ss:$8 sps:$4 sm:$0xff]   ;;  %v2279_v35 = vld [vmem:[%s2527_s9 + $0x40] ss:$8 sps:$4 sm:$0xff]  }
  0x3d   : > { %v2280_v36 = vld [vmem:[%s2527_s9 + $0x140] ss:$8 sps:$4 sm:$0xff]   ;;  %v2281_v37 = vld [vmem:[%s2527_s9 + $0x54] ss:$8 sps:$4 sm:$0xff]   ;;  %v2285_v39 = vld [vmem:[%s2527_s9 + $0x50] ss:$8 sps:$4 sm:$0xff]  }
  0x3e   : > { %v2283_v38 = vld [vmem:[%s2527_s9 + $0x154] ss:$8 sps:$4 sm:$0xff]   ;;  %v2286_v40 = vld [vmem:[%s2527_s9 + $0x150] ss:$8 sps:$4 sm:$0xff]   ;;  %v2287_v41 = vld [vmem:[%s2527_s9 + $0x64] ss:$8 sps:$4 sm:$0xff]  }
  0x3f   : > { %741 = vmatpush1.bf16.msra.mxu0 %v2238_v4  ;;  %2180 = vmatpush1.bf16.msra.mxu1 %v2238_v4  ;;  %v2289_v42 = vld [vmem:[%s2527_s9 + $0x164] ss:$8 sps:$4 sm:$0xff]   ;;  %v2291_v43 = vld [vmem:[%s2527_s9 + $0x60] ss:$8 sps:$4 sm:$0xff]   ;;  %v2293_v45 = vld [vmem:[%s2527_s9 + $0x74] ss:$8 sps:$4 sm:$0xff]  }
  0x40   : > { %742 = vmatprep.subr.bf16.mxu0 %v2416_v0  ;;  %2165 = vmatprep.subr.bf16.mxu1 %v2416_v0  ;;  %v2292_v44 = vld [vmem:[%s2527_s9 + $0x160] ss:$8 sps:$4 sm:$0xff]   ;;  %v2295_v46 = vld [vmem:[%s2527_s9 + $0x174] ss:$8 sps:$4 sm:$0xff]   ;;  %v2297_v47 = vld [vmem:[%s2527_s9 + $0x70] ss:$8 sps:$4 sm:$0xff]  }
  0x41   : > { %v2298_v48 = vld [vmem:[%s2527_s9 + $0x170] ss:$8 sps:$4 sm:$0xff]   ;;  %v2299_v49 = vld [vmem:[%s2527_s9 + $0x84] ss:$8 sps:$4 sm:$0xff]   ;;  %v2303_v51 = vld [vmem:[%s2527_s9 + $0x80] ss:$8 sps:$4 sm:$0xff]  }
  0x42   : > { %v2301_v50 = vld [vmem:[%s2527_s9 + $0x184] ss:$8 sps:$4 sm:$0xff]   ;;  %v2304_v52 = vld [vmem:[%s2527_s9 + $0x180] ss:$8 sps:$4 sm:$0xff]   ;;  %v2305_v53 = vld [vmem:[%s2527_s9 + $0x94] ss:$8 sps:$4 sm:$0xff]  }
  0x43   : > { %743 = vmatpush1.bf16.msra.mxu0 %v2239_v5  ;;  %2181 = vmatpush1.bf16.msra.mxu1 %v2239_v5  ;;  %v2307_v54 = vld [vmem:[%s2527_s9 + $0x194] ss:$8 sps:$4 sm:$0xff]   ;;  %v2309_v55 = vld [vmem:[%s2527_s9 + $0x90] ss:$8 sps:$4 sm:$0xff]   ;;  %v2311_v57 = vld [vmem:[%s2527_s9 + $0xa4] ss:$8 sps:$4 sm:$0xff]  }
  0x44   : > { %744 = vmatprep.subr.bf16.mxu0 %v2416_v0  ;;  %2166 = vmatprep.subr.bf16.mxu1 %v2416_v0  ;;  %v2310_v56 = vld [vmem:[%s2527_s9 + $0x190] ss:$8 sps:$4 sm:$0xff]   ;;  %v2313_v58 = vld [vmem:[%s2527_s9 + $0x1a4] ss:$8 sps:$4 sm:$0xff]   ;;  %v2315_v59 = vld [vmem:[%s2527_s9 + $0xa0] ss:$8 sps:$4 sm:$0xff]  }
  0x45   : > { %v2316_v60 = vld [vmem:[%s2527_s9 + $0x1a0] ss:$8 sps:$4 sm:$0xff]   ;;  %v2317_v61 = vld [vmem:[%s2527_s9 + $0xb4] ss:$8 sps:$4 sm:$0xff]   ;;  %v2321_v63 = vld [vmem:[%s2527_s9 + $0xb0] ss:$8 sps:$4 sm:$0xff]  }
  0x46   : > { %v2319_v62 = vld [vmem:[%s2527_s9 + $0x1b4] ss:$8 sps:$4 sm:$0xff]   ;;  %v2323_v1 = vld [vmem:[%s2527_s9 + $0xc4] ss:$8 sps:$4 sm:$0xff]   ;;  %v2327_v3 = vld [vmem:[%s2527_s9 + $0xc0] ss:$8 sps:$4 sm:$0xff]  }
  0x47   : > { %745 = vmatpush1.bf16.msra.mxu0 %v2240_v7  ;;  %2182 = vmatpush1.bf16.msra.mxu1 %v2240_v7  ;;  %v2325_v2 = vld [vmem:[%s2527_s9 + $0x1c4] ss:$8 sps:$4 sm:$0xff]   ;;  %v2328_v4 = vld [vmem:[%s2527_s9 + $0x1c0] ss:$8 sps:$4 sm:$0xff]   ;;  %v2329_v5 = vld [vmem:[%s2527_s9 + $0xd4] ss:$8 sps:$4 sm:$0xff]  }
  0x48   : > { %746 = vmatprep.subr.bf16.mxu0 %v2416_v0  ;;  %2167 = vmatprep.subr.bf16.mxu1 %v2416_v0  ;;  %v2331_v6 = vld [vmem:[%s2527_s9 + $0x1d4] ss:$8 sps:$4 sm:$0xff]   ;;  %v2333_v7 = vld [vmem:[%s2527_s9 + $0xd0] ss:$8 sps:$4 sm:$0xff]  }
  0x49   : > { %v2334_v8 = vld [vmem:[%s2527_s9 + $0x1d0] ss:$8 sps:$4 sm:$0xff]  }
  0x4b   : > { %747 = vmatpush1.bf16.msra.mxu0 %v2241_v9  ;;  %2183 = vmatpush1.bf16.msra.mxu1 %v2241_v9  ;;  %v2335_v9 = vld [vmem:[%s2527_s9 + $0xe4] ss:$8 sps:$4 sm:$0xff]  }
  0x4c   : > { %748 = vmatprep.subr.bf16.mxu0 %v2416_v0  ;;  %2168 = vmatprep.subr.bf16.mxu1 %v2416_v0 }
  0x4f   : > { %749 = vmatpush1.bf16.msra.mxu0 %v2242_v10  ;;  %2184 = vmatpush1.bf16.msra.mxu1 %v2242_v10  ;;  %v2337_v10 = vld [vmem:[%s2527_s9 + $0x1e4] ss:$8 sps:$4 sm:$0xff]  }
  0x50   : > { %750 = vmatprep.subr.bf16.mxu0 %v2416_v0  ;;  %2169 = vmatprep.subr.bf16.mxu1 %v2416_v0 }
  0x53   : > { %751 = vmatpush1.bf16.msra.mxu0 %v2243_v11  ;;  %2185 = vmatpush1.bf16.msra.mxu1 %v2243_v11  ;;  %v2339_v11 = vld [vmem:[%s2527_s9 + $0xe0] ss:$8 sps:$4 sm:$0xff]  }
  0x54   : > { %752 = vmatprep.subr.bf16.mxu0 %v2416_v0  ;;  %2170 = vmatprep.subr.bf16.mxu1 %v2416_v0 }
  0x57   : > { %753 = vmatpush1.bf16.msra.mxu0 %v2244_v12  ;;  %2186 = vmatpush1.bf16.msra.mxu1 %v2244_v12  ;;  %v2340_v12 = vld [vmem:[%s2527_s9 + $0x1e0] ss:$8 sps:$4 sm:$0xff]  }
  0x58   : > { %754 = vmatprep.subr.bf16.mxu0 %v2416_v0  ;;  %2171 = vmatprep.subr.bf16.mxu1 %v2416_v0 }
  0x5b   : > { %755 = vmatpush1.bf16.msra.mxu0 %v2245_v13  ;;  %2187 = vmatpush1.bf16.msra.mxu1 %v2245_v13  ;;  %v2341_v13 = vld [vmem:[%s2527_s9 + $0xf4] ss:$8 sps:$4 sm:$0xff]  }
  0x5c   : > { %756 = vmatprep.subr.bf16.mxu0 %v2416_v0  ;;  %2172 = vmatprep.subr.bf16.mxu1 %v2416_v0 }
  0x5f   : > { %757 = vmatpush1.bf16.msra.mxu0 %v2246_v14  ;;  %2188 = vmatpush1.bf16.msra.mxu1 %v2246_v14  ;;  %v2343_v14 = vld [vmem:[%s2527_s9 + $0x1f4] ss:$8 sps:$4 sm:$0xff]  }
  0x60   : > { %758 = vmatprep.subr.bf16.mxu0 %v2416_v0  ;;  %2173 = vmatprep.subr.bf16.mxu1 %v2416_v0 }
  0x63   : > { %759 = vmatpush1.bf16.msra.mxu0 %v2247_v15  ;;  %2189 = vmatpush1.bf16.msra.mxu1 %v2247_v15  ;;  %v2345_v15 = vld [vmem:[%s2527_s9 + $0xf0] ss:$8 sps:$4 sm:$0xff]  }
  0x64   : > { %760 = vmatprep.subr.bf16.mxu0 %v2416_v0  ;;  %2174 = vmatprep.subr.bf16.mxu1 %v2416_v0 }
  0x67   : > { %761 = vmatpush1.bf16.msra.mxu0 %v2248_v16  ;;  %2190 = vmatpush1.bf16.msra.mxu1 %v2248_v16  ;;  %v2346_v16 = vld [vmem:[%s2527_s9 + $0x1f0] ss:$8 sps:$4 sm:$0xff]  }
  0x68   : > { %762 = vmatprep.subr.bf16.mxu0 %v2416_v0  ;;  %2175 = vmatprep.subr.bf16.mxu1 %v2416_v0 }
  0x6b   : > { %763 = vmatpush1.bf16.msra.mxu0 %v2249_v17  ;;  %2191 = vmatpush1.bf16.msra.mxu1 %v2249_v17  ;;  %v2682_v17 = vld [vmem:[%s2869_s2] ss:$0 sm:$0xff] }
  0x6c   : > { %764 = vmatprep.subr.bf16.mxu0 %v2416_v0  ;;  %2176 = vmatprep.subr.bf16.mxu1 %v2416_v0  ;;  %v2322_v0 = vld [vmem:[%s2527_s9 + $0x1b0] ss:$8 sps:$4 sm:$0xff]  }
  0x6f   : > { %765 = vmatpush1.bf16.msra.mxu0 %v2250_v18  ;;  %2192 = vmatpush1.bf16.msra.mxu1 %v2250_v18 }
  0x72   : > { %767 = vmatmul.mubr.bf16.vlgmr.msra.gmra.mrb[0].mxu0 %v2251_v19  ;;  %895 = vmatmul.mubr.bf16.vlgmr.msra.gmra.mrb[0].mxu1 %v2254_v20  ;;  %v2687_v19 = vld [vmem:[%s2870_s3] ss:$0 sm:$0xff] }
  0x73   : > { %774 = vmatprep.mubr.bf16.mxu0 %v2257_v21  ;;  %902 = vmatprep.mubr.bf16.mxu1 %v2259_v22 }
  0x7a   : > { %775 = vmatmul.mubr.bf16.gmra.mrb[4].mxu0 %v2261_v23  ;;  %903 = vmatmul.mubr.bf16.gmra.mrb[4].mxu1 %v2262_v24 }
  0x7b   : > { %782 = vmatprep.mubr.bf16.mxu0 %v2263_v25  ;;  %910 = vmatprep.mubr.bf16.mxu1 %v2265_v26 }
  0x82   : > { %783 = vmatmul.mubr.bf16.gmra.mrb[8].mxu0 %v2267_v27  ;;  %911 = vmatmul.mubr.bf16.gmra.mrb[8].mxu1 %v2268_v28 }
  0x83   : > { %790 = vmatprep.mubr.bf16.mxu0 %v2269_v29  ;;  %918 = vmatprep.mubr.bf16.mxu1 %v2271_v30 }
  0x8a   : > { %791 = vmatmul.mubr.bf16.gmra.mrb[12].mxu0 %v2273_v31  ;;  %919 = vmatmul.mubr.bf16.gmra.mrb[12].mxu1 %v2274_v32 }
  0x8b   : > { %798 = vmatprep.mubr.bf16.mxu0 %v2275_v33  ;;  %926 = vmatprep.mubr.bf16.mxu1 %v2277_v34 }
  0x92   : > { %799 = vmatmul.mubr.bf16.gmra.mrb[16].mxu0 %v2279_v35  ;;  %927 = vmatmul.mubr.bf16.gmra.mrb[16].mxu1 %v2280_v36 }
  0x93   : > { %806 = vmatprep.mubr.bf16.mxu0 %v2281_v37  ;;  %934 = vmatprep.mubr.bf16.mxu1 %v2283_v38 }
  0x9a   : > { %807 = vmatmul.mubr.bf16.gmra.mrb[20].mxu0 %v2285_v39  ;;  %935 = vmatmul.mubr.bf16.gmra.mrb[20].mxu1 %v2286_v40 }
  0x9b   : > { %814 = vmatprep.mubr.bf16.mxu0 %v2287_v41  ;;  %942 = vmatprep.mubr.bf16.mxu1 %v2289_v42 }
  0xa2   : > { %815 = vmatmul.mubr.bf16.gmra.mrb[24].mxu0 %v2291_v43  ;;  %943 = vmatmul.mubr.bf16.gmra.mrb[24].mxu1 %v2292_v44 }
  0xa3   : > { %822 = vmatprep.mubr.bf16.mxu0 %v2293_v45  ;;  %950 = vmatprep.mubr.bf16.mxu1 %v2295_v46 }
  0xaa   : > { %823 = vmatmul.mubr.bf16.gmra.mrb[28].mxu0 %v2297_v47  ;;  %951 = vmatmul.mubr.bf16.gmra.mrb[28].mxu1 %v2298_v48 }
  0xab   : > { %830 = vmatprep.mubr.bf16.mxu0 %v2299_v49  ;;  %958 = vmatprep.mubr.bf16.mxu1 %v2301_v50 }
  0xb2   : > { %831 = vmatmul.mubr.bf16.gmra.mrb[32].mxu0 %v2303_v51  ;;  %959 = vmatmul.mubr.bf16.gmra.mrb[32].mxu1 %v2304_v52 }
  0xb3   : > { %838 = vmatprep.mubr.bf16.mxu0 %v2305_v53  ;;  %966 = vmatprep.mubr.bf16.mxu1 %v2307_v54 }
  0xba   : > { %839 = vmatmul.mubr.bf16.gmra.mrb[36].mxu0 %v2309_v55  ;;  %967 = vmatmul.mubr.bf16.gmra.mrb[36].mxu1 %v2310_v56 }
  0xbb   : > { %846 = vmatprep.mubr.bf16.mxu0 %v2311_v57  ;;  %974 = vmatprep.mubr.bf16.mxu1 %v2313_v58 }
  0xc2   : > { %847 = vmatmul.mubr.bf16.gmra.mrb[40].mxu0 %v2315_v59  ;;  %975 = vmatmul.mubr.bf16.gmra.mrb[40].mxu1 %v2316_v60 }
  0xc3   : > { %854 = vmatprep.mubr.bf16.mxu0 %v2317_v61  ;;  %982 = vmatprep.mubr.bf16.mxu1 %v2319_v62 }
  0xca   : > { %855 = vmatmul.mubr.bf16.gmra.mrb[44].mxu0 %v2321_v63  ;;  %983 = vmatmul.mubr.bf16.gmra.mrb[44].mxu1 %v2322_v0 }
  0xcb   : > { %862 = vmatprep.mubr.bf16.mxu0 %v2323_v1  ;;  %990 = vmatprep.mubr.bf16.mxu1 %v2325_v2 }
  0xd2   : > { %863 = vmatmul.mubr.bf16.gmra.mrb[48].mxu0 %v2327_v3  ;;  %991 = vmatmul.mubr.bf16.gmra.mrb[48].mxu1 %v2328_v4 }
  0xd3   : > { %870 = vmatprep.mubr.bf16.mxu0 %v2329_v5  ;;  %998 = vmatprep.mubr.bf16.mxu1 %v2331_v6 }
  0xda   : > { %871 = vmatmul.mubr.bf16.gmra.mrb[52].mxu0 %v2333_v7  ;;  %999 = vmatmul.mubr.bf16.gmra.mrb[52].mxu1 %v2334_v8 }
  0xdb   : > { %878 = vmatprep.mubr.bf16.mxu0 %v2335_v9  ;;  %1006 = vmatprep.mubr.bf16.mxu1 %v2337_v10 }
  0xe2   : > { %879 = vmatmul.mubr.bf16.gmra.mrb[56].mxu0 %v2339_v11  ;;  %1007 = vmatmul.mubr.bf16.gmra.mrb[56].mxu1 %v2340_v12 }
  0xe3   : > { %886 = vmatprep.mubr.bf16.mxu0 %v2341_v13  ;;  %1014 = vmatprep.mubr.bf16.mxu1 %v2343_v14 }
  0xea   : > { %887 = vmatmul.mubr.bf16.gmra.mrb[60].mxu0 %v2345_v15  ;;  %1015 = vmatmul.mubr.bf16.gmra.mrb[60].mxu1 %v2346_v16 }
 0x145   : > { %v768_v18 = vpop.f32.mrb[0].mxu0  ;;  %v896_v20 = vpop.f32.mrb[0].mxu1 }
 0x146   : > { %v1030_v21 = vmul.f32 %v2682_v17, %v768_v18  ;;  %v1062_v22 = vmul.f32 %v2682_v17, %v896_v20  ;;  %v770_v23 = vpop.f32.mrb[1].mxu0  ;;  %v898_v24 = vpop.f32.mrb[1].mxu1 }
 0x147   : > { %v771_v25 = vpop.f32.mrb[2].mxu0  ;;  %v899_v26 = vpop.f32.mrb[2].mxu1 }
 0x148   : > { %v1101_v27 = vadd.f32 %v2687_v19, %v1030_v21  ;;  %v1133_v28 = vadd.f32 %v2687_v19, %v1062_v22  ;;  %v1031_v29 = vmul.f32 %v2682_v17, %v771_v25  ;;  %v1063_v30 = vmul.f32 %v2682_v17, %v899_v26  ;;  %v773_v31 = vpop.f32.mrb[3].mxu0  ;;  %v901_v32 = vpop.f32.mrb[3].mxu1 }
 0x14a   : > { %v1229_v33 = vmul.f32 0.2, %v1101_v27  ;;  %v1261_v34 = vmul.f32 0.2, %v1133_v28  ;;  %vm1165_vm0 = vcmp.gt.f32.partialorder %v1101_v27, 0.0  ;;  %vm1197_vm1 = vcmp.gt.f32.partialorder %v1133_v28, 0.0 }
 0x14b   : > { %v1102_v35 = vadd.f32 %v2687_v19, %v1031_v29  ;;  %v1134_v36 = vadd.f32 %v2687_v19, %v1063_v30 }
 0x14c   : > { %v1293_v39 = vsel %vm1165_vm0, %v1101_v27, %v1229_v33  ;;  %v1325_v40 = vsel %vm1197_vm1, %v1133_v28, %v1261_v34 }
 0x14d   : > { %vm1166_vm2 = vcmp.gt.f32.partialorder %v1102_v35, 0.0  ;;  %v1230_v37 = vmul.f32 0.2, %v1102_v35  ;;  %vm1198_vm3 = vcmp.gt.f32.partialorder %v1134_v36, 0.0  ;;  %v1262_v38 = vmul.f32 0.2, %v1134_v36 }
 0x14e   : > { %v776_v41 = vpop.f32.mrb[4].mxu0  ;;  %v904_v42 = vpop.f32.mrb[4].mxu1 }
 0x14f   : > { %v1294_v43 = vsel %vm1166_vm2, %v1102_v35, %v1230_v37  ;;  %v1326_v44 = vsel %vm1198_vm3, %v1134_v36, %v1262_v38  ;;  %v1032_v45 = vmul.f32 %v2682_v17, %v776_v41  ;;  %v1064_v46 = vmul.f32 %v2682_v17, %v904_v42  ;;  %v778_v47 = vpop.f32.mrb[5].mxu0  ;;  %v906_v48 = vpop.f32.mrb[5].mxu1 }
 0x150   : > { %v1973_v49 = vpack.c.bf16 %v1294_v43, %v1293_v39  ;;  %v2053_v50 = vpack.c.bf16 %v1326_v44, %v1325_v40  ;;  %v779_v51 = vpop.f32.mrb[6].mxu0  ;;  %v907_v52 = vpop.f32.mrb[6].mxu1 }
 0x151   : > { %v1103_v53 = vadd.f32 %v2687_v19, %v1032_v45  ;;  %v1135_v54 = vadd.f32 %v2687_v19, %v1064_v46  ;;  %v1033_v55 = vmul.f32 %v2682_v17, %v779_v51  ;;  %v1065_v56 = vmul.f32 %v2682_v17, %v907_v52  ;;  %v781_v57 = vpop.f32.mrb[7].mxu0  ;;  %v909_v58 = vpop.f32.mrb[7].mxu1 }
 0x152   : > { %1974 = vst [vmem:[%s2700_s5] sm:$0xff] %v1973_v49   ;;  %2145 = vst [vmem:[%s2700_s5 + $0x80] sm:$0xff] %v2053_v50  }
 0x153   : > { %v1231_v59 = vmul.f32 0.2, %v1103_v53  ;;  %v1263_v60 = vmul.f32 0.2, %v1135_v54  ;;  %v1104_v61 = vadd.f32 %v2687_v19, %v1033_v55  ;;  %v1136_v62 = vadd.f32 %v2687_v19, %v1065_v56 }
 0x154   : > { %vm1167_vm4 = vcmp.gt.f32.partialorder %v1103_v53, 0.0  ;;  %vm1199_vm5 = vcmp.gt.f32.partialorder %v1135_v54, 0.0 }
 0x155   : > { %v784_v63 = vpop.f32.mrb[8].mxu0  ;;  %v912_v0 = vpop.f32.mrb[8].mxu1  ;;  %vm1168_vm6 = vcmp.gt.f32.partialorder %v1104_v61, 0.0  ;;  %v1232_v1 = vmul.f32 0.2, %v1104_v61  ;;  %vm1200_vm7 = vcmp.gt.f32.partialorder %v1136_v62, 0.0  ;;  %v1295_v7 = vsel %vm1167_vm4, %v1103_v53, %v1231_v59 }
 0x156   : > { %v1264_v2 = vmul.f32 0.2, %v1136_v62  ;;  %v1034_v3 = vmul.f32 %v2682_v17, %v784_v63  ;;  %v1066_v4 = vmul.f32 %v2682_v17, %v912_v0  ;;  %v786_v5 = vpop.f32.mrb[9].mxu0  ;;  %v914_v6 = vpop.f32.mrb[9].mxu1  ;;  %v1327_v8 = vsel %vm1199_vm5, %v1135_v54, %v1263_v60 }
 0x157   : > { %v1296_v9 = vsel %vm1168_vm6, %v1104_v61, %v1232_v1  ;;  %v787_v11 = vpop.f32.mrb[10].mxu0  ;;  %v915_v12 = vpop.f32.mrb[10].mxu1 }
 0x158   : > { %v1328_v10 = vsel %vm1200_vm7, %v1136_v62, %v1264_v2  ;;  %v1978_v13 = vpack.c.bf16 %v1296_v9, %v1295_v7  ;;  %v1105_v15 = vadd.f32 %v2687_v19, %v1034_v3  ;;  %v1137_v16 = vadd.f32 %v2687_v19, %v1066_v4  ;;  %v789_v18 = vpop.f32.mrb[11].mxu0  ;;  %v917_v20 = vpop.f32.mrb[11].mxu1 }
 0x159   : > { %v2058_v14 = vpack.c.bf16 %v1328_v10, %v1327_v8  ;;  %v1035_v21 = vmul.f32 %v2682_v17, %v787_v11  ;;  %v1067_v22 = vmul.f32 %v2682_v17, %v915_v12 }
 0x15a   : > { %2130 = vst [vmem:[%s2700_s5 + $0x8] sm:$0xff] %v1978_v13   ;;  %v1233_v23 = vmul.f32 0.2, %v1105_v15  ;;  %v1265_v24 = vmul.f32 0.2, %v1137_v16  ;;  %vm1169_vm8 = vcmp.gt.f32.partialorder %v1105_v15, 0.0 }
 0x15b   : > { %2146 = vst [vmem:[%s2700_s5 + $0x88] sm:$0xff] %v2058_v14   ;;  %v1106_v25 = vadd.f32 %v2687_v19, %v1035_v21  ;;  %v1138_v26 = vadd.f32 %v2687_v19, %v1067_v22  ;;  %vm1201_vm9 = vcmp.gt.f32.partialorder %v1137_v16, 0.0 }
 0x15c   : > { %v1297_v35 = vsel %vm1169_vm8, %v1105_v15, %v1233_v23  ;;  %v1329_v36 = vsel %vm1201_vm9, %v1137_v16, %v1265_v24 }
 0x15d   : > { %v792_v27 = vpop.f32.mrb[12].mxu0  ;;  %v920_v28 = vpop.f32.mrb[12].mxu1  ;;  %vm1170_vm10 = vcmp.gt.f32.partialorder %v1106_v25, 0.0  ;;  %v1234_v29 = vmul.f32 0.2, %v1106_v25  ;;  %vm1202_vm11 = vcmp.gt.f32.partialorder %v1138_v26, 0.0 }
 0x15e   : > { %v1266_v30 = vmul.f32 0.2, %v1138_v26  ;;  %v1036_v31 = vmul.f32 %v2682_v17, %v792_v27  ;;  %v1068_v32 = vmul.f32 %v2682_v17, %v920_v28  ;;  %v794_v33 = vpop.f32.mrb[13].mxu0  ;;  %v922_v34 = vpop.f32.mrb[13].mxu1 }
 0x15f   : > { %v1298_v37 = vsel %vm1170_vm10, %v1106_v25, %v1234_v29  ;;  %v795_v39 = vpop.f32.mrb[14].mxu0  ;;  %v923_v40 = vpop.f32.mrb[14].mxu1 }
 0x160   : > { %v1330_v38 = vsel %vm1202_vm11, %v1138_v26, %v1266_v30  ;;  %v1983_v41 = vpack.c.bf16 %v1298_v37, %v1297_v35  ;;  %v1107_v43 = vadd.f32 %v2687_v19, %v1036_v31  ;;  %v1139_v44 = vadd.f32 %v2687_v19, %v1068_v32  ;;  %v797_v45 = vpop.f32.mrb[15].mxu0  ;;  %v925_v46 = vpop.f32.mrb[15].mxu1 }
 0x161   : > { %v2063_v42 = vpack.c.bf16 %v1330_v38, %v1329_v36  ;;  %v1037_v47 = vmul.f32 %v2682_v17, %v795_v39  ;;  %v1069_v48 = vmul.f32 %v2682_v17, %v923_v40 }
 0x162   : > { %2131 = vst [vmem:[%s2700_s5 + $0x10] sm:$0xff] %v1983_v41   ;;  %v1235_v49 = vmul.f32 0.2, %v1107_v43  ;;  %v1267_v50 = vmul.f32 0.2, %v1139_v44  ;;  %vm1171_vm12 = vcmp.gt.f32.partialorder %v1107_v43, 0.0 }
 0x163   : > { %2147 = vst [vmem:[%s2700_s5 + $0x90] sm:$0xff] %v2063_v42   ;;  %v1108_v51 = vadd.f32 %v2687_v19, %v1037_v47  ;;  %v1140_v52 = vadd.f32 %v2687_v19, %v1069_v48  ;;  %vm1203_vm13 = vcmp.gt.f32.partialorder %v1139_v44, 0.0 }
 0x164   : > { %v1299_v61 = vsel %vm1171_vm12, %v1107_v43, %v1235_v49  ;;  %v1331_v62 = vsel %vm1203_vm13, %v1139_v44, %v1267_v50 }
 0x165   : > { %v800_v53 = vpop.f32.mrb[16].mxu0  ;;  %v928_v54 = vpop.f32.mrb[16].mxu1  ;;  %vm1172_vm14 = vcmp.gt.f32.partialorder %v1108_v51, 0.0  ;;  %v1236_v55 = vmul.f32 0.2, %v1108_v51  ;;  %vm1204_vm15 = vcmp.gt.f32.partialorder %v1140_v52, 0.0 }
 0x166   : > { %v1268_v56 = vmul.f32 0.2, %v1140_v52  ;;  %v1038_v57 = vmul.f32 %v2682_v17, %v800_v53  ;;  %v1070_v58 = vmul.f32 %v2682_v17, %v928_v54  ;;  %v802_v59 = vpop.f32.mrb[17].mxu0  ;;  %v930_v60 = vpop.f32.mrb[17].mxu1 }
 0x167   : > { %v1300_v63 = vsel %vm1172_vm14, %v1108_v51, %v1236_v55  ;;  %v803_v1 = vpop.f32.mrb[18].mxu0  ;;  %v931_v2 = vpop.f32.mrb[18].mxu1 }
 0x168   : > { %v1332_v0 = vsel %vm1204_vm15, %v1140_v52, %v1268_v56  ;;  %v1988_v3 = vpack.c.bf16 %v1300_v63, %v1299_v61  ;;  %v1109_v5 = vadd.f32 %v2687_v19, %v1038_v57  ;;  %v1141_v6 = vadd.f32 %v2687_v19, %v1070_v58  ;;  %v805_v7 = vpop.f32.mrb[19].mxu0  ;;  %v933_v8 = vpop.f32.mrb[19].mxu1 }
 0x169   : > { %v2068_v4 = vpack.c.bf16 %v1332_v0, %v1331_v62  ;;  %v1039_v9 = vmul.f32 %v2682_v17, %v803_v1  ;;  %v1071_v10 = vmul.f32 %v2682_v17, %v931_v2 }
 0x16a   : > { %2132 = vst [vmem:[%s2700_s5 + $0x18] sm:$0xff] %v1988_v3   ;;  %v1237_v11 = vmul.f32 0.2, %v1109_v5  ;;  %v1269_v12 = vmul.f32 0.2, %v1141_v6  ;;  %vm1173_vm0 = vcmp.gt.f32.partialorder %v1109_v5, 0.0 }
 0x16b   : > { %2148 = vst [vmem:[%s2700_s5 + $0x98] sm:$0xff] %v2068_v4   ;;  %v1110_v13 = vadd.f32 %v2687_v19, %v1039_v9  ;;  %v1142_v14 = vadd.f32 %v2687_v19, %v1071_v10  ;;  %vm1205_vm1 = vcmp.gt.f32.partialorder %v1141_v6, 0.0 }
 0x16c   : > { %v1301_v25 = vsel %vm1173_vm0, %v1109_v5, %v1237_v11  ;;  %v1333_v26 = vsel %vm1205_vm1, %v1141_v6, %v1269_v12 }
 0x16d   : > { %v808_v15 = vpop.f32.mrb[20].mxu0  ;;  %v936_v16 = vpop.f32.mrb[20].mxu1  ;;  %vm1174_vm2 = vcmp.gt.f32.partialorder %v1110_v13, 0.0  ;;  %v1238_v18 = vmul.f32 0.2, %v1110_v13  ;;  %vm1206_vm3 = vcmp.gt.f32.partialorder %v1142_v14, 0.0 }
 0x16e   : > { %v1270_v20 = vmul.f32 0.2, %v1142_v14  ;;  %v1040_v21 = vmul.f32 %v2682_v17, %v808_v15  ;;  %v1072_v22 = vmul.f32 %v2682_v17, %v936_v16  ;;  %v810_v23 = vpop.f32.mrb[21].mxu0  ;;  %v938_v24 = vpop.f32.mrb[21].mxu1 }
 0x16f   : > { %v1302_v27 = vsel %vm1174_vm2, %v1110_v13, %v1238_v18  ;;  %v811_v29 = vpop.f32.mrb[22].mxu0  ;;  %v939_v30 = vpop.f32.mrb[22].mxu1 }
 0x170   : > { %v1334_v28 = vsel %vm1206_vm3, %v1142_v14, %v1270_v20  ;;  %v1993_v31 = vpack.c.bf16 %v1302_v27, %v1301_v25  ;;  %v1111_v33 = vadd.f32 %v2687_v19, %v1040_v21  ;;  %v1143_v34 = vadd.f32 %v2687_v19, %v1072_v22  ;;  %v813_v35 = vpop.f32.mrb[23].mxu0  ;;  %v941_v36 = vpop.f32.mrb[23].mxu1 }
 0x171   : > { %v2073_v32 = vpack.c.bf16 %v1334_v28, %v1333_v26  ;;  %v1041_v37 = vmul.f32 %v2682_v17, %v811_v29  ;;  %v1073_v38 = vmul.f32 %v2682_v17, %v939_v30 }
 0x172   : > { %2133 = vst [vmem:[%s2700_s5 + $0x20] sm:$0xff] %v1993_v31   ;;  %v1239_v39 = vmul.f32 0.2, %v1111_v33  ;;  %v1271_v40 = vmul.f32 0.2, %v1143_v34  ;;  %vm1175_vm4 = vcmp.gt.f32.partialorder %v1111_v33, 0.0 }
 0x173   : > { %2149 = vst [vmem:[%s2700_s5 + $0xa0] sm:$0xff] %v2073_v32   ;;  %v1112_v41 = vadd.f32 %v2687_v19, %v1041_v37  ;;  %v1144_v42 = vadd.f32 %v2687_v19, %v1073_v38  ;;  %vm1207_vm5 = vcmp.gt.f32.partialorder %v1143_v34, 0.0 }
 0x174   : > { %v1303_v51 = vsel %vm1175_vm4, %v1111_v33, %v1239_v39  ;;  %v1335_v52 = vsel %vm1207_vm5, %v1143_v34, %v1271_v40 }
 0x175   : > { %v816_v43 = vpop.f32.mrb[24].mxu0  ;;  %v944_v44 = vpop.f32.mrb[24].mxu1  ;;  %vm1176_vm6 = vcmp.gt.f32.partialorder %v1112_v41, 0.0  ;;  %v1240_v45 = vmul.f32 0.2, %v1112_v41  ;;  %vm1208_vm7 = vcmp.gt.f32.partialorder %v1144_v42, 0.0 }
 0x176   : > { %v1272_v46 = vmul.f32 0.2, %v1144_v42  ;;  %v1042_v47 = vmul.f32 %v2682_v17, %v816_v43  ;;  %v1074_v48 = vmul.f32 %v2682_v17, %v944_v44  ;;  %v818_v49 = vpop.f32.mrb[25].mxu0  ;;  %v946_v50 = vpop.f32.mrb[25].mxu1 }
 0x177   : > { %v1304_v53 = vsel %vm1176_vm6, %v1112_v41, %v1240_v45  ;;  %v819_v55 = vpop.f32.mrb[26].mxu0  ;;  %v947_v56 = vpop.f32.mrb[26].mxu1 }
 0x178   : > { %v1336_v54 = vsel %vm1208_vm7, %v1144_v42, %v1272_v46  ;;  %v1998_v57 = vpack.c.bf16 %v1304_v53, %v1303_v51  ;;  %v1113_v59 = vadd.f32 %v2687_v19, %v1042_v47  ;;  %v1145_v60 = vadd.f32 %v2687_v19, %v1074_v48  ;;  %v821_v61 = vpop.f32.mrb[27].mxu0  ;;  %v949_v62 = vpop.f32.mrb[27].mxu1 }
 0x179   : > { %v2078_v58 = vpack.c.bf16 %v1336_v54, %v1335_v52  ;;  %v1043_v63 = vmul.f32 %v2682_v17, %v819_v55  ;;  %v1075_v0 = vmul.f32 %v2682_v17, %v947_v56 }
 0x17a   : > { %2134 = vst [vmem:[%s2700_s5 + $0x28] sm:$0xff] %v1998_v57   ;;  %v1241_v1 = vmul.f32 0.2, %v1113_v59  ;;  %v1273_v2 = vmul.f32 0.2, %v1145_v60  ;;  %vm1177_vm8 = vcmp.gt.f32.partialorder %v1113_v59, 0.0 }
 0x17b   : > { %2150 = vst [vmem:[%s2700_s5 + $0xa8] sm:$0xff] %v2078_v58   ;;  %v1114_v3 = vadd.f32 %v2687_v19, %v1043_v63  ;;  %v1146_v4 = vadd.f32 %v2687_v19, %v1075_v0  ;;  %vm1209_vm9 = vcmp.gt.f32.partialorder %v1145_v60, 0.0 }
 0x17c   : > { %v1305_v13 = vsel %vm1177_vm8, %v1113_v59, %v1241_v1  ;;  %v1337_v14 = vsel %vm1209_vm9, %v1145_v60, %v1273_v2 }
 0x17d   : > { %v824_v5 = vpop.f32.mrb[28].mxu0  ;;  %v952_v6 = vpop.f32.mrb[28].mxu1  ;;  %vm1178_vm10 = vcmp.gt.f32.partialorder %v1114_v3, 0.0  ;;  %v1242_v7 = vmul.f32 0.2, %v1114_v3  ;;  %vm1210_vm11 = vcmp.gt.f32.partialorder %v1146_v4, 0.0 }
 0x17e   : > { %v1274_v8 = vmul.f32 0.2, %v1146_v4  ;;  %v1044_v9 = vmul.f32 %v2682_v17, %v824_v5  ;;  %v1076_v10 = vmul.f32 %v2682_v17, %v952_v6  ;;  %v826_v11 = vpop.f32.mrb[29].mxu0  ;;  %v954_v12 = vpop.f32.mrb[29].mxu1 }
 0x17f   : > { %v1306_v15 = vsel %vm1178_vm10, %v1114_v3, %v1242_v7  ;;  %v827_v18 = vpop.f32.mrb[30].mxu0  ;;  %v955_v20 = vpop.f32.mrb[30].mxu1 }
 0x180   : > { %v1338_v16 = vsel %vm1210_vm11, %v1146_v4, %v1274_v8  ;;  %v2003_v21 = vpack.c.bf16 %v1306_v15, %v1305_v13  ;;  %v1115_v23 = vadd.f32 %v2687_v19, %v1044_v9  ;;  %v1147_v24 = vadd.f32 %v2687_v19, %v1076_v10  ;;  %v829_v25 = vpop.f32.mrb[31].mxu0  ;;  %v957_v26 = vpop.f32.mrb[31].mxu1 }
 0x181   : > { %v2083_v22 = vpack.c.bf16 %v1338_v16, %v1337_v14  ;;  %v1045_v27 = vmul.f32 %v2682_v17, %v827_v18  ;;  %v1077_v28 = vmul.f32 %v2682_v17, %v955_v20 }
 0x182   : > { %2135 = vst [vmem:[%s2700_s5 + $0x30] sm:$0xff] %v2003_v21   ;;  %v1243_v29 = vmul.f32 0.2, %v1115_v23  ;;  %v1275_v30 = vmul.f32 0.2, %v1147_v24  ;;  %vm1179_vm12 = vcmp.gt.f32.partialorder %v1115_v23, 0.0 }
 0x183   : > { %2151 = vst [vmem:[%s2700_s5 + $0xb0] sm:$0xff] %v2083_v22   ;;  %v1116_v31 = vadd.f32 %v2687_v19, %v1045_v27  ;;  %v1148_v32 = vadd.f32 %v2687_v19, %v1077_v28  ;;  %vm1211_vm13 = vcmp.gt.f32.partialorder %v1147_v24, 0.0 }
 0x184   : > { %v1307_v41 = vsel %vm1179_vm12, %v1115_v23, %v1243_v29  ;;  %v1339_v42 = vsel %vm1211_vm13, %v1147_v24, %v1275_v30 }
 0x185   : > { %v832_v33 = vpop.f32.mrb[32].mxu0  ;;  %v960_v34 = vpop.f32.mrb[32].mxu1  ;;  %vm1180_vm14 = vcmp.gt.f32.partialorder %v1116_v31, 0.0  ;;  %v1244_v35 = vmul.f32 0.2, %v1116_v31  ;;  %vm1212_vm15 = vcmp.gt.f32.partialorder %v1148_v32, 0.0 }
 0x186   : > { %v1276_v36 = vmul.f32 0.2, %v1148_v32  ;;  %v1046_v37 = vmul.f32 %v2682_v17, %v832_v33  ;;  %v1078_v38 = vmul.f32 %v2682_v17, %v960_v34  ;;  %v834_v39 = vpop.f32.mrb[33].mxu0  ;;  %v962_v40 = vpop.f32.mrb[33].mxu1 }
 0x187   : > { %v1308_v43 = vsel %vm1180_vm14, %v1116_v31, %v1244_v35  ;;  %v835_v45 = vpop.f32.mrb[34].mxu0  ;;  %v963_v46 = vpop.f32.mrb[34].mxu1 }
 0x188   : > { %v1340_v44 = vsel %vm1212_vm15, %v1148_v32, %v1276_v36  ;;  %v2008_v47 = vpack.c.bf16 %v1308_v43, %v1307_v41  ;;  %v1117_v49 = vadd.f32 %v2687_v19, %v1046_v37  ;;  %v1149_v50 = vadd.f32 %v2687_v19, %v1078_v38  ;;  %v837_v51 = vpop.f32.mrb[35].mxu0  ;;  %v965_v52 = vpop.f32.mrb[35].mxu1 }
 0x189   : > { %v2088_v48 = vpack.c.bf16 %v1340_v44, %v1339_v42  ;;  %v1047_v53 = vmul.f32 %v2682_v17, %v835_v45  ;;  %v1079_v54 = vmul.f32 %v2682_v17, %v963_v46 }
 0x18a   : > { %2136 = vst [vmem:[%s2700_s5 + $0x38] sm:$0xff] %v2008_v47   ;;  %v1245_v55 = vmul.f32 0.2, %v1117_v49  ;;  %v1277_v56 = vmul.f32 0.2, %v1149_v50  ;;  %vm1181_vm0 = vcmp.gt.f32.partialorder %v1117_v49, 0.0 }
 0x18b   : > { %2152 = vst [vmem:[%s2700_s5 + $0xb8] sm:$0xff] %v2088_v48   ;;  %v1118_v57 = vadd.f32 %v2687_v19, %v1047_v53  ;;  %v1150_v58 = vadd.f32 %v2687_v19, %v1079_v54  ;;  %vm1213_vm1 = vcmp.gt.f32.partialorder %v1149_v50, 0.0 }
 0x18c   : > { %v1309_v3 = vsel %vm1181_vm0, %v1117_v49, %v1245_v55  ;;  %v1341_v4 = vsel %vm1213_vm1, %v1149_v50, %v1277_v56 }
 0x18d   : > { %v840_v59 = vpop.f32.mrb[36].mxu0  ;;  %v968_v60 = vpop.f32.mrb[36].mxu1  ;;  %vm1182_vm2 = vcmp.gt.f32.partialorder %v1118_v57, 0.0  ;;  %v1246_v61 = vmul.f32 0.2, %v1118_v57  ;;  %vm1214_vm3 = vcmp.gt.f32.partialorder %v1150_v58, 0.0 }
 0x18e   : > { %v1278_v62 = vmul.f32 0.2, %v1150_v58  ;;  %v1048_v63 = vmul.f32 %v2682_v17, %v840_v59  ;;  %v1080_v0 = vmul.f32 %v2682_v17, %v968_v60  ;;  %v842_v1 = vpop.f32.mrb[37].mxu0  ;;  %v970_v2 = vpop.f32.mrb[37].mxu1 }
 0x18f   : > { %v1310_v5 = vsel %vm1182_vm2, %v1118_v57, %v1246_v61  ;;  %v843_v7 = vpop.f32.mrb[38].mxu0  ;;  %v971_v8 = vpop.f32.mrb[38].mxu1 }
 0x190   : > { %v1342_v6 = vsel %vm1214_vm3, %v1150_v58, %v1278_v62  ;;  %v2013_v9 = vpack.c.bf16 %v1310_v5, %v1309_v3  ;;  %v1119_v11 = vadd.f32 %v2687_v19, %v1048_v63  ;;  %v1151_v12 = vadd.f32 %v2687_v19, %v1080_v0  ;;  %v845_v13 = vpop.f32.mrb[39].mxu0  ;;  %v973_v14 = vpop.f32.mrb[39].mxu1 }
 0x191   : > { %v2093_v10 = vpack.c.bf16 %v1342_v6, %v1341_v4  ;;  %v1049_v15 = vmul.f32 %v2682_v17, %v843_v7  ;;  %v1081_v16 = vmul.f32 %v2682_v17, %v971_v8 }
 0x192   : > { %2137 = vst [vmem:[%s2700_s5 + $0x40] sm:$0xff] %v2013_v9   ;;  %v1247_v18 = vmul.f32 0.2, %v1119_v11  ;;  %v1279_v20 = vmul.f32 0.2, %v1151_v12  ;;  %vm1183_vm4 = vcmp.gt.f32.partialorder %v1119_v11, 0.0 }
 0x193   : > { %2153 = vst [vmem:[%s2700_s5 + $0xc0] sm:$0xff] %v2093_v10   ;;  %v1120_v21 = vadd.f32 %v2687_v19, %v1049_v15  ;;  %v1152_v22 = vadd.f32 %v2687_v19, %v1081_v16  ;;  %vm1215_vm5 = vcmp.gt.f32.partialorder %v1151_v12, 0.0 }
 0x194   : > { %v1311_v31 = vsel %vm1183_vm4, %v1119_v11, %v1247_v18  ;;  %v1343_v32 = vsel %vm1215_vm5, %v1151_v12, %v1279_v20 }
 0x195   : > { %v848_v23 = vpop.f32.mrb[40].mxu0  ;;  %v976_v24 = vpop.f32.mrb[40].mxu1  ;;  %vm1184_vm6 = vcmp.gt.f32.partialorder %v1120_v21, 0.0  ;;  %v1248_v25 = vmul.f32 0.2, %v1120_v21  ;;  %vm1216_vm7 = vcmp.gt.f32.partialorder %v1152_v22, 0.0 }
 0x196   : > { %v1280_v26 = vmul.f32 0.2, %v1152_v22  ;;  %v1050_v27 = vmul.f32 %v2682_v17, %v848_v23  ;;  %v1082_v28 = vmul.f32 %v2682_v17, %v976_v24  ;;  %v850_v29 = vpop.f32.mrb[41].mxu0  ;;  %v978_v30 = vpop.f32.mrb[41].mxu1 }
 0x197   : > { %v1312_v33 = vsel %vm1184_vm6, %v1120_v21, %v1248_v25  ;;  %v851_v35 = vpop.f32.mrb[42].mxu0  ;;  %v979_v36 = vpop.f32.mrb[42].mxu1 }
 0x198   : > { %v1344_v34 = vsel %vm1216_vm7, %v1152_v22, %v1280_v26  ;;  %v2018_v37 = vpack.c.bf16 %v1312_v33, %v1311_v31  ;;  %v1121_v39 = vadd.f32 %v2687_v19, %v1050_v27  ;;  %v1153_v40 = vadd.f32 %v2687_v19, %v1082_v28  ;;  %v853_v41 = vpop.f32.mrb[43].mxu0  ;;  %v981_v42 = vpop.f32.mrb[43].mxu1 }
 0x199   : > { %v2098_v38 = vpack.c.bf16 %v1344_v34, %v1343_v32  ;;  %v1051_v43 = vmul.f32 %v2682_v17, %v851_v35  ;;  %v1083_v44 = vmul.f32 %v2682_v17, %v979_v36 }
 0x19a   : > { %2138 = vst [vmem:[%s2700_s5 + $0x48] sm:$0xff] %v2018_v37   ;;  %v1249_v45 = vmul.f32 0.2, %v1121_v39  ;;  %v1281_v46 = vmul.f32 0.2, %v1153_v40  ;;  %vm1185_vm8 = vcmp.gt.f32.partialorder %v1121_v39, 0.0 }
 0x19b   : > { %2154 = vst [vmem:[%s2700_s5 + $0xc8] sm:$0xff] %v2098_v38   ;;  %v1122_v47 = vadd.f32 %v2687_v19, %v1051_v43  ;;  %v1154_v48 = vadd.f32 %v2687_v19, %v1083_v44  ;;  %vm1217_vm9 = vcmp.gt.f32.partialorder %v1153_v40, 0.0 }
 0x19c   : > { %v1313_v57 = vsel %vm1185_vm8, %v1121_v39, %v1249_v45  ;;  %v1345_v58 = vsel %vm1217_vm9, %v1153_v40, %v1281_v46 }
 0x19d   : > { %v856_v49 = vpop.f32.mrb[44].mxu0  ;;  %v984_v50 = vpop.f32.mrb[44].mxu1  ;;  %vm1186_vm10 = vcmp.gt.f32.partialorder %v1122_v47, 0.0  ;;  %v1250_v51 = vmul.f32 0.2, %v1122_v47  ;;  %vm1218_vm11 = vcmp.gt.f32.partialorder %v1154_v48, 0.0 }
 0x19e   : > { %v1282_v52 = vmul.f32 0.2, %v1154_v48  ;;  %v1052_v53 = vmul.f32 %v2682_v17, %v856_v49  ;;  %v1084_v54 = vmul.f32 %v2682_v17, %v984_v50  ;;  %v858_v55 = vpop.f32.mrb[45].mxu0  ;;  %v986_v56 = vpop.f32.mrb[45].mxu1 }
 0x19f   : > { %v1314_v59 = vsel %vm1186_vm10, %v1122_v47, %v1250_v51  ;;  %v859_v61 = vpop.f32.mrb[46].mxu0  ;;  %v987_v62 = vpop.f32.mrb[46].mxu1 }
 0x1a0   : > { %v1346_v60 = vsel %vm1218_vm11, %v1154_v48, %v1282_v52  ;;  %v2023_v63 = vpack.c.bf16 %v1314_v59, %v1313_v57  ;;  %v1123_v1 = vadd.f32 %v2687_v19, %v1052_v53  ;;  %v1155_v2 = vadd.f32 %v2687_v19, %v1084_v54  ;;  %v861_v3 = vpop.f32.mrb[47].mxu0  ;;  %v989_v4 = vpop.f32.mrb[47].mxu1 }
 0x1a1   : > { %v2103_v0 = vpack.c.bf16 %v1346_v60, %v1345_v58  ;;  %v1053_v5 = vmul.f32 %v2682_v17, %v859_v61  ;;  %v1085_v6 = vmul.f32 %v2682_v17, %v987_v62 }
 0x1a2   : > { %2139 = vst [vmem:[%s2700_s5 + $0x50] sm:$0xff] %v2023_v63   ;;  %v1251_v7 = vmul.f32 0.2, %v1123_v1  ;;  %v1283_v8 = vmul.f32 0.2, %v1155_v2  ;;  %vm1187_vm12 = vcmp.gt.f32.partialorder %v1123_v1, 0.0 }
 0x1a3   : > { %2155 = vst [vmem:[%s2700_s5 + $0xd0] sm:$0xff] %v2103_v0   ;;  %v1124_v9 = vadd.f32 %v2687_v19, %v1053_v5  ;;  %v1156_v10 = vadd.f32 %v2687_v19, %v1085_v6  ;;  %vm1219_vm13 = vcmp.gt.f32.partialorder %v1155_v2, 0.0 }
 0x1a4   : > { %v1315_v21 = vsel %vm1187_vm12, %v1123_v1, %v1251_v7  ;;  %v1347_v22 = vsel %vm1219_vm13, %v1155_v2, %v1283_v8 }
 0x1a5   : > { %v864_v11 = vpop.f32.mrb[48].mxu0  ;;  %v992_v12 = vpop.f32.mrb[48].mxu1  ;;  %vm1188_vm14 = vcmp.gt.f32.partialorder %v1124_v9, 0.0  ;;  %v1252_v13 = vmul.f32 0.2, %v1124_v9  ;;  %vm1220_vm15 = vcmp.gt.f32.partialorder %v1156_v10, 0.0 }
 0x1a6   : > { %v1284_v14 = vmul.f32 0.2, %v1156_v10  ;;  %v1054_v15 = vmul.f32 %v2682_v17, %v864_v11  ;;  %v1086_v16 = vmul.f32 %v2682_v17, %v992_v12  ;;  %v866_v18 = vpop.f32.mrb[49].mxu0  ;;  %v994_v20 = vpop.f32.mrb[49].mxu1 }
 0x1a7   : > { %v1316_v23 = vsel %vm1188_vm14, %v1124_v9, %v1252_v13  ;;  %v867_v25 = vpop.f32.mrb[50].mxu0  ;;  %v995_v26 = vpop.f32.mrb[50].mxu1 }
 0x1a8   : > { %v1348_v24 = vsel %vm1220_vm15, %v1156_v10, %v1284_v14  ;;  %v2028_v27 = vpack.c.bf16 %v1316_v23, %v1315_v21  ;;  %v1125_v29 = vadd.f32 %v2687_v19, %v1054_v15  ;;  %v1157_v30 = vadd.f32 %v2687_v19, %v1086_v16  ;;  %v869_v31 = vpop.f32.mrb[51].mxu0  ;;  %v997_v32 = vpop.f32.mrb[51].mxu1 }
 0x1a9   : > { %v2108_v28 = vpack.c.bf16 %v1348_v24, %v1347_v22  ;;  %v1055_v33 = vmul.f32 %v2682_v17, %v867_v25  ;;  %v1087_v34 = vmul.f32 %v2682_v17, %v995_v26 }
 0x1aa   : > { %2140 = vst [vmem:[%s2700_s5 + $0x58] sm:$0xff] %v2028_v27   ;;  %v1253_v35 = vmul.f32 0.2, %v1125_v29  ;;  %v1285_v36 = vmul.f32 0.2, %v1157_v30  ;;  %vm1189_vm0 = vcmp.gt.f32.partialorder %v1125_v29, 0.0 }
 0x1ab   : > { %2156 = vst [vmem:[%s2700_s5 + $0xd8] sm:$0xff] %v2108_v28   ;;  %v1126_v37 = vadd.f32 %v2687_v19, %v1055_v33  ;;  %v1158_v38 = vadd.f32 %v2687_v19, %v1087_v34  ;;  %vm1221_vm1 = vcmp.gt.f32.partialorder %v1157_v30, 0.0 }
 0x1ac   : > { %v1317_v47 = vsel %vm1189_vm0, %v1125_v29, %v1253_v35  ;;  %v1349_v48 = vsel %vm1221_vm1, %v1157_v30, %v1285_v36 }
 0x1ad   : > { %v872_v39 = vpop.f32.mrb[52].mxu0  ;;  %v1000_v40 = vpop.f32.mrb[52].mxu1  ;;  %vm1190_vm2 = vcmp.gt.f32.partialorder %v1126_v37, 0.0  ;;  %v1254_v41 = vmul.f32 0.2, %v1126_v37  ;;  %vm1222_vm3 = vcmp.gt.f32.partialorder %v1158_v38, 0.0 }
 0x1ae   : > { %v1286_v42 = vmul.f32 0.2, %v1158_v38  ;;  %v1056_v43 = vmul.f32 %v2682_v17, %v872_v39  ;;  %v1088_v44 = vmul.f32 %v2682_v17, %v1000_v40  ;;  %v874_v45 = vpop.f32.mrb[53].mxu0  ;;  %v1002_v46 = vpop.f32.mrb[53].mxu1 }
 0x1af   : > { %v1318_v49 = vsel %vm1190_vm2, %v1126_v37, %v1254_v41  ;;  %v875_v51 = vpop.f32.mrb[54].mxu0  ;;  %v1003_v52 = vpop.f32.mrb[54].mxu1 }
 0x1b0   : > { %v1350_v50 = vsel %vm1222_vm3, %v1158_v38, %v1286_v42  ;;  %v2033_v53 = vpack.c.bf16 %v1318_v49, %v1317_v47  ;;  %v1127_v55 = vadd.f32 %v2687_v19, %v1056_v43  ;;  %v1159_v56 = vadd.f32 %v2687_v19, %v1088_v44  ;;  %v877_v57 = vpop.f32.mrb[55].mxu0  ;;  %v1005_v58 = vpop.f32.mrb[55].mxu1 }
 0x1b1   : > { %v2113_v54 = vpack.c.bf16 %v1350_v50, %v1349_v48  ;;  %v1057_v59 = vmul.f32 %v2682_v17, %v875_v51  ;;  %v1089_v60 = vmul.f32 %v2682_v17, %v1003_v52 }
 0x1b2   : > { %2141 = vst [vmem:[%s2700_s5 + $0x60] sm:$0xff] %v2033_v53   ;;  %v1255_v61 = vmul.f32 0.2, %v1127_v55  ;;  %v1287_v62 = vmul.f32 0.2, %v1159_v56  ;;  %vm1191_vm4 = vcmp.gt.f32.partialorder %v1127_v55, 0.0 }
 0x1b3   : > { %2157 = vst [vmem:[%s2700_s5 + $0xe0] sm:$0xff] %v2113_v54   ;;  %v1128_v63 = vadd.f32 %v2687_v19, %v1057_v59  ;;  %v1160_v0 = vadd.f32 %v2687_v19, %v1089_v60  ;;  %vm1223_vm5 = vcmp.gt.f32.partialorder %v1159_v56, 0.0 }
 0x1b4   : > { %v1319_v9 = vsel %vm1191_vm4, %v1127_v55, %v1255_v61  ;;  %v1351_v10 = vsel %vm1223_vm5, %v1159_v56, %v1287_v62 }
 0x1b5   : > { %v880_v1 = vpop.f32.mrb[56].mxu0  ;;  %v1008_v2 = vpop.f32.mrb[56].mxu1  ;;  %vm1192_vm6 = vcmp.gt.f32.partialorder %v1128_v63, 0.0  ;;  %v1256_v3 = vmul.f32 0.2, %v1128_v63  ;;  %vm1224_vm7 = vcmp.gt.f32.partialorder %v1160_v0, 0.0 }
 0x1b6   : > { %v1288_v4 = vmul.f32 0.2, %v1160_v0  ;;  %v1058_v5 = vmul.f32 %v2682_v17, %v880_v1  ;;  %v1090_v6 = vmul.f32 %v2682_v17, %v1008_v2  ;;  %v882_v7 = vpop.f32.mrb[57].mxu0  ;;  %v1010_v8 = vpop.f32.mrb[57].mxu1 }
 0x1b7   : > { %v1320_v11 = vsel %vm1192_vm6, %v1128_v63, %v1256_v3  ;;  %v883_v13 = vpop.f32.mrb[58].mxu0  ;;  %v1011_v14 = vpop.f32.mrb[58].mxu1 }
 0x1b8   : > { %v1352_v12 = vsel %vm1224_vm7, %v1160_v0, %v1288_v4  ;;  %v2038_v15 = vpack.c.bf16 %v1320_v11, %v1319_v9  ;;  %v1129_v18 = vadd.f32 %v2687_v19, %v1058_v5  ;;  %v1161_v20 = vadd.f32 %v2687_v19, %v1090_v6  ;;  %v885_v21 = vpop.f32.mrb[59].mxu0  ;;  %v1013_v22 = vpop.f32.mrb[59].mxu1 }
 0x1b9   : > { %v2118_v16 = vpack.c.bf16 %v1352_v12, %v1351_v10  ;;  %v1059_v23 = vmul.f32 %v2682_v17, %v883_v13  ;;  %v1091_v24 = vmul.f32 %v2682_v17, %v1011_v14 }
 0x1ba   : > { %2142 = vst [vmem:[%s2700_s5 + $0x68] sm:$0xff] %v2038_v15   ;;  %v1257_v25 = vmul.f32 0.2, %v1129_v18  ;;  %v1289_v26 = vmul.f32 0.2, %v1161_v20  ;;  %vm1193_vm8 = vcmp.gt.f32.partialorder %v1129_v18, 0.0 }
 0x1bb   : > { %2158 = vst [vmem:[%s2700_s5 + $0xe8] sm:$0xff] %v2118_v16   ;;  %v1130_v27 = vadd.f32 %v2687_v19, %v1059_v23  ;;  %v1162_v28 = vadd.f32 %v2687_v19, %v1091_v24  ;;  %vm1225_vm9 = vcmp.gt.f32.partialorder %v1161_v20, 0.0 }
 0x1bc   : > { %v1321_v37 = vsel %vm1193_vm8, %v1129_v18, %v1257_v25  ;;  %v1353_v38 = vsel %vm1225_vm9, %v1161_v20, %v1289_v26 }
 0x1bd   : > { %v888_v29 = vpop.f32.mrb[60].mxu0  ;;  %v1016_v30 = vpop.f32.mrb[60].mxu1  ;;  %vm1194_vm10 = vcmp.gt.f32.partialorder %v1130_v27, 0.0  ;;  %v1258_v31 = vmul.f32 0.2, %v1130_v27  ;;  %vm1226_vm11 = vcmp.gt.f32.partialorder %v1162_v28, 0.0 }
 0x1be   : > { %v1290_v32 = vmul.f32 0.2, %v1162_v28  ;;  %v1060_v33 = vmul.f32 %v2682_v17, %v888_v29  ;;  %v1092_v34 = vmul.f32 %v2682_v17, %v1016_v30  ;;  %v890_v35 = vpop.f32.mrb[61].mxu0  ;;  %v1018_v36 = vpop.f32.mrb[61].mxu1 }
 0x1bf   : > { %v1322_v39 = vsel %vm1194_vm10, %v1130_v27, %v1258_v31  ;;  %v891_v41 = vpop.f32.mrb[62].mxu0  ;;  %v1019_v42 = vpop.f32.mrb[62].mxu1 }
 0x1c0   : > { %v1354_v40 = vsel %vm1226_vm11, %v1162_v28, %v1290_v32  ;;  %v2043_v43 = vpack.c.bf16 %v1322_v39, %v1321_v37  ;;  %v1131_v45 = vadd.f32 %v2687_v19, %v1060_v33  ;;  %v1163_v46 = vadd.f32 %v2687_v19, %v1092_v34  ;;  %v893_v47 = vpop.f32.mrb[63].mxu0  ;;  %v1021_v48 = vpop.f32.mrb[63].mxu1 }
 0x1c1   : > { %v2123_v44 = vpack.c.bf16 %v1354_v40, %v1353_v38  ;;  %v1061_v49 = vmul.f32 %v2682_v17, %v891_v41  ;;  %v1093_v50 = vmul.f32 %v2682_v17, %v1019_v42 }
 0x1c2   : > { %2143 = vst [vmem:[%s2700_s5 + $0x70] sm:$0xff] %v2043_v43   ;;  %v1259_v51 = vmul.f32 0.2, %v1131_v45  ;;  %v1291_v52 = vmul.f32 0.2, %v1163_v46  ;;  %vm1195_vm12 = vcmp.gt.f32.partialorder %v1131_v45, 0.0 }
 0x1c3   : > { %2159 = vst [vmem:[%s2700_s5 + $0xf0] sm:$0xff] %v2123_v44   ;;  %v1132_v53 = vadd.f32 %v2687_v19, %v1061_v49  ;;  %v1164_v54 = vadd.f32 %v2687_v19, %v1093_v50  ;;  %vm1227_vm13 = vcmp.gt.f32.partialorder %v1163_v46, 0.0 }
 0x1c4   : > { %v1323_v57 = vsel %vm1195_vm12, %v1131_v45, %v1259_v51  ;;  %v1355_v58 = vsel %vm1227_vm13, %v1163_v46, %v1291_v52 }
 0x1c5   : > { %vm1196_vm14 = vcmp.gt.f32.partialorder %v1132_v53, 0.0  ;;  %v1260_v55 = vmul.f32 0.2, %v1132_v53  ;;  %vm1228_vm15 = vcmp.gt.f32.partialorder %v1164_v54, 0.0  ;;  %v1292_v56 = vmul.f32 0.2, %v1164_v54 }
 0x1c7   : > { %v1324_v59 = vsel %vm1196_vm14, %v1132_v53, %v1260_v55  ;;  %v1356_v17 = vsel %vm1228_vm15, %v1164_v54, %v1292_v56 }
 0x1c8   : > { %v2048_v60 = vpack.c.bf16 %v1324_v59, %v1323_v57  ;;  %v2128_v61 = vpack.c.bf16 %v1356_v17, %v1355_v58 }
 0x1ca   : > { %2144 = vst [vmem:[%s2700_s5 + $0x78] sm:$0xff] %v2048_v60   ;;  %2160 = vst [vmem:[%s2700_s5 + $0xf8] sm:$0xff] %v2128_v61  }
 0x1cb PF: > { %p14_p8 = scmp.ge.s32.totalorder %s2462_s20, 6   ;;  %s2875_s15 = smov %s2403_s16 }
 0x1cc   : > { %s2876_s16 = smov %s2407_s17  ;;  %s2877_s17 = smov %s2472_s23 }
 0x1cd   : > { %s2878_s18 = smov %s2462_s20  ;;  %16 = sbr.rel (!%p14_p8) target bundleno = 3 (0x3), region = 76 }
 0x1d4   :  { %1699 = vsyncpa [#allocation3], 1 }
 0x1d5   :  { %1701 = vsyncpa [#allocation3 + $0x1], 1 }

// kernel: mul.18
= control target key start
LH: loop header
LB: loop body
LE: loop exit
PB: predicated region body
PF: predicated region fallthrough
CT: control target
= control target key end

     0   :  { %vm817_vm0 = vcmask 1041409   ;;  %vm821_vm1 = vcmask 1042434   ;;  %vm825_vm2 = vcmask 1043459   ;;  %vm829_vm3 = vcmask 1044484   ;;  %s2822_s10 = smov 96   ;;  %s3963_s0 = inlined_call_operand.vmem [shape: f32[4,4,32,32], index: 0, kind: input, shape index: {}]   ;;  %s3964_s1 = inlined_call_operand.vmem [shape: f32[512,32], index: 1, kind: output, shape index: {}]  }
   0x1   :  { %v2715_v0 = vld [vmem:[%s3963_s0 + $0x70] sm:$0xf]  ;;  %v2719_v1 = vld [vmem:[%s3963_s0 + $0x60] sm:$0xf]  ;;  %v2712_v8 = vld [vmem:[%s3963_s0 + $0x7c] sm:$0xf] }
   0x2   :  { %v2723_v2 = vld [vmem:[%s3963_s0 + $0x50] sm:$0xf]  ;;  %503 = vst [vmem:[#allocation0 + $0xe0] sm:$0xf] %v2715_v0  ;;  %523 = vst [vmem:[#allocation0 + $0xc0] sm:$0xf] %v2719_v1 }
   0x3   :  { %543 = vst [vmem:[#allocation0 + $0xa0] sm:$0xf] %v2723_v2  ;;  %v2727_v3 = vld [vmem:[%s3963_s0 + $0x40] sm:$0xf]  ;;  %v2731_v4 = vld [vmem:[%s3963_s0 + $0x30] sm:$0xf] }
   0x4   :  { %v2735_v5 = vld [vmem:[%s3963_s0 + $0x20] sm:$0xf]  ;;  %563 = vst [vmem:[#allocation0 + $0x80] sm:$0xf] %v2727_v3  ;;  %583 = vst [vmem:[#allocation0 + $0x60] sm:$0xf] %v2731_v4 }
   0x5   :  { %603 = vst [vmem:[#allocation0 + $0x40] sm:$0xf] %v2735_v5  ;;  %v2739_v6 = vld [vmem:[%s3963_s0 + $0x10] sm:$0xf]  ;;  %v638_v7 = vld [vmem:[%s3963_s0] sm:$0xf] }
   0x6   :  { %623 = vst [vmem:[#allocation0 + $0x20] sm:$0xf] %v2739_v6  ;;  %639 = vst [vmem:[#allocation0] sm:$0xf] %v638_v7  ;;  %v2713_v9 = vld [vmem:[%s3963_s0 + $0x78] sm:$0xf] }
   0x7   :  { %488 = vst [vmem:[#allocation0 + $0xf8] sm:$0xf] %v2712_v8  ;;  %493 = vst [vmem:[#allocation0 + $0xf0] sm:$0xf] %v2713_v9  ;;  %v2714_v10 = vld [vmem:[%s3963_s0 + $0x74] sm:$0xf] }
   0x8   :  { %v2651_v11 = vld [vmem:[%s3963_s0 + $0x170] sm:$0xf]  ;;  %v2655_v12 = vld [vmem:[%s3963_s0 + $0x160] sm:$0xf]  ;;  %498 = vst [vmem:[#allocation0 + $0xe8] sm:$0xf] %v2714_v10 }
   0x9   :  { %183 = vst [vmem:[#allocation0 + $0x2e0] sm:$0xf] %v2651_v11  ;;  %203 = vst [vmem:[#allocation0 + $0x2c0] sm:$0xf] %v2655_v12  ;;  %v2659_v13 = vld [vmem:[%s3963_s0 + $0x150] sm:$0xf] }
   0xa   :  { %v2663_v14 = vld [vmem:[%s3963_s0 + $0x140] sm:$0xf]  ;;  %v2667_v15 = vld [vmem:[%s3963_s0 + $0x130] sm:$0xf]  ;;  %223 = vst [vmem:[#allocation0 + $0x2a0] sm:$0xf] %v2659_v13 }
   0xb   :  { %243 = vst [vmem:[#allocation0 + $0x280] sm:$0xf] %v2663_v14  ;;  %263 = vst [vmem:[#allocation0 + $0x260] sm:$0xf] %v2667_v15  ;;  %v2671_v16 = vld [vmem:[%s3963_s0 + $0x120] sm:$0xf] }
   0xc   :  { %v2675_v17 = vld [vmem:[%s3963_s0 + $0x110] sm:$0xf]  ;;  %v2679_v18 = vld [vmem:[%s3963_s0 + $0x100] sm:$0xf]  ;;  %vm833_vm4 = vcmask 1045509   ;;  %vm837_vm5 = vcmask 1046534  }
   0xd   :  { %283 = vst [vmem:[#allocation0 + $0x240] sm:$0xf] %v2671_v16  ;;  %303 = vst [vmem:[#allocation0 + $0x220] sm:$0xf] %v2675_v17  ;;  %v820_v19 = vld [vmem:[#allocation0 + $0x41] sm:$0x4]  }
   0xe   :  { %323 = vst [vmem:[#allocation0 + $0x200] sm:$0xf] %v2679_v18  ;;  %v824_v20 = vld [vmem:[#allocation0 + $0x60] sm:$0x8]   ;;  %v2648_v25 = vld [vmem:[%s3963_s0 + $0x17c] sm:$0xf] }
   0xf   :  { %v828_v21 = vld [vmem:[#allocation0 + $0x7f] sm:$0x10]   ;;  %168 = vst [vmem:[#allocation0 + $0x2f8] sm:$0xf] %v2648_v25  ;;  %v2649_v27 = vld [vmem:[%s3963_s0 + $0x178] sm:$0xf] }
  0x10   :  { %v814_v22 = vld [vmem:[#allocation0 + $0x3] sm:$0x1]   ;;  %v2650_v28 = vld [vmem:[%s3963_s0 + $0x174] sm:$0xf]  ;;  %v2683_v29 = vld [vmem:[%s3963_s0 + $0xf0] sm:$0xf] }
  0x11   :  { %v816_v23 = vld [vmem:[#allocation0 + $0x22] sm:$0x2]   ;;  %173 = vst [vmem:[#allocation0 + $0x2f0] sm:$0xf] %v2649_v27  ;;  %178 = vst [vmem:[#allocation0 + $0x2e8] sm:$0xf] %v2650_v28 }
  0x12   :  { %v832_v24 = vld [vmem:[#allocation0 + $0x9e] sm:$0x20]   ;;  %v818_v26 = vsel %vm817_vm0, %v816_v23, %v814_v22  ;;  %343 = vst [vmem:[#allocation0 + $0x1e0] sm:$0xf] %v2683_v29  ;;  %v2691_v32 = vld [vmem:[%s3963_s0 + $0xd0] sm:$0xf] }
  0x13   :  { %v822_v30 = vsel %vm821_vm1, %v820_v19, %v818_v26  ;;  %v2687_v31 = vld [vmem:[%s3963_s0 + $0xe0] sm:$0xf]  ;;  %vm841_vm6 = vcmask 1047559   ;;  %383 = vst [vmem:[#allocation0 + $0x1a0] sm:$0xf] %v2691_v32  ;;  %vm642_vm7 = vcmask 1047556  }
  0x14   :  { %v2695_v33 = vld [vmem:[%s3963_s0 + $0xc0] sm:$0xf]  ;;  %v826_v34 = vsel %vm825_vm2, %v824_v20, %v822_v30  ;;  %363 = vst [vmem:[#allocation0 + $0x1c0] sm:$0xf] %v2687_v31  ;;  %v2699_v48 = vld [vmem:[%s3963_s0 + $0xb0] sm:$0xf] }
  0x15   :  { %v836_v35 = vld [vmem:[#allocation0 + $0xbd] sm:$0x40]   ;;  %403 = vst [vmem:[#allocation0 + $0x180] sm:$0xf] %v2695_v33  ;;  %v830_v36 = vsel %vm829_vm3, %v828_v21, %v826_v34  ;;  %423 = vst [vmem:[#allocation0 + $0x160] sm:$0xf] %v2699_v48 }
  0x16   :  { %v840_v37 = vld [vmem:[#allocation0 + $0xdc] sm:$0x80]   ;;  %v834_v40 = vsel %vm833_vm4, %v832_v24, %v830_v36  ;;  %v2707_v52 = vld [vmem:[%s3963_s0 + $0x90] sm:$0xf]  ;;  %v2718_v4 = vld [vmem:[%s3963_s0 + $0x64] sm:$0xf] }
  0x17   :  { %v893_v38 = vld [vmem:[#allocation0 + $0x260] sm:$0x8]   ;;  %v838_v44 = vsel %vm837_vm5, %v836_v35, %v834_v40  ;;  %v2619_v54 = vld [vmem:[%s3963_s0 + $0x1f0] sm:$0xf]  ;;  %463 = vst [vmem:[#allocation0 + $0x120] sm:$0xf] %v2707_v52 }
  0x18   :  { %v897_v39 = vld [vmem:[#allocation0 + $0x27f] sm:$0x10]   ;;  %v842_v50 = vsel %vm841_vm6, %v840_v37, %v838_v44  ;;  %23 = vst [vmem:[#allocation0 + $0x3e0] sm:$0xf] %v2619_v54  ;;  %v2627_v57 = vld [vmem:[%s3963_s0 + $0x1d0] sm:$0xf] }
  0x19   :  { %v883_v41 = vld [vmem:[#allocation0 + $0x203] sm:$0x1]   ;;  %843 = vrot.lane.b32.xlu0 %v842_v50, %s2822_s10  ;;  %63 = vst [vmem:[#allocation0 + $0x3a0] sm:$0xf] %v2627_v57  ;;  %v2635_v63 = vld [vmem:[%s3963_s0 + $0x1b0] sm:$0xf] }
  0x1a   :  { %v885_v42 = vld [vmem:[#allocation0 + $0x222] sm:$0x2]   ;;  %v2643_v1 = vld [vmem:[%s3963_s0 + $0x190] sm:$0xf]  ;;  %103 = vst [vmem:[#allocation0 + $0x360] sm:$0xf] %v2635_v63 }
  0x1b   :  { %v889_v43 = vld [vmem:[#allocation0 + $0x241] sm:$0x4]   ;;  %v887_v45 = vsel %vm817_vm0, %v885_v42, %v883_v41  ;;  %143 = vst [vmem:[#allocation0 + $0x320] sm:$0xf] %v2643_v1  ;;  %v2722_v5 = vld [vmem:[%s3963_s0 + $0x54] sm:$0xf] }
  0x1c   :  { %v901_v46 = vld [vmem:[#allocation0 + $0x29e] sm:$0x20]   ;;  %v891_v51 = vsel %vm821_vm1, %v889_v43, %v887_v45  ;;  %518 = vst [vmem:[#allocation0 + $0xc8] sm:$0xf] %v2718_v4  ;;  %538 = vst [vmem:[#allocation0 + $0xa8] sm:$0xf] %v2722_v5 }
  0x1d   :  { %v905_v47 = vld [vmem:[#allocation0 + $0x2bd] sm:$0x40]   ;;  %v895_v55 = vsel %vm825_vm2, %v893_v38, %v891_v51  ;;  %v2726_v6 = vld [vmem:[%s3963_s0 + $0x44] sm:$0xf]  ;;  %v2730_v7 = vld [vmem:[%s3963_s0 + $0x34] sm:$0xf] }
  0x1e   :  { %v2703_v49 = vld [vmem:[%s3963_s0 + $0xa0] sm:$0xf]  ;;  %v899_v59 = vsel %vm829_vm3, %v897_v39, %v895_v55  ;;  %v2734_v8 = vld [vmem:[%s3963_s0 + $0x24] sm:$0xf]  ;;  %558 = vst [vmem:[#allocation0 + $0x88] sm:$0xf] %v2726_v6 }
  0x1f   :  { %443 = vst [vmem:[#allocation0 + $0x140] sm:$0xf] %v2703_v49  ;;  %v2711_v53 = vld [vmem:[%s3963_s0 + $0x80] sm:$0xf]  ;;  %v903_v61 = vsel %vm833_vm4, %v901_v46, %v899_v59  ;;  %578 = vst [vmem:[#allocation0 + $0x68] sm:$0xf] %v2730_v7 }
  0x20   :  { %483 = vst [vmem:[#allocation0 + $0x100] sm:$0xf] %v2711_v53  ;;  %v2623_v56 = vld [vmem:[%s3963_s0 + $0x1e0] sm:$0xf]  ;;  %v907_v62 = vsel %vm837_vm5, %v905_v47, %v903_v61  ;;  %598 = vst [vmem:[#allocation0 + $0x48] sm:$0xf] %v2734_v8 }
  0x21   :  { %v2631_v58 = vld [vmem:[%s3963_s0 + $0x1c0] sm:$0xf]  ;;  %43 = vst [vmem:[#allocation0 + $0x3c0] sm:$0xf] %v2623_v56  ;;  %v2738_v10 = vld [vmem:[%s3963_s0 + $0x14] sm:$0xf] }
  0x22   :  { %v909_v60 = vld [vmem:[#allocation0 + $0x2dc] sm:$0x80]   ;;  %83 = vst [vmem:[#allocation0 + $0x380] sm:$0xf] %v2631_v58  ;;  %618 = vst [vmem:[#allocation0 + $0x28] sm:$0xf] %v2738_v10 }
  0x23   :  { %v2639_v0 = vld [vmem:[%s3963_s0 + $0x1a0] sm:$0xf]  ;;  %v911_v2 = vsel %vm841_vm6, %v909_v60, %v907_v62  ;;  %v2742_v19 = vld [vmem:[%s3963_s0 + $0x4] sm:$0xf]  ;;  %v2682_v20 = vld [vmem:[%s3963_s0 + $0xf4] sm:$0xf] }
  0x24   :  { %123 = vst [vmem:[#allocation0 + $0x340] sm:$0xf] %v2639_v0  ;;  %v2647_v3 = vld [vmem:[%s3963_s0 + $0x180] sm:$0xf]  ;;  %912 = vrot.lane.b32.xlu1 %v911_v2, %s2822_s10  ;;  %637 = vst [vmem:[#allocation0 + $0x8] sm:$0xf] %v2742_v19 }
  0x25   :  { %163 = vst [vmem:[#allocation0 + $0x300] sm:$0xf] %v2647_v3  ;;  %v850_v12 = vld [vmem:[#allocation0 + $0x122] sm:$0x2]   ;;  %338 = vst [vmem:[#allocation0 + $0x1e8] sm:$0xf] %v2682_v20 }
  0x26   :  { %v854_v9 = vld [vmem:[#allocation0 + $0x141] sm:$0x4]   ;;  %v2686_v22 = vld [vmem:[%s3963_s0 + $0xe4] sm:$0xf]  ;;  %v2690_v23 = vld [vmem:[%s3963_s0 + $0xd4] sm:$0xf] }
  0x27   :  { %v848_v11 = vld [vmem:[#allocation0 + $0x103] sm:$0x1]   ;;  %v2694_v24 = vld [vmem:[%s3963_s0 + $0xc4] sm:$0xf]  ;;  %358 = vst [vmem:[#allocation0 + $0x1c8] sm:$0xf] %v2686_v22 }
  0x28   :  { %v858_v13 = vld [vmem:[#allocation0 + $0x160] sm:$0x8]   ;;  %v852_v14 = vsel %vm817_vm0, %v850_v12, %v848_v11  ;;  %378 = vst [vmem:[#allocation0 + $0x1a8] sm:$0xf] %v2690_v23  ;;  %398 = vst [vmem:[#allocation0 + $0x188] sm:$0xf] %v2694_v24 }
  0x29   :  { %v862_v15 = vld [vmem:[#allocation0 + $0x17f] sm:$0x10]   ;;  %v856_v17 = vsel %vm821_vm1, %v854_v9, %v852_v14  ;;  %v955_v40 = vld [vmem:[#allocation0 + $0x2a] sm:$0x2]   ;;  %v2698_v42 = vld [vmem:[%s3963_s0 + $0xb4] sm:$0xf] }
  0x2a   :  { %v866_v16 = vld [vmem:[#allocation0 + $0x19e] sm:$0x20]   ;;  %v860_v21 = vsel %vm825_vm2, %v858_v13, %v856_v17  ;;  %v959_v41 = vld [vmem:[#allocation0 + $0x49] sm:$0x4]   ;;  %v2702_v43 = vld [vmem:[%s3963_s0 + $0xa4] sm:$0xf] }
  0x2b   :  { %v870_v18 = vld [vmem:[#allocation0 + $0x1bd] sm:$0x40]   ;;  %v864_v25 = vsel %vm829_vm3, %v862_v15, %v860_v21  ;;  %418 = vst [vmem:[#allocation0 + $0x168] sm:$0xf] %v2698_v42  ;;  %438 = vst [vmem:[#allocation0 + $0x148] sm:$0xf] %v2702_v43 }
  0x2c   :  { %v874_v26 = vld [vmem:[#allocation0 + $0x1dc] sm:$0x80]   ;;  %v868_v29 = vsel %vm833_vm4, %v866_v16, %v864_v25  ;;  %v2706_v45 = vld [vmem:[%s3963_s0 + $0x94] sm:$0xf]  ;;  %v2710_v46 = vld [vmem:[%s3963_s0 + $0x84] sm:$0xf] }
  0x2d   :  { %v920_v27 = vld [vmem:[#allocation0 + $0x322] sm:$0x2]   ;;  %v872_v32 = vsel %vm837_vm5, %v870_v18, %v868_v29  ;;  %v2654_v47 = vld [vmem:[%s3963_s0 + $0x164] sm:$0xf]  ;;  %458 = vst [vmem:[#allocation0 + $0x128] sm:$0xf] %v2706_v45 }
  0x2e   :  { %v924_v28 = vld [vmem:[#allocation0 + $0x341] sm:$0x4]   ;;  %v876_v37 = vsel %vm841_vm6, %v874_v26, %v872_v32  ;;  %478 = vst [vmem:[#allocation0 + $0x108] sm:$0xf] %v2710_v46  ;;  %198 = vst [vmem:[#allocation0 + $0x2c8] sm:$0xf] %v2654_v47 }
  0x2f   :  { %v918_v30 = vld [vmem:[#allocation0 + $0x303] sm:$0x1]   ;;  %877 = vrot.lane.b32.xlu0 %v876_v37, %s2822_s10  ;;  %v2658_v49 = vld [vmem:[%s3963_s0 + $0x154] sm:$0xf]  ;;  %v2662_v50 = vld [vmem:[%s3963_s0 + $0x144] sm:$0xf] }
  0x30   :  { %v928_v31 = vld [vmem:[#allocation0 + $0x360] sm:$0x8]   ;;  %v922_v33 = vsel %vm817_vm0, %v920_v27, %v918_v30  ;;  %v2666_v51 = vld [vmem:[%s3963_s0 + $0x134] sm:$0xf]  ;;  %v953_v53 = vld [vmem:[#allocation0 + $0xb] sm:$0x1]  }
  0x31   :  { %v932_v34 = vld [vmem:[#allocation0 + $0x37f] sm:$0x10]   ;;  %v926_v38 = vsel %vm821_vm1, %v924_v28, %v922_v33  ;;  %v963_v54 = vld [vmem:[#allocation0 + $0x68] sm:$0x8]   ;;  %218 = vst [vmem:[#allocation0 + $0x2a8] sm:$0xf] %v2658_v49  ;;  %v957_v57 = vsel %vm817_vm0, %v955_v40, %v953_v53 }
  0x32   :  { %v936_v35 = vld [vmem:[#allocation0 + $0x39e] sm:$0x20]   ;;  %v930_v44 = vsel %vm825_vm2, %v928_v31, %v926_v38  ;;  %238 = vst [vmem:[#allocation0 + $0x288] sm:$0xf] %v2662_v50  ;;  %258 = vst [vmem:[#allocation0 + $0x268] sm:$0xf] %v2666_v51  ;;  %v961_v61 = vsel %vm821_vm1, %v959_v41, %v957_v57 }
  0x33   :  { %v940_v36 = vld [vmem:[#allocation0 + $0x3bd] sm:$0x40]   ;;  %v934_v48 = vsel %vm829_vm3, %v932_v34, %v930_v44  ;;  %v2670_v55 = vld [vmem:[%s3963_s0 + $0x124] sm:$0xf]  ;;  %v967_v58 = vld [vmem:[#allocation0 + $0x87] sm:$0x10]   ;;  %v965_v2 = vsel %vm825_vm2, %v963_v54, %v961_v61 }
  0x34   :  { %v944_v39 = vld [vmem:[#allocation0 + $0x3dc] sm:$0x80]   ;;  %v938_v52 = vsel %vm833_vm4, %v936_v35, %v934_v48  ;;  %v971_v59 = vld [vmem:[#allocation0 + $0xa6] sm:$0x20]   ;;  %278 = vst [vmem:[#allocation0 + $0x248] sm:$0xf] %v2670_v55  ;;  %v969_v6 = vsel %vm829_vm3, %v967_v58, %v965_v2 }
  0x35   :  { %v942_v56 = vsel %vm837_vm5, %v940_v36, %v938_v52  ;;  %v975_v62 = vld [vmem:[#allocation0 + $0xc5] sm:$0x40]   ;;  %v2674_v0 = vld [vmem:[%s3963_s0 + $0x114] sm:$0xf]  ;;  %v2678_v1 = vld [vmem:[%s3963_s0 + $0x104] sm:$0xf]  ;;  %v973_v10 = vsel %vm833_vm4, %v971_v59, %v969_v6 }
  0x36   :  { %v946_v60 = vsel %vm841_vm6, %v944_v39, %v942_v56  ;;  %v979_v63 = vld [vmem:[#allocation0 + $0xe4] sm:$0x80]   ;;  %298 = vst [vmem:[#allocation0 + $0x228] sm:$0xf] %v2674_v0  ;;  %318 = vst [vmem:[#allocation0 + $0x208] sm:$0xf] %v2678_v1  ;;  %v977_v13 = vsel %vm837_vm5, %v975_v62, %v973_v10 }
  0x37   :  { %947 = vrot.lane.b32.xlu1 %v946_v60, %s2822_s10  ;;  %v2618_v3 = vld [vmem:[%s3963_s0 + $0x1f4] sm:$0xf]  ;;  %v2622_v4 = vld [vmem:[%s3963_s0 + $0x1e4] sm:$0xf]  ;;  %v994_v11 = vld [vmem:[#allocation0 + $0x149] sm:$0x4]   ;;  %v981_v17 = vsel %vm841_vm6, %v979_v63, %v977_v13 }
  0x38   :  { %v2626_v5 = vld [vmem:[%s3963_s0 + $0x1d4] sm:$0xf]  ;;  %18 = vst [vmem:[#allocation0 + $0x3e8] sm:$0xf] %v2618_v3  ;;  %38 = vst [vmem:[#allocation0 + $0x3c8] sm:$0xf] %v2622_v4  ;;  %982 = vrot.lane.b32.xlu0 %v981_v17, %s2822_s10 }
  0x39   :  { %58 = vst [vmem:[#allocation0 + $0x3a8] sm:$0xf] %v2626_v5  ;;  %v2630_v7 = vld [vmem:[%s3963_s0 + $0x1c4] sm:$0xf]  ;;  %v2634_v8 = vld [vmem:[%s3963_s0 + $0x1b4] sm:$0xf] }
  0x3a   :  { %v2638_v9 = vld [vmem:[%s3963_s0 + $0x1a4] sm:$0xf]  ;;  %78 = vst [vmem:[#allocation0 + $0x388] sm:$0xf] %v2630_v7  ;;  %98 = vst [vmem:[#allocation0 + $0x368] sm:$0xf] %v2634_v8 }
  0x3b   :  { %118 = vst [vmem:[#allocation0 + $0x348] sm:$0xf] %v2638_v9  ;;  %v2642_v12 = vld [vmem:[%s3963_s0 + $0x194] sm:$0xf]  ;;  %v988_v14 = vld [vmem:[#allocation0 + $0x10b] sm:$0x1]  }
  0x3c   :  { %v990_v15 = vld [vmem:[#allocation0 + $0x12a] sm:$0x2]   ;;  %138 = vst [vmem:[#allocation0 + $0x328] sm:$0xf] %v2642_v12  ;;  %v2646_v26 = vld [vmem:[%s3963_s0 + $0x184] sm:$0xf] }
  0x3d   :  { %v998_v16 = vld [vmem:[#allocation0 + $0x168] sm:$0x8]   ;;  %v992_v18 = vsel %vm817_vm0, %v990_v15, %v988_v14  ;;  %158 = vst [vmem:[#allocation0 + $0x308] sm:$0xf] %v2646_v26  ;;  %v2721_v29 = vld [vmem:[%s3963_s0 + $0x58] sm:$0xf] }
  0x3e   :  { %v1002_v19 = vld [vmem:[#allocation0 + $0x187] sm:$0x10]   ;;  %v996_v22 = vsel %vm821_vm1, %v994_v11, %v992_v18  ;;  %v2729_v31 = vld [vmem:[%s3963_s0 + $0x38] sm:$0xf]  ;;  %533 = vst [vmem:[#allocation0 + $0xb0] sm:$0xf] %v2721_v29 }
  0x3f   :  { %v1006_v20 = vld [vmem:[#allocation0 + $0x1a6] sm:$0x20]   ;;  %v1000_v28 = vsel %vm825_vm2, %v998_v16, %v996_v22  ;;  %573 = vst [vmem:[#allocation0 + $0x70] sm:$0xf] %v2729_v31  ;;  %v2737_v47 = vld [vmem:[%s3963_s0 + $0x18] sm:$0xf] }
  0x40   :  { %v1010_v21 = vld [vmem:[#allocation0 + $0x1c5] sm:$0x40]   ;;  %v1004_v32 = vsel %vm829_vm3, %v1002_v19, %v1000_v28  ;;  %613 = vst [vmem:[#allocation0 + $0x30] sm:$0xf] %v2737_v47  ;;  %v2681_v51 = vld [vmem:[%s3963_s0 + $0xf8] sm:$0xf] }
  0x41   :  { %v1014_v23 = vld [vmem:[#allocation0 + $0x1e4] sm:$0x80]   ;;  %v1008_v36 = vsel %vm833_vm4, %v1006_v20, %v1004_v32  ;;  %333 = vst [vmem:[#allocation0 + $0x1f0] sm:$0xf] %v2681_v51  ;;  %v2689_v54 = vld [vmem:[%s3963_s0 + $0xd8] sm:$0xf] }
  0x42   :  { %v1029_v24 = vld [vmem:[#allocation0 + $0x249] sm:$0x4]   ;;  %v1012_v39 = vsel %vm837_vm5, %v1010_v21, %v1008_v36  ;;  %v2697_v56 = vld [vmem:[%s3963_s0 + $0xb8] sm:$0xf]  ;;  %373 = vst [vmem:[#allocation0 + $0x1b0] sm:$0xf] %v2689_v54 }
  0x43   :  { %v1033_v25 = vld [vmem:[#allocation0 + $0x268] sm:$0x8]   ;;  %v1016_v44 = vsel %vm841_vm6, %v1014_v23, %v1012_v39  ;;  %413 = vst [vmem:[#allocation0 + $0x170] sm:$0xf] %v2697_v56  ;;  %v2705_v5 = vld [vmem:[%s3963_s0 + $0x98] sm:$0xf] }
  0x44   :  { %v2717_v27 = vld [vmem:[%s3963_s0 + $0x68] sm:$0xf]  ;;  %1017 = vrot.lane.b32.xlu1 %v1016_v44, %s2822_s10  ;;  %453 = vst [vmem:[#allocation0 + $0x130] sm:$0xf] %v2705_v5  ;;  %v2657_v10 = vld [vmem:[%s3963_s0 + $0x158] sm:$0xf] }
  0x45   :  { %513 = vst [vmem:[#allocation0 + $0xd0] sm:$0xf] %v2717_v27  ;;  %v2725_v30 = vld [vmem:[%s3963_s0 + $0x48] sm:$0xf]  ;;  %213 = vst [vmem:[#allocation0 + $0x2b0] sm:$0xf] %v2657_v10 }
  0x46   :  { %v1023_v33 = vld [vmem:[#allocation0 + $0x20b] sm:$0x1]   ;;  %553 = vst [vmem:[#allocation0 + $0x90] sm:$0xf] %v2725_v30  ;;  %v1103_v8 = vld [vmem:[#allocation0 + $0x70] sm:$0x8]  }
  0x47   :  { %v1025_v34 = vld [vmem:[#allocation0 + $0x22a] sm:$0x2]   ;;  %v2665_v13 = vld [vmem:[%s3963_s0 + $0x138] sm:$0xf]  ;;  %v1095_v18 = vld [vmem:[#allocation0 + $0x32] sm:$0x2]  }
  0x48   :  { %v2733_v35 = vld [vmem:[%s3963_s0 + $0x28] sm:$0xf]  ;;  %v1027_v37 = vsel %vm817_vm0, %v1025_v34, %v1023_v33  ;;  %v2673_v15 = vld [vmem:[%s3963_s0 + $0x118] sm:$0xf]  ;;  %253 = vst [vmem:[#allocation0 + $0x270] sm:$0xf] %v2665_v13 }
  0x49   :  { %v1037_v38 = vld [vmem:[#allocation0 + $0x287] sm:$0x10]   ;;  %593 = vst [vmem:[#allocation0 + $0x50] sm:$0xf] %v2733_v35  ;;  %v1031_v40 = vsel %vm821_vm1, %v1029_v24, %v1027_v37  ;;  %293 = vst [vmem:[#allocation0 + $0x230] sm:$0xf] %v2673_v15 }
  0x4a   :  { %v1041_v41 = vld [vmem:[#allocation0 + $0x2a6] sm:$0x20]   ;;  %v1035_v45 = vsel %vm825_vm2, %v1033_v25, %v1031_v40  ;;  %v1111_v25 = vld [vmem:[#allocation0 + $0xae] sm:$0x20]   ;;  %v2617_v31 = vld [vmem:[%s3963_s0 + $0x1f8] sm:$0xf] }
  0x4b   :  { %v1045_v42 = vld [vmem:[#allocation0 + $0x2c5] sm:$0x40]   ;;  %v1039_v49 = vsel %vm829_vm3, %v1037_v38, %v1035_v45  ;;  %v1119_v27 = vld [vmem:[#allocation0 + $0xec] sm:$0x80]   ;;  %13 = vst [vmem:[#allocation0 + $0x3f0] sm:$0xf] %v2617_v31 }
  0x4c   :  { %v1049_v43 = vld [vmem:[#allocation0 + $0x2e4] sm:$0x80]   ;;  %v1043_v53 = vsel %vm833_vm4, %v1041_v41, %v1039_v49  ;;  %v1115_v26 = vld [vmem:[#allocation0 + $0xcd] sm:$0x40]   ;;  %v2625_v34 = vld [vmem:[%s3963_s0 + $0x1d8] sm:$0xf] }
  0x4d   :  { %v1064_v46 = vld [vmem:[#allocation0 + $0x349] sm:$0x4]   ;;  %v1047_v57 = vsel %vm837_vm5, %v1045_v42, %v1043_v53  ;;  %v1107_v22 = vld [vmem:[#allocation0 + $0x8f] sm:$0x10]   ;;  %v2633_v36 = vld [vmem:[%s3963_s0 + $0x1b8] sm:$0xf] }
  0x4e   :  { %v2741_v48 = vld [vmem:[%s3963_s0 + $0x8] sm:$0xf]  ;;  %v1051_v61 = vsel %vm841_vm6, %v1049_v43, %v1047_v57  ;;  %v1138_v30 = vld [vmem:[#allocation0 + $0x170] sm:$0x8]   ;;  %53 = vst [vmem:[#allocation0 + $0x3b0] sm:$0xf] %v2625_v34 }
  0x4f   :  { %v1060_v50 = vld [vmem:[#allocation0 + $0x32a] sm:$0x2]   ;;  %633 = vst [vmem:[#allocation0 + $0x10] sm:$0xf] %v2741_v48  ;;  %1052 = vrot.lane.b32.xlu0 %v1051_v61, %s2822_s10  ;;  %v1130_v39 = vld [vmem:[#allocation0 + $0x132] sm:$0x2]  }
  0x50   :  { %v2685_v52 = vld [vmem:[%s3963_s0 + $0xe8] sm:$0xf]  ;;  %v1099_v4 = vld [vmem:[#allocation0 + $0x51] sm:$0x4]   ;;  %93 = vst [vmem:[#allocation0 + $0x370] sm:$0xf] %v2633_v36 }
  0x51   :  { %353 = vst [vmem:[#allocation0 + $0x1d0] sm:$0xf] %v2685_v52  ;;  %v2693_v55 = vld [vmem:[%s3963_s0 + $0xc8] sm:$0xf]  ;;  %v1146_v44 = vld [vmem:[#allocation0 + $0x1ae] sm:$0x20]  }
  0x52   :  { %v1058_v58 = vld [vmem:[#allocation0 + $0x30b] sm:$0x1]   ;;  %393 = vst [vmem:[#allocation0 + $0x190] sm:$0xf] %v2693_v55  ;;  %v1154_v48 = vld [vmem:[#allocation0 + $0x1ec] sm:$0x80]  }
  0x53   :  { %v1068_v59 = vld [vmem:[#allocation0 + $0x368] sm:$0x8]   ;;  %v1062_v62 = vsel %vm817_vm0, %v1060_v50, %v1058_v58  ;;  %v1165_v49 = vld [vmem:[#allocation0 + $0x232] sm:$0x2]   ;;  %v2641_v56 = vld [vmem:[%s3963_s0 + $0x198] sm:$0xf] }
  0x54   :  { %v2701_v60 = vld [vmem:[%s3963_s0 + $0xa8] sm:$0xf]  ;;  %v1066_v2 = vsel %vm821_vm1, %v1064_v46, %v1062_v62  ;;  %v1173_v51 = vld [vmem:[#allocation0 + $0x270] sm:$0x8]   ;;  %133 = vst [vmem:[#allocation0 + $0x330] sm:$0xf] %v2641_v56 }
  0x55   :  { %v1072_v63 = vld [vmem:[#allocation0 + $0x387] sm:$0x10]   ;;  %433 = vst [vmem:[#allocation0 + $0x150] sm:$0xf] %v2701_v60  ;;  %v1070_v7 = vsel %vm825_vm2, %v1068_v59, %v1066_v2  ;;  %v1181_v55 = vld [vmem:[#allocation0 + $0x2ae] sm:$0x20]  }
  0x56   :  { %v1076_v0 = vld [vmem:[#allocation0 + $0x3a6] sm:$0x20]   ;;  %v1074_v12 = vsel %vm829_vm3, %v1072_v63, %v1070_v7  ;;  %v1093_v17 = vld [vmem:[#allocation0 + $0x13] sm:$0x1]   ;;  %v2716_v60 = vld [vmem:[%s3963_s0 + $0x6c] sm:$0xf] }
  0x57   :  { %v1080_v1 = vld [vmem:[#allocation0 + $0x3c5] sm:$0x40]   ;;  %v1078_v16 = vsel %vm833_vm4, %v1076_v0, %v1074_v12  ;;  %v1097_v21 = vsel %vm817_vm0, %v1095_v18, %v1093_v17  ;;  %v2720_v61 = vld [vmem:[%s3963_s0 + $0x5c] sm:$0xf]  ;;  %v2724_v62 = vld [vmem:[%s3963_s0 + $0x4c] sm:$0xf] }
  0x58   :  { %v1084_v3 = vld [vmem:[#allocation0 + $0x3e4] sm:$0x80]   ;;  %v1082_v20 = vsel %vm837_vm5, %v1080_v1, %v1078_v16  ;;  %v1101_v24 = vsel %vm821_vm1, %v1099_v4, %v1097_v21  ;;  %v1150_v45 = vld [vmem:[#allocation0 + $0x1cd] sm:$0x40]   ;;  %508 = vst [vmem:[#allocation0 + $0xd8] sm:$0xf] %v2716_v60 }
  0x59   :  { %v2709_v6 = vld [vmem:[%s3963_s0 + $0x88] sm:$0xf]  ;;  %v1086_v23 = vsel %vm841_vm6, %v1084_v3, %v1082_v20  ;;  %v1105_v28 = vsel %vm825_vm2, %v1103_v8, %v1101_v24  ;;  %v1142_v43 = vld [vmem:[#allocation0 + $0x18f] sm:$0x10]   ;;  %528 = vst [vmem:[#allocation0 + $0xb8] sm:$0xf] %v2720_v61 }
  0x5a   :  { %473 = vst [vmem:[#allocation0 + $0x110] sm:$0xf] %v2709_v6  ;;  %v2653_v9 = vld [vmem:[%s3963_s0 + $0x168] sm:$0xf]  ;;  %1087 = vrot.lane.b32.xlu1 %v1086_v23, %s2822_s10  ;;  %v1109_v33 = vsel %vm829_vm3, %v1107_v22, %v1105_v28  ;;  %548 = vst [vmem:[#allocation0 + $0x98] sm:$0xf] %v2724_v62 }
  0x5b   :  { %v2661_v11 = vld [vmem:[%s3963_s0 + $0x148] sm:$0xf]  ;;  %193 = vst [vmem:[#allocation0 + $0x2d0] sm:$0xf] %v2653_v9  ;;  %v1113_v37 = vsel %vm833_vm4, %v1111_v25, %v1109_v33  ;;  %v2728_v1 = vld [vmem:[%s3963_s0 + $0x3c] sm:$0xf] }
  0x5c   :  { %233 = vst [vmem:[#allocation0 + $0x290] sm:$0xf] %v2661_v11  ;;  %v2669_v14 = vld [vmem:[%s3963_s0 + $0x128] sm:$0xf]  ;;  %v1134_v29 = vld [vmem:[#allocation0 + $0x151] sm:$0x4]   ;;  %v1117_v41 = vsel %vm837_vm5, %v1115_v26, %v1113_v37 }
  0x5d   :  { %273 = vst [vmem:[#allocation0 + $0x250] sm:$0xf] %v2669_v14  ;;  %v2677_v19 = vld [vmem:[%s3963_s0 + $0x108] sm:$0xf]  ;;  %v1121_v46 = vsel %vm841_vm6, %v1119_v27, %v1117_v41  ;;  %v2732_v2 = vld [vmem:[%s3963_s0 + $0x2c] sm:$0xf] }
  0x5e   :  { %313 = vst [vmem:[#allocation0 + $0x210] sm:$0xf] %v2677_v19  ;;  %v2621_v32 = vld [vmem:[%s3963_s0 + $0x1e8] sm:$0xf]  ;;  %1122 = vrot.lane.b32.xlu0 %v1121_v46, %s2822_s10  ;;  %v2736_v3 = vld [vmem:[%s3963_s0 + $0x1c] sm:$0xf] }
  0x5f   :  { %33 = vst [vmem:[#allocation0 + $0x3d0] sm:$0xf] %v2621_v32  ;;  %v2629_v35 = vld [vmem:[%s3963_s0 + $0x1c8] sm:$0xf]  ;;  %568 = vst [vmem:[#allocation0 + $0x78] sm:$0xf] %v2728_v1 }
  0x60   :  { %73 = vst [vmem:[#allocation0 + $0x390] sm:$0xf] %v2629_v35  ;;  %v2637_v40 = vld [vmem:[%s3963_s0 + $0x1a8] sm:$0xf]  ;;  %588 = vst [vmem:[#allocation0 + $0x58] sm:$0xf] %v2732_v2 }
  0x61   :  { %v1128_v38 = vld [vmem:[#allocation0 + $0x113] sm:$0x1]   ;;  %113 = vst [vmem:[#allocation0 + $0x350] sm:$0xf] %v2637_v40  ;;  %v2645_v57 = vld [vmem:[%s3963_s0 + $0x188] sm:$0xf] }
  0x62   :  { %v1132_v42 = vsel %vm817_vm0, %v1130_v39, %v1128_v38  ;;  %153 = vst [vmem:[#allocation0 + $0x310] sm:$0xf] %v2645_v57  ;;  %v1185_v6 = vld [vmem:[#allocation0 + $0x2cd] sm:$0x40]   ;;  %608 = vst [vmem:[#allocation0 + $0x38] sm:$0xf] %v2736_v3 }
  0x63   :  { %v1136_v47 = vsel %vm821_vm1, %v1134_v29, %v1132_v42  ;;  %v1177_v52 = vld [vmem:[#allocation0 + $0x28f] sm:$0x10]   ;;  %v2740_v7 = vld [vmem:[%s3963_s0 + $0xc] sm:$0xf]  ;;  %v2680_v13 = vld [vmem:[%s3963_s0 + $0xfc] sm:$0xf] }
  0x64   :  { %v1169_v50 = vld [vmem:[#allocation0 + $0x251] sm:$0x4]   ;;  %v1140_v53 = vsel %vm825_vm2, %v1138_v30, %v1136_v47  ;;  %628 = vst [vmem:[#allocation0 + $0x18] sm:$0xf] %v2740_v7  ;;  %328 = vst [vmem:[#allocation0 + $0x1f8] sm:$0xf] %v2680_v13 }
  0x65   :  { %v1163_v54 = vld [vmem:[#allocation0 + $0x213] sm:$0x1]   ;;  %v1144_v58 = vsel %vm829_vm3, %v1142_v43, %v1140_v53  ;;  %v2684_v16 = vld [vmem:[%s3963_s0 + $0xec] sm:$0xf]  ;;  %v2688_v17 = vld [vmem:[%s3963_s0 + $0xdc] sm:$0xf] }
  0x66   :  { %v1167_v59 = vsel %vm817_vm0, %v1165_v49, %v1163_v54  ;;  %v1148_v63 = vsel %vm833_vm4, %v1146_v44, %v1144_v58  ;;  %v1189_v10 = vld [vmem:[#allocation0 + $0x2ec] sm:$0x80]   ;;  %v2692_v18 = vld [vmem:[%s3963_s0 + $0xcc] sm:$0xf]  ;;  %348 = vst [vmem:[#allocation0 + $0x1d8] sm:$0xf] %v2684_v16 }
  0x67   :  { %v1171_v0 = vsel %vm821_vm1, %v1169_v50, %v1167_v59  ;;  %v1152_v4 = vsel %vm837_vm5, %v1150_v45, %v1148_v63  ;;  %v1208_v15 = vld [vmem:[#allocation0 + $0x370] sm:$0x8]   ;;  %368 = vst [vmem:[#allocation0 + $0x1b8] sm:$0xf] %v2688_v17  ;;  %388 = vst [vmem:[#allocation0 + $0x198] sm:$0xf] %v2692_v18 }
  0x68   :  { %v1175_v5 = vsel %vm825_vm2, %v1173_v51, %v1171_v0  ;;  %v1156_v8 = vsel %vm841_vm6, %v1154_v48, %v1152_v4  ;;  %v1204_v12 = vld [vmem:[#allocation0 + $0x351] sm:$0x4]   ;;  %v2696_v20 = vld [vmem:[%s3963_s0 + $0xbc] sm:$0xf]  ;;  %v2700_v21 = vld [vmem:[%s3963_s0 + $0xac] sm:$0xf] }
  0x69   :  { %v1179_v9 = vsel %vm829_vm3, %v1177_v52, %v1175_v5  ;;  %1157 = vrot.lane.b32.xlu1 %v1156_v8, %s2822_s10  ;;  %v2704_v22 = vld [vmem:[%s3963_s0 + $0x9c] sm:$0xf]  ;;  %v1198_v23 = vld [vmem:[#allocation0 + $0x313] sm:$0x1]   ;;  %408 = vst [vmem:[#allocation0 + $0x178] sm:$0xf] %v2696_v20 }
  0x6a   :  { %v1183_v11 = vsel %vm833_vm4, %v1181_v55, %v1179_v9  ;;  %v1200_v24 = vld [vmem:[#allocation0 + $0x332] sm:$0x2]   ;;  %428 = vst [vmem:[#allocation0 + $0x158] sm:$0xf] %v2700_v21  ;;  %448 = vst [vmem:[#allocation0 + $0x138] sm:$0xf] %v2704_v22 }
  0x6b   :  { %v1187_v14 = vsel %vm837_vm5, %v1185_v6, %v1183_v11  ;;  %v2708_v25 = vld [vmem:[%s3963_s0 + $0x8c] sm:$0xf]  ;;  %v1202_v26 = vsel %vm817_vm0, %v1200_v24, %v1198_v23  ;;  %v1212_v27 = vld [vmem:[#allocation0 + $0x38f] sm:$0x10]   ;;  %v1235_v32 = vld [vmem:[#allocation0 + $0x3a] sm:$0x2]  }
  0x6c   :  { %v1191_v19 = vsel %vm841_vm6, %v1189_v10, %v1187_v14  ;;  %v1216_v28 = vld [vmem:[#allocation0 + $0x3ae] sm:$0x20]   ;;  %468 = vst [vmem:[#allocation0 + $0x118] sm:$0xf] %v2708_v25  ;;  %v1206_v30 = vsel %vm821_vm1, %v1204_v12, %v1202_v26  ;;  %v1239_v33 = vld [vmem:[#allocation0 + $0x59] sm:$0x4]  }
  0x6d   :  { %1192 = vrot.lane.b32.xlu0 %v1191_v19, %s2822_s10  ;;  %v1220_v29 = vld [vmem:[#allocation0 + $0x3cd] sm:$0x40]   ;;  %v1243_v34 = vld [vmem:[#allocation0 + $0x78] sm:$0x8]   ;;  %v1210_v36 = vsel %vm825_vm2, %v1208_v15, %v1206_v30  ;;  %v2652_v38 = vld [vmem:[%s3963_s0 + $0x16c] sm:$0xf] }
  0x6e   :  { %v1224_v31 = vld [vmem:[#allocation0 + $0x3ec] sm:$0x80]   ;;  %v1247_v35 = vld [vmem:[#allocation0 + $0x97] sm:$0x10]   ;;  %v2656_v39 = vld [vmem:[%s3963_s0 + $0x15c] sm:$0xf]  ;;  %v1214_v40 = vsel %vm829_vm3, %v1212_v27, %v1210_v36 }
  0x6f   :  { %v1233_v37 = vld [vmem:[#allocation0 + $0x1b] sm:$0x1]   ;;  %188 = vst [vmem:[#allocation0 + $0x2d8] sm:$0xf] %v2652_v38  ;;  %208 = vst [vmem:[#allocation0 + $0x2b8] sm:$0xf] %v2656_v39  ;;  %v1218_v45 = vsel %vm833_vm4, %v1216_v28, %v1214_v40 }
  0x70   :  { %v1237_v41 = vsel %vm817_vm0, %v1235_v32, %v1233_v37  ;;  %v2660_v42 = vld [vmem:[%s3963_s0 + $0x14c] sm:$0xf]  ;;  %v2664_v43 = vld [vmem:[%s3963_s0 + $0x13c] sm:$0xf]  ;;  %v1251_v47 = vld [vmem:[#allocation0 + $0xb6] sm:$0x20]   ;;  %v1222_v48 = vsel %vm837_vm5, %v1220_v29, %v1218_v45 }
  0x71   :  { %v2668_v44 = vld [vmem:[%s3963_s0 + $0x12c] sm:$0xf]  ;;  %v1241_v46 = vsel %vm821_vm1, %v1239_v33, %v1237_v41  ;;  %228 = vst [vmem:[#allocation0 + $0x298] sm:$0xf] %v2660_v42  ;;  %248 = vst [vmem:[#allocation0 + $0x278] sm:$0xf] %v2664_v43  ;;  %v1226_v52 = vsel %vm841_vm6, %v1224_v31, %v1222_v48 }
  0x72   :  { %268 = vst [vmem:[#allocation0 + $0x258] sm:$0xf] %v2668_v44  ;;  %v1245_v49 = vsel %vm825_vm2, %v1243_v34, %v1241_v46  ;;  %v1255_v50 = vld [vmem:[#allocation0 + $0xd5] sm:$0x40]   ;;  %1227 = vrot.lane.b32.xlu1 %v1226_v52, %s2822_s10  ;;  %v2672_v60 = vld [vmem:[%s3963_s0 + $0x11c] sm:$0xf] }
  0x73   :  { %v1259_v51 = vld [vmem:[#allocation0 + $0xf4] sm:$0x80]   ;;  %v1249_v53 = vsel %vm829_vm3, %v1247_v35, %v1245_v49  ;;  %v2676_v61 = vld [vmem:[%s3963_s0 + $0x10c] sm:$0xf]  ;;  %288 = vst [vmem:[#allocation0 + $0x238] sm:$0xf] %v2672_v60 }
  0x74   :  { %v1270_v54 = vld [vmem:[#allocation0 + $0x13a] sm:$0x2]   ;;  %v1253_v58 = vsel %vm833_vm4, %v1251_v47, %v1249_v53  ;;  %308 = vst [vmem:[#allocation0 + $0x218] sm:$0xf] %v2676_v61  ;;  %v2616_v1 = vld [vmem:[%s3963_s0 + $0x1fc] sm:$0xf] }
  0x75   :  { %v1274_v55 = vld [vmem:[#allocation0 + $0x159] sm:$0x4]   ;;  %v1257_v62 = vsel %vm837_vm5, %v1255_v50, %v1253_v58  ;;  %v2620_v2 = vld [vmem:[%s3963_s0 + $0x1ec] sm:$0xf]  ;;  %8 = vst [vmem:[#allocation0 + $0x3f8] sm:$0xf] %v2616_v1 }
  0x76   :  { %v1278_v56 = vld [vmem:[#allocation0 + $0x178] sm:$0x8]   ;;  %v1261_v3 = vsel %vm841_vm6, %v1259_v51, %v1257_v62  ;;  %28 = vst [vmem:[#allocation0 + $0x3d8] sm:$0xf] %v2620_v2  ;;  %v2624_v5 = vld [vmem:[%s3963_s0 + $0x1dc] sm:$0xf] }
  0x77   :  { %v1282_v57 = vld [vmem:[#allocation0 + $0x197] sm:$0x10]   ;;  %v2628_v6 = vld [vmem:[%s3963_s0 + $0x1cc] sm:$0xf]  ;;  %v2632_v7 = vld [vmem:[%s3963_s0 + $0x1bc] sm:$0xf]  ;;  %1262 = vrot.lane.b32.xlu0 %v1261_v3, %s2822_s10 }
  0x78   :  { %v1268_v59 = vld [vmem:[#allocation0 + $0x11b] sm:$0x1]   ;;  %48 = vst [vmem:[#allocation0 + $0x3b8] sm:$0xf] %v2624_v5  ;;  %68 = vst [vmem:[#allocation0 + $0x398] sm:$0xf] %v2628_v6 }
  0x79   :  { %v1272_v63 = vsel %vm817_vm0, %v1270_v54, %v1268_v59  ;;  %v1286_v0 = vld [vmem:[#allocation0 + $0x1b6] sm:$0x20]   ;;  %88 = vst [vmem:[#allocation0 + $0x378] sm:$0xf] %v2632_v7  ;;  %v2636_v10 = vld [vmem:[%s3963_s0 + $0x1ac] sm:$0xf] }
  0x7a   :  { %v1276_v4 = vsel %vm821_vm1, %v1274_v55, %v1272_v63  ;;  %v1290_v9 = vld [vmem:[#allocation0 + $0x1d5] sm:$0x40]   ;;  %108 = vst [vmem:[#allocation0 + $0x358] sm:$0xf] %v2636_v10  ;;  %v2640_v14 = vld [vmem:[%s3963_s0 + $0x19c] sm:$0xf] }
  0x7b   :  { %v1280_v8 = vsel %vm825_vm2, %v1278_v56, %v1276_v4  ;;  %v1294_v12 = vld [vmem:[#allocation0 + $0x1f4] sm:$0x80]   ;;  %v2644_v15 = vld [vmem:[%s3963_s0 + $0x18c] sm:$0xf]  ;;  %v1373_v16 = vld [vmem:[#allocation0 + $0x2] sm:$0x1]  }
  0x7c   :  { %v1284_v11 = vsel %vm829_vm3, %v1282_v57, %v1280_v8  ;;  %128 = vst [vmem:[#allocation0 + $0x338] sm:$0xf] %v2640_v14  ;;  %148 = vst [vmem:[#allocation0 + $0x318] sm:$0xf] %v2644_v15  ;;  %v1375_v18 = vld [vmem:[#allocation0 + $0x21] sm:$0x2]  }
  0x7d   :  { %v1288_v13 = vsel %vm833_vm4, %v1286_v0, %v1284_v11  ;;  %v1379_v19 = vld [vmem:[#allocation0 + $0x40] sm:$0x4]   ;;  %v1309_v22 = vld [vmem:[#allocation0 + $0x259] sm:$0x4]   ;;  %v1377_v24 = vsel %vm817_vm0, %v1375_v18, %v1373_v16  ;;  %s2823_s0 = smov 64   ;;  %vm644_vm8 = vcmask 261120  }
  0x7e   :  { %v1292_v17 = vsel %vm837_vm5, %v1290_v9, %v1288_v13  ;;  %v1383_v20 = vld [vmem:[#allocation0 + $0x5f] sm:$0x8]   ;;  %v1313_v23 = vld [vmem:[#allocation0 + $0x278] sm:$0x8]   ;;  %v1381_v28 = vsel %vm821_vm1, %v1379_v19, %v1377_v24  ;;  %vm845_vm9 = vcmask 1048320   ;;  %vm1404_vm10 = vcmask 785920  }
  0x7f   :  { %v1296_v21 = vsel %vm841_vm6, %v1294_v12, %v1292_v17  ;;  %v1387_v25 = vld [vmem:[#allocation0 + $0x7e] sm:$0x10]   ;;  %v1303_v26 = vld [vmem:[#allocation0 + $0x21b] sm:$0x1]   ;;  %v1385_v32 = vsel %vm825_vm2, %v1383_v20, %v1381_v28  ;;  %vm1963_vm11 = vcmask 523520  }
  0x80   :  { %1297 = vrot.lane.b32.xlu1 %v1296_v21, %s2822_s10  ;;  %v1305_v27 = vld [vmem:[#allocation0 + $0x23a] sm:$0x2]   ;;  %v1391_v29 = vld [vmem:[#allocation0 + $0x9d] sm:$0x20]   ;;  %v1389_v38 = vsel %vm829_vm3, %v1387_v25, %v1385_v32 }
  0x81   :  { %v1307_v30 = vsel %vm817_vm0, %v1305_v27, %v1303_v26  ;;  %v1317_v31 = vld [vmem:[#allocation0 + $0x297] sm:$0x10]   ;;  %v1407_v33 = vld [vmem:[#allocation0 + $0x102] sm:$0x1]   ;;  %v1393_v42 = vsel %vm833_vm4, %v1391_v29, %v1389_v38  ;;  %v1514_v38 = vld [vmem:[#allocation0 + $0x29] sm:$0x2]  }
  0x82   :  { %v1311_v34 = vsel %vm821_vm1, %v1309_v22, %v1307_v30  ;;  %v1321_v35 = vld [vmem:[#allocation0 + $0x2b6] sm:$0x20]   ;;  %v1395_v39 = vld [vmem:[#allocation0 + $0xbc] sm:$0x40]  }
  0x83   :  { %v1325_v36 = vld [vmem:[#allocation0 + $0x2d5] sm:$0x40]   ;;  %v1315_v40 = vsel %vm825_vm2, %v1313_v23, %v1311_v34  ;;  %v1409_v43 = vld [vmem:[#allocation0 + $0x121] sm:$0x2]   ;;  %v1397_v61 = vsel %vm837_vm5, %v1395_v39, %v1393_v42  ;;  %v1512_v34 = vld [vmem:[#allocation0 + $0xa] sm:$0x1]  }
  0x84   :  { %v1329_v37 = vld [vmem:[#allocation0 + $0x2f4] sm:$0x80]   ;;  %v1413_v44 = vld [vmem:[#allocation0 + $0x140] sm:$0x4]   ;;  %v1319_v45 = vsel %vm829_vm3, %v1317_v31, %v1315_v40  ;;  %v1411_v49 = vsel %vm817_vm0, %v1409_v43, %v1407_v33  ;;  %v1518_v39 = vld [vmem:[#allocation0 + $0x48] sm:$0x4]  }
  0x85   :  { %v1348_v41 = vld [vmem:[#allocation0 + $0x378] sm:$0x8]   ;;  %v1399_v48 = vld [vmem:[#allocation0 + $0xdb] sm:$0x80]   ;;  %v1323_v52 = vsel %vm833_vm4, %v1321_v35, %v1319_v45  ;;  %v1415_v55 = vsel %vm821_vm1, %v1413_v44, %v1411_v49  ;;  %v1522_v40 = vld [vmem:[#allocation0 + $0x67] sm:$0x8]   ;;  %v1516_v44 = vsel %vm817_vm0, %v1514_v38, %v1512_v34 }
  0x86   :  { %v1344_v46 = vld [vmem:[#allocation0 + $0x359] sm:$0x4]   ;;  %v1417_v50 = vld [vmem:[#allocation0 + $0x15f] sm:$0x8]   ;;  %v1327_v57 = vsel %vm837_vm5, %v1325_v36, %v1323_v52  ;;  %v1401_v16 = vsel %vm841_vm6, %v1399_v48, %v1397_v61  ;;  %v1526_v45 = vld [vmem:[#allocation0 + $0x86] sm:$0x10]   ;;  %v1520_v49 = vsel %vm821_vm1, %v1518_v39, %v1516_v44 }
  0x87   :  { %v1352_v47 = vld [vmem:[#allocation0 + $0x397] sm:$0x10]   ;;  %v1421_v51 = vld [vmem:[#allocation0 + $0x17e] sm:$0x10]   ;;  %v1419_v62 = vsel %vm825_vm2, %v1417_v50, %v1415_v55  ;;  %v1331_v1 = vsel %vm841_vm6, %v1329_v37, %v1327_v57  ;;  %v1534_v50 = vld [vmem:[#allocation0 + $0xc4] sm:$0x40]  }
  0x88   :  { %v1338_v53 = vld [vmem:[#allocation0 + $0x31b] sm:$0x1]   ;;  %v1425_v56 = vld [vmem:[#allocation0 + $0x19d] sm:$0x20]   ;;  %v1423_v4 = vsel %vm829_vm3, %v1421_v51, %v1419_v62  ;;  %1332 = vrot.lane.b32.xlu0 %v1331_v1, %s2822_s10  ;;  %v1547_v51 = vld [vmem:[#allocation0 + $0x10a] sm:$0x1]  }
  0x89   :  { %v1340_v54 = vld [vmem:[#allocation0 + $0x33a] sm:$0x2]   ;;  %v1442_v63 = vld [vmem:[#allocation0 + $0x202] sm:$0x1]   ;;  %v1427_v10 = vsel %vm833_vm4, %v1425_v56, %v1423_v4  ;;  %v1549_v52 = vld [vmem:[#allocation0 + $0x129] sm:$0x2]  }
  0x8a   :  { %v1342_v58 = vsel %vm817_vm0, %v1340_v54, %v1338_v53  ;;  %v1356_v59 = vld [vmem:[#allocation0 + $0x3b6] sm:$0x20]   ;;  %v1444_v0 = vld [vmem:[#allocation0 + $0x221] sm:$0x2]   ;;  %v1524_v54 = vsel %vm825_vm2, %v1522_v40, %v1520_v49  ;;  %v1551_v55 = vsel %vm817_vm0, %v1549_v52, %v1547_v51  ;;  %v1553_v56 = vld [vmem:[#allocation0 + $0x148] sm:$0x4]  }
  0x8b   :  { %v1360_v60 = vld [vmem:[#allocation0 + $0x3d5] sm:$0x40]   ;;  %v1346_v2 = vsel %vm821_vm1, %v1344_v46, %v1342_v58  ;;  %v1446_v5 = vsel %vm817_vm0, %v1444_v0, %v1442_v63  ;;  %v1448_v6 = vld [vmem:[#allocation0 + $0x240] sm:$0x4]   ;;  %v1530_v46 = vld [vmem:[#allocation0 + $0xa5] sm:$0x20]   ;;  %v1555_v61 = vsel %vm821_vm1, %v1553_v56, %v1551_v55 }
  0x8c   :  { %v1364_v3 = vld [vmem:[#allocation0 + $0x3f4] sm:$0x80]   ;;  %v1452_v7 = vld [vmem:[#allocation0 + $0x25f] sm:$0x8]   ;;  %v1350_v9 = vsel %vm825_vm2, %v1348_v41, %v1346_v2  ;;  %v1450_v12 = vsel %vm821_vm1, %v1448_v6, %v1446_v5  ;;  %1402 = vrot.lane.b32.xlu0 %v1401_v16, %s2823_s0  ;;  %v1557_v57 = vld [vmem:[#allocation0 + $0x167] sm:$0x8]  }
  0x8d   :  { %v1456_v8 = vld [vmem:[#allocation0 + $0x27e] sm:$0x10]   ;;  %v1354_v15 = vsel %vm829_vm3, %v1352_v47, %v1350_v9  ;;  %v1454_v18 = vsel %vm825_vm2, %v1452_v7, %v1450_v12  ;;  %v1561_v58 = vld [vmem:[#allocation0 + $0x186] sm:$0x10]   ;;  %v1559_v1 = vsel %vm825_vm2, %v1557_v57, %v1555_v61  ;;  %v1662_v38 = vld [vmem:[#allocation0 + $0x6f] sm:$0x8]  }
  0x8e   :  { %v1429_v11 = vld [vmem:[#allocation0 + $0x1bc] sm:$0x40]   ;;  %v1358_v22 = vsel %vm833_vm4, %v1356_v59, %v1354_v15  ;;  %v1458_v23 = vsel %vm829_vm3, %v1456_v8, %v1454_v18  ;;  %v1528_v59 = vsel %vm829_vm3, %v1526_v45, %v1524_v54  ;;  %v1565_v62 = vld [vmem:[#allocation0 + $0x1a5] sm:$0x20]   ;;  %v1563_v7 = vsel %vm829_vm3, %v1561_v58, %v1559_v1  ;;  %v1666_v39 = vld [vmem:[#allocation0 + $0x8e] sm:$0x10]  }
  0x8f   :  { %v1460_v13 = vld [vmem:[#allocation0 + $0x29d] sm:$0x20]   ;;  %v1362_v28 = vsel %vm837_vm5, %v1360_v60, %v1358_v22  ;;  %v1431_v29 = vsel %vm837_vm5, %v1429_v11, %v1427_v10  ;;  %v1538_v60 = vld [vmem:[#allocation0 + $0xe3] sm:$0x80]   ;;  %v1532_v0 = vsel %vm833_vm4, %v1530_v46, %v1528_v59  ;;  %v1670_v44 = vld [vmem:[#allocation0 + $0xad] sm:$0x20]  }
  0x90   :  { %v1464_v14 = vld [vmem:[#allocation0 + $0x2bc] sm:$0x40]   ;;  %v1462_v30 = vsel %vm833_vm4, %v1460_v13, %v1458_v23  ;;  %v1366_v35 = vsel %vm841_vm6, %v1364_v3, %v1362_v28  ;;  %v1569_v63 = vld [vmem:[#allocation0 + $0x1c4] sm:$0x40]   ;;  %v1536_v6 = vsel %vm837_vm5, %v1534_v50, %v1532_v0  ;;  %v1567_v13 = vsel %vm833_vm4, %v1565_v62, %v1563_v7  ;;  %v1674_v45 = vld [vmem:[#allocation0 + $0xcc] sm:$0x40]  }
  0x91   :  { %v1433_v17 = vld [vmem:[#allocation0 + $0x1db] sm:$0x80]   ;;  %v1466_v36 = vsel %vm837_vm5, %v1464_v14, %v1462_v30  ;;  %1367 = vrot.lane.b32.xlu1 %v1366_v35, %s2822_s10  ;;  %v1582_v2 = vld [vmem:[#allocation0 + $0x20a] sm:$0x1]   ;;  %v1540_v12 = vsel %vm841_vm6, %v1538_v60, %v1536_v6  ;;  %v1571_v18 = vsel %vm837_vm5, %v1569_v63, %v1567_v13  ;;  %v1689_v49 = vld [vmem:[#allocation0 + $0x131] sm:$0x2]  }
  0x92   :  { %v1477_v19 = vld [vmem:[#allocation0 + $0x302] sm:$0x1]   ;;  %v1435_v47 = vsel %vm841_vm6, %v1433_v17, %v1431_v29  ;;  %v1584_v3 = vld [vmem:[#allocation0 + $0x229] sm:$0x2]   ;;  %v1693_v50 = vld [vmem:[#allocation0 + $0x150] sm:$0x4]  }
  0x93   :  { %v1479_v20 = vld [vmem:[#allocation0 + $0x321] sm:$0x2]   ;;  %v1588_v4 = vld [vmem:[#allocation0 + $0x248] sm:$0x4]   ;;  %v1586_v9 = vsel %vm817_vm0, %v1584_v3, %v1582_v2  ;;  %v1697_v55 = vld [vmem:[#allocation0 + $0x16f] sm:$0x8]  }
  0x94   :  { %v1483_v21 = vld [vmem:[#allocation0 + $0x340] sm:$0x4]   ;;  %v1481_v25 = vsel %vm817_vm0, %v1479_v20, %v1477_v19  ;;  %v1573_v8 = vld [vmem:[#allocation0 + $0x1e3] sm:$0x80]   ;;  %v1590_v14 = vsel %vm821_vm1, %v1588_v4, %v1586_v9  ;;  %v1701_v56 = vld [vmem:[#allocation0 + $0x18e] sm:$0x10]  }
  0x95   :  { %v1468_v24 = vld [vmem:[#allocation0 + $0x2db] sm:$0x80]   ;;  %v1485_v31 = vsel %vm821_vm1, %v1483_v21, %v1481_v25  ;;  %1436 = vrot.lane.b32.xlu1 %v1435_v47, %s2823_s0  ;;  %v1592_v10 = vld [vmem:[#allocation0 + $0x267] sm:$0x8]   ;;  %v1575_v28 = vsel %vm841_vm6, %v1573_v8, %v1571_v18  ;;  %v1705_v60 = vld [vmem:[#allocation0 + $0x1ad] sm:$0x20]  }
  0x96   :  { %v1487_v26 = vld [vmem:[#allocation0 + $0x35f] sm:$0x8]   ;;  %v1470_v41 = vsel %vm841_vm6, %v1468_v24, %v1466_v36  ;;  %v1596_v11 = vld [vmem:[#allocation0 + $0x286] sm:$0x10]   ;;  %v1594_v19 = vsel %vm825_vm2, %v1592_v10, %v1590_v14  ;;  %v1709_v61 = vld [vmem:[#allocation0 + $0x1cc] sm:$0x40]  }
  0x97   :  { %v1491_v27 = vld [vmem:[#allocation0 + $0x37e] sm:$0x10]   ;;  %v1489_v37 = vsel %vm825_vm2, %v1487_v26, %v1485_v31  ;;  %1471 = vrot.lane.b32.xlu0 %v1470_v41, %s2823_s0  ;;  %v1600_v15 = vld [vmem:[#allocation0 + $0x2a5] sm:$0x20]   ;;  %v1598_v23 = vsel %vm829_vm3, %v1596_v11, %v1594_v19  ;;  %v1722_v62 = vld [vmem:[#allocation0 + $0x212] sm:$0x1]  }
  0x98   :  { %v1495_v32 = vld [vmem:[#allocation0 + $0x39d] sm:$0x20]   ;;  %v1493_v42 = vsel %vm829_vm3, %v1491_v27, %v1489_v37  ;;  %v1604_v16 = vld [vmem:[#allocation0 + $0x2c4] sm:$0x40]   ;;  %v1602_v29 = vsel %vm833_vm4, %v1600_v15, %v1598_v23  ;;  %v1658_v37 = vld [vmem:[#allocation0 + $0x50] sm:$0x4]  }
  0x99   :  { %v1499_v33 = vld [vmem:[#allocation0 + $0x3bc] sm:$0x40]   ;;  %v1497_v48 = vsel %vm833_vm4, %v1495_v32, %v1493_v42  ;;  %v1617_v17 = vld [vmem:[#allocation0 + $0x30a] sm:$0x1]   ;;  %v1652_v32 = vld [vmem:[#allocation0 + $0x12] sm:$0x1]   ;;  %v1606_v34 = vsel %vm837_vm5, %v1604_v16, %v1602_v29 }
  0x9a   :  { %v1503_v43 = vld [vmem:[#allocation0 + $0x3db] sm:$0x80]   ;;  %v1501_v53 = vsel %vm837_vm5, %v1499_v33, %v1497_v48  ;;  %v1619_v20 = vld [vmem:[#allocation0 + $0x329] sm:$0x2]   ;;  %v1654_v33 = vld [vmem:[#allocation0 + $0x31] sm:$0x2]  }
  0x9b   :  { %v1505_v5 = vsel %vm841_vm6, %v1503_v43, %v1501_v53  ;;  %1541 = vrot.lane.b32.xlu0 %v1540_v12, %s2823_s0  ;;  %v1623_v21 = vld [vmem:[#allocation0 + $0x348] sm:$0x4]   ;;  %v1621_v25 = vsel %vm817_vm0, %v1619_v20, %v1617_v17  ;;  %v1656_v36 = vsel %vm817_vm0, %v1654_v33, %v1652_v32  ;;  %v1687_v48 = vld [vmem:[#allocation0 + $0x112] sm:$0x1]   ;;  %v1794_v33 = vld [vmem:[#allocation0 + $0x39] sm:$0x2]  }
  0x9c   :  { %v1627_v22 = vld [vmem:[#allocation0 + $0x367] sm:$0x8]   ;;  %1506 = vrot.lane.b32.xlu1 %v1505_v5, %s2823_s0  ;;  %v1625_v30 = vsel %vm821_vm1, %v1623_v21, %v1621_v25  ;;  %v1660_v43 = vsel %vm821_vm1, %v1658_v37, %v1656_v36  ;;  %v1678_v53 = vld [vmem:[#allocation0 + $0xeb] sm:$0x80]   ;;  %v1691_v54 = vsel %vm817_vm0, %v1689_v49, %v1687_v48  ;;  %s2824_s10 = smov 32  }
  0x9d   :  { %v1608_v24 = vld [vmem:[#allocation0 + $0x2e3] sm:$0x80]   ;;  %v1629_v35 = vsel %vm825_vm2, %v1627_v22, %v1625_v30  ;;  %v1664_v47 = vsel %vm825_vm2, %v1662_v38, %v1660_v43  ;;  %v1695_v59 = vsel %vm821_vm1, %v1693_v50, %v1691_v54  ;;  %v1724_v1 = vld [vmem:[#allocation0 + $0x231] sm:$0x2]   ;;  %v1792_v30 = vld [vmem:[#allocation0 + $0x1a] sm:$0x1]  }
  0x9e   :  { %v1631_v26 = vld [vmem:[#allocation0 + $0x386] sm:$0x10]   ;;  %v1610_v40 = vsel %vm841_vm6, %v1608_v24, %v1606_v34  ;;  %v1668_v52 = vsel %vm829_vm3, %v1666_v39, %v1664_v47  ;;  %v1699_v0 = vsel %vm825_vm2, %v1697_v55, %v1695_v59  ;;  %v1728_v2 = vld [vmem:[#allocation0 + $0x250] sm:$0x4]   ;;  %v1726_v7 = vsel %vm817_vm0, %v1724_v1, %v1722_v62  ;;  %v1798_v34 = vld [vmem:[#allocation0 + $0x58] sm:$0x4]  }
  0x9f   :  { %v1635_v27 = vld [vmem:[#allocation0 + $0x3a5] sm:$0x20]   ;;  %v1633_v41 = vsel %vm829_vm3, %v1631_v26, %v1629_v35  ;;  %1611 = vrot.lane.b32.xlu0 %v1610_v40, %s2823_s0  ;;  %v1672_v58 = vsel %vm833_vm4, %v1670_v44, %v1668_v52  ;;  %v1732_v3 = vld [vmem:[#allocation0 + $0x26f] sm:$0x8]   ;;  %v1703_v5 = vsel %vm829_vm3, %v1701_v56, %v1699_v0  ;;  %v1730_v11 = vsel %vm821_vm1, %v1728_v2, %v1726_v7  ;;  %v1802_v35 = vld [vmem:[#allocation0 + $0x77] sm:$0x8]  }
  0xa0   :  { %v1639_v31 = vld [vmem:[#allocation0 + $0x3c4] sm:$0x40]   ;;  %1576 = vrot.lane.b32.xlu1 %v1575_v28, %s2823_s0  ;;  %v1637_v46 = vsel %vm833_vm4, %v1635_v27, %v1633_v41  ;;  %v1676_v63 = vsel %vm837_vm5, %v1674_v45, %v1672_v58  ;;  %v1713_v6 = vld [vmem:[#allocation0 + $0x1eb] sm:$0x80]   ;;  %v1707_v10 = vsel %vm833_vm4, %v1705_v60, %v1703_v5  ;;  %v1734_v16 = vsel %vm825_vm2, %v1732_v3, %v1730_v11  ;;  %v1806_v39 = vld [vmem:[#allocation0 + $0x96] sm:$0x10]  }
  0xa1   :  { %v1643_v42 = vld [vmem:[#allocation0 + $0x3e3] sm:$0x80]   ;;  %v1641_v51 = vsel %vm837_vm5, %v1639_v31, %v1637_v46  ;;  %v1680_v4 = vsel %vm841_vm6, %v1678_v53, %v1676_v63  ;;  %v1736_v8 = vld [vmem:[#allocation0 + $0x28e] sm:$0x10]   ;;  %v1711_v15 = vsel %vm837_vm5, %v1709_v61, %v1707_v10  ;;  %v1796_v38 = vsel %vm817_vm0, %v1794_v33, %v1792_v30  ;;  %v1810_v40 = vld [vmem:[#allocation0 + $0xb5] sm:$0x20]  }
  0xa2   :  { %v1645_v57 = vsel %vm841_vm6, %v1643_v42, %v1641_v51  ;;  %v1740_v9 = vld [vmem:[#allocation0 + $0x2ad] sm:$0x20]   ;;  %v1715_v21 = vsel %vm841_vm6, %v1713_v6, %v1711_v15  ;;  %v1738_v22 = vsel %vm829_vm3, %v1736_v8, %v1734_v16  ;;  %v1814_v41 = vld [vmem:[#allocation0 + $0xd4] sm:$0x40]   ;;  %v1800_v43 = vsel %vm821_vm1, %v1798_v34, %v1796_v38  ;;  %v1946_v33 = vld [vmem:[#allocation0 + $0x7d] sm:$0x10]  }
  0xa3   :  { %1681 = vrot.lane.b32.xlu0 %v1680_v4, %s2823_s0  ;;  %v1744_v12 = vld [vmem:[#allocation0 + $0x2cc] sm:$0x40]   ;;  %v1742_v26 = vsel %vm833_vm4, %v1740_v9, %v1738_v22  ;;  %v1818_v44 = vld [vmem:[#allocation0 + $0xf3] sm:$0x80]   ;;  %v1804_v48 = vsel %vm825_vm2, %v1802_v35, %v1800_v43  ;;  %v1954_v38 = vld [vmem:[#allocation0 + $0xbb] sm:$0x40]  }
  0xa4   :  { %1646 = vrot.lane.b32.xlu1 %v1645_v57, %s2823_s0  ;;  %v1757_v13 = vld [vmem:[#allocation0 + $0x312] sm:$0x1]   ;;  %v1746_v31 = vsel %vm837_vm5, %v1744_v12, %v1742_v26  ;;  %v1827_v45 = vld [vmem:[#allocation0 + $0x11a] sm:$0x1]   ;;  %v1808_v53 = vsel %vm829_vm3, %v1806_v39, %v1804_v48  ;;  %v1934_v26 = vld [vmem:[#allocation0 + $0x20] sm:$0x2]  }
  0xa5   :  { %v1759_v14 = vld [vmem:[#allocation0 + $0x331] sm:$0x2]   ;;  %v1829_v46 = vld [vmem:[#allocation0 + $0x139] sm:$0x2]   ;;  %v1812_v58 = vsel %vm833_vm4, %v1810_v40, %v1808_v53  ;;  %v1958_v39 = vld [vmem:[#allocation0 + $0xda] sm:$0x80]  }
  0xa6   :  { %v1761_v17 = vsel %vm817_vm0, %v1759_v14, %v1757_v13  ;;  %v1763_v18 = vld [vmem:[#allocation0 + $0x350] sm:$0x4]   ;;  %v1831_v49 = vsel %vm817_vm0, %v1829_v46, %v1827_v45  ;;  %v1833_v50 = vld [vmem:[#allocation0 + $0x158] sm:$0x4]   ;;  %v1816_v63 = vsel %vm837_vm5, %v1814_v41, %v1812_v58  ;;  %v1968_v43 = vld [vmem:[#allocation0 + $0x120] sm:$0x2]  }
  0xa7   :  { %v1767_v19 = vld [vmem:[#allocation0 + $0x36f] sm:$0x8]   ;;  %v1765_v24 = vsel %vm821_vm1, %v1763_v18, %v1761_v17  ;;  %v1837_v51 = vld [vmem:[#allocation0 + $0x177] sm:$0x8]   ;;  %v1835_v54 = vsel %vm821_vm1, %v1833_v50, %v1831_v49  ;;  %v1820_v5 = vsel %vm841_vm6, %v1818_v44, %v1816_v63  ;;  %v1972_v44 = vld [vmem:[#allocation0 + $0x13f] sm:$0x4]  }
  0xa8   :  { %v1771_v20 = vld [vmem:[#allocation0 + $0x38e] sm:$0x10]   ;;  %1716 = vrot.lane.b32.xlu1 %v1715_v21, %s2823_s0  ;;  %v1769_v27 = vsel %vm825_vm2, %v1767_v19, %v1765_v24  ;;  %v1841_v52 = vld [vmem:[#allocation0 + $0x196] sm:$0x10]   ;;  %v1839_v59 = vsel %vm825_vm2, %v1837_v51, %v1835_v54  ;;  %v1976_v48 = vld [vmem:[#allocation0 + $0x15e] sm:$0x8]  }
  0xa9   :  { %v1748_v23 = vld [vmem:[#allocation0 + $0x2eb] sm:$0x80]   ;;  %v1773_v32 = vsel %vm829_vm3, %v1771_v20, %v1769_v27  ;;  %v1845_v55 = vld [vmem:[#allocation0 + $0x1b5] sm:$0x20]   ;;  %v1843_v0 = vsel %vm829_vm3, %v1841_v52, %v1839_v59  ;;  %v3466_v27 = vpop.permute.xlu0 %843   ;;  %v1980_v49 = vld [vmem:[#allocation0 + $0x17d] sm:$0x10]  }
  0xaa   :  { %v1775_v25 = vld [vmem:[#allocation0 + $0x3ad] sm:$0x20]   ;;  %v1750_v36 = vsel %vm841_vm6, %v1748_v23, %v1746_v31  ;;  %v1849_v56 = vld [vmem:[#allocation0 + $0x1d4] sm:$0x40]   ;;  %v1847_v6 = vsel %vm833_vm4, %v1845_v55, %v1843_v0  ;;  %v1938_v31 = vld [vmem:[#allocation0 + $0x3f] sm:$0x4]  }
  0xab   :  { %v1779_v28 = vld [vmem:[#allocation0 + $0x3cc] sm:$0x40]   ;;  %v1777_v37 = vsel %vm833_vm4, %v1775_v25, %v1773_v32  ;;  %1751 = vrot.lane.b32.xlu0 %v1750_v36, %s2823_s0  ;;  %v1853_v57 = vld [vmem:[#allocation0 + $0x1f3] sm:$0x80]   ;;  %v1851_v11 = vsel %vm837_vm5, %v1849_v56, %v1847_v6  ;;  %v1932_v25 = vld [vmem:[#allocation0 + $0x1] sm:$0x1]  }
  0xac   :  { %v1783_v29 = vld [vmem:[#allocation0 + $0x3eb] sm:$0x80]   ;;  %v1781_v42 = vsel %vm837_vm5, %v1779_v28, %v1777_v37  ;;  %v1862_v60 = vld [vmem:[#allocation0 + $0x21a] sm:$0x1]   ;;  %v1855_v16 = vsel %vm841_vm6, %v1853_v57, %v1851_v11  ;;  %v1936_v30 = vsel %vm817_vm0, %v1934_v26, %v1932_v25  ;;  %v1942_v32 = vld [vmem:[#allocation0 + $0x5e] sm:$0x8]   ;;  %v3483_v57 = vpop.permute.xlu1 %912  }
  0xad   :  { %v1785_v47 = vsel %vm841_vm6, %v1783_v29, %v1781_v42  ;;  %v1864_v61 = vld [vmem:[#allocation0 + $0x239] sm:$0x2]   ;;  %v1940_v36 = vsel %vm821_vm1, %v1938_v31, %v1936_v30  ;;  %v1950_v37 = vld [vmem:[#allocation0 + $0x9c] sm:$0x20]   ;;  %v2073_v25 = vld [vmem:[#allocation0 + $0x28] sm:$0x2]  }
  0xae   :  { %1786 = vrot.lane.b32.xlu1 %v1785_v47, %s2823_s0  ;;  %v1868_v62 = vld [vmem:[#allocation0 + $0x258] sm:$0x4]   ;;  %v1866_v1 = vsel %vm817_vm0, %v1864_v61, %v1862_v60  ;;  %v1944_v41 = vsel %vm825_vm2, %v1942_v32, %v1940_v36  ;;  %v1966_v42 = vld [vmem:[#allocation0 + $0x101] sm:$0x1]   ;;  %v2077_v26 = vld [vmem:[#allocation0 + $0x47] sm:$0x4]  }
  0xaf   :  { %v1872_v2 = vld [vmem:[#allocation0 + $0x277] sm:$0x8]   ;;  %v1870_v7 = vsel %vm821_vm1, %v1868_v62, %v1866_v1  ;;  %1821 = vrot.lane.b32.xlu0 %v1820_v5, %s2823_s0  ;;  %v1948_v46 = vsel %vm829_vm3, %v1946_v33, %v1944_v41  ;;  %v1970_v47 = vsel %vm817_vm0, %v1968_v43, %v1966_v42  ;;  %v1984_v50 = vld [vmem:[#allocation0 + $0x19c] sm:$0x20]   ;;  %v2081_v31 = vld [vmem:[#allocation0 + $0x66] sm:$0x8]  }
  0xb0   :  { %v1876_v3 = vld [vmem:[#allocation0 + $0x296] sm:$0x10]   ;;  %v1874_v12 = vsel %vm825_vm2, %v1872_v2, %v1870_v7  ;;  %v1952_v52 = vsel %vm833_vm4, %v1950_v37, %v1948_v46  ;;  %v1974_v53 = vsel %vm821_vm1, %v1972_v44, %v1970_v47  ;;  %v1988_v54 = vld [vmem:[#allocation0 + $0x1bb] sm:$0x40]   ;;  %v2085_v32 = vld [vmem:[#allocation0 + $0x85] sm:$0x10]  }
  0xb1   :  { %v1880_v4 = vld [vmem:[#allocation0 + $0x2b5] sm:$0x20]   ;;  %v1878_v17 = vsel %vm829_vm3, %v1876_v3, %v1874_v12  ;;  %v1992_v55 = vld [vmem:[#allocation0 + $0x1da] sm:$0x80]   ;;  %v1956_v58 = vsel %vm837_vm5, %v1954_v38, %v1952_v52  ;;  %v1978_v59 = vsel %vm825_vm2, %v1976_v48, %v1974_v53  ;;  %v2089_v33 = vld [vmem:[#allocation0 + $0xa4] sm:$0x20]  }
  0xb2   :  { %v1884_v8 = vld [vmem:[#allocation0 + $0x2d4] sm:$0x40]   ;;  %1856 = vrot.lane.b32.xlu1 %v1855_v16, %s2823_s0  ;;  %v1882_v22 = vsel %vm833_vm4, %v1880_v4, %v1878_v17  ;;  %v2001_v56 = vld [vmem:[#allocation0 + $0x201] sm:$0x1]   ;;  %v1960_v63 = vsel %vm841_vm6, %v1958_v39, %v1956_v58  ;;  %v1982_v0 = vsel %vm829_vm3, %v1980_v49, %v1978_v59  ;;  %v2093_v37 = vld [vmem:[#allocation0 + $0xc3] sm:$0x40]  }
  0xb3   :  { %v1888_v9 = vld [vmem:[#allocation0 + $0x2f3] sm:$0x80]   ;;  %v1886_v28 = vsel %vm837_vm5, %v1884_v8, %v1882_v22  ;;  %v2003_v60 = vld [vmem:[#allocation0 + $0x220] sm:$0x2]   ;;  %v1986_v5 = vsel %vm833_vm4, %v1984_v50, %v1982_v0  ;;  %v2097_v38 = vld [vmem:[#allocation0 + $0xe2] sm:$0x80]  }
  0xb4   :  { %v1897_v10 = vld [vmem:[#allocation0 + $0x31a] sm:$0x1]   ;;  %v1890_v34 = vsel %vm841_vm6, %v1888_v9, %v1886_v28  ;;  %v2007_v61 = vld [vmem:[#allocation0 + $0x23f] sm:$0x4]   ;;  %v2005_v1 = vsel %vm817_vm0, %v2003_v60, %v2001_v56  ;;  %v2106_v39 = vld [vmem:[#allocation0 + $0x109] sm:$0x1]  }
  0xb5   :  { %v1899_v13 = vld [vmem:[#allocation0 + $0x339] sm:$0x2]   ;;  %1891 = vrot.lane.b32.xlu0 %v1890_v34, %s2823_s0  ;;  %v2011_v62 = vld [vmem:[#allocation0 + $0x25e] sm:$0x8]   ;;  %v2009_v6 = vsel %vm821_vm1, %v2007_v61, %v2005_v1  ;;  %v2108_v42 = vld [vmem:[#allocation0 + $0x128] sm:$0x2]  }
  0xb6   :  { %v1903_v14 = vld [vmem:[#allocation0 + $0x358] sm:$0x4]   ;;  %v1901_v18 = vsel %vm817_vm0, %v1899_v13, %v1897_v10  ;;  %v2015_v2 = vld [vmem:[#allocation0 + $0x27d] sm:$0x10]   ;;  %v1990_v10 = vsel %vm837_vm5, %v1988_v54, %v1986_v5  ;;  %v2013_v11 = vsel %vm825_vm2, %v2011_v62, %v2009_v6  ;;  %v2112_v43 = vld [vmem:[#allocation0 + $0x147] sm:$0x4]   ;;  %v2110_v47 = vsel %vm817_vm0, %v2108_v42, %v2106_v39 }
  0xb7   :  { %v1907_v15 = vld [vmem:[#allocation0 + $0x377] sm:$0x8]   ;;  %v1905_v23 = vsel %vm821_vm1, %v1903_v14, %v1901_v18  ;;  %v2019_v3 = vld [vmem:[#allocation0 + $0x29c] sm:$0x20]   ;;  %v1994_v16 = vsel %vm841_vm6, %v1992_v55, %v1990_v10  ;;  %v2017_v17 = vsel %vm829_vm3, %v2015_v2, %v2013_v11  ;;  %v2116_v44 = vld [vmem:[#allocation0 + $0x166] sm:$0x8]   ;;  %v2114_v53 = vsel %vm821_vm1, %v2112_v43, %v2110_v47 }
  0xb8   :  { %v1911_v19 = vld [vmem:[#allocation0 + $0x396] sm:$0x10]   ;;  %v1909_v29 = vsel %vm825_vm2, %v1907_v15, %v1905_v23  ;;  %v2023_v4 = vld [vmem:[#allocation0 + $0x2bb] sm:$0x40]   ;;  %v2021_v22 = vsel %vm833_vm4, %v2019_v3, %v2017_v17  ;;  %v2120_v48 = vld [vmem:[#allocation0 + $0x185] sm:$0x10]   ;;  %v2118_v59 = vsel %vm825_vm2, %v2116_v44, %v2114_v53  ;;  %v3532_v17 = vpop.permute.xlu1 %947  }
  0xb9   :  { %v1915_v20 = vld [vmem:[#allocation0 + $0x3b5] sm:$0x20]   ;;  %v1913_v35 = vsel %vm829_vm3, %v1911_v19, %v1909_v29  ;;  %1961 = vrot.lane.b32.xlu0 %v1960_v63, %s2824_s10  ;;  %v2027_v7 = vld [vmem:[#allocation0 + $0x2da] sm:$0x80]   ;;  %v2025_v28 = vsel %vm837_vm5, %v2023_v4, %v2021_v22  ;;  %v2124_v49 = vld [vmem:[#allocation0 + $0x1a4] sm:$0x20]   ;;  %v2122_v1 = vsel %vm829_vm3, %v2120_v48, %v2118_v59 }
  0xba   :  { %v1919_v21 = vld [vmem:[#allocation0 + $0x3d4] sm:$0x40]   ;;  %v1917_v40 = vsel %vm833_vm4, %v1915_v20, %v1913_v35  ;;  %v2036_v8 = vld [vmem:[#allocation0 + $0x301] sm:$0x1]   ;;  %v2029_v34 = vsel %vm841_vm6, %v2027_v7, %v2025_v28  ;;  %v2128_v50 = vld [vmem:[#allocation0 + $0x1c3] sm:$0x40]   ;;  %v2126_v6 = vsel %vm833_vm4, %v2124_v49, %v2122_v1 }
  0xbb   :  { %v1923_v24 = vld [vmem:[#allocation0 + $0x3f3] sm:$0x80]   ;;  %v1921_v45 = vsel %vm837_vm5, %v1919_v21, %v1917_v40  ;;  %v2038_v9 = vld [vmem:[#allocation0 + $0x320] sm:$0x2]   ;;  %v2132_v54 = vld [vmem:[#allocation0 + $0x1e2] sm:$0x80]   ;;  %v2130_v11 = vsel %vm837_vm5, %v2128_v50, %v2126_v6 }
  0xbc   :  { %v1925_v51 = vsel %vm841_vm6, %v1923_v24, %v1921_v45  ;;  %v2040_v12 = vsel %vm817_vm0, %v2038_v9, %v2036_v8  ;;  %v2042_v13 = vld [vmem:[#allocation0 + $0x33f] sm:$0x4]   ;;  %v2071_v24 = vld [vmem:[#allocation0 + $0x9] sm:$0x1]   ;;  %v2217_v28 = vld [vmem:[#allocation0 + $0x4f] sm:$0x4]  }
  0xbd   :  { %1926 = vrot.lane.b32.xlu1 %v1925_v51, %s2823_s0  ;;  %v2046_v14 = vld [vmem:[#allocation0 + $0x35e] sm:$0x8]   ;;  %v2044_v18 = vsel %vm821_vm1, %v2042_v13, %v2040_v12  ;;  %v2075_v30 = vsel %vm817_vm0, %v2073_v25, %v2071_v24  ;;  %2030 = vrot.lane.b32.xlu0 %v2029_v34, %s2824_s10  ;;  %v3515_v51 = vpop.permute.xlu0 %877   ;;  %v2141_v55 = vld [vmem:[#allocation0 + $0x209] sm:$0x1]   ;;  %v2229_v34 = vld [vmem:[#allocation0 + $0xac] sm:$0x20]  }
  0xbe   :  { %v2050_v15 = vld [vmem:[#allocation0 + $0x37d] sm:$0x10]   ;;  %v2048_v23 = vsel %vm825_vm2, %v2046_v14, %v2044_v18  ;;  %v2079_v36 = vsel %vm821_vm1, %v2077_v26, %v2075_v30  ;;  %v2143_v56 = vld [vmem:[#allocation0 + $0x228] sm:$0x2]   ;;  %v2134_v18 = vsel %vm841_vm6, %v2132_v54, %v2130_v11  ;;  %v2213_v26 = vld [vmem:[#allocation0 + $0x30] sm:$0x2]  }
  0xbf   :  { %v2054_v19 = vld [vmem:[#allocation0 + $0x39c] sm:$0x20]   ;;  %v2052_v29 = vsel %vm829_vm3, %v2050_v15, %v2048_v23  ;;  %v2083_v41 = vsel %vm825_vm2, %v2081_v31, %v2079_v36  ;;  %v2145_v60 = vsel %vm817_vm0, %v2143_v56, %v2141_v55  ;;  %v2147_v61 = vld [vmem:[#allocation0 + $0x247] sm:$0x4]   ;;  %v2211_v23 = vld [vmem:[#allocation0 + $0x11] sm:$0x1]  }
  0xc0   :  { %v2058_v20 = vld [vmem:[#allocation0 + $0x3bb] sm:$0x40]   ;;  %v2056_v35 = vsel %vm833_vm4, %v2054_v19, %v2052_v29  ;;  %v2087_v46 = vsel %vm829_vm3, %v2085_v32, %v2083_v41  ;;  %v2151_v62 = vld [vmem:[#allocation0 + $0x266] sm:$0x8]   ;;  %v2149_v2 = vsel %vm821_vm1, %v2147_v61, %v2145_v60  ;;  %v2221_v29 = vld [vmem:[#allocation0 + $0x6e] sm:$0x8]   ;;  %v2215_v32 = vsel %vm817_vm0, %v2213_v26, %v2211_v23 }
  0xc1   :  { %v2062_v21 = vld [vmem:[#allocation0 + $0x3da] sm:$0x80]   ;;  %1995 = vrot.lane.b32.xlu1 %v1994_v16, %s2824_s10  ;;  %v2060_v40 = vsel %vm837_vm5, %v2058_v20, %v2056_v35  ;;  %v2091_v52 = vsel %vm833_vm4, %v2089_v33, %v2087_v46  ;;  %v2155_v63 = vld [vmem:[#allocation0 + $0x285] sm:$0x10]   ;;  %v2153_v7 = vsel %vm825_vm2, %v2151_v62, %v2149_v2  ;;  %v2225_v33 = vld [vmem:[#allocation0 + $0x8d] sm:$0x10]   ;;  %v3549_v47 = vpop.permute.xlu0 %982  }
  0xc2   :  { %v2064_v45 = vsel %vm841_vm6, %v2062_v21, %v2060_v40  ;;  %v2095_v58 = vsel %vm837_vm5, %v2093_v37, %v2091_v52  ;;  %v2159_v3 = vld [vmem:[#allocation0 + $0x2a4] sm:$0x20]   ;;  %v2157_v12 = vsel %vm829_vm3, %v2155_v63, %v2153_v7  ;;  %v2233_v35 = vld [vmem:[#allocation0 + $0xcb] sm:$0x40]   ;;  %v2219_v37 = vsel %vm821_vm1, %v2217_v28, %v2215_v32  ;;  %v2353_v26 = vld [vmem:[#allocation0 + $0x38] sm:$0x2]  }
  0xc3   :  { %v2099_v0 = vsel %vm841_vm6, %v2097_v38, %v2095_v58  ;;  %v2163_v4 = vld [vmem:[#allocation0 + $0x2c3] sm:$0x40]   ;;  %v2161_v19 = vsel %vm833_vm4, %v2159_v3, %v2157_v12  ;;  %v2237_v38 = vld [vmem:[#allocation0 + $0xea] sm:$0x80]   ;;  %v2223_v42 = vsel %vm825_vm2, %v2221_v29, %v2219_v37  ;;  %v2361_v32 = vld [vmem:[#allocation0 + $0x76] sm:$0x8]  }
  0xc4   :  { %v2167_v5 = vld [vmem:[#allocation0 + $0x2e2] sm:$0x80]   ;;  %2100 = vrot.lane.b32.xlu0 %v2099_v0, %s2824_s10  ;;  %v2165_v24 = vsel %vm837_vm5, %v2163_v4, %v2161_v19  ;;  %v2246_v39 = vld [vmem:[#allocation0 + $0x111] sm:$0x1]   ;;  %v2227_v49 = vsel %vm829_vm3, %v2225_v33, %v2223_v42  ;;  %v2365_v33 = vld [vmem:[#allocation0 + $0x95] sm:$0x10]  }
  0xc5   :  { %2065 = vrot.lane.b32.xlu1 %v2064_v45, %s2824_s10  ;;  %v2176_v8 = vld [vmem:[#allocation0 + $0x309] sm:$0x1]   ;;  %v2169_v30 = vsel %vm841_vm6, %v2167_v5, %v2165_v24  ;;  %v2248_v40 = vld [vmem:[#allocation0 + $0x130] sm:$0x2]   ;;  %v2231_v55 = vsel %vm833_vm4, %v2229_v34, %v2227_v49  ;;  %v2369_v37 = vld [vmem:[#allocation0 + $0xb4] sm:$0x20]  }
  0xc6   :  { %v2178_v9 = vld [vmem:[#allocation0 + $0x328] sm:$0x2]   ;;  %v2250_v43 = vsel %vm817_vm0, %v2248_v40, %v2246_v39  ;;  %v2252_v44 = vld [vmem:[#allocation0 + $0x14f] sm:$0x4]   ;;  %v2235_v61 = vsel %vm837_vm5, %v2233_v35, %v2231_v55  ;;  %v2377_v39 = vld [vmem:[#allocation0 + $0xf2] sm:$0x80]  }
  0xc7   :  { %v2182_v10 = vld [vmem:[#allocation0 + $0x347] sm:$0x4]   ;;  %v2180_v13 = vsel %vm817_vm0, %v2178_v9, %v2176_v8  ;;  %v2256_v45 = vld [vmem:[#allocation0 + $0x16e] sm:$0x8]   ;;  %v2254_v50 = vsel %vm821_vm1, %v2252_v44, %v2250_v43  ;;  %v2239_v3 = vsel %vm841_vm6, %v2237_v38, %v2235_v61  ;;  %v2373_v38 = vld [vmem:[#allocation0 + $0xd3] sm:$0x40]  }
  0xc8   :  { %v2186_v14 = vld [vmem:[#allocation0 + $0x366] sm:$0x8]   ;;  %v2184_v20 = vsel %vm821_vm1, %v2182_v10, %v2180_v13  ;;  %2170 = vrot.lane.b32.xlu0 %v2169_v30, %s2824_s10  ;;  %v2260_v46 = vld [vmem:[#allocation0 + $0x18d] sm:$0x10]   ;;  %v2258_v56 = vsel %vm825_vm2, %v2256_v45, %v2254_v50  ;;  %v2386_v42 = vld [vmem:[#allocation0 + $0x119] sm:$0x1]   ;;  %v3583_v45 = vpop.permute.xlu0 %1052  }
  0xc9   :  { %v2190_v15 = vld [vmem:[#allocation0 + $0x385] sm:$0x10]   ;;  %2135 = vrot.lane.b32.xlu1 %v2134_v18, %s2824_s10  ;;  %v2188_v25 = vsel %vm825_vm2, %v2186_v14, %v2184_v20  ;;  %v2264_v52 = vld [vmem:[#allocation0 + $0x1ac] sm:$0x20]   ;;  %v2262_v62 = vsel %vm829_vm3, %v2260_v46, %v2258_v56  ;;  %v2388_v43 = vld [vmem:[#allocation0 + $0x138] sm:$0x2]  }
  0xca   :  { %v2194_v16 = vld [vmem:[#allocation0 + $0x3a4] sm:$0x20]   ;;  %v2192_v31 = vsel %vm829_vm3, %v2190_v15, %v2188_v25  ;;  %v2268_v53 = vld [vmem:[#allocation0 + $0x1cb] sm:$0x40]   ;;  %v2266_v4 = vsel %vm833_vm4, %v2264_v52, %v2262_v62  ;;  %v2351_v25 = vld [vmem:[#allocation0 + $0x19] sm:$0x1]   ;;  %v2390_v49 = vsel %vm817_vm0, %v2388_v43, %v2386_v42 }
  0xcb   :  { %v2198_v21 = vld [vmem:[#allocation0 + $0x3c3] sm:$0x40]   ;;  %v2196_v36 = vsel %vm833_vm4, %v2194_v16, %v2192_v31  ;;  %v2272_v54 = vld [vmem:[#allocation0 + $0x1ea] sm:$0x80]   ;;  %v2270_v9 = vsel %vm837_vm5, %v2268_v53, %v2266_v4  ;;  %v2355_v30 = vsel %vm817_vm0, %v2353_v26, %v2351_v25  ;;  %v2357_v31 = vld [vmem:[#allocation0 + $0x57] sm:$0x4]  }
  0xcc   :  { %v2202_v22 = vld [vmem:[#allocation0 + $0x3e2] sm:$0x80]   ;;  %v2200_v41 = vsel %vm837_vm5, %v2198_v21, %v2196_v36  ;;  %v2281_v58 = vld [vmem:[#allocation0 + $0x211] sm:$0x1]   ;;  %2240 = vrot.lane.b32.xlu0 %v2239_v3, %s2824_s10  ;;  %v2274_v14 = vsel %vm841_vm6, %v2272_v54, %v2270_v9  ;;  %v3569_v21 = vpop.permute.xlu1 %1017   ;;  %v2359_v36 = vsel %vm821_vm1, %v2357_v31, %v2355_v30  ;;  %v2392_v44 = vld [vmem:[#allocation0 + $0x157] sm:$0x4]  }
  0xcd   :  { %v2204_v48 = vsel %vm841_vm6, %v2202_v22, %v2200_v41  ;;  %v2283_v59 = vld [vmem:[#allocation0 + $0x230] sm:$0x2]   ;;  %v2363_v41 = vsel %vm825_vm2, %v2361_v32, %v2359_v36  ;;  %v2396_v50 = vld [vmem:[#allocation0 + $0x176] sm:$0x8]   ;;  %v2394_v56 = vsel %vm821_vm1, %v2392_v44, %v2390_v49 }
  0xce   :  { %2205 = vrot.lane.b32.xlu1 %v2204_v48, %s2824_s10  ;;  %v2287_v60 = vld [vmem:[#allocation0 + $0x24f] sm:$0x4]   ;;  %v2285_v63 = vsel %vm817_vm0, %v2283_v59, %v2281_v58  ;;  %v2367_v48 = vsel %vm829_vm3, %v2365_v33, %v2363_v41  ;;  %v2400_v52 = vld [vmem:[#allocation0 + $0x195] sm:$0x10]   ;;  %v2398_v62 = vsel %vm825_vm2, %v2396_v50, %v2394_v56 }
  0xcf   :  { %v2291_v0 = vld [vmem:[#allocation0 + $0x26e] sm:$0x8]   ;;  %v2289_v5 = vsel %vm821_vm1, %v2287_v60, %v2285_v63  ;;  %v2404_v53 = vld [vmem:[#allocation0 + $0x1b4] sm:$0x20]   ;;  %v2371_v55 = vsel %vm833_vm4, %v2369_v37, %v2367_v48  ;;  %v2402_v3 = vsel %vm829_vm3, %v2400_v52, %v2398_v62 }
  0xd0   :  { %v2295_v1 = vld [vmem:[#allocation0 + $0x28d] sm:$0x10]   ;;  %v2293_v10 = vsel %vm825_vm2, %v2291_v0, %v2289_v5  ;;  %v2408_v58 = vld [vmem:[#allocation0 + $0x1d3] sm:$0x40]   ;;  %v2375_v61 = vsel %vm837_vm5, %v2373_v38, %v2371_v55  ;;  %v1123_v48 = vpop.permute.xlu0 %1122  }
  0xd1   :  { %v2299_v2 = vld [vmem:[#allocation0 + $0x2ac] sm:$0x20]   ;;  %v2297_v15 = vsel %vm829_vm3, %v2295_v1, %v2293_v10  ;;  %v2412_v59 = vld [vmem:[#allocation0 + $0x1f2] sm:$0x80]  }
  0xd2   :  { %v2303_v6 = vld [vmem:[#allocation0 + $0x2cb] sm:$0x40]   ;;  %2275 = vrot.lane.b32.xlu1 %v2274_v14, %s2824_s10  ;;  %v2301_v22 = vsel %vm833_vm4, %v2299_v2, %v2297_v15  ;;  %v2421_v60 = vld [vmem:[#allocation0 + $0x219] sm:$0x1]   ;;  %v2379_v2 = vsel %vm841_vm6, %v2377_v39, %v2375_v61 }
  0xd3   :  { %v2307_v7 = vld [vmem:[#allocation0 + $0x2ea] sm:$0x80]   ;;  %v2305_v28 = vsel %vm837_vm5, %v2303_v6, %v2301_v22  ;;  %v2423_v63 = vld [vmem:[#allocation0 + $0x238] sm:$0x2]  }
  0xd4   :  { %v2316_v8 = vld [vmem:[#allocation0 + $0x311] sm:$0x1]   ;;  %v2309_v34 = vsel %vm841_vm6, %v2307_v7, %v2305_v28  ;;  %v2427_v0 = vld [vmem:[#allocation0 + $0x257] sm:$0x4]   ;;  %v2425_v4 = vsel %vm817_vm0, %v2423_v63, %v2421_v60 }
  0xd5   :  { %v2318_v11 = vld [vmem:[#allocation0 + $0x330] sm:$0x2]   ;;  %2310 = vrot.lane.b32.xlu0 %v2309_v34, %s2824_s10  ;;  %v2431_v1 = vld [vmem:[#allocation0 + $0x276] sm:$0x8]   ;;  %v2429_v9 = vsel %vm821_vm1, %v2427_v0, %v2425_v4 }
  0xd6   :  { %v2322_v12 = vld [vmem:[#allocation0 + $0x34f] sm:$0x4]   ;;  %v2320_v16 = vsel %vm817_vm0, %v2318_v11, %v2316_v8  ;;  %v2435_v5 = vld [vmem:[#allocation0 + $0x295] sm:$0x10]   ;;  %v2406_v8 = vsel %vm833_vm4, %v2404_v53, %v2402_v3  ;;  %v2433_v14 = vsel %vm825_vm2, %v2431_v1, %v2429_v9 }
  0xd7   :  { %v2326_v13 = vld [vmem:[#allocation0 + $0x36e] sm:$0x8]   ;;  %v2324_v23 = vsel %vm821_vm1, %v2322_v12, %v2320_v16  ;;  %v2439_v6 = vld [vmem:[#allocation0 + $0x2b4] sm:$0x20]  }
  0xd8   :  { %v2330_v18 = vld [vmem:[#allocation0 + $0x38d] sm:$0x10]   ;;  %v2328_v29 = vsel %vm825_vm2, %v2326_v13, %v2324_v23  ;;  %v2443_v7 = vld [vmem:[#allocation0 + $0x2d3] sm:$0x40]   ;;  %v2410_v13 = vsel %vm837_vm5, %v2408_v58, %v2406_v8 }
  0xd9   :  { %v2334_v19 = vld [vmem:[#allocation0 + $0x3ac] sm:$0x20]   ;;  %v2332_v35 = vsel %vm829_vm3, %v2330_v18, %v2328_v29  ;;  %2380 = vrot.lane.b32.xlu0 %v2379_v2, %s2824_s10  ;;  %v2447_v10 = vld [vmem:[#allocation0 + $0x2f2] sm:$0x80]   ;;  %v2414_v23 = vsel %vm841_vm6, %v2412_v59, %v2410_v13 }
  0xda   :  { %v2338_v20 = vld [vmem:[#allocation0 + $0x3cb] sm:$0x40]   ;;  %v2336_v40 = vsel %vm833_vm4, %v2334_v19, %v2332_v35  ;;  %v2456_v11 = vld [vmem:[#allocation0 + $0x319] sm:$0x1]  }
  0xdb   :  { %v2342_v24 = vld [vmem:[#allocation0 + $0x3ea] sm:$0x80]   ;;  %v2340_v46 = vsel %vm837_vm5, %v2338_v20, %v2336_v40  ;;  %v2458_v12 = vld [vmem:[#allocation0 + $0x338] sm:$0x2]   ;;  %v3603_v20 = vpop.permute.xlu1 %1087  }
  0xdc   :  { %v2344_v54 = vsel %vm841_vm6, %v2342_v24, %v2340_v46  ;;  %v2460_v15 = vsel %vm817_vm0, %v2458_v12, %v2456_v11  ;;  %v2462_v16 = vld [vmem:[#allocation0 + $0x357] sm:$0x4]   ;;  %v673_v22 = vld [vmem:[#allocation0 + $0xc0] ss:$8 sm:$0xf0]   ;;  %v2437_v24 = vsel %vm829_vm3, %v2435_v5, %v2433_v14 }
  0xdd   :  { %2345 = vrot.lane.b32.xlu1 %v2344_v54, %s2824_s10  ;;  %v2466_v18 = vld [vmem:[#allocation0 + $0x376] sm:$0x8]   ;;  %v2464_v25 = vsel %vm821_vm1, %v2462_v16, %v2460_v15  ;;  %v2441_v30 = vsel %vm833_vm4, %v2439_v6, %v2437_v24  ;;  %v640_v32 = vld [vmem:[#allocation0] ss:$8 sm:$0xf]  }
  0xde   :  { %v2470_v19 = vld [vmem:[#allocation0 + $0x395] sm:$0x10]   ;;  %v2468_v31 = vsel %vm825_vm2, %v2466_v18, %v2464_v25  ;;  %v641_v33 = vld [vmem:[#allocation0] ss:$8 sm:$0xf0]   ;;  %v2445_v34 = vsel %vm837_vm5, %v2443_v7, %v2441_v30 }
  0xdf   :  { %v2474_v26 = vld [vmem:[#allocation0 + $0x3b4] sm:$0x20]   ;;  %v2472_v35 = vsel %vm829_vm3, %v2470_v19, %v2468_v31  ;;  %v643_v36 = vsel %vm642_vm7, %v641_v33, %v640_v32  ;;  %v649_v37 = vld [vmem:[#allocation0 + $0x40] ss:$8 sm:$0xf]   ;;  %v2449_v39 = vsel %vm841_vm6, %v2447_v10, %v2445_v34  ;;  %v1158_v1 = vpop.permute.xlu1 %1157   ;;  %v1193_v10 = vpop.permute.xlu0 %1192  }
  0xe0   :  { %v2478_v28 = vld [vmem:[#allocation0 + $0x3d3] sm:$0x40]   ;;  %v651_v38 = vld [vmem:[#allocation0 + $0x40] ss:$8 sm:$0xf0]   ;;  %v2476_v40 = vsel %vm833_vm4, %v2474_v26, %v2472_v35  ;;  %2450 = vrot.lane.b32.xlu0 %v2449_v39, %s2824_s10 }
  0xe1   :  { %v2482_v29 = vld [vmem:[#allocation0 + $0x3f2] sm:$0x80]   ;;  %2415 = vrot.lane.b32.xlu1 %v2414_v23, %s2824_s10  ;;  %645 = vst.msk [vmem:[%s3964_s1] ss:$8 sm:$0xf] %vm644_vm8, %v643_v36   ;;  %v653_v41 = vsel %vm642_vm7, %v651_v38, %v649_v37  ;;  %v2480_v46 = vsel %vm837_vm5, %v2478_v28, %v2476_v40 }
  0xe2   :  { %2743 = vst.msk [vmem:[%s3964_s1 - $0x1f] ss:$8 sm:$0xf0] %vm644_vm8, %v643_v36   ;;  %v660_v42 = vld [vmem:[#allocation0 + $0x80] ss:$8 sm:$0xf]   ;;  %v2484_v52 = vsel %vm841_vm6, %v2482_v29, %v2480_v46 }
  0xe3   :  { %v662_v43 = vld [vmem:[#allocation0 + $0x80] ss:$8 sm:$0xf0]   ;;  %2744 = vst.msk [vmem:[%s3964_s1 + $0x2] ss:$8 sm:$0xf] %vm644_vm8, %v653_v41  }
  0xe4   :  { %v717_v44 = vld [vmem:[#allocation0 + $0x1c0] ss:$8 sm:$0xf0]   ;;  %2745 = vst.msk [vmem:[%s3964_s1 - $0x1d] ss:$8 sm:$0xf0] %vm644_vm8, %v653_v41   ;;  %v664_v49 = vsel %vm642_vm7, %v662_v43, %v660_v42 }
  0xe5   :  { %v671_v50 = vld [vmem:[#allocation0 + $0xc0] ss:$8 sm:$0xf]   ;;  %2746 = vst.msk [vmem:[%s3964_s1 + $0x4] ss:$8 sm:$0xf] %vm644_vm8, %v664_v49   ;;  %2485 = vrot.lane.b32.xlu1 %v2484_v52, %s2824_s10 }
  0xe6   :  { %2747 = vst.msk [vmem:[%s3964_s1 - $0x1b] ss:$8 sm:$0xf0] %vm644_vm8, %v664_v49   ;;  %v675_v53 = vsel %vm642_vm7, %v673_v22, %v671_v50  ;;  %v682_v54 = vld [vmem:[#allocation0 + $0x100] ss:$8 sm:$0xf]  }
  0xe7   :  { %v684_v55 = vld [vmem:[#allocation0 + $0x100] ss:$8 sm:$0xf0]   ;;  %2748 = vst.msk [vmem:[%s3964_s1 + $0x6] ss:$8 sm:$0xf] %vm644_vm8, %v675_v53  }
  0xe8   :  { %2749 = vst.msk [vmem:[%s3964_s1 - $0x19] ss:$8 sm:$0xf0] %vm644_vm8, %v675_v53   ;;  %v686_v56 = vsel %vm642_vm7, %v684_v55, %v682_v54  ;;  %v693_v58 = vld [vmem:[#allocation0 + $0x140] ss:$8 sm:$0xf]  }
  0xe9   :  { %v695_v59 = vld [vmem:[#allocation0 + $0x140] ss:$8 sm:$0xf0]   ;;  %846 = vst.msk [vmem:[%s3964_s1] sm:$0xff] %vm845_vm9, %v3466_v27   ;;  %2777 = vst.msk [vmem:[%s3964_s1 + $0x8] sm:$0xff] %vm845_vm9, %v3549_v47  }
  0xea   :  { %v761_v60 = vld [vmem:[#allocation0 + $0x2c0] ss:$8 sm:$0xf0]   ;;  %2781 = vst.msk [vmem:[%s3964_s1 + $0x10] sm:$0xff] %vm845_vm9, %v1123_v48   ;;  %v697_v27 = vsel %vm642_vm7, %v695_v59, %v693_v58 }
  0xeb   :  { %2750 = vst.msk [vmem:[%s3964_s1 + $0x20] ss:$8 sm:$0xf] %vm644_vm8, %v686_v56   ;;  %2751 = vst.msk [vmem:[%s3964_s1 + $0x1] ss:$8 sm:$0xf0] %vm644_vm8, %v686_v56  }
  0xec   :  { %v704_v47 = vld [vmem:[#allocation0 + $0x180] ss:$8 sm:$0xf]   ;;  %2752 = vst.msk [vmem:[%s3964_s1 + $0x22] ss:$8 sm:$0xf] %vm644_vm8, %v697_v27  }
  0xed   :  { %v706_v61 = vld [vmem:[#allocation0 + $0x180] ss:$8 sm:$0xf0]   ;;  %2753 = vst.msk [vmem:[%s3964_s1 + $0x3] ss:$8 sm:$0xf0] %vm644_vm8, %v697_v27  }
  0xee   :  { %v708_v62 = vsel %vm642_vm7, %v706_v61, %v704_v47  ;;  %v715_v63 = vld [vmem:[#allocation0 + $0x1c0] ss:$8 sm:$0xf]  }
  0xef   :  { %v726_v0 = vld [vmem:[#allocation0 + $0x200] ss:$8 sm:$0xf]   ;;  %2754 = vst.msk [vmem:[%s3964_s1 + $0x24] ss:$8 sm:$0xf] %vm644_vm8, %v708_v62   ;;  %v719_v2 = vsel %vm642_vm7, %v717_v44, %v715_v63 }
  0xf0   :  { %2755 = vst.msk [vmem:[%s3964_s1 + $0x5] ss:$8 sm:$0xf0] %vm644_vm8, %v708_v62   ;;  %v728_v3 = vld [vmem:[#allocation0 + $0x200] ss:$8 sm:$0xf0]  }
  0xf1   :  { %v737_v4 = vld [vmem:[#allocation0 + $0x240] ss:$8 sm:$0xf]   ;;  %2756 = vst.msk [vmem:[%s3964_s1 + $0x26] ss:$8 sm:$0xf] %vm644_vm8, %v719_v2   ;;  %v730_v5 = vsel %vm642_vm7, %v728_v3, %v726_v0 }
  0xf2   :  { %2757 = vst.msk [vmem:[%s3964_s1 + $0x7] ss:$8 sm:$0xf0] %vm644_vm8, %v719_v2   ;;  %v739_v6 = vld [vmem:[#allocation0 + $0x240] ss:$8 sm:$0xf0]  }
  0xf3   :  { %v748_v7 = vld [vmem:[#allocation0 + $0x280] ss:$8 sm:$0xf]   ;;  %2774 = vst.msk [vmem:[%s3964_s1 + $0x20] sm:$0xff] %vm845_vm9, %v3515_v51   ;;  %2778 = vst.msk [vmem:[%s3964_s1 + $0x28] sm:$0xff] %vm845_vm9, %v3569_v21   ;;  %v741_v51 = vsel %vm642_vm7, %v739_v6, %v737_v4 }
  0xf4   :  { %v805_v8 = vld [vmem:[#allocation0 + $0x3c0] ss:$8 sm:$0xf0]   ;;  %2782 = vst.msk [vmem:[%s3964_s1 + $0x30] sm:$0xff] %vm845_vm9, %v1158_v1  }
  0xf5   :  { %2758 = vst.msk [vmem:[%s3964_s1 + $0x40] ss:$8 sm:$0xf] %vm644_vm8, %v730_v5   ;;  %2759 = vst.msk [vmem:[%s3964_s1 + $0x21] ss:$8 sm:$0xf0] %vm644_vm8, %v730_v5  }
  0xf6   :  { %v750_v21 = vld [vmem:[#allocation0 + $0x280] ss:$8 sm:$0xf0]   ;;  %2760 = vst.msk [vmem:[%s3964_s1 + $0x42] ss:$8 sm:$0xf] %vm644_vm8, %v741_v51  }
  0xf7   :  { %v759_v9 = vld [vmem:[#allocation0 + $0x2c0] ss:$8 sm:$0xf]   ;;  %2761 = vst.msk [vmem:[%s3964_s1 + $0x23] ss:$8 sm:$0xf0] %vm644_vm8, %v741_v51   ;;  %v752_v11 = vsel %vm642_vm7, %v750_v21, %v748_v7 }
  0xf8   :  { %v763_v12 = vsel %vm642_vm7, %v761_v60, %v759_v9  ;;  %v770_v13 = vld [vmem:[#allocation0 + $0x300] ss:$8 sm:$0xf]   ;;  %2762 = vst.msk [vmem:[%s3964_s1 + $0x44] ss:$8 sm:$0xf] %vm644_vm8, %v752_v11  }
  0xf9   :  { %v772_v14 = vld [vmem:[#allocation0 + $0x300] ss:$8 sm:$0xf0]   ;;  %2763 = vst.msk [vmem:[%s3964_s1 + $0x25] ss:$8 sm:$0xf0] %vm644_vm8, %v752_v11  }
  0xfa   :  { %2764 = vst.msk [vmem:[%s3964_s1 + $0x46] ss:$8 sm:$0xf] %vm644_vm8, %v763_v12   ;;  %2765 = vst.msk [vmem:[%s3964_s1 + $0x27] ss:$8 sm:$0xf0] %vm644_vm8, %v763_v12   ;;  %v774_v15 = vsel %vm642_vm7, %v772_v14, %v770_v13 }
  0xfb   :  { %v781_v16 = vld [vmem:[#allocation0 + $0x340] ss:$8 sm:$0xf]   ;;  %2775 = vst.msk [vmem:[%s3964_s1 + $0x40] sm:$0xff] %vm845_vm9, %v3483_v57   ;;  %2779 = vst.msk [vmem:[%s3964_s1 + $0x48] sm:$0xff] %vm845_vm9, %v3583_v45  }
  0xfc   :  { %v783_v18 = vld [vmem:[#allocation0 + $0x340] ss:$8 sm:$0xf0]   ;;  %2783 = vst.msk [vmem:[%s3964_s1 + $0x50] sm:$0xff] %vm845_vm9, %v1193_v10  }
  0xfd   :  { %2766 = vst.msk [vmem:[%s3964_s1 + $0x60] ss:$8 sm:$0xf] %vm644_vm8, %v774_v15   ;;  %2767 = vst.msk [vmem:[%s3964_s1 + $0x41] ss:$8 sm:$0xf0] %vm644_vm8, %v774_v15   ;;  %v785_v57 = vsel %vm642_vm7, %v783_v18, %v781_v16 }
  0xfe   :  { %v792_v45 = vld [vmem:[#allocation0 + $0x380] ss:$8 sm:$0xf]   ;;  %2768 = vst.msk [vmem:[%s3964_s1 + $0x62] ss:$8 sm:$0xf] %vm644_vm8, %v785_v57  }
  0xff   :  { %v794_v19 = vld [vmem:[#allocation0 + $0x380] ss:$8 sm:$0xf0]   ;;  %2769 = vst.msk [vmem:[%s3964_s1 + $0x43] ss:$8 sm:$0xf0] %vm644_vm8, %v785_v57  }
 0x100   :  { %v796_v22 = vsel %vm642_vm7, %v794_v19, %v792_v45  ;;  %v803_v23 = vld [vmem:[#allocation0 + $0x3c0] ss:$8 sm:$0xf]  }
 0x101   :  { %2770 = vst.msk [vmem:[%s3964_s1 + $0x64] ss:$8 sm:$0xf] %vm644_vm8, %v796_v22   ;;  %2771 = vst.msk [vmem:[%s3964_s1 + $0x45] ss:$8 sm:$0xf0] %vm644_vm8, %v796_v22   ;;  %v807_v24 = vsel %vm642_vm7, %v805_v8, %v803_v23 }
 0x102   :  { %2772 = vst.msk [vmem:[%s3964_s1 + $0x66] ss:$8 sm:$0xf] %vm644_vm8, %v807_v24   ;;  %2773 = vst.msk [vmem:[%s3964_s1 + $0x47] ss:$8 sm:$0xf0] %vm644_vm8, %v807_v24  }
 0x103   :  { %2776 = vst.msk [vmem:[%s3964_s1 + $0x60] sm:$0xff] %vm845_vm9, %v3532_v17   ;;  %2780 = vst.msk [vmem:[%s3964_s1 + $0x68] sm:$0xff] %vm845_vm9, %v3603_v20   ;;  %v1228_v17 = vpop.permute.xlu1 %1227   ;;  %v1263_v20 = vpop.permute.xlu0 %1262  }
 0x104   :  { %2784 = vst.msk [vmem:[%s3964_s1 + $0x70] sm:$0xff] %vm845_vm9, %v1228_v17   ;;  %2785 = vst.msk [vmem:[%s3964_s1 + $0x18] sm:$0xff] %vm845_vm9, %v1263_v20  }
 0x107   :  { %v1298_v25 = vpop.permute.xlu1 %1297   ;;  %v1333_v26 = vpop.permute.xlu0 %1332  }
 0x108   :  { %2786 = vst.msk [vmem:[%s3964_s1 + $0x38] sm:$0xff] %vm845_vm9, %v1298_v25   ;;  %2787 = vst.msk [vmem:[%s3964_s1 + $0x58] sm:$0xff] %vm845_vm9, %v1333_v26  }
 0x10b   :  { %v1403_v28 = vpop.permute.xlu0 %1402   ;;  %v1368_v29 = vpop.permute.xlu1 %1367  }
 0x10c   :  { %1405 = vst.msk [vmem:[%s3964_s1] sm:$0xff] %vm1404_vm10, %v1403_v28  }
 0x10d   :  { %2788 = vst.msk [vmem:[%s3964_s1 + $0x78] sm:$0xff] %vm845_vm9, %v1368_v29  }
 0x10f   :  { %v1472_v30 = vpop.permute.xlu0 %1471   ;;  %v1437_v31 = vpop.permute.xlu1 %1436  }
 0x110   :  { %2790 = vst.msk [vmem:[%s3964_s1 + $0x40] sm:$0xff] %vm1404_vm10, %v1472_v30   ;;  %2789 = vst.msk [vmem:[%s3964_s1 + $0x20] sm:$0xff] %vm1404_vm10, %v1437_v31  }
 0x113   :  { %v1542_v32 = vpop.permute.xlu0 %1541   ;;  %v1507_v33 = vpop.permute.xlu1 %1506  }
 0x114   :  { %2792 = vst.msk [vmem:[%s3964_s1 + $0x8] sm:$0xff] %vm1404_vm10, %v1542_v32   ;;  %2791 = vst.msk [vmem:[%s3964_s1 + $0x60] sm:$0xff] %vm1404_vm10, %v1507_v33  }
 0x117   :  { %v1577_v34 = vpop.permute.xlu1 %1576   ;;  %v1612_v35 = vpop.permute.xlu0 %1611  }
 0x118   :  { %2793 = vst.msk [vmem:[%s3964_s1 + $0x28] sm:$0xff] %vm1404_vm10, %v1577_v34   ;;  %2794 = vst.msk [vmem:[%s3964_s1 + $0x48] sm:$0xff] %vm1404_vm10, %v1612_v35  }
 0x11b   :  { %v1647_v36 = vpop.permute.xlu1 %1646   ;;  %v1682_v37 = vpop.permute.xlu0 %1681  }
 0x11c   :  { %2795 = vst.msk [vmem:[%s3964_s1 + $0x68] sm:$0xff] %vm1404_vm10, %v1647_v36   ;;  %2796 = vst.msk [vmem:[%s3964_s1 + $0x10] sm:$0xff] %vm1404_vm10, %v1682_v37  }
 0x11f   :  { %v1717_v38 = vpop.permute.xlu1 %1716   ;;  %v1752_v39 = vpop.permute.xlu0 %1751  }
 0x120   :  { %2797 = vst.msk [vmem:[%s3964_s1 + $0x30] sm:$0xff] %vm1404_vm10, %v1717_v38   ;;  %2798 = vst.msk [vmem:[%s3964_s1 + $0x50] sm:$0xff] %vm1404_vm10, %v1752_v39  }
 0x123   :  { %v1787_v40 = vpop.permute.xlu1 %1786   ;;  %v1822_v41 = vpop.permute.xlu0 %1821  }
 0x124   :  { %2799 = vst.msk [vmem:[%s3964_s1 + $0x70] sm:$0xff] %vm1404_vm10, %v1787_v40   ;;  %2800 = vst.msk [vmem:[%s3964_s1 + $0x18] sm:$0xff] %vm1404_vm10, %v1822_v41  }
 0x127   :  { %v1857_v42 = vpop.permute.xlu1 %1856   ;;  %v1892_v43 = vpop.permute.xlu0 %1891  }
 0x128   :  { %2801 = vst.msk [vmem:[%s3964_s1 + $0x38] sm:$0xff] %vm1404_vm10, %v1857_v42   ;;  %2802 = vst.msk [vmem:[%s3964_s1 + $0x58] sm:$0xff] %vm1404_vm10, %v1892_v43  }
 0x12b   :  { %v1962_v46 = vpop.permute.xlu0 %1961  }
 0x12c   :  { %1964 = vst.msk [vmem:[%s3964_s1] sm:$0xff] %vm1963_vm11, %v1962_v46  }
 0x12f   :  { %v1927_v44 = vpop.permute.xlu1 %1926   ;;  %v2031_v49 = vpop.permute.xlu0 %2030  }
 0x130   :  { %2803 = vst.msk [vmem:[%s3964_s1 + $0x78] sm:$0xff] %vm1404_vm10, %v1927_v44  }
 0x131   :  { %2805 = vst.msk [vmem:[%s3964_s1 + $0x40] sm:$0xff] %vm1963_vm11, %v2031_v49  }
 0x133   :  { %v1996_v48 = vpop.permute.xlu1 %1995  }
 0x134   :  { %2804 = vst.msk [vmem:[%s3964_s1 + $0x20] sm:$0xff] %vm1963_vm11, %v1996_v48  }
 0x136   :  { %v2101_v52 = vpop.permute.xlu0 %2100  }
 0x137   :  { %v2066_v50 = vpop.permute.xlu1 %2065   ;;  %2807 = vst.msk [vmem:[%s3964_s1 + $0x8] sm:$0xff] %vm1963_vm11, %v2101_v52  }
 0x138   :  { %2806 = vst.msk [vmem:[%s3964_s1 + $0x60] sm:$0xff] %vm1963_vm11, %v2066_v50  }
 0x13a   :  { %v2171_v54 = vpop.permute.xlu0 %2170  }
 0x13b   :  { %v2136_v53 = vpop.permute.xlu1 %2135   ;;  %2809 = vst.msk [vmem:[%s3964_s1 + $0x48] sm:$0xff] %vm1963_vm11, %v2171_v54  }
 0x13c   :  { %2808 = vst.msk [vmem:[%s3964_s1 + $0x28] sm:$0xff] %vm1963_vm11, %v2136_v53  }
 0x13e   :  { %v2241_v56 = vpop.permute.xlu0 %2240  }
 0x13f   :  { %2811 = vst.msk [vmem:[%s3964_s1 + $0x10] sm:$0xff] %vm1963_vm11, %v2241_v56  }
 0x140   :  { %v2206_v55 = vpop.permute.xlu1 %2205  }
 0x141   :  { %2810 = vst.msk [vmem:[%s3964_s1 + $0x68] sm:$0xff] %vm1963_vm11, %v2206_v55  }
 0x144   :  { %v2276_v58 = vpop.permute.xlu1 %2275  }
 0x145   :  { %2812 = vst.msk [vmem:[%s3964_s1 + $0x30] sm:$0xff] %vm1963_vm11, %v2276_v58  }
 0x147   :  { %v2311_v59 = vpop.permute.xlu0 %2310  }
 0x148   :  { %2813 = vst.msk [vmem:[%s3964_s1 + $0x50] sm:$0xff] %vm1963_vm11, %v2311_v59  }
 0x14b   :  { %v2381_v27 = vpop.permute.xlu0 %2380  }
 0x14c   :  { %2815 = vst.msk [vmem:[%s3964_s1 + $0x18] sm:$0xff] %vm1963_vm11, %v2381_v27  }
 0x14f   :  { %v2346_v60 = vpop.permute.xlu1 %2345  }
 0x150   :  { %2814 = vst.msk [vmem:[%s3964_s1 + $0x70] sm:$0xff] %vm1963_vm11, %v2346_v60  }
 0x152   :  { %v2451_v61 = vpop.permute.xlu0 %2450  }
 0x153   :  { %v2416_v47 = vpop.permute.xlu1 %2415   ;;  %2817 = vst.msk [vmem:[%s3964_s1 + $0x58] sm:$0xff] %vm1963_vm11, %v2451_v61  }
 0x154   :  { %2816 = vst.msk [vmem:[%s3964_s1 + $0x38] sm:$0xff] %vm1963_vm11, %v2416_v47  }
 0x157   :  { %v2486_v62 = vpop.permute.xlu1 %2485  }
 0x158   :  { %2818 = vst.msk [vmem:[%s3964_s1 + $0x78] sm:$0xff] %vm1963_vm11, %v2486_v62  }

// kernel: discriminator_forward.5
= control target key start
LH: loop header
LB: loop body
LE: loop exit
PB: predicated region body
PF: predicated region fallthrough
CT: control target
= control target key end

     0   :  { %s6066_s15 = smov 0   ;;  %s7167_s0 = inlined_call_operand.vmem [shape: bf16[512,2048], index: 0, kind: input, shape index: {}]   ;;  %s7168_s1 = inlined_call_operand.vmem [shape: bf16[2048,128], index: 1, kind: input, shape index: {}]   ;;  %s7169_s2 = inlined_call_operand.vmem [shape: f32[1,128], index: 2, kind: input, shape index: {}]   ;;  %s7170_s3 = inlined_call_operand.vmem [shape: f32[1,128], index: 3, kind: input, shape index: {}]   ;;  %s7171_s4 = inlined_call_operand.vmem [shape: bf16[512,128], index: 4, kind: output, shape index: {}]  }
   0x1 LB: > { %s4443_s16 = sadd.s32 4294967295, %s6039_s15   ;;  %p4447_p0 = scmp.ge.s32.totalorder %s6039_s15, 1  ;;  %s6039_s15 = sphi %s6066_s15, %s14_s15  }
   0x2   : > { %p164_p1 = scmp.lt.s32.totalorder %s6039_s15, 3 }
   0x4   : > { %p165_p2 = pnand %p4447_p0, %p164_p1 }
   0x5   : > { %v5905_v0 = vld [vmem:[%s7168_s1 + $0x40] sm:$0xff] (!%p165_p2)   ;;  %v5909_v4 = vld [vmem:[%s7168_s1 + $0x48] sm:$0xff] (!%p165_p2)   ;;  %v5913_v8 = vld [vmem:[%s7168_s1 + $0x50] sm:$0xff] (!%p165_p2)   ;;  %s4448_s25 = sshll.u32 (!%p165_p2), %s4443_s16, 5 }
   0x6   : > { %168 = sbr.rel (%p165_p2) target bundleno = 775 (0x307), region = 36  ;;  %v5906_v1 = vld [vmem:[%s7168_s1 + $0xc0] sm:$0xff] (!%p165_p2)   ;;  %5001 = vmatprep.subr.bf16.mxu0 (!%p165_p2), %v5905_v0  ;;  %v5910_v5 = vld [vmem:[%s7168_s1 + $0xc8] sm:$0xff] (!%p165_p2)   ;;  %v5914_v9 = vld [vmem:[%s7168_s1 + $0xd0] sm:$0xff] (!%p165_p2)   ;;  %p192_p3 = scmp.lt.s32.totalorder (!%p165_p2), %s4448_s25, 63 }
   0x7   : > { %v5907_v2 = vld [vmem:[%s7168_s1] sm:$0xff] (!%p165_p2)   ;;  %5113 = vmatprep.subr.bf16.mxu1 (!%p165_p2), %v5906_v1  ;;  %v5911_v6 = vld [vmem:[%s7168_s1 + $0x8] sm:$0xff] (!%p165_p2)   ;;  %v5915_v10 = vld [vmem:[%s7168_s1 + $0x10] sm:$0xff] (!%p165_p2)  }
   0x8   : > { %v5908_v3 = vld [vmem:[%s7168_s1 + $0x80] sm:$0xff] (!%p165_p2)   ;;  %5002 = vmatpush3.bf16.msra.mxu0 (!%p165_p2), %v5907_v2  ;;  %v5912_v7 = vld [vmem:[%s7168_s1 + $0x88] sm:$0xff] (!%p165_p2)   ;;  %v5916_v11 = vld [vmem:[%s7168_s1 + $0x90] sm:$0xff] (!%p165_p2)  }
   0x9   : > { %5114 = vmatpush3.bf16.msra.mxu1 (!%p165_p2), %v5908_v3  ;;  %5003 = vmatprep.subr.bf16.mxu0 (!%p165_p2), %v5909_v4  ;;  %v5917_v12 = vld [vmem:[%s7168_s1 + $0x58] sm:$0xff] (!%p165_p2)   ;;  %v5921_v16 = vld [vmem:[%s7168_s1 + $0x60] sm:$0xff] (!%p165_p2)   ;;  %v5925_v20 = vld [vmem:[%s7168_s1 + $0x68] sm:$0xff] (!%p165_p2)  }
   0xa   : > { %5115 = vmatprep.subr.bf16.mxu1 (!%p165_p2), %v5910_v5  ;;  %v5918_v13 = vld [vmem:[%s7168_s1 + $0xd8] sm:$0xff] (!%p165_p2)   ;;  %v5922_v17 = vld [vmem:[%s7168_s1 + $0xe0] sm:$0xff] (!%p165_p2)   ;;  %v5926_v21 = vld [vmem:[%s7168_s1 + $0xe8] sm:$0xff] (!%p165_p2)  }
   0xb   : > { %v5919_v14 = vld [vmem:[%s7168_s1 + $0x18] sm:$0xff] (!%p165_p2)   ;;  %v5923_v18 = vld [vmem:[%s7168_s1 + $0x20] sm:$0xff] (!%p165_p2)   ;;  %v5927_v22 = vld [vmem:[%s7168_s1 + $0x28] sm:$0xff] (!%p165_p2)  }
   0xc   : > { %5004 = vmatpush3.bf16.msra.mxu0 (!%p165_p2), %v5911_v6  ;;  %v5920_v15 = vld [vmem:[%s7168_s1 + $0x98] sm:$0xff] (!%p165_p2)   ;;  %v5924_v19 = vld [vmem:[%s7168_s1 + $0xa0] sm:$0xff] (!%p165_p2)   ;;  %v5928_v23 = vld [vmem:[%s7168_s1 + $0xa8] sm:$0xff] (!%p165_p2)  }
   0xd   : > { %5116 = vmatpush3.bf16.msra.mxu1 %v5912_v7  ;;  %5005 = vmatprep.subr.bf16.mxu0 %v5913_v8  ;;  %s7173_s25 = smov (!%p192_p3, %s4448_s25), 63  ;;  %v5929_v24 = vld [vmem:[%s7168_s1 + $0x70] sm:$0xff]   ;;  %v5933_v28 = vld [vmem:[%s7168_s1 + $0x78] sm:$0xff]   ;;  %v5937_v40 = vld [vmem:[%s7168_s1 + $0x140] sm:$0xff]  }
   0xe   : > { %5117 = vmatprep.subr.bf16.mxu1 %v5914_v9  ;;  %v5930_v25 = vld [vmem:[%s7168_s1 + $0xf0] sm:$0xff]   ;;  %s4873_s23 = sshll.u32 %s7173_s25, 6  ;;  %v5934_v29 = vld [vmem:[%s7168_s1 + $0xf8] sm:$0xff]   ;;  %v5938_v41 = vld [vmem:[%s7168_s1 + $0x100] sm:$0xff]   ;;  %s4452_s24 = sshll.u32 %s7173_s25, 2 }
   0xf   : > { %v5931_v26 = vld [vmem:[%s7168_s1 + $0x30] sm:$0xff]   ;;  %s6172_s7 = scalar_lea.vmem %s7167_s0, %s4873_s23  ;;  %v5935_v30 = vld [vmem:[%s7168_s1 + $0x38] sm:$0xff]   ;;  %v5939_v42 = vld [vmem:[%s7168_s1 + $0x1c0] sm:$0xff]   ;;  %s7058_s28 = scalar_lea.vmem %s7171_s4, %s4452_s24 }
  0x10   : > { %5006 = vmatpush3.bf16.msra.mxu0 %v5915_v10  ;;  %v5932_v27 = vld [vmem:[%s7168_s1 + $0xb0] sm:$0xff]   ;;  %v5936_v31 = vld [vmem:[%s7168_s1 + $0xb8] sm:$0xff]   ;;  %v205_v32 = vld [vmem:[%s6172_s7] sm:$0xff] }
  0x11   : > { %5118 = vmatpush3.bf16.msra.mxu1 %v5916_v11  ;;  %5007 = vmatprep.subr.bf16.mxu0 %v5917_v12  ;;  %v213_v33 = vld [vmem:[%s6172_s7 + $0x40] sm:$0xff]  ;;  %v206_v34 = vld [vmem:[%s6172_s7 + $0x8] sm:$0xff]  ;;  %v5945_v2 = vld [vmem:[%s7168_s1 + $0x150] sm:$0xff]  }
  0x12   : > { %5119 = vmatprep.subr.bf16.mxu1 %v5918_v13  ;;  %v4453_v35 = vcombine.low %v205_v32, %v213_v33  ;;  %v4454_v36 = vcombine.high %v205_v32, %v213_v33  ;;  %v214_v37 = vld [vmem:[%s6172_s7 + $0x48] sm:$0xff]  ;;  %v5940_v43 = vld [vmem:[%s7168_s1 + $0x180] sm:$0xff]   ;;  %v5946_v4 = vld [vmem:[%s7168_s1 + $0x110] sm:$0xff]  }
  0x13   : > { %v4455_v38 = vcombine.low %v206_v34, %v214_v37  ;;  %v4456_v39 = vcombine.high %v206_v34, %v214_v37  ;;  %v221_v44 = vld [vmem:[%s6172_s7 + $0x80] sm:$0xff]  ;;  %v222_v47 = vld [vmem:[%s6172_s7 + $0x88] sm:$0xff]  ;;  %v5947_v7 = vld [vmem:[%s7168_s1 + $0x1d0] sm:$0xff]  }
  0x14   : > { %5008 = vmatpush3.bf16.msra.mxu0 %v5919_v14  ;;  %2797 = vmatprep.mubr.bf16.mxu0 %v4454_v36  ;;  %v229_v45 = vld [vmem:[%s6172_s7 + $0xc0] sm:$0xff]  ;;  %v230_v48 = vld [vmem:[%s6172_s7 + $0xc8] sm:$0xff]  ;;  %v5948_v9 = vld [vmem:[%s7168_s1 + $0x190] sm:$0xff]  }
  0x15   : > { %5120 = vmatpush3.bf16.msra.mxu1 %v5920_v15  ;;  %5009 = vmatprep.subr.bf16.mxu0 %v5921_v16  ;;  %v4470_v46 = vcombine.high %v221_v44, %v229_v45  ;;  %v237_v49 = vld [vmem:[%s6172_s7 + $0x100] sm:$0xff]  ;;  %v4472_v50 = vcombine.high %v222_v47, %v230_v48  ;;  %v238_v52 = vld [vmem:[%s6172_s7 + $0x108] sm:$0xff]  ;;  %v4469_v54 = vcombine.low %v221_v44, %v229_v45  ;;  %v5949_v14 = vld [vmem:[%s7168_s1 + $0x158] sm:$0xff]  }
  0x16   : > { %5121 = vmatprep.subr.bf16.mxu1 %v5922_v17  ;;  %2958 = vmatprep.mubr.bf16.mxu1 %v4456_v39  ;;  %v245_v51 = vld [vmem:[%s6172_s7 + $0x140] sm:$0xff]  ;;  %v246_v53 = vld [vmem:[%s6172_s7 + $0x148] sm:$0xff]  ;;  %v4471_v56 = vcombine.low %v222_v47, %v230_v48  ;;  %v5950_v15 = vld [vmem:[%s7168_s1 + $0x118] sm:$0xff]  }
  0x17   : > { %v5941_v55 = vld [vmem:[%s7168_s1 + $0x148] sm:$0xff]   ;;  %v4486_v57 = vcombine.high %v237_v49, %v245_v51  ;;  %v4488_v59 = vcombine.high %v238_v52, %v246_v53  ;;  %v253_v62 = vld [vmem:[%s6172_s7 + $0x180] sm:$0xff]  ;;  %v4485_v3 = vcombine.low %v237_v49, %v245_v51  ;;  %v4487_v5 = vcombine.low %v238_v52, %v246_v53  ;;  %v5951_v17 = vld [vmem:[%s7168_s1 + $0x1d8] sm:$0xff]  }
  0x18   : > { %5010 = vmatpush3.bf16.msra.mxu0 %v5923_v18  ;;  %v5942_v58 = vld [vmem:[%s7168_s1 + $0x108] sm:$0xff]   ;;  %v261_v63 = vld [vmem:[%s6172_s7 + $0x1c0] sm:$0xff]  ;;  %v5962_v47 = vld [vmem:[%s7168_s1 + $0x130] sm:$0xff]  }
  0x19   : > { %5122 = vmatpush3.bf16.msra.mxu1 %v5924_v19  ;;  %5011 = vmatprep.subr.bf16.mxu0 %v5925_v20  ;;  %v5943_v60 = vld [vmem:[%s7168_s1 + $0x1c8] sm:$0xff]   ;;  %v4502_v6 = vcombine.high %v253_v62, %v261_v63  ;;  %v269_v10 = vld [vmem:[%s6172_s7 + $0x200] sm:$0xff]  ;;  %v4501_v16 = vcombine.low %v253_v62, %v261_v63  ;;  %v5952_v20 = vld [vmem:[%s7168_s1 + $0x198] sm:$0xff]  }
  0x1a   : > { %5123 = vmatprep.subr.bf16.mxu1 %v5926_v21  ;;  %v5944_v61 = vld [vmem:[%s7168_s1 + $0x188] sm:$0xff]   ;;  %v277_v11 = vld [vmem:[%s6172_s7 + $0x240] sm:$0xff]  ;;  %v5963_v48 = vld [vmem:[%s7168_s1 + $0x1f0] sm:$0xff]  }
  0x1b   : > { %v254_v0 = vld [vmem:[%s6172_s7 + $0x188] sm:$0xff]  ;;  %v4518_v19 = vcombine.high %v269_v10, %v277_v11  ;;  %v5964_v49 = vld [vmem:[%s7168_s1 + $0x1b0] sm:$0xff]   ;;  %v325_v51 = vld [vmem:[%s6172_s7 + $0x3c0] sm:$0xff] }
  0x1c   : > { %5012 = vmatpush3.bf16.msra.mxu0 %v5927_v22  ;;  %v262_v1 = vld [vmem:[%s6172_s7 + $0x1c8] sm:$0xff]  ;;  %v285_v22 = vld [vmem:[%s6172_s7 + $0x280] sm:$0xff] }
  0x1d   : > { %5124 = vmatpush3.bf16.msra.mxu1 %v5928_v23  ;;  %5013 = vmatprep.subr.bf16.mxu0 %v5929_v24  ;;  %v4504_v8 = vcombine.high %v254_v0, %v262_v1  ;;  %v270_v12 = vld [vmem:[%s6172_s7 + $0x208] sm:$0xff]  ;;  %v4503_v18 = vcombine.low %v254_v0, %v262_v1  ;;  %v293_v23 = vld [vmem:[%s6172_s7 + $0x2c0] sm:$0xff] }
  0x1e   : > { %5125 = vmatprep.subr.bf16.mxu1 %v5930_v25  ;;  %v278_v13 = vld [vmem:[%s6172_s7 + $0x248] sm:$0xff]  ;;  %v5953_v24 = vld [vmem:[%s7168_s1 + $0x160] sm:$0xff]   ;;  %v4534_v32 = vcombine.high %v285_v22, %v293_v23 }
  0x1f   : > { %v4520_v21 = vcombine.high %v270_v12, %v278_v13  ;;  %v286_v25 = vld [vmem:[%s6172_s7 + $0x288] sm:$0xff]  ;;  %v333_v62 = vld [vmem:[%s6172_s7 + $0x400] sm:$0xff] }
  0x20   : > { %5014 = vmatpush3.bf16.msra.mxu0 %v5931_v26  ;;  %v294_v26 = vld [vmem:[%s6172_s7 + $0x2c8] sm:$0xff]  ;;  %v341_v63 = vld [vmem:[%s6172_s7 + $0x440] sm:$0xff] }
  0x21   : > { %5126 = vmatpush3.bf16.msra.mxu1 %v5932_v27  ;;  %5015 = vmatprep.subr.bf16.mxu0 %v5933_v28  ;;  %v5954_v27 = vld [vmem:[%s7168_s1 + $0x120] sm:$0xff]   ;;  %v4536_v33 = vcombine.high %v286_v25, %v294_v26  ;;  %v5957_v34 = vld [vmem:[%s7168_s1 + $0x168] sm:$0xff]  }
  0x22   : > { %5127 = vmatprep.subr.bf16.mxu1 %v5934_v29  ;;  %v5955_v28 = vld [vmem:[%s7168_s1 + $0x1e0] sm:$0xff]   ;;  %v5958_v36 = vld [vmem:[%s7168_s1 + $0x128] sm:$0xff]  }
  0x23   : > { %v5956_v29 = vld [vmem:[%s7168_s1 + $0x1a0] sm:$0xff]   ;;  %v5959_v37 = vld [vmem:[%s7168_s1 + $0x1e8] sm:$0xff]  }
  0x24   : > { %5016 = vmatpush3.bf16.msra.mxu0 %v5935_v30  ;;  %v4517_v30 = vcombine.low %v269_v10, %v277_v11  ;;  %v5960_v39 = vld [vmem:[%s7168_s1 + $0x1a8] sm:$0xff]  }
  0x25   : > { %5128 = vmatpush3.bf16.msra.mxu1 %v5936_v31  ;;  %5225 = vmatprep.subr.bf16.mxu0 %v5937_v40  ;;  %v4519_v31 = vcombine.low %v270_v12, %v278_v13  ;;  %v302_v40 = vld [vmem:[%s6172_s7 + $0x308] sm:$0xff]  ;;  %v4581_v12 = vcombine.low %v333_v62, %v341_v63 }
  0x26   : > { %5337 = vmatprep.subr.bf16.mxu1 %v5939_v42  ;;  %v4533_v42 = vcombine.low %v285_v22, %v293_v23  ;;  %v318_v52 = vld [vmem:[%s6172_s7 + $0x388] sm:$0xff] }
  0x27   : > { %2798 = vmatmul.mubr.bf16.vlgmr.msra.gmra.mrb[0].mxu0 %v4453_v35  ;;  %v301_v35 = vld [vmem:[%s6172_s7 + $0x300] sm:$0xff]  ;;  %v326_v53 = vld [vmem:[%s6172_s7 + $0x3c8] sm:$0xff] }
  0x28   : > { %2959 = vmatmul.mubr.bf16.vlgmr.msra.gmra.mrb[0].mxu1 %v4455_v38  ;;  %5226 = vmatpush3.bf16.msra.mxu0 %v5938_v41  ;;  %v309_v38 = vld [vmem:[%s6172_s7 + $0x340] sm:$0xff]  ;;  %v310_v41 = vld [vmem:[%s6172_s7 + $0x348] sm:$0xff] }
  0x29   : > { %5338 = vmatpush3.bf16.msra.mxu1 %v5940_v43  ;;  %2805 = vmatprep.mubr.bf16.mxu0 %v4470_v46  ;;  %v4535_v43 = vcombine.low %v286_v25, %v294_v26  ;;  %v4550_v44 = vcombine.high %v301_v35, %v309_v38  ;;  %v4552_v45 = vcombine.high %v302_v40, %v310_v41  ;;  %v5961_v46 = vld [vmem:[%s7168_s1 + $0x170] sm:$0xff]   ;;  %v334_v0 = vld [vmem:[%s6172_s7 + $0x408] sm:$0xff]  ;;  %v389_v25 = vld [vmem:[%s6172_s7 + $0x5c0] sm:$0xff] }
  0x2a   : > { %2966 = vmatprep.mubr.bf16.mxu1 %v4472_v50  ;;  %5227 = vmatprep.subr.bf16.mxu0 %v5941_v55  ;;  %v317_v50 = vld [vmem:[%s6172_s7 + $0x380] sm:$0xff]  ;;  %v5965_v55 = vld [vmem:[%s7168_s1 + $0x178] sm:$0xff]   ;;  %v342_v1 = vld [vmem:[%s6172_s7 + $0x448] sm:$0xff] }
  0x2b   : > { %5339 = vmatprep.subr.bf16.mxu1 %v5943_v60  ;;  %v5967_v60 = vld [vmem:[%s7168_s1 + $0x1f8] sm:$0xff]   ;;  %v350_v10 = vld [vmem:[%s6172_s7 + $0x488] sm:$0xff]  ;;  %v4583_v13 = vcombine.low %v334_v0, %v342_v1 }
  0x2c   : > { %5228 = vmatpush3.bf16.msra.mxu0 %v5942_v58  ;;  %v5966_v58 = vld [vmem:[%s7168_s1 + $0x138] sm:$0xff]   ;;  %v358_v11 = vld [vmem:[%s6172_s7 + $0x4c8] sm:$0xff] }
  0x2d   : > { %5340 = vmatpush3.bf16.msra.mxu1 %v5944_v61  ;;  %5229 = vmatprep.subr.bf16.mxu0 %v5945_v2  ;;  %v5968_v61 = vld [vmem:[%s7168_s1 + $0x1b8] sm:$0xff]   ;;  %v5969_v2 = vld [vmem:[%s7168_s1 + $0x240] sm:$0xff]   ;;  %v382_v26 = vld [vmem:[%s6172_s7 + $0x588] sm:$0xff] }
  0x2e   : > { %5341 = vmatprep.subr.bf16.mxu1 %v5947_v7  ;;  %v4584_v7 = vcombine.high %v334_v0, %v342_v1  ;;  %v207_v0 = vld [vmem:[%s6172_s7 + $0x10] sm:$0xff] }
  0x2f   : > { %2806 = vmatmul.mubr.bf16.gmra.mrb[4].mxu0 %v4469_v54  ;;  %v4549_v54 = vcombine.low %v301_v35, %v309_v38  ;;  %v406_v35 = vld [vmem:[%s6172_s7 + $0x648] sm:$0xff]  ;;  %v215_v1 = vld [vmem:[%s6172_s7 + $0x50] sm:$0xff] }
  0x30   : > { %2967 = vmatmul.mubr.bf16.gmra.mrb[4].mxu1 %v4471_v56  ;;  %2813 = vmatprep.mubr.bf16.mxu0 %v4486_v57  ;;  %v4551_v56 = vcombine.low %v302_v40, %v310_v41  ;;  %v4566_v57 = vcombine.high %v317_v50, %v325_v51  ;;  %v413_v40 = vld [vmem:[%s6172_s7 + $0x680] sm:$0xff] }
  0x31   : > { %2974 = vmatprep.mubr.bf16.mxu1 %v4488_v59  ;;  %5230 = vmatpush3.bf16.msra.mxu0 %v5946_v4  ;;  %v4568_v59 = vcombine.high %v318_v52, %v326_v53  ;;  %v4567_v4 = vcombine.low %v318_v52, %v326_v53  ;;  %v421_v41 = vld [vmem:[%s6172_s7 + $0x6c0] sm:$0xff] }
  0x32   : > { %5342 = vmatpush3.bf16.msra.mxu1 %v5948_v9  ;;  %5231 = vmatprep.subr.bf16.mxu0 %v5949_v14  ;;  %v357_v9 = vld [vmem:[%s6172_s7 + $0x4c0] sm:$0xff]  ;;  %v4661_v52 = vcombine.low %v413_v40, %v421_v41 }
  0x33   : > { %5343 = vmatprep.subr.bf16.mxu1 %v5951_v17  ;;  %v373_v17 = vld [vmem:[%s6172_s7 + $0x540] sm:$0xff] }
  0x35   : > { %5232 = vmatpush3.bf16.msra.mxu0 %v5950_v15  ;;  %v4600_v15 = vcombine.high %v350_v10, %v358_v11 }
  0x36   : > { %5344 = vmatpush3.bf16.msra.mxu1 %v5952_v20  ;;  %5233 = vmatprep.subr.bf16.mxu0 %v5953_v24  ;;  %v381_v24 = vld [vmem:[%s6172_s7 + $0x580] sm:$0xff] }
  0x37   : > { %2814 = vmatmul.mubr.bf16.gmra.mrb[8].mxu0 %v4485_v3  ;;  %5345 = vmatprep.subr.bf16.mxu1 %v5955_v28  ;;  %v4565_v3 = vcombine.low %v317_v50, %v325_v51  ;;  %v430_v50 = vld [vmem:[%s6172_s7 + $0x708] sm:$0xff] }
  0x38   : > { %2975 = vmatmul.mubr.bf16.gmra.mrb[8].mxu1 %v4487_v5  ;;  %2821 = vmatprep.mubr.bf16.mxu0 %v4502_v6  ;;  %v4582_v5 = vcombine.high %v333_v62, %v341_v63  ;;  %v5971_v6 = vld [vmem:[%s7168_s1 + $0x2c0] sm:$0xff]   ;;  %v438_v51 = vld [vmem:[%s6172_s7 + $0x748] sm:$0xff] }
  0x39   : > { %2982 = vmatprep.mubr.bf16.mxu1 %v4504_v8  ;;  %5234 = vmatpush3.bf16.msra.mxu0 %v5954_v27  ;;  %v349_v8 = vld [vmem:[%s6172_s7 + $0x480] sm:$0xff]  ;;  %v390_v27 = vld [vmem:[%s6172_s7 + $0x5c8] sm:$0xff] }
  0x3a   : > { %5346 = vmatpush3.bf16.msra.mxu1 %v5956_v29  ;;  %5235 = vmatprep.subr.bf16.mxu0 %v5957_v34  ;;  %v4598_v14 = vcombine.high %v349_v8, %v357_v9  ;;  %v4597_v20 = vcombine.low %v349_v8, %v357_v9  ;;  %v398_v34 = vld [vmem:[%s6172_s7 + $0x608] sm:$0xff]  ;;  %v223_v8 = vld [vmem:[%s6172_s7 + $0x90] sm:$0xff] }
  0x3b   : > { %5347 = vmatprep.subr.bf16.mxu1 %v5959_v37  ;;  %v4631_v37 = vcombine.low %v382_v26, %v390_v27  ;;  %v231_v9 = vld [vmem:[%s6172_s7 + $0xd0] sm:$0xff] }
  0x3d   : > { %5236 = vmatpush3.bf16.msra.mxu0 %v5958_v36  ;;  %v4629_v36 = vcombine.low %v381_v24, %v389_v25 }
  0x3e   : > { %5348 = vmatpush3.bf16.msra.mxu1 %v5960_v39  ;;  %5237 = vmatprep.subr.bf16.mxu0 %v5961_v46  ;;  %v4648_v39 = vcombine.high %v398_v34, %v406_v35  ;;  %v4662_v46 = vcombine.high %v413_v40, %v421_v41  ;;  %v264_v40 = vld [vmem:[%s6172_s7 + $0x1d8] sm:$0xff] }
  0x3f   : > { %2822 = vmatmul.mubr.bf16.gmra.mrb[12].mxu0 %v4501_v16  ;;  %5349 = vmatprep.subr.bf16.mxu1 %v5963_v48  ;;  %v365_v16 = vld [vmem:[%s6172_s7 + $0x500] sm:$0xff]  ;;  %v5984_v41 = vld [vmem:[%s7168_s1 + $0x298] sm:$0xff]  }
  0x40   : > { %2983 = vmatmul.mubr.bf16.gmra.mrb[12].mxu1 %v4503_v18  ;;  %2829 = vmatprep.mubr.bf16.mxu0 %v4518_v19  ;;  %v366_v18 = vld [vmem:[%s6172_s7 + $0x508] sm:$0xff]  ;;  %v4614_v22 = vcombine.high %v365_v16, %v373_v17  ;;  %v4613_v28 = vcombine.low %v365_v16, %v373_v17  ;;  %v429_v48 = vld [vmem:[%s6172_s7 + $0x700] sm:$0xff]  ;;  %v4474_v16 = vcombine.high %v223_v8, %v231_v9 }
  0x41   : > { %2990 = vmatprep.mubr.bf16.mxu1 %v4520_v21  ;;  %5238 = vmatpush3.bf16.msra.mxu0 %v5962_v47  ;;  %v374_v19 = vld [vmem:[%s6172_s7 + $0x548] sm:$0xff]  ;;  %v4599_v21 = vcombine.low %v350_v10, %v358_v11  ;;  %v4457_v10 = vcombine.low %v207_v0, %v215_v1  ;;  %v224_v11 = vld [vmem:[%s6172_s7 + $0x98] sm:$0xff] }
  0x42   : > { %5350 = vmatpush3.bf16.msra.mxu1 %v5964_v49  ;;  %5239 = vmatprep.subr.bf16.mxu0 %v5965_v55  ;;  %v4616_v23 = vcombine.high %v366_v18, %v374_v19  ;;  %v4615_v29 = vcombine.low %v366_v18, %v374_v19  ;;  %v437_v49 = vld [vmem:[%s6172_s7 + $0x740] sm:$0xff]  ;;  %v4680_v55 = vcombine.high %v430_v50, %v438_v51  ;;  %v5973_v18 = vld [vmem:[%s7168_s1 + $0x248] sm:$0xff]  }
  0x43   : > { %5351 = vmatprep.subr.bf16.mxu1 %v5967_v60  ;;  %v4677_v60 = vcombine.low %v429_v48, %v437_v49  ;;  %v5975_v19 = vld [vmem:[%s7168_s1 + $0x2c8] sm:$0xff]  }
  0x45   : > { %5240 = vmatpush3.bf16.msra.mxu0 %v5966_v58  ;;  %v446_v58 = vld [vmem:[%s6172_s7 + $0x788] sm:$0xff] }
  0x46   : > { %5352 = vmatpush3.bf16.msra.mxu1 %v5968_v61  ;;  %5449 = vmatprep.subr.bf16.mxu0 %v5969_v2  ;;  %v4679_v61 = vcombine.low %v430_v50, %v438_v51  ;;  %v208_v2 = vld [vmem:[%s6172_s7 + $0x18] sm:$0xff]  ;;  %v5989_v50 = vld [vmem:[%s7168_s1 + $0x268] sm:$0xff]  }
  0x47   : > { %2830 = vmatmul.mubr.bf16.gmra.mrb[16].mxu0 %v4517_v30  ;;  %5561 = vmatprep.subr.bf16.mxu1 %v5971_v6  ;;  %v4630_v30 = vcombine.high %v381_v24, %v389_v25  ;;  %v4458_v6 = vcombine.high %v207_v0, %v215_v1  ;;  %v5977_v24 = vld [vmem:[%s7168_s1 + $0x250] sm:$0xff]   ;;  %v240_v25 = vld [vmem:[%s6172_s7 + $0x118] sm:$0xff]  ;;  %v5991_v51 = vld [vmem:[%s7168_s1 + $0x2e8] sm:$0xff]  }
  0x48   : > { %2991 = vmatmul.mubr.bf16.gmra.mrb[16].mxu1 %v4519_v31  ;;  %2837 = vmatprep.mubr.bf16.mxu0 %v4534_v32  ;;  %v4632_v31 = vcombine.high %v382_v26, %v390_v27  ;;  %v397_v32 = vld [vmem:[%s6172_s7 + $0x600] sm:$0xff]  ;;  %v248_v26 = vld [vmem:[%s6172_s7 + $0x158] sm:$0xff]  ;;  %v5979_v27 = vld [vmem:[%s7168_s1 + $0x2d0] sm:$0xff]  }
  0x49   : > { %2998 = vmatprep.mubr.bf16.mxu1 %v4536_v33  ;;  %v405_v33 = vld [vmem:[%s6172_s7 + $0x640] sm:$0xff]  ;;  %v5994_v0 = vld [vmem:[%s7168_s1 + $0x230] sm:$0xff]  }
  0x4a   : > { %v4646_v38 = vcombine.high %v397_v32, %v405_v33  ;;  %v5996_v1 = vld [vmem:[%s7168_s1 + $0x2b0] sm:$0xff]  }
  0x4f   : > { %2838 = vmatmul.mubr.bf16.gmra.mrb[20].mxu0 %v4533_v42  ;;  %v414_v42 = vld [vmem:[%s6172_s7 + $0x688] sm:$0xff] }
  0x50   : > { %2999 = vmatmul.mubr.bf16.gmra.mrb[20].mxu1 %v4535_v43  ;;  %2845 = vmatprep.mubr.bf16.mxu0 %v4550_v44  ;;  %v422_v43 = vld [vmem:[%s6172_s7 + $0x6c8] sm:$0xff]  ;;  %v4645_v44 = vcombine.low %v397_v32, %v405_v33  ;;  %v5978_v32 = vld [vmem:[%s7168_s1 + $0x210] sm:$0xff]  }
  0x51   : > { %3006 = vmatprep.mubr.bf16.mxu1 %v4552_v45  ;;  %v4647_v45 = vcombine.low %v398_v34, %v406_v35  ;;  %v4664_v47 = vcombine.high %v414_v42, %v422_v43  ;;  %v4663_v53 = vcombine.low %v414_v42, %v422_v43  ;;  %v5980_v33 = vld [vmem:[%s7168_s1 + $0x290] sm:$0xff]   ;;  %v5981_v34 = vld [vmem:[%s7168_s1 + $0x258] sm:$0xff]   ;;  %v5985_v42 = vld [vmem:[%s7168_s1 + $0x260] sm:$0xff]  }
  0x52   : > { %v5983_v35 = vld [vmem:[%s7168_s1 + $0x2d8] sm:$0xff]  }
  0x57   : > { %2846 = vmatmul.mubr.bf16.gmra.mrb[24].mxu0 %v4549_v54  ;;  %v4678_v54 = vcombine.high %v429_v48, %v437_v49  ;;  %v5986_v48 = vld [vmem:[%s7168_s1 + $0x220] sm:$0xff]  }
  0x58   : > { %3007 = vmatmul.mubr.bf16.gmra.mrb[24].mxu1 %v4551_v56  ;;  %2853 = vmatprep.mubr.bf16.mxu0 %v4566_v57  ;;  %v445_v56 = vld [vmem:[%s6172_s7 + $0x780] sm:$0xff] }
  0x59   : > { %3014 = vmatprep.mubr.bf16.mxu1 %v4568_v59  ;;  %v453_v57 = vld [vmem:[%s6172_s7 + $0x7c0] sm:$0xff]  ;;  %v454_v59 = vld [vmem:[%s6172_s7 + $0x7c8] sm:$0xff] }
  0x5a   : > { %v4694_v62 = vcombine.high %v445_v56, %v453_v57  ;;  %v4696_v63 = vcombine.high %v446_v58, %v454_v59  ;;  %v5988_v49 = vld [vmem:[%s7168_s1 + $0x2a0] sm:$0xff]  }
  0x5f   : > { %2854 = vmatmul.mubr.bf16.gmra.mrb[28].mxu0 %v4565_v3  ;;  %v216_v3 = vld [vmem:[%s6172_s7 + $0x58] sm:$0xff] }
  0x60   : > { %3015 = vmatmul.mubr.bf16.gmra.mrb[28].mxu1 %v4567_v4  ;;  %2861 = vmatprep.mubr.bf16.mxu0 %v4582_v5  ;;  %v4693_v4 = vcombine.low %v445_v56, %v453_v57  ;;  %v4695_v5 = vcombine.low %v446_v58, %v454_v59  ;;  %v280_v56 = vld [vmem:[%s6172_s7 + $0x258] sm:$0xff]  ;;  %v5992_v57 = vld [vmem:[%s7168_s1 + $0x2a8] sm:$0xff]   ;;  %v5993_v58 = vld [vmem:[%s7168_s1 + $0x270] sm:$0xff]  }
  0x61   : > { %3022 = vmatprep.mubr.bf16.mxu1 %v4584_v7  ;;  %v4460_v7 = vcombine.high %v208_v2, %v216_v3 }
  0x67   : > { %2862 = vmatmul.mubr.bf16.gmra.mrb[32].mxu0 %v4581_v12  ;;  %v232_v12 = vld [vmem:[%s6172_s7 + $0xd8] sm:$0xff] }
  0x68   : > { %3023 = vmatmul.mubr.bf16.gmra.mrb[32].mxu1 %v4583_v13  ;;  %2869 = vmatprep.mubr.bf16.mxu0 %v4598_v14  ;;  %v4459_v13 = vcombine.low %v208_v2, %v216_v3  ;;  %v5970_v14 = vld [vmem:[%s7168_s1 + $0x200] sm:$0xff]   ;;  %v4476_v17 = vcombine.high %v224_v11, %v232_v12  ;;  %v5997_v2 = vld [vmem:[%s7168_s1 + $0x278] sm:$0xff]  }
  0x69   : > { %3030 = vmatprep.mubr.bf16.mxu1 %v4600_v15  ;;  %v5972_v15 = vld [vmem:[%s7168_s1 + $0x280] sm:$0xff]   ;;  %v5999_v3 = vld [vmem:[%s7168_s1 + $0x2f8] sm:$0xff]  }
  0x6f   : > { %2870 = vmatmul.mubr.bf16.gmra.mrb[36].mxu0 %v4597_v20  ;;  %v239_v20 = vld [vmem:[%s6172_s7 + $0x110] sm:$0xff] }
  0x70   : > { %3031 = vmatmul.mubr.bf16.gmra.mrb[36].mxu1 %v4599_v21  ;;  %2877 = vmatprep.mubr.bf16.mxu0 %v4614_v22  ;;  %v5974_v21 = vld [vmem:[%s7168_s1 + $0x208] sm:$0xff]   ;;  %v247_v22 = vld [vmem:[%s6172_s7 + $0x150] sm:$0xff] }
  0x71   : > { %3038 = vmatprep.mubr.bf16.mxu1 %v4616_v23  ;;  %v5976_v23 = vld [vmem:[%s7168_s1 + $0x288] sm:$0xff]   ;;  %v4489_v43 = vcombine.low %v239_v20, %v247_v22 }
  0x77   : > { %2878 = vmatmul.mubr.bf16.gmra.mrb[40].mxu0 %v4613_v28  ;;  %v4473_v28 = vcombine.low %v223_v8, %v231_v9  ;;  %v296_v8 = vld [vmem:[%s6172_s7 + $0x2d8] sm:$0xff] }
  0x78   : > { %3039 = vmatmul.mubr.bf16.gmra.mrb[40].mxu1 %v4615_v29  ;;  %2885 = vmatprep.mubr.bf16.mxu0 %v4630_v30  ;;  %v4475_v29 = vcombine.low %v224_v11, %v232_v12  ;;  %v4490_v30 = vcombine.high %v239_v20, %v247_v22  ;;  %v6000_v9 = vld [vmem:[%s7168_s1 + $0x2b8] sm:$0xff]   ;;  %v6003_v12 = vld [vmem:[%s7168_s1 + $0x3c0] sm:$0xff]  }
  0x79   : > { %3046 = vmatprep.mubr.bf16.mxu1 %v4632_v31  ;;  %v4492_v31 = vcombine.high %v240_v25, %v248_v26 }
  0x7f   : > { %2886 = vmatmul.mubr.bf16.gmra.mrb[44].mxu0 %v4629_v36  ;;  %v255_v36 = vld [vmem:[%s6172_s7 + $0x190] sm:$0xff] }
  0x80   : > { %3047 = vmatmul.mubr.bf16.gmra.mrb[44].mxu1 %v4631_v37  ;;  %2893 = vmatprep.mubr.bf16.mxu0 %v4646_v38  ;;  %v263_v37 = vld [vmem:[%s6172_s7 + $0x1d0] sm:$0xff]  ;;  %v256_v38 = vld [vmem:[%s6172_s7 + $0x198] sm:$0xff] }
  0x81   : > { %3054 = vmatprep.mubr.bf16.mxu1 %v4648_v39  ;;  %v5982_v39 = vld [vmem:[%s7168_s1 + $0x218] sm:$0xff]   ;;  %v4505_v59 = vcombine.low %v255_v36, %v263_v37 }
  0x87   : > { %2894 = vmatmul.mubr.bf16.gmra.mrb[48].mxu0 %v4645_v44  ;;  %v5987_v44 = vld [vmem:[%s7168_s1 + $0x2e0] sm:$0xff]  }
  0x88   : > { %3055 = vmatmul.mubr.bf16.gmra.mrb[48].mxu1 %v4647_v45  ;;  %2901 = vmatprep.mubr.bf16.mxu0 %v4662_v46  ;;  %v4491_v45 = vcombine.low %v240_v25, %v248_v26  ;;  %v4506_v46 = vcombine.high %v255_v36, %v263_v37  ;;  %v327_v25 = vld [vmem:[%s6172_s7 + $0x3d0] sm:$0xff]  ;;  %v320_v26 = vld [vmem:[%s6172_s7 + $0x398] sm:$0xff] }
  0x89   : > { %3062 = vmatprep.mubr.bf16.mxu1 %v4664_v47  ;;  %v4508_v47 = vcombine.high %v256_v38, %v264_v40 }
  0x8f   : > { %2902 = vmatmul.mubr.bf16.gmra.mrb[52].mxu0 %v4661_v52  ;;  %v271_v52 = vld [vmem:[%s6172_s7 + $0x210] sm:$0xff] }
  0x90   : > { %3063 = vmatmul.mubr.bf16.gmra.mrb[52].mxu1 %v4663_v53  ;;  %2909 = vmatprep.mubr.bf16.mxu0 %v4678_v54  ;;  %v279_v53 = vld [vmem:[%s6172_s7 + $0x250] sm:$0xff]  ;;  %v272_v54 = vld [vmem:[%s6172_s7 + $0x218] sm:$0xff] }
  0x91   : > { %3070 = vmatprep.mubr.bf16.mxu1 %v4680_v55  ;;  %v5990_v55 = vld [vmem:[%s7168_s1 + $0x228] sm:$0xff]   ;;  %v4521_v11 = vcombine.low %v271_v52, %v279_v53 }
  0x97   : > { %2910 = vmatmul.mubr.bf16.gmra.mrb[56].mxu0 %v4677_v60  ;;  %v5995_v60 = vld [vmem:[%s7168_s1 + $0x2f0] sm:$0xff]  }
  0x98   : > { %3071 = vmatmul.mubr.bf16.gmra.mrb[56].mxu1 %v4679_v61  ;;  %2917 = vmatprep.mubr.bf16.mxu0 %v4694_v62  ;;  %v4507_v61 = vcombine.low %v256_v38, %v264_v40  ;;  %v4522_v62 = vcombine.high %v271_v52, %v279_v53  ;;  %v351_v40 = vld [vmem:[%s6172_s7 + $0x490] sm:$0xff] }
  0x99   : > { %3078 = vmatprep.mubr.bf16.mxu1 %v4696_v63  ;;  %v4524_v63 = vcombine.high %v272_v54, %v280_v56 }
  0x9f   : > { %2918 = vmatmul.mubr.bf16.gmra.mrb[60].mxu0 %v4693_v4  ;;  %v287_v4 = vld [vmem:[%s6172_s7 + $0x290] sm:$0xff] }
  0xa0   : > { %3079 = vmatmul.mubr.bf16.gmra.mrb[60].mxu1 %v4695_v5  ;;  %3119 = vmatprep.mubr.bf16.mxu0 %v4458_v6  ;;  %v295_v5 = vld [vmem:[%s6172_s7 + $0x2d0] sm:$0xff]  ;;  %v288_v6 = vld [vmem:[%s6172_s7 + $0x298] sm:$0xff] }
  0xa1   : > { %3280 = vmatprep.mubr.bf16.mxu1 %v4460_v7  ;;  %v5998_v7 = vld [vmem:[%s7168_s1 + $0x238] sm:$0xff]   ;;  %v4537_v20 = vcombine.low %v287_v4, %v295_v5 }
  0xa7   : > { %3120 = vmatmul.mubr.bf16.vlgmr.msra.gmra.mrb[64].mxu0 %v4457_v10  ;;  %v6001_v10 = vld [vmem:[%s7168_s1 + $0x340] sm:$0xff]  }
  0xa8   : > { %3281 = vmatmul.mubr.bf16.vlgmr.msra.gmra.mrb[64].mxu1 %v4459_v13  ;;  %5450 = vmatpush3.bf16.msra.mxu0 %v5970_v14  ;;  %v4523_v13 = vcombine.low %v272_v54, %v280_v56  ;;  %v4538_v14 = vcombine.high %v287_v4, %v295_v5  ;;  %v383_v56 = vld [vmem:[%s6172_s7 + $0x590] sm:$0xff]  ;;  %v408_v4 = vld [vmem:[%s6172_s7 + $0x658] sm:$0xff] }
  0xa9   : > { %5562 = vmatpush3.bf16.msra.mxu1 %v5972_v15  ;;  %3127 = vmatprep.mubr.bf16.mxu0 %v4474_v16  ;;  %v4540_v15 = vcombine.high %v288_v6, %v296_v8  ;;  %v303_v16 = vld [vmem:[%s6172_s7 + $0x310] sm:$0xff] }
  0xaa   : > { %3288 = vmatprep.mubr.bf16.mxu1 %v4476_v17  ;;  %5451 = vmatprep.subr.bf16.mxu0 %v5973_v18  ;;  %v311_v17 = vld [vmem:[%s6172_s7 + $0x350] sm:$0xff]  ;;  %v304_v18 = vld [vmem:[%s6172_s7 + $0x318] sm:$0xff] }
  0xab   : > { %5563 = vmatprep.subr.bf16.mxu1 %v5975_v19  ;;  %v312_v19 = vld [vmem:[%s6172_s7 + $0x358] sm:$0xff]  ;;  %v4554_v22 = vcombine.high %v303_v16, %v311_v17 }
  0xac   : > { %5452 = vmatpush3.bf16.msra.mxu0 %v5974_v21  ;;  %v4539_v21 = vcombine.low %v288_v6, %v296_v8 }
  0xad   : > { %5564 = vmatpush3.bf16.msra.mxu1 %v5976_v23  ;;  %5453 = vmatprep.subr.bf16.mxu0 %v5977_v24  ;;  %v4556_v23 = vcombine.high %v304_v18, %v312_v19  ;;  %v319_v24 = vld [vmem:[%s6172_s7 + $0x390] sm:$0xff] }
  0xae   : > { %5565 = vmatprep.subr.bf16.mxu1 %v5979_v27  ;;  %v328_v27 = vld [vmem:[%s6172_s7 + $0x3d8] sm:$0xff]  ;;  %v4569_v36 = vcombine.low %v319_v24, %v327_v25 }
  0xaf   : > { %3128 = vmatmul.mubr.bf16.gmra.mrb[68].mxu0 %v4473_v28  ;;  %v4553_v28 = vcombine.low %v303_v16, %v311_v17  ;;  %v4571_v37 = vcombine.low %v320_v26, %v328_v27 }
  0xb0   : > { %3289 = vmatmul.mubr.bf16.gmra.mrb[68].mxu1 %v4475_v29  ;;  %3135 = vmatprep.mubr.bf16.mxu0 %v4490_v30  ;;  %v4555_v29 = vcombine.low %v304_v18, %v312_v19  ;;  %v4570_v30 = vcombine.high %v319_v24, %v327_v25  ;;  %v416_v25 = vld [vmem:[%s6172_s7 + $0x698] sm:$0xff] }
  0xb1   : > { %3296 = vmatprep.mubr.bf16.mxu1 %v4492_v31  ;;  %5454 = vmatpush3.bf16.msra.mxu0 %v5978_v32  ;;  %v4572_v31 = vcombine.high %v320_v26, %v328_v27  ;;  %v335_v32 = vld [vmem:[%s6172_s7 + $0x410] sm:$0xff]  ;;  %v424_v26 = vld [vmem:[%s6172_s7 + $0x6d8] sm:$0xff] }
  0xb2   : > { %5566 = vmatpush3.bf16.msra.mxu1 %v5980_v33  ;;  %5455 = vmatprep.subr.bf16.mxu0 %v5981_v34  ;;  %v343_v33 = vld [vmem:[%s6172_s7 + $0x450] sm:$0xff]  ;;  %v336_v34 = vld [vmem:[%s6172_s7 + $0x418] sm:$0xff] }
  0xb3   : > { %5567 = vmatprep.subr.bf16.mxu1 %v5983_v35  ;;  %v344_v35 = vld [vmem:[%s6172_s7 + $0x458] sm:$0xff]  ;;  %v4586_v38 = vcombine.high %v335_v32, %v343_v33 }
  0xb5   : > { %5456 = vmatpush3.bf16.msra.mxu0 %v5982_v39  ;;  %v4588_v39 = vcombine.high %v336_v34, %v344_v35 }
  0xb6   : > { %5568 = vmatpush3.bf16.msra.mxu1 %v5984_v41  ;;  %5457 = vmatprep.subr.bf16.mxu0 %v5985_v42  ;;  %v359_v41 = vld [vmem:[%s6172_s7 + $0x4d0] sm:$0xff]  ;;  %v352_v42 = vld [vmem:[%s6172_s7 + $0x498] sm:$0xff] }
  0xb7   : > { %3136 = vmatmul.mubr.bf16.gmra.mrb[72].mxu0 %v4489_v43  ;;  %5569 = vmatprep.subr.bf16.mxu1 %v5987_v44  ;;  %v360_v43 = vld [vmem:[%s6172_s7 + $0x4d8] sm:$0xff]  ;;  %v4585_v44 = vcombine.low %v335_v32, %v343_v33  ;;  %v4601_v52 = vcombine.low %v351_v40, %v359_v41 }
  0xb8   : > { %3297 = vmatmul.mubr.bf16.gmra.mrb[72].mxu1 %v4491_v45  ;;  %3143 = vmatprep.mubr.bf16.mxu0 %v4506_v46  ;;  %v4587_v45 = vcombine.low %v336_v34, %v344_v35  ;;  %v4602_v46 = vcombine.high %v351_v40, %v359_v41  ;;  %v4603_v53 = vcombine.low %v352_v42, %v360_v43 }
  0xb9   : > { %3304 = vmatprep.mubr.bf16.mxu1 %v4508_v47  ;;  %5458 = vmatpush3.bf16.msra.mxu0 %v5986_v48  ;;  %v4604_v47 = vcombine.high %v352_v42, %v360_v43  ;;  %v367_v48 = vld [vmem:[%s6172_s7 + $0x510] sm:$0xff] }
  0xba   : > { %5570 = vmatpush3.bf16.msra.mxu1 %v5988_v49  ;;  %5459 = vmatprep.subr.bf16.mxu0 %v5989_v50  ;;  %v375_v49 = vld [vmem:[%s6172_s7 + $0x550] sm:$0xff]  ;;  %v368_v50 = vld [vmem:[%s6172_s7 + $0x518] sm:$0xff] }
  0xbb   : > { %5571 = vmatprep.subr.bf16.mxu1 %v5991_v51  ;;  %v376_v51 = vld [vmem:[%s6172_s7 + $0x558] sm:$0xff]  ;;  %v4618_v54 = vcombine.high %v367_v48, %v375_v49 }
  0xbd   : > { %5460 = vmatpush3.bf16.msra.mxu0 %v5990_v55  ;;  %v4620_v55 = vcombine.high %v368_v50, %v376_v51 }
  0xbe   : > { %5572 = vmatpush3.bf16.msra.mxu1 %v5992_v57  ;;  %5461 = vmatprep.subr.bf16.mxu0 %v5993_v58  ;;  %v391_v57 = vld [vmem:[%s6172_s7 + $0x5d0] sm:$0xff]  ;;  %v384_v58 = vld [vmem:[%s6172_s7 + $0x598] sm:$0xff] }
  0xbf   : > { %3144 = vmatmul.mubr.bf16.gmra.mrb[76].mxu0 %v4505_v59  ;;  %5573 = vmatprep.subr.bf16.mxu1 %v5995_v60  ;;  %v392_v59 = vld [vmem:[%s6172_s7 + $0x5d8] sm:$0xff]  ;;  %v4617_v60 = vcombine.low %v367_v48, %v375_v49 }
  0xc0   : > { %3305 = vmatmul.mubr.bf16.gmra.mrb[76].mxu1 %v4507_v61  ;;  %3151 = vmatprep.mubr.bf16.mxu0 %v4522_v62  ;;  %v4619_v61 = vcombine.low %v368_v50, %v376_v51  ;;  %v4634_v62 = vcombine.high %v383_v56, %v391_v57  ;;  %v440_v48 = vld [vmem:[%s6172_s7 + $0x758] sm:$0xff] }
  0xc1   : > { %3312 = vmatprep.mubr.bf16.mxu1 %v4524_v63  ;;  %5462 = vmatpush3.bf16.msra.mxu0 %v5994_v0  ;;  %v4636_v63 = vcombine.high %v384_v58, %v392_v59  ;;  %v399_v0 = vld [vmem:[%s6172_s7 + $0x610] sm:$0xff] }
  0xc2   : > { %5574 = vmatpush3.bf16.msra.mxu1 %v5996_v1  ;;  %5463 = vmatprep.subr.bf16.mxu0 %v5997_v2  ;;  %v407_v1 = vld [vmem:[%s6172_s7 + $0x650] sm:$0xff] }
  0xc3   : > { %5575 = vmatprep.subr.bf16.mxu1 %v5999_v3  ;;  %v400_v3 = vld [vmem:[%s6172_s7 + $0x618] sm:$0xff] }
  0xc4   : > { %v4652_v16 = vcombine.high %v400_v3, %v408_v4  ;;  %v4651_v33 = vcombine.low %v400_v3, %v408_v4  ;;  %v455_v3 = vld [vmem:[%s6172_s7 + $0x7d0] sm:$0xff] }
  0xc5   : > { %5464 = vmatpush3.bf16.msra.mxu0 %v5998_v7  ;;  %v4633_v7 = vcombine.low %v383_v56, %v391_v57 }
  0xc6   : > { %5576 = vmatpush3.bf16.msra.mxu1 %v6000_v9  ;;  %5673 = vmatprep.subr.bf16.mxu0 %v6001_v10 }
  0xc7   : > { %3152 = vmatmul.mubr.bf16.gmra.mrb[80].mxu0 %v4521_v11  ;;  %5785 = vmatprep.subr.bf16.mxu1 %v6003_v12  ;;  %v4635_v11 = vcombine.low %v384_v58, %v392_v59  ;;  %v4650_v12 = vcombine.high %v399_v0, %v407_v1 }
  0xc8   : > { %3313 = vmatmul.mubr.bf16.gmra.mrb[80].mxu1 %v4523_v13  ;;  %3159 = vmatprep.mubr.bf16.mxu0 %v4538_v14 }
  0xc9   : > { %3320 = vmatprep.mubr.bf16.mxu1 %v4540_v15 }
  0xcf   : > { %3160 = vmatmul.mubr.bf16.gmra.mrb[84].mxu0 %v4537_v20 }
  0xd0   : > { %3321 = vmatmul.mubr.bf16.gmra.mrb[84].mxu1 %v4539_v21  ;;  %3167 = vmatprep.mubr.bf16.mxu0 %v4554_v22  ;;  %v415_v22 = vld [vmem:[%s6172_s7 + $0x690] sm:$0xff] }
  0xd1   : > { %3328 = vmatprep.mubr.bf16.mxu1 %v4556_v23  ;;  %v423_v23 = vld [vmem:[%s6172_s7 + $0x6d0] sm:$0xff] }
  0xd2   : > { %v4666_v34 = vcombine.high %v415_v22, %v423_v23  ;;  %v4665_v51 = vcombine.low %v415_v22, %v423_v23 }
  0xd7   : > { %3168 = vmatmul.mubr.bf16.gmra.mrb[88].mxu0 %v4553_v28 }
  0xd8   : > { %3329 = vmatmul.mubr.bf16.gmra.mrb[88].mxu1 %v4555_v29  ;;  %3175 = vmatprep.mubr.bf16.mxu0 %v4570_v30  ;;  %v4649_v29 = vcombine.low %v399_v0, %v407_v1 }
  0xd9   : > { %3336 = vmatprep.mubr.bf16.mxu1 %v4572_v31 }
  0xdf   : > { %3176 = vmatmul.mubr.bf16.gmra.mrb[92].mxu0 %v4569_v36 }
  0xe0   : > { %3337 = vmatmul.mubr.bf16.gmra.mrb[92].mxu1 %v4571_v37  ;;  %3183 = vmatprep.mubr.bf16.mxu0 %v4586_v38  ;;  %v4668_v38 = vcombine.high %v416_v25, %v424_v26 }
  0xe1   : > { %3344 = vmatprep.mubr.bf16.mxu1 %v4588_v39 }
  0xe7   : > { %3184 = vmatmul.mubr.bf16.gmra.mrb[96].mxu0 %v4585_v44  ;;  %v431_v44 = vld [vmem:[%s6172_s7 + $0x710] sm:$0xff] }
  0xe8   : > { %3345 = vmatmul.mubr.bf16.gmra.mrb[96].mxu1 %v4587_v45  ;;  %3191 = vmatprep.mubr.bf16.mxu0 %v4602_v46  ;;  %v439_v45 = vld [vmem:[%s6172_s7 + $0x750] sm:$0xff] }
  0xe9   : > { %3352 = vmatprep.mubr.bf16.mxu1 %v4604_v47  ;;  %v432_v47 = vld [vmem:[%s6172_s7 + $0x718] sm:$0xff]  ;;  %v4682_v56 = vcombine.high %v431_v44, %v439_v45 }
  0xef   : > { %3192 = vmatmul.mubr.bf16.gmra.mrb[100].mxu0 %v4601_v52 }
  0xf0   : > { %3353 = vmatmul.mubr.bf16.gmra.mrb[100].mxu1 %v4603_v53  ;;  %3199 = vmatprep.mubr.bf16.mxu0 %v4618_v54 }
  0xf1   : > { %3360 = vmatprep.mubr.bf16.mxu1 %v4620_v55  ;;  %v4667_v55 = vcombine.low %v416_v25, %v424_v26  ;;  %v209_v26 = vld [vmem:[%s6172_s7 + $0x20] sm:$0xff] }
  0xf7   : > { %3200 = vmatmul.mubr.bf16.gmra.mrb[104].mxu0 %v4617_v60  ;;  %v4684_v60 = vcombine.high %v432_v47, %v440_v48 }
  0xf8   : > { %3361 = vmatmul.mubr.bf16.gmra.mrb[104].mxu1 %v4619_v61  ;;  %3207 = vmatprep.mubr.bf16.mxu0 %v4634_v62 }
  0xf9   : > { %3368 = vmatprep.mubr.bf16.mxu1 %v4636_v63 }
  0xfa   : > { %v5017_v2 = vpop.f32.mrb[0].mxu0 }
  0xfb   : > { %v5129_v5 = vpop.f32.mrb[0].mxu1  ;;  %v5018_v6 = vpop.f32.mrb[1].mxu0 }
  0xfc   : > { %v5019_v8 = vadd.f32 %v5018_v6, %v5017_v2  ;;  %v5130_v9 = vpop.f32.mrb[1].mxu1  ;;  %v5020_v10 = vpop.f32.mrb[2].mxu0  ;;  %v447_v2 = vld [vmem:[%s6172_s7 + $0x790] sm:$0xff]  ;;  %v456_v6 = vld [vmem:[%s6172_s7 + $0x7d8] sm:$0xff] }
  0xfd   : > { %v5131_v13 = vadd.f32 %v5130_v9, %v5129_v5  ;;  %v5132_v14 = vpop.f32.mrb[2].mxu1  ;;  %v5021_v15 = vpop.f32.mrb[3].mxu0  ;;  %v448_v5 = vld [vmem:[%s6172_s7 + $0x798] sm:$0xff]  ;;  %v4681_v9 = vcombine.low %v431_v44, %v439_v45 }
  0xfe   : > { %v5022_v17 = vadd.f32 %v5021_v15, %v5020_v10  ;;  %v5133_v18 = vpop.f32.mrb[3].mxu1 }
  0xff   : > { %v6494_v19 = vadd.f32 %v5131_v13, %v5019_v8  ;;  %v5134_v20 = vadd.f32 %v5133_v18, %v5132_v14  ;;  %3208 = vmatmul.mubr.bf16.gmra.mrb[108].mxu0 %v4633_v7  ;;  %v4683_v13 = vcombine.low %v432_v47, %v440_v48  ;;  %v4698_v14 = vcombine.high %v447_v2, %v455_v3 }
 0x100   : > { %3369 = vmatmul.mubr.bf16.gmra.mrb[108].mxu1 %v4635_v11  ;;  %3215 = vmatprep.mubr.bf16.mxu0 %v4650_v12  ;;  %v4700_v18 = vcombine.high %v448_v5, %v456_v6 }
 0x101   : > { %v6496_v21 = vadd.f32 %v5134_v20, %v5022_v17  ;;  %3376 = vmatprep.mubr.bf16.mxu1 %v4652_v16 }
 0x102   : > { %v5023_v24 = vpop.f32.mrb[4].mxu0 }
 0x103   : > { %v5135_v27 = vpop.f32.mrb[4].mxu1  ;;  %v5024_v28 = vpop.f32.mrb[5].mxu0 }
 0x104   : > { %v5025_v30 = vadd.f32 %v5024_v28, %v5023_v24  ;;  %v5136_v31 = vpop.f32.mrb[5].mxu1  ;;  %v5026_v32 = vpop.f32.mrb[6].mxu0 }
 0x105   : > { %v5137_v35 = vadd.f32 %v5136_v31, %v5135_v27  ;;  %v5138_v36 = vpop.f32.mrb[6].mxu1  ;;  %v5027_v37 = vpop.f32.mrb[7].mxu0  ;;  %v217_v27 = vld [vmem:[%s6172_s7 + $0x60] sm:$0xff] }
 0x106   : > { %v5028_v39 = vadd.f32 %v5027_v37, %v5026_v32  ;;  %v5139_v40 = vpop.f32.mrb[7].mxu1  ;;  %v4699_v37 = vcombine.low %v448_v5, %v456_v6 }
 0x107   : > { %v6502_v41 = vadd.f32 %v5137_v35, %v5025_v30  ;;  %v5140_v42 = vadd.f32 %v5139_v40, %v5138_v36  ;;  %3216 = vmatmul.mubr.bf16.gmra.mrb[112].mxu0 %v4649_v29  ;;  %v210_v29 = vld [vmem:[%s6172_s7 + $0x28] sm:$0xff] }
 0x108   : > { %3377 = vmatmul.mubr.bf16.gmra.mrb[112].mxu1 %v4651_v33  ;;  %3223 = vmatprep.mubr.bf16.mxu0 %v4666_v34  ;;  %v218_v30 = vld [vmem:[%s6172_s7 + $0x68] sm:$0xff]  ;;  %v4697_v33 = vcombine.low %v447_v2, %v455_v3 }
 0x109   : > { %v6504_v43 = vadd.f32 %v5140_v42, %v5028_v39  ;;  %3384 = vmatprep.mubr.bf16.mxu1 %v4668_v38  ;;  %v4462_v38 = vcombine.high %v209_v26, %v217_v27  ;;  %v4464_v44 = vcombine.high %v210_v29, %v218_v30 }
 0x10a   : > { %v5029_v46 = vpop.f32.mrb[8].mxu0 }
 0x10b   : > { %v5141_v49 = vpop.f32.mrb[8].mxu1  ;;  %v5030_v50 = vpop.f32.mrb[9].mxu0 }
 0x10c   : > { %v5031_v52 = vadd.f32 %v5030_v50, %v5029_v46  ;;  %v5142_v53 = vpop.f32.mrb[9].mxu1  ;;  %v5032_v54 = vpop.f32.mrb[10].mxu0 }
 0x10d   : > { %v5143_v57 = vadd.f32 %v5142_v53, %v5141_v49  ;;  %v5144_v58 = vpop.f32.mrb[10].mxu1  ;;  %v5033_v59 = vpop.f32.mrb[11].mxu0 }
 0x10e   : > { %v5034_v61 = vadd.f32 %v5033_v59, %v5032_v54  ;;  %v5145_v62 = vpop.f32.mrb[11].mxu1 }
 0x10f   : > { %v6510_v63 = vadd.f32 %v5143_v57, %v5031_v52  ;;  %v5146_v0 = vadd.f32 %v5145_v62, %v5144_v58  ;;  %3224 = vmatmul.mubr.bf16.gmra.mrb[116].mxu0 %v4665_v51  ;;  %v6531_v51 = vld [vmem:[%s6172_s7 + $0xa0] sm:$0xff]  ;;  %v234_v57 = vld [vmem:[%s6172_s7 + $0xe8] sm:$0xff] }
 0x110   : > { %3385 = vmatmul.mubr.bf16.gmra.mrb[116].mxu1 %v4667_v55  ;;  %3231 = vmatprep.mubr.bf16.mxu0 %v4682_v56  ;;  %v6534_v52 = vld [vmem:[%s6172_s7 + $0xe0] sm:$0xff]  ;;  %v4461_v55 = vcombine.low %v209_v26, %v217_v27  ;;  %v226_v56 = vld [vmem:[%s6172_s7 + $0xa8] sm:$0xff]  ;;  %v6011_v26 = vld [vmem:[%s7168_s1 + $0x3d0] sm:$0xff]  }
 0x111   : > { %v6512_v1 = vadd.f32 %v5146_v0, %v5034_v61  ;;  %3392 = vmatprep.mubr.bf16.mxu1 %v4684_v60  ;;  %v4463_v61 = vcombine.low %v210_v29, %v218_v30  ;;  %v6002_v62 = vld [vmem:[%s7168_s1 + $0x300] sm:$0xff]   ;;  %v4478_v5 = vcombine.high %v6531_v51, %v6534_v52  ;;  %v4477_v29 = vcombine.low %v6531_v51, %v6534_v52 }
 0x112   : > { %v5035_v4 = vpop.f32.mrb[12].mxu0  ;;  %v6601_v51 = vld [vmem:[%s6172_s7 + $0x1a0] sm:$0xff] }
 0x113   : > { %v5147_v7 = vpop.f32.mrb[12].mxu1  ;;  %v5036_v8 = vpop.f32.mrb[13].mxu0 }
 0x114   : > { %v5037_v10 = vadd.f32 %v5036_v8, %v5035_v4  ;;  %v5148_v11 = vpop.f32.mrb[13].mxu1  ;;  %v5038_v12 = vpop.f32.mrb[14].mxu0  ;;  %v6004_v4 = vld [vmem:[%s7168_s1 + $0x380] sm:$0xff]   ;;  %v4480_v8 = vcombine.high %v226_v56, %v234_v57 }
 0x115   : > { %v5149_v15 = vadd.f32 %v5148_v11, %v5147_v7  ;;  %v5150_v16 = vpop.f32.mrb[14].mxu1  ;;  %v5039_v17 = vpop.f32.mrb[15].mxu0 }
 0x116   : > { %v5040_v20 = vadd.f32 %v5039_v17, %v5038_v12  ;;  %v5151_v22 = vpop.f32.mrb[15].mxu1  ;;  %v6007_v12 = vld [vmem:[%s7168_s1 + $0x3c8] sm:$0xff]  }
 0x117   : > { %v6518_v23 = vadd.f32 %v5149_v15, %v5037_v10  ;;  %v5152_v24 = vadd.f32 %v5151_v22, %v5150_v16  ;;  %3232 = vmatmul.mubr.bf16.gmra.mrb[120].mxu0 %v4681_v9  ;;  %v6005_v9 = vld [vmem:[%s7168_s1 + $0x348] sm:$0xff]   ;;  %v6563_v16 = vld [vmem:[%s6172_s7 + $0x160] sm:$0xff] }
 0x118   : > { %3393 = vmatmul.mubr.bf16.gmra.mrb[120].mxu1 %v4683_v13  ;;  %3239 = vmatprep.mubr.bf16.mxu0 %v4698_v14  ;;  %v6555_v13 = vld [vmem:[%s6172_s7 + $0x120] sm:$0xff]  ;;  %v6006_v14 = vld [vmem:[%s7168_s1 + $0x308] sm:$0xff]  }
 0x119   : > { %v6520_v25 = vadd.f32 %v5152_v24, %v5040_v20  ;;  %3400 = vmatprep.mubr.bf16.mxu1 %v4700_v18  ;;  %v6008_v17 = vld [vmem:[%s7168_s1 + $0x388] sm:$0xff]   ;;  %v6009_v18 = vld [vmem:[%s7168_s1 + $0x350] sm:$0xff]  }
 0x11a   : > { %v5041_v28 = vpop.f32.mrb[16].mxu0  ;;  %v6572_v22 = vld [vmem:[%s6172_s7 + $0x128] sm:$0xff] }
 0x11b   : > { %v5153_v31 = vpop.f32.mrb[16].mxu1  ;;  %v5042_v32 = vpop.f32.mrb[17].mxu0  ;;  %v6575_v24 = vld [vmem:[%s6172_s7 + $0x168] sm:$0xff] }
 0x11c   : > { %v5043_v34 = vadd.f32 %v5042_v32, %v5041_v28  ;;  %v5154_v35 = vpop.f32.mrb[17].mxu1  ;;  %v5044_v36 = vpop.f32.mrb[18].mxu0 }
 0x11d   : > { %v5155_v39 = vadd.f32 %v5154_v35, %v5153_v31  ;;  %v5156_v40 = vpop.f32.mrb[18].mxu1  ;;  %v5045_v42 = vpop.f32.mrb[19].mxu0 }
 0x11e   : > { %v5046_v45 = vadd.f32 %v5045_v42, %v5044_v36  ;;  %v5157_v46 = vpop.f32.mrb[19].mxu1 }
 0x11f   : > { %v6526_v47 = vadd.f32 %v5155_v39, %v5043_v34  ;;  %v5158_v48 = vadd.f32 %v5157_v46, %v5156_v40  ;;  %3240 = vmatmul.mubr.bf16.gmra.mrb[124].mxu0 %v4697_v33  ;;  %v4479_v33 = vcombine.low %v226_v56, %v234_v57  ;;  %v4494_v34 = vcombine.high %v6555_v13, %v6563_v16  ;;  %v6010_v39 = vld [vmem:[%s7168_s1 + $0x310] sm:$0xff]   ;;  %v6615_v57 = vld [vmem:[%s6172_s7 + $0x1e8] sm:$0xff] }
 0x120   : > { %3401 = vmatmul.mubr.bf16.gmra.mrb[124].mxu1 %v4699_v37  ;;  %3441 = vmatprep.mubr.bf16.mxu0 %v4462_v38  ;;  %v4496_v38 = vcombine.high %v6572_v22, %v6575_v24 }
 0x121   : > { %v6528_v49 = vadd.f32 %v5158_v48, %v5046_v45  ;;  %3602 = vmatprep.mubr.bf16.mxu1 %v4464_v44  ;;  %v6012_v44 = vld [vmem:[%s7168_s1 + $0x390] sm:$0xff]   ;;  %v6013_v45 = vld [vmem:[%s7168_s1 + $0x358] sm:$0xff]  }
 0x122   : > { %v5047_v50 = vpop.f32.mrb[20].mxu0 }
 0x123   : > { %v5159_v53 = vpop.f32.mrb[20].mxu1  ;;  %v5048_v54 = vpop.f32.mrb[21].mxu0 }
 0x124   : > { %v5049_v58 = vadd.f32 %v5048_v54, %v5047_v50  ;;  %v5160_v59 = vpop.f32.mrb[21].mxu1  ;;  %v5050_v60 = vpop.f32.mrb[22].mxu0  ;;  %v6015_v50 = vld [vmem:[%s7168_s1 + $0x3d8] sm:$0xff]   ;;  %v6609_v54 = vld [vmem:[%s6172_s7 + $0x1a8] sm:$0xff] }
 0x125   : > { %v5161_v0 = vadd.f32 %v5160_v59, %v5159_v53  ;;  %v5162_v2 = vpop.f32.mrb[22].mxu1  ;;  %v5051_v3 = vpop.f32.mrb[23].mxu0  ;;  %v6606_v53 = vld [vmem:[%s6172_s7 + $0x1e0] sm:$0xff] }
 0x126   : > { %v5052_v6 = vadd.f32 %v5051_v3, %v5050_v60  ;;  %v5163_v7 = vpop.f32.mrb[23].mxu1  ;;  %v6017_v59 = vld [vmem:[%s7168_s1 + $0x360] sm:$0xff]  }
 0x127   : > { %v6549_v10 = vadd.f32 %v5161_v0, %v5049_v58  ;;  %v5164_v11 = vadd.f32 %v5163_v7, %v5162_v2  ;;  %3442 = vmatmul.mubr.bf16.vlgmr.msra.gmra.mrb[128].mxu0 %v4461_v55  ;;  %v6014_v55 = vld [vmem:[%s7168_s1 + $0x318] sm:$0xff]   ;;  %v6019_v0 = vld [vmem:[%s7168_s1 + $0x3e0] sm:$0xff]  }
 0x128   : > { %3603 = vmatmul.mubr.bf16.vlgmr.msra.gmra.mrb[128].mxu1 %v4463_v61  ;;  %5674 = vmatpush3.bf16.msra.mxu0 %v6002_v62  ;;  %v6016_v58 = vld [vmem:[%s7168_s1 + $0x398] sm:$0xff]   ;;  %v4493_v62 = vcombine.low %v6555_v13, %v6563_v16  ;;  %v6020_v16 = vld [vmem:[%s7168_s1 + $0x3a0] sm:$0xff]  }
 0x129   : > { %v6560_v15 = vadd.f32 %v5164_v11, %v5052_v6  ;;  %5786 = vmatpush3.bf16.msra.mxu1 %v6004_v4  ;;  %3449 = vmatprep.mubr.bf16.mxu0 %v4478_v5  ;;  %v4495_v5 = vcombine.low %v6572_v22, %v6575_v24  ;;  %v4510_v6 = vcombine.high %v6601_v51, %v6606_v53  ;;  %v6023_v22 = vld [vmem:[%s7168_s1 + $0x3e8] sm:$0xff]   ;;  %v6649_v24 = vld [vmem:[%s6172_s7 + $0x220] sm:$0xff] }
 0x12a   : > { %v5053_v20 = vpop.f32.mrb[24].mxu0  ;;  %3610 = vmatprep.mubr.bf16.mxu1 %v4480_v8  ;;  %5675 = vmatprep.subr.bf16.mxu0 %v6005_v9  ;;  %v4512_v11 = vcombine.high %v6609_v54, %v6615_v57 }
 0x12b   : > { %v5165_v27 = vpop.f32.mrb[24].mxu1  ;;  %v5054_v28 = vpop.f32.mrb[25].mxu0  ;;  %5787 = vmatprep.subr.bf16.mxu1 %v6007_v12  ;;  %v6018_v12 = vld [vmem:[%s7168_s1 + $0x320] sm:$0xff]  }
 0x12c   : > { %v5055_v30 = vadd.f32 %v5054_v28, %v5053_v20  ;;  %v5166_v31 = vpop.f32.mrb[25].mxu1  ;;  %v5056_v32 = vpop.f32.mrb[26].mxu0  ;;  %5676 = vmatpush3.bf16.msra.mxu0 %v6006_v14  ;;  %v6657_v28 = vld [vmem:[%s6172_s7 + $0x228] sm:$0xff] }
 0x12d   : > { %v5167_v35 = vadd.f32 %v5166_v31, %v5165_v27  ;;  %v5168_v36 = vpop.f32.mrb[26].mxu1  ;;  %v5057_v37 = vpop.f32.mrb[27].mxu0  ;;  %5788 = vmatpush3.bf16.msra.mxu1 %v6008_v17  ;;  %5677 = vmatprep.subr.bf16.mxu0 %v6009_v18  ;;  %v6021_v17 = vld [vmem:[%s7168_s1 + $0x368] sm:$0xff]   ;;  %v6654_v27 = vld [vmem:[%s6172_s7 + $0x260] sm:$0xff] }
 0x12e   : > { %v5058_v40 = vadd.f32 %v5057_v37, %v5056_v32  ;;  %v5169_v42 = vpop.f32.mrb[27].mxu1  ;;  %5789 = vmatprep.subr.bf16.mxu1 %v6011_v26  ;;  %v6663_v31 = vld [vmem:[%s6172_s7 + $0x268] sm:$0xff]  ;;  %v6027_v37 = vld [vmem:[%s7168_s1 + $0x3f0] sm:$0xff]  }
 0x12f   : > { %v6595_v46 = vadd.f32 %v5167_v35, %v5055_v30  ;;  %v5170_v48 = vadd.f32 %v5169_v42, %v5168_v36  ;;  %3450 = vmatmul.mubr.bf16.gmra.mrb[132].mxu0 %v4477_v29  ;;  %v6022_v29 = vld [vmem:[%s7168_s1 + $0x328] sm:$0xff]   ;;  %v4509_v36 = vcombine.low %v6601_v51, %v6606_v53  ;;  %v4511_v42 = vcombine.low %v6609_v54, %v6615_v57  ;;  %v6026_v53 = vld [vmem:[%s7168_s1 + $0x330] sm:$0xff]   ;;  %v6029_v57 = vld [vmem:[%s7168_s1 + $0x378] sm:$0xff]  }
 0x130   : > { %3611 = vmatmul.mubr.bf16.gmra.mrb[132].mxu1 %v4479_v33  ;;  %3457 = vmatprep.mubr.bf16.mxu0 %v4494_v34  ;;  %v6024_v32 = vld [vmem:[%s7168_s1 + $0x3a8] sm:$0xff]   ;;  %v6025_v33 = vld [vmem:[%s7168_s1 + $0x370] sm:$0xff]   ;;  %v4528_v51 = vcombine.high %v6657_v28, %v6663_v31 }
 0x131   : > { %v6603_v52 = vadd.f32 %v5170_v48, %v5058_v40  ;;  %3618 = vmatprep.mubr.bf16.mxu1 %v4496_v38  ;;  %5678 = vmatpush3.bf16.msra.mxu0 %v6010_v39  ;;  %v6028_v54 = vld [vmem:[%s7168_s1 + $0x3b0] sm:$0xff]  }
 0x132   : > { %v5059_v56 = vpop.f32.mrb[28].mxu0  ;;  %5790 = vmatpush3.bf16.msra.mxu1 %v6012_v44  ;;  %5679 = vmatprep.subr.bf16.mxu0 %v6013_v45  ;;  %v4526_v44 = vcombine.high %v6649_v24, %v6654_v27 }
 0x133   : > { %v5171_v60 = vpop.f32.mrb[28].mxu1  ;;  %v5060_v61 = vpop.f32.mrb[29].mxu0  ;;  %5791 = vmatprep.subr.bf16.mxu1 %v6015_v50 }
 0x134   : > { %v5061_v2 = vadd.f32 %v5060_v61, %v5059_v56  ;;  %v5172_v3 = vpop.f32.mrb[29].mxu1  ;;  %v5062_v4 = vpop.f32.mrb[30].mxu0 }
 0x135   : > { %v5173_v7 = vadd.f32 %v5172_v3, %v5171_v60  ;;  %v5174_v8 = vpop.f32.mrb[30].mxu1  ;;  %v5063_v9 = vpop.f32.mrb[31].mxu0  ;;  %5680 = vmatpush3.bf16.msra.mxu0 %v6014_v55  ;;  %v6031_v60 = vld [vmem:[%s7168_s1 + $0x3f8] sm:$0xff]  }
 0x136   : > { %v5064_v13 = vadd.f32 %v5063_v9, %v5062_v4  ;;  %v5175_v14 = vpop.f32.mrb[31].mxu1  ;;  %5792 = vmatpush3.bf16.msra.mxu1 %v6016_v58  ;;  %5681 = vmatprep.subr.bf16.mxu0 %v6017_v59  ;;  %v290_v4 = vld [vmem:[%s6172_s7 + $0x2a8] sm:$0xff]  ;;  %v4525_v9 = vcombine.low %v6649_v24, %v6654_v27 }
 0x137   : > { %v6643_v18 = vadd.f32 %v5173_v7, %v5061_v2  ;;  %v5176_v20 = vadd.f32 %v5175_v14, %v5174_v8  ;;  %3458 = vmatmul.mubr.bf16.gmra.mrb[136].mxu0 %v4493_v62  ;;  %5793 = vmatprep.subr.bf16.mxu1 %v6019_v0  ;;  %v289_v62 = vld [vmem:[%s6172_s7 + $0x2a0] sm:$0xff]  ;;  %v6030_v2 = vld [vmem:[%s7168_s1 + $0x338] sm:$0xff]   ;;  %v4527_v14 = vcombine.low %v6657_v28, %v6663_v31 }
 0x138   : > { %3619 = vmatmul.mubr.bf16.gmra.mrb[136].mxu1 %v4495_v5  ;;  %3465 = vmatprep.mubr.bf16.mxu0 %v4510_v6  ;;  %v297_v0 = vld [vmem:[%s6172_s7 + $0x2e0] sm:$0xff]  ;;  %v298_v5 = vld [vmem:[%s6172_s7 + $0x2e8] sm:$0xff]  ;;  %v6032_v6 = vld [vmem:[%s7168_s1 + $0x3b8] sm:$0xff]  }
 0x139   : > { %v6651_v26 = vadd.f32 %v5176_v20, %v5064_v13  ;;  %3626 = vmatprep.mubr.bf16.mxu1 %v4512_v11  ;;  %5682 = vmatpush3.bf16.msra.mxu0 %v6018_v12  ;;  %v305_v31 = vld [vmem:[%s6172_s7 + $0x320] sm:$0xff] }
 0x13a   : > { %v5065_v30 = vpop.f32.mrb[32].mxu0  ;;  %5794 = vmatpush3.bf16.msra.mxu1 %v6020_v16  ;;  %5683 = vmatprep.subr.bf16.mxu0 %v6021_v17  ;;  %v4542_v16 = vcombine.high %v289_v62, %v297_v0 }
 0x13b   : > { %v5177_v34 = vpop.f32.mrb[32].mxu1  ;;  %v5066_v35 = vpop.f32.mrb[33].mxu0  ;;  %5795 = vmatprep.subr.bf16.mxu1 %v6023_v22 }
 0x13c   : > { %v5067_v38 = vadd.f32 %v5066_v35, %v5065_v30  ;;  %v5178_v39 = vpop.f32.mrb[33].mxu1  ;;  %v5068_v40 = vpop.f32.mrb[34].mxu0  ;;  %v306_v35 = vld [vmem:[%s6172_s7 + $0x328] sm:$0xff] }
 0x13d   : > { %v5179_v45 = vadd.f32 %v5178_v39, %v5177_v34  ;;  %v5180_v48 = vpop.f32.mrb[34].mxu1  ;;  %v5069_v50 = vpop.f32.mrb[35].mxu0  ;;  %5684 = vmatpush3.bf16.msra.mxu0 %v6022_v29  ;;  %v4544_v29 = vcombine.high %v290_v4, %v298_v5  ;;  %v4541_v39 = vcombine.low %v289_v62, %v297_v0  ;;  %v321_v62 = vld [vmem:[%s6172_s7 + $0x3a0] sm:$0xff] }
 0x13e   : > { %v5070_v55 = vadd.f32 %v5069_v50, %v5068_v40  ;;  %v5181_v56 = vpop.f32.mrb[35].mxu1  ;;  %5796 = vmatpush3.bf16.msra.mxu1 %v6024_v32  ;;  %5685 = vmatprep.subr.bf16.mxu0 %v6025_v33  ;;  %v313_v33 = vld [vmem:[%s6172_s7 + $0x360] sm:$0xff] }
 0x13f   : > { %v6691_v58 = vadd.f32 %v5179_v45, %v5067_v38  ;;  %v5182_v59 = vadd.f32 %v5181_v56, %v5180_v48  ;;  %3466 = vmatmul.mubr.bf16.gmra.mrb[140].mxu0 %v4509_v36  ;;  %5797 = vmatprep.subr.bf16.mxu1 %v6027_v37  ;;  %v314_v36 = vld [vmem:[%s6172_s7 + $0x368] sm:$0xff]  ;;  %v4543_v45 = vcombine.low %v290_v4, %v298_v5  ;;  %v329_v0 = vld [vmem:[%s6172_s7 + $0x3e0] sm:$0xff] }
 0x140   : > { %3627 = vmatmul.mubr.bf16.gmra.mrb[140].mxu1 %v4511_v42  ;;  %3473 = vmatprep.mubr.bf16.mxu0 %v4526_v44  ;;  %v4558_v48 = vcombine.high %v305_v31, %v313_v33  ;;  %v330_v4 = vld [vmem:[%s6172_s7 + $0x3e8] sm:$0xff] }
 0x141   : > { %v6696_v61 = vadd.f32 %v5182_v59, %v5070_v55  ;;  %3634 = vmatprep.mubr.bf16.mxu1 %v4528_v51  ;;  %5686 = vmatpush3.bf16.msra.mxu0 %v6026_v53  ;;  %v4560_v55 = vcombine.high %v306_v35, %v314_v36 }
 0x142   : > { %v5071_v3 = vpop.f32.mrb[36].mxu0  ;;  %5798 = vmatpush3.bf16.msra.mxu1 %v6028_v54  ;;  %5687 = vmatprep.subr.bf16.mxu0 %v6029_v57 }
 0x143   : > { %v5183_v7 = vpop.f32.mrb[36].mxu1  ;;  %v5072_v8 = vpop.f32.mrb[37].mxu0  ;;  %5799 = vmatprep.subr.bf16.mxu1 %v6031_v60 }
 0x144   : > { %v5073_v11 = vadd.f32 %v5072_v8, %v5071_v3  ;;  %v5184_v12 = vpop.f32.mrb[37].mxu1  ;;  %v5074_v13 = vpop.f32.mrb[38].mxu0  ;;  %v322_v3 = vld [vmem:[%s6172_s7 + $0x3a8] sm:$0xff] }
 0x145   : > { %v5185_v17 = vadd.f32 %v5184_v12, %v5183_v7  ;;  %v5186_v20 = vpop.f32.mrb[38].mxu1  ;;  %v5075_v22 = vpop.f32.mrb[39].mxu0  ;;  %5688 = vmatpush3.bf16.msra.mxu0 %v6030_v2  ;;  %v4557_v7 = vcombine.low %v305_v31, %v313_v33  ;;  %v4559_v12 = vcombine.low %v306_v35, %v314_v36  ;;  %v337_v31 = vld [vmem:[%s6172_s7 + $0x420] sm:$0xff]  ;;  %v338_v35 = vld [vmem:[%s6172_s7 + $0x428] sm:$0xff] }
 0x146   : > { %v5076_v30 = vadd.f32 %v5075_v22, %v5074_v13  ;;  %v5187_v32 = vpop.f32.mrb[39].mxu1  ;;  %5800 = vmatpush3.bf16.msra.mxu1 %v6032_v6  ;;  %v4574_v13 = vcombine.high %v321_v62, %v329_v0  ;;  %v345_v33 = vld [vmem:[%s6172_s7 + $0x460] sm:$0xff]  ;;  %v346_v36 = vld [vmem:[%s6172_s7 + $0x468] sm:$0xff] }
 0x147   : > { %v6712_v24 = vadd.f32 %v5185_v17, %v5073_v11  ;;  %v5188_v27 = vadd.f32 %v5187_v32, %v5186_v20  ;;  %3474 = vmatmul.mubr.bf16.gmra.mrb[144].mxu0 %v4525_v9  ;;  %v4576_v20 = vcombine.high %v322_v3, %v330_v4 }
 0x148   : > { %3635 = vmatmul.mubr.bf16.gmra.mrb[144].mxu1 %v4527_v14  ;;  %3481 = vmatprep.mubr.bf16.mxu0 %v4542_v16 }
 0x149   : > { %v6714_v28 = vadd.f32 %v5188_v27, %v5076_v30  ;;  %3642 = vmatprep.mubr.bf16.mxu1 %v4544_v29 }
 0x14a   : > { %v5077_v34 = vpop.f32.mrb[40].mxu0 }
 0x14b   : > { %v5189_v37 = vpop.f32.mrb[40].mxu1  ;;  %v5078_v38 = vpop.f32.mrb[41].mxu0 }
 0x14c   : > { %v5079_v40 = vadd.f32 %v5078_v38, %v5077_v34  ;;  %v5190_v42 = vpop.f32.mrb[41].mxu1  ;;  %v5080_v44 = vpop.f32.mrb[42].mxu0 }
 0x14d   : > { %v5191_v50 = vadd.f32 %v5190_v42, %v5189_v37  ;;  %v5192_v51 = vpop.f32.mrb[42].mxu1  ;;  %v5081_v53 = vpop.f32.mrb[43].mxu0 }
 0x14e   : > { %v5082_v56 = vadd.f32 %v5081_v53, %v5080_v44  ;;  %v5193_v54 = vpop.f32.mrb[43].mxu1 }
 0x14f   : > { %v6720_v57 = vadd.f32 %v5191_v50, %v5079_v40  ;;  %v5194_v59 = vadd.f32 %v5193_v54, %v5192_v51  ;;  %3482 = vmatmul.mubr.bf16.gmra.mrb[148].mxu0 %v4541_v39  ;;  %v4573_v39 = vcombine.low %v321_v62, %v329_v0  ;;  %v353_v0 = vld [vmem:[%s6172_s7 + $0x4a0] sm:$0xff] }
 0x150   : > { %3643 = vmatmul.mubr.bf16.gmra.mrb[148].mxu1 %v4543_v45  ;;  %3489 = vmatprep.mubr.bf16.mxu0 %v4558_v48  ;;  %v4575_v45 = vcombine.low %v322_v3, %v330_v4  ;;  %v4590_v48 = vcombine.high %v337_v31, %v345_v33  ;;  %v361_v3 = vld [vmem:[%s6172_s7 + $0x4e0] sm:$0xff] }
 0x151   : > { %v6722_v60 = vadd.f32 %v5194_v59, %v5082_v56  ;;  %3650 = vmatprep.mubr.bf16.mxu1 %v4560_v55  ;;  %v4592_v55 = vcombine.high %v338_v35, %v346_v36 }
 0x152   : > { %v5083_v2 = vpop.f32.mrb[44].mxu0 }
 0x153   : > { %v5195_v5 = vpop.f32.mrb[44].mxu1  ;;  %v5084_v6 = vpop.f32.mrb[45].mxu0 }
 0x154   : > { %v5085_v8 = vadd.f32 %v5084_v6, %v5083_v2  ;;  %v5196_v9 = vpop.f32.mrb[45].mxu1  ;;  %v5086_v11 = vpop.f32.mrb[46].mxu0  ;;  %v362_v6 = vld [vmem:[%s6172_s7 + $0x4e8] sm:$0xff] }
 0x155   : > { %v5197_v14 = vadd.f32 %v5196_v9, %v5195_v5  ;;  %v5198_v16 = vpop.f32.mrb[46].mxu1  ;;  %v5087_v17 = vpop.f32.mrb[47].mxu0  ;;  %v354_v5 = vld [vmem:[%s6172_s7 + $0x4a8] sm:$0xff]  ;;  %v4589_v9 = vcombine.low %v337_v31, %v345_v33  ;;  %v369_v33 = vld [vmem:[%s6172_s7 + $0x520] sm:$0xff] }
 0x156   : > { %v5088_v22 = vadd.f32 %v5087_v17, %v5086_v11  ;;  %v5199_v29 = vpop.f32.mrb[47].mxu1 }
 0x157   : > { %v6728_v30 = vadd.f32 %v5197_v14, %v5085_v8  ;;  %v5200_v32 = vadd.f32 %v5199_v29, %v5198_v16  ;;  %3490 = vmatmul.mubr.bf16.gmra.mrb[152].mxu0 %v4557_v7  ;;  %v4591_v14 = vcombine.low %v338_v35, %v346_v36  ;;  %v4606_v16 = vcombine.high %v353_v0, %v361_v3  ;;  %v377_v35 = vld [vmem:[%s6172_s7 + $0x560] sm:$0xff] }
 0x158   : > { %3651 = vmatmul.mubr.bf16.gmra.mrb[152].mxu1 %v4559_v12  ;;  %3497 = vmatprep.mubr.bf16.mxu0 %v4574_v13  ;;  %v4608_v29 = vcombine.high %v354_v5, %v362_v6 }
 0x159   : > { %v6730_v27 = vadd.f32 %v5200_v32, %v5088_v22  ;;  %3658 = vmatprep.mubr.bf16.mxu1 %v4576_v20 }
 0x15a   : > { %v5089_v34 = vpop.f32.mrb[48].mxu0 }
 0x15b   : > { %v5201_v37 = vpop.f32.mrb[48].mxu1  ;;  %v5090_v38 = vpop.f32.mrb[49].mxu0 }
 0x15c   : > { %v5091_v40 = vadd.f32 %v5090_v38, %v5089_v34  ;;  %v5202_v42 = vpop.f32.mrb[49].mxu1  ;;  %v5092_v44 = vpop.f32.mrb[50].mxu0 }
 0x15d   : > { %v5203_v50 = vadd.f32 %v5202_v42, %v5201_v37  ;;  %v5204_v51 = vpop.f32.mrb[50].mxu1  ;;  %v5093_v53 = vpop.f32.mrb[51].mxu0 }
 0x15e   : > { %v5094_v56 = vadd.f32 %v5093_v53, %v5092_v44  ;;  %v5205_v54 = vpop.f32.mrb[51].mxu1  ;;  %v4607_v53 = vcombine.low %v354_v5, %v362_v6  ;;  %v393_v5 = vld [vmem:[%s6172_s7 + $0x5e0] sm:$0xff] }
 0x15f   : > { %v6736_v59 = vadd.f32 %v5203_v50, %v5091_v40  ;;  %v5206_v2 = vadd.f32 %v5205_v54, %v5204_v51  ;;  %3498 = vmatmul.mubr.bf16.gmra.mrb[156].mxu0 %v4573_v39  ;;  %v370_v39 = vld [vmem:[%s6172_s7 + $0x528] sm:$0xff] }
 0x160   : > { %3659 = vmatmul.mubr.bf16.gmra.mrb[156].mxu1 %v4575_v45  ;;  %3505 = vmatprep.mubr.bf16.mxu0 %v4590_v48  ;;  %v378_v40 = vld [vmem:[%s6172_s7 + $0x568] sm:$0xff]  ;;  %v4605_v45 = vcombine.low %v353_v0, %v361_v3  ;;  %v385_v3 = vld [vmem:[%s6172_s7 + $0x5a0] sm:$0xff] }
 0x161   : > { %v6738_v62 = vadd.f32 %v5206_v2, %v5094_v56  ;;  %3666 = vmatprep.mubr.bf16.mxu1 %v4592_v55  ;;  %v4622_v55 = vcombine.high %v369_v33, %v377_v35 }
 0x162   : > { %v5095_v4 = vpop.f32.mrb[52].mxu0 }
 0x163   : > { %v5207_v7 = vpop.f32.mrb[52].mxu1  ;;  %v5096_v8 = vpop.f32.mrb[53].mxu0 }
 0x164   : > { %v5097_v11 = vadd.f32 %v5096_v8, %v5095_v4  ;;  %v5208_v12 = vpop.f32.mrb[53].mxu1  ;;  %v5098_v13 = vpop.f32.mrb[54].mxu0  ;;  %v4624_v4 = vcombine.high %v370_v39, %v378_v40 }
 0x165   : > { %v5209_v17 = vadd.f32 %v5208_v12, %v5207_v7  ;;  %v5210_v20 = vpop.f32.mrb[54].mxu1  ;;  %v5099_v22 = vpop.f32.mrb[55].mxu0  ;;  %v386_v12 = vld [vmem:[%s6172_s7 + $0x5a8] sm:$0xff] }
 0x166   : > { %v5100_v32 = vadd.f32 %v5099_v22, %v5098_v13  ;;  %v5211_v34 = vpop.f32.mrb[55].mxu1  ;;  %v394_v13 = vld [vmem:[%s6172_s7 + $0x5e8] sm:$0xff] }
 0x167   : > { %v6744_v37 = vadd.f32 %v5209_v17, %v5097_v11  ;;  %v5212_v38 = vadd.f32 %v5211_v34, %v5210_v20  ;;  %3506 = vmatmul.mubr.bf16.gmra.mrb[160].mxu0 %v4589_v9  ;;  %v4621_v17 = vcombine.low %v369_v33, %v377_v35  ;;  %v4638_v34 = vcombine.high %v385_v3, %v393_v5  ;;  %v401_v35 = vld [vmem:[%s6172_s7 + $0x620] sm:$0xff] }
 0x168   : > { %3667 = vmatmul.mubr.bf16.gmra.mrb[160].mxu1 %v4591_v14  ;;  %3513 = vmatprep.mubr.bf16.mxu0 %v4606_v16 }
 0x169   : > { %v6746_v31 = vadd.f32 %v5212_v38, %v5100_v32  ;;  %3674 = vmatprep.mubr.bf16.mxu1 %v4608_v29  ;;  %v4623_v32 = vcombine.low %v370_v39, %v378_v40  ;;  %v409_v39 = vld [vmem:[%s6172_s7 + $0x660] sm:$0xff] }
 0x16a   : > { %v5101_v36 = vpop.f32.mrb[56].mxu0 }
 0x16b   : > { %v5213_v42 = vpop.f32.mrb[56].mxu1  ;;  %v5102_v44 = vpop.f32.mrb[57].mxu0 }
 0x16c   : > { %v5103_v48 = vadd.f32 %v5102_v44, %v5101_v36  ;;  %v5214_v50 = vpop.f32.mrb[57].mxu1  ;;  %v5104_v51 = vpop.f32.mrb[58].mxu0  ;;  %v4640_v44 = vcombine.high %v386_v12, %v394_v13 }
 0x16d   : > { %v5215_v56 = vadd.f32 %v5214_v50, %v5213_v42  ;;  %v5216_v54 = vpop.f32.mrb[58].mxu1  ;;  %v5105_v2 = vpop.f32.mrb[59].mxu0 }
 0x16e   : > { %v5106_v7 = vadd.f32 %v5105_v2, %v5104_v51  ;;  %v5217_v8 = vpop.f32.mrb[59].mxu1  ;;  %v4637_v2 = vcombine.low %v385_v3, %v393_v5 }
 0x16f   : > { %v6752_v9 = vadd.f32 %v5215_v56, %v5103_v48  ;;  %v5218_v11 = vadd.f32 %v5217_v8, %v5216_v54  ;;  %3514 = vmatmul.mubr.bf16.gmra.mrb[164].mxu0 %v4605_v45 }
 0x170   : > { %3675 = vmatmul.mubr.bf16.gmra.mrb[164].mxu1 %v4607_v53  ;;  %3521 = vmatprep.mubr.bf16.mxu0 %v4622_v55  ;;  %v402_v53 = vld [vmem:[%s6172_s7 + $0x628] sm:$0xff] }
 0x171   : > { %v6754_v0 = vadd.f32 %v5218_v11, %v5106_v7  ;;  %3682 = vmatprep.mubr.bf16.mxu1 %v4624_v4  ;;  %v410_v55 = vld [vmem:[%s6172_s7 + $0x668] sm:$0xff]  ;;  %v4639_v11 = vcombine.low %v386_v12, %v394_v13  ;;  %v417_v12 = vld [vmem:[%s6172_s7 + $0x6a0] sm:$0xff] }
 0x172   : > { %v5107_v6 = vpop.f32.mrb[60].mxu0  ;;  %v425_v13 = vld [vmem:[%s6172_s7 + $0x6e0] sm:$0xff] }
 0x173   : > { %v5219_v14 = vpop.f32.mrb[60].mxu1  ;;  %v5108_v16 = vpop.f32.mrb[61].mxu0 }
 0x174   : > { %v5109_v20 = vadd.f32 %v5108_v16, %v5107_v6  ;;  %v5220_v22 = vpop.f32.mrb[61].mxu1  ;;  %v5110_v29 = vpop.f32.mrb[62].mxu0  ;;  %v4654_v6 = vcombine.high %v401_v35, %v409_v39 }
 0x175   : > { %v5221_v38 = vadd.f32 %v5220_v22, %v5219_v14  ;;  %v5222_v36 = vpop.f32.mrb[62].mxu1  ;;  %v5111_v42 = vpop.f32.mrb[63].mxu0 }
 0x176   : > { %v5112_v45 = vadd.f32 %v5111_v42, %v5110_v29  ;;  %v5223_v48 = vpop.f32.mrb[63].mxu1  ;;  %v418_v42 = vld [vmem:[%s6172_s7 + $0x6a8] sm:$0xff] }
 0x177   : > { %v6760_v50 = vadd.f32 %v5221_v38, %v5109_v20  ;;  %v5224_v51 = vadd.f32 %v5223_v48, %v5222_v36  ;;  %3522 = vmatmul.mubr.bf16.gmra.mrb[168].mxu0 %v4621_v17  ;;  %v4656_v20 = vcombine.high %v402_v53, %v410_v55  ;;  %v4653_v48 = vcombine.low %v401_v35, %v409_v39 }
 0x178   : > { %3683 = vmatmul.mubr.bf16.gmra.mrb[168].mxu1 %v4623_v32  ;;  %3529 = vmatprep.mubr.bf16.mxu0 %v4638_v34 }
 0x179   : > { %v6762_v33 = vadd.f32 %v5224_v51, %v5112_v45  ;;  %3690 = vmatprep.mubr.bf16.mxu1 %v4640_v44  ;;  %v426_v44 = vld [vmem:[%s6172_s7 + $0x6e8] sm:$0xff] }
 0x17a   : > { %v5241_v40 = vpop.f32.mrb[64].mxu0 }
 0x17b   : > { %v5353_v56 = vpop.f32.mrb[64].mxu1  ;;  %v5242_v54 = vpop.f32.mrb[65].mxu0 }
 0x17c   : > { %v5243_v4 = vadd.f32 %v5242_v54, %v5241_v40  ;;  %v5354_v7 = vpop.f32.mrb[65].mxu1  ;;  %v5244_v8 = vpop.f32.mrb[66].mxu0  ;;  %v4655_v54 = vcombine.low %v402_v53, %v410_v55  ;;  %v433_v53 = vld [vmem:[%s6172_s7 + $0x720] sm:$0xff] }
 0x17d   : > { %v5355_v14 = vadd.f32 %v5354_v7, %v5353_v56  ;;  %v5356_v16 = vpop.f32.mrb[66].mxu1  ;;  %v5245_v17 = vpop.f32.mrb[67].mxu0  ;;  %v441_v55 = vld [vmem:[%s6172_s7 + $0x760] sm:$0xff] }
 0x17e   : > { %v3122_v22 = vadd.f32 %v5243_v4, %v6494_v19  ;;  %v5246_v29 = vadd.f32 %v5245_v17, %v5244_v8  ;;  %v5357_v32 = vpop.f32.mrb[67].mxu1  ;;  %v4672_v8 = vcombine.high %v418_v42, %v426_v44 }
 0x17f   : > { %v5358_v34 = vadd.f32 %v5357_v32, %v5356_v16  ;;  %3530 = vmatmul.mubr.bf16.gmra.mrb[172].mxu0 %v4637_v2  ;;  %v4670_v2 = vcombine.high %v417_v12, %v425_v13 }
 0x180   : > { %v6769_v3 = vadd.f32 %v5355_v14, %v3122_v22  ;;  %v3125_v5 = vadd.f32 %v5246_v29, %v6496_v21  ;;  %3691 = vmatmul.mubr.bf16.gmra.mrb[172].mxu1 %v4639_v11  ;;  %3537 = vmatprep.mubr.bf16.mxu0 %v4654_v6  ;;  %v434_v22 = vld [vmem:[%s6172_s7 + $0x728] sm:$0xff] }
 0x181   : > { %3698 = vmatprep.mubr.bf16.mxu1 %v4656_v20  ;;  %v442_v29 = vld [vmem:[%s6172_s7 + $0x768] sm:$0xff] }
 0x182   : > { %v6774_v38 = vadd.f32 %v5358_v34, %v3125_v5  ;;  %v5247_v36 = vpop.f32.mrb[68].mxu0  ;;  %v4669_v34 = vcombine.low %v417_v12, %v425_v13 }
 0x183   : > { %v5359_v45 = vpop.f32.mrb[68].mxu1  ;;  %v5248_v19 = vpop.f32.mrb[69].mxu0 }
 0x184   : > { %v5249_v51 = vadd.f32 %v5248_v19, %v5247_v36  ;;  %v5360_v40 = vpop.f32.mrb[69].mxu1  ;;  %v5250_v56 = vpop.f32.mrb[70].mxu0  ;;  %v4671_v19 = vcombine.low %v418_v42, %v426_v44  ;;  %v449_v42 = vld [vmem:[%s6172_s7 + $0x7a0] sm:$0xff] }
 0x185   : > { %v5361_v21 = vadd.f32 %v5360_v40, %v5359_v45  ;;  %v5362_v4 = vpop.f32.mrb[70].mxu1  ;;  %v5251_v7 = vpop.f32.mrb[71].mxu0  ;;  %v457_v44 = vld [vmem:[%s6172_s7 + $0x7e0] sm:$0xff] }
 0x186   : > { %v3130_v11 = vadd.f32 %v5249_v51, %v6502_v41  ;;  %v5252_v6 = vadd.f32 %v5251_v7, %v5250_v56  ;;  %v5363_v14 = vpop.f32.mrb[71].mxu1  ;;  %v4688_v56 = vcombine.high %v434_v22, %v442_v29 }
 0x187   : > { %v5364_v16 = vadd.f32 %v5363_v14, %v5362_v4  ;;  %3538 = vmatmul.mubr.bf16.gmra.mrb[176].mxu0 %v4653_v48  ;;  %v4686_v48 = vcombine.high %v433_v53, %v441_v55 }
 0x188   : > { %v6779_v35 = vadd.f32 %v5361_v21, %v3130_v11  ;;  %v3133_v39 = vadd.f32 %v5252_v6, %v6504_v43  ;;  %3699 = vmatmul.mubr.bf16.gmra.mrb[176].mxu1 %v4655_v54  ;;  %3545 = vmatprep.mubr.bf16.mxu0 %v4670_v2  ;;  %v450_v11 = vld [vmem:[%s6172_s7 + $0x7a8] sm:$0xff] }
 0x189   : > { %3706 = vmatprep.mubr.bf16.mxu1 %v4672_v8  ;;  %v458_v6 = vld [vmem:[%s6172_s7 + $0x7e8] sm:$0xff] }
 0x18a   : > { %v6784_v17 = vadd.f32 %v5364_v16, %v3133_v39  ;;  %v5253_v20 = vpop.f32.mrb[72].mxu0  ;;  %v4685_v16 = vcombine.low %v433_v53, %v441_v55 }
 0x18b   : > { %v5365_v32 = vpop.f32.mrb[72].mxu1  ;;  %v5254_v41 = vpop.f32.mrb[73].mxu0 }
 0x18c   : > { %v5255_v5 = vadd.f32 %v5254_v41, %v5253_v20  ;;  %v5366_v36 = vpop.f32.mrb[73].mxu1  ;;  %v5256_v45 = vpop.f32.mrb[74].mxu0  ;;  %v4687_v41 = vcombine.low %v434_v22, %v442_v29  ;;  %v211_v22 = vld [vmem:[%s6172_s7 + $0x30] sm:$0xff] }
 0x18d   : > { %v5367_v43 = vadd.f32 %v5366_v36, %v5365_v32  ;;  %v5368_v51 = vpop.f32.mrb[74].mxu1  ;;  %v5257_v40 = vpop.f32.mrb[75].mxu0  ;;  %v219_v29 = vld [vmem:[%s6172_s7 + $0x70] sm:$0xff] }
 0x18e   : > { %v3138_v54 = vadd.f32 %v5255_v5, %v6510_v63  ;;  %v5258_v2 = vadd.f32 %v5257_v40, %v5256_v45  ;;  %v5369_v21 = vpop.f32.mrb[75].mxu1  ;;  %v4704_v45 = vcombine.high %v450_v11, %v458_v6 }
 0x18f   : > { %v5370_v4 = vadd.f32 %v5369_v21, %v5368_v51  ;;  %3546 = vmatmul.mubr.bf16.gmra.mrb[180].mxu0 %v4669_v34  ;;  %v4702_v34 = vcombine.high %v449_v42, %v457_v44 }
 0x190   : > { %v6789_v12 = vadd.f32 %v5367_v43, %v3138_v54  ;;  %v3141_v13 = vadd.f32 %v5258_v2, %v6512_v1  ;;  %3707 = vmatmul.mubr.bf16.gmra.mrb[180].mxu1 %v4671_v19  ;;  %3553 = vmatprep.mubr.bf16.mxu0 %v4686_v48  ;;  %v212_v54 = vld [vmem:[%s6172_s7 + $0x38] sm:$0xff] }
 0x191   : > { %3714 = vmatprep.mubr.bf16.mxu1 %v4688_v56  ;;  %v220_v2 = vld [vmem:[%s6172_s7 + $0x78] sm:$0xff] }
 0x192   : > { %v6794_v7 = vadd.f32 %v5370_v4, %v3141_v13  ;;  %v5259_v8 = vpop.f32.mrb[76].mxu0  ;;  %v4701_v4 = vcombine.low %v449_v42, %v457_v44 }
 0x193   : > { %v5371_v14 = vpop.f32.mrb[76].mxu1  ;;  %v5260_v63 = vpop.f32.mrb[77].mxu0 }
 0x194   : > { %v5261_v39 = vadd.f32 %v5260_v63, %v5259_v8  ;;  %v5372_v20 = vpop.f32.mrb[77].mxu1  ;;  %v5262_v32 = vpop.f32.mrb[78].mxu0  ;;  %v4703_v63 = vcombine.low %v450_v11, %v458_v6  ;;  %v227_v11 = vld [vmem:[%s6172_s7 + $0xb0] sm:$0xff] }
 0x195   : > { %v5373_v1 = vadd.f32 %v5372_v20, %v5371_v14  ;;  %v5374_v5 = vpop.f32.mrb[78].mxu1  ;;  %v5263_v36 = vpop.f32.mrb[79].mxu0  ;;  %v235_v6 = vld [vmem:[%s6172_s7 + $0xf0] sm:$0xff] }
 0x196   : > { %v3146_v19 = vadd.f32 %v5261_v39, %v6518_v23  ;;  %v5264_v48 = vadd.f32 %v5263_v36, %v5262_v32  ;;  %v5375_v43 = vpop.f32.mrb[79].mxu1  ;;  %v4468_v32 = vcombine.high %v212_v54, %v220_v2 }
 0x197   : > { %v5376_v51 = vadd.f32 %v5375_v43, %v5374_v5  ;;  %3554 = vmatmul.mubr.bf16.gmra.mrb[184].mxu0 %v4685_v16  ;;  %v4466_v16 = vcombine.high %v211_v22, %v219_v29 }
 0x198   : > { %v6799_v53 = vadd.f32 %v5373_v1, %v3146_v19  ;;  %v3149_v55 = vadd.f32 %v5264_v48, %v6520_v25  ;;  %3715 = vmatmul.mubr.bf16.gmra.mrb[184].mxu1 %v4687_v41  ;;  %3561 = vmatprep.mubr.bf16.mxu0 %v4702_v34  ;;  %v228_v19 = vld [vmem:[%s6172_s7 + $0xb8] sm:$0xff] }
 0x199   : > { %3722 = vmatprep.mubr.bf16.mxu1 %v4704_v45  ;;  %v236_v48 = vld [vmem:[%s6172_s7 + $0xf8] sm:$0xff] }
 0x19a   : > { %v6804_v40 = vadd.f32 %v5376_v51, %v3149_v55  ;;  %v5265_v56 = vpop.f32.mrb[80].mxu0  ;;  %v4465_v51 = vcombine.low %v211_v22, %v219_v29 }
 0x19b   : > { %v5377_v21 = vpop.f32.mrb[80].mxu1  ;;  %v5266_v23 = vpop.f32.mrb[81].mxu0 }
 0x19c   : > { %v5267_v13 = vadd.f32 %v5266_v23, %v5265_v56  ;;  %v5378_v8 = vpop.f32.mrb[81].mxu1  ;;  %v5268_v14 = vpop.f32.mrb[82].mxu0  ;;  %v4467_v23 = vcombine.low %v212_v54, %v220_v2  ;;  %v243_v54 = vld [vmem:[%s6172_s7 + $0x130] sm:$0xff] }
 0x19d   : > { %v5379_v25 = vadd.f32 %v5378_v8, %v5377_v21  ;;  %v5380_v39 = vpop.f32.mrb[82].mxu1  ;;  %v5269_v20 = vpop.f32.mrb[83].mxu0  ;;  %v251_v2 = vld [vmem:[%s6172_s7 + $0x170] sm:$0xff] }
 0x19e   : > { %v3154_v41 = vadd.f32 %v5267_v13, %v6526_v47  ;;  %v5270_v34 = vadd.f32 %v5269_v20, %v5268_v14  ;;  %v5381_v1 = vpop.f32.mrb[83].mxu1  ;;  %v4484_v14 = vcombine.high %v228_v19, %v236_v48 }
 0x19f   : > { %v5382_v5 = vadd.f32 %v5381_v1, %v5380_v39  ;;  %3562 = vmatmul.mubr.bf16.gmra.mrb[188].mxu0 %v4701_v4  ;;  %v4482_v4 = vcombine.high %v227_v11, %v235_v6 }
 0x1a0   : > { %v6809_v42 = vadd.f32 %v5379_v25, %v3154_v41  ;;  %v3157_v44 = vadd.f32 %v5270_v34, %v6528_v49  ;;  %3723 = vmatmul.mubr.bf16.gmra.mrb[188].mxu1 %v4703_v63  ;;  %3763 = vmatprep.mubr.bf16.mxu0 %v4466_v16  ;;  %v244_v41 = vld [vmem:[%s6172_s7 + $0x138] sm:$0xff] }
 0x1a1   : > { %3924 = vmatprep.mubr.bf16.mxu1 %v4468_v32  ;;  %v252_v34 = vld [vmem:[%s6172_s7 + $0x178] sm:$0xff] }
 0x1a2   : > { %v6814_v36 = vadd.f32 %v5382_v5, %v3157_v44  ;;  %v5271_v45 = vpop.f32.mrb[84].mxu0  ;;  %v4481_v5 = vcombine.low %v227_v11, %v235_v6 }
 0x1a3   : > { %v5383_v43 = vpop.f32.mrb[84].mxu1  ;;  %v5272_v47 = vpop.f32.mrb[85].mxu0 }
 0x1a4   : > { %v5273_v55 = vadd.f32 %v5272_v47, %v5271_v45  ;;  %v5384_v56 = vpop.f32.mrb[85].mxu1  ;;  %v5274_v21 = vpop.f32.mrb[86].mxu0  ;;  %v4483_v47 = vcombine.low %v228_v19, %v236_v48  ;;  %v259_v19 = vld [vmem:[%s6172_s7 + $0x1b0] sm:$0xff] }
 0x1a5   : > { %v5385_v49 = vadd.f32 %v5384_v56, %v5383_v43  ;;  %v5386_v13 = vpop.f32.mrb[86].mxu1  ;;  %v5275_v8 = vpop.f32.mrb[87].mxu0  ;;  %v267_v48 = vld [vmem:[%s6172_s7 + $0x1f0] sm:$0xff] }
 0x1a6   : > { %v3162_v63 = vadd.f32 %v5273_v55, %v6549_v10  ;;  %v5276_v16 = vadd.f32 %v5275_v8, %v5274_v21  ;;  %v5387_v25 = vpop.f32.mrb[87].mxu1  ;;  %v4500_v21 = vcombine.high %v244_v41, %v252_v34 }
 0x1a7   : > { %v5388_v39 = vadd.f32 %v5387_v25, %v5386_v13  ;;  %3764 = vmatmul.mubr.bf16.vlgmr.msra.gmra.mrb[192].mxu0 %v4465_v51  ;;  %v4498_v51 = vcombine.high %v243_v54, %v251_v2 }
 0x1a8   : > { %v6819_v22 = vadd.f32 %v5385_v49, %v3162_v63  ;;  %v3165_v29 = vadd.f32 %v5276_v16, %v6560_v15  ;;  %3925 = vmatmul.mubr.bf16.vlgmr.msra.gmra.mrb[192].mxu1 %v4467_v23  ;;  %3771 = vmatprep.mubr.bf16.mxu0 %v4482_v4  ;;  %v260_v63 = vld [vmem:[%s6172_s7 + $0x1b8] sm:$0xff] }
 0x1a9   : > { %3932 = vmatprep.mubr.bf16.mxu1 %v4484_v14  ;;  %v268_v16 = vld [vmem:[%s6172_s7 + $0x1f8] sm:$0xff] }
 0x1aa   : > { %v6824_v20 = vadd.f32 %v5388_v39, %v3165_v29  ;;  %v5277_v32 = vpop.f32.mrb[88].mxu0  ;;  %v4497_v39 = vcombine.low %v243_v54, %v251_v2 }
 0x1ab   : > { %v5389_v1 = vpop.f32.mrb[88].mxu1  ;;  %v5278_v10 = vpop.f32.mrb[89].mxu0 }
 0x1ac   : > { %v5279_v44 = vadd.f32 %v5278_v10, %v5277_v32  ;;  %v5390_v45 = vpop.f32.mrb[89].mxu1  ;;  %v5280_v43 = vpop.f32.mrb[90].mxu0  ;;  %v4499_v10 = vcombine.low %v244_v41, %v252_v34  ;;  %v275_v41 = vld [vmem:[%s6172_s7 + $0x230] sm:$0xff] }
 0x1ad   : > { %v5391_v15 = vadd.f32 %v5390_v45, %v5389_v1  ;;  %v5392_v55 = vpop.f32.mrb[90].mxu1  ;;  %v5281_v56 = vpop.f32.mrb[91].mxu0  ;;  %v283_v34 = vld [vmem:[%s6172_s7 + $0x270] sm:$0xff] }
 0x1ae   : > { %v3170_v23 = vadd.f32 %v5279_v44, %v6595_v46  ;;  %v5282_v4 = vadd.f32 %v5281_v56, %v5280_v43  ;;  %v5393_v49 = vpop.f32.mrb[91].mxu1  ;;  %v4516_v43 = vcombine.high %v260_v63, %v268_v16 }
 0x1af   : > { %v5394_v13 = vadd.f32 %v5393_v49, %v5392_v55  ;;  %3772 = vmatmul.mubr.bf16.gmra.mrb[196].mxu0 %v4481_v5  ;;  %v4514_v5 = vcombine.high %v259_v19, %v267_v48 }
 0x1b0   : > { %v6829_v11 = vadd.f32 %v5391_v15, %v3170_v23  ;;  %v3173_v6 = vadd.f32 %v5282_v4, %v6603_v52  ;;  %3933 = vmatmul.mubr.bf16.gmra.mrb[196].mxu1 %v4483_v47  ;;  %3779 = vmatprep.mubr.bf16.mxu0 %v4498_v51  ;;  %v276_v23 = vld [vmem:[%s6172_s7 + $0x238] sm:$0xff] }
 0x1b1   : > { %3940 = vmatprep.mubr.bf16.mxu1 %v4500_v21  ;;  %v284_v4 = vld [vmem:[%s6172_s7 + $0x278] sm:$0xff] }
 0x1b2   : > { %v6834_v8 = vadd.f32 %v5394_v13, %v3173_v6  ;;  %v5283_v14 = vpop.f32.mrb[92].mxu0  ;;  %v4513_v13 = vcombine.low %v259_v19, %v267_v48 }
 0x1b3   : > { %v5395_v25 = vpop.f32.mrb[92].mxu1  ;;  %v5284_v46 = vpop.f32.mrb[93].mxu0 }
 0x1b4   : > { %v5285_v29 = vadd.f32 %v5284_v46, %v5283_v14  ;;  %v5396_v32 = vpop.f32.mrb[93].mxu1  ;;  %v5286_v1 = vpop.f32.mrb[94].mxu0  ;;  %v4515_v46 = vcombine.low %v260_v63, %v268_v16  ;;  %v291_v63 = vld [vmem:[%s6172_s7 + $0x2b0] sm:$0xff] }
 0x1b5   : > { %v5397_v52 = vadd.f32 %v5396_v32, %v5395_v25  ;;  %v5398_v44 = vpop.f32.mrb[94].mxu1  ;;  %v5287_v45 = vpop.f32.mrb[95].mxu0  ;;  %v299_v16 = vld [vmem:[%s6172_s7 + $0x2f0] sm:$0xff] }
 0x1b6   : > { %v3178_v47 = vadd.f32 %v5285_v29, %v6643_v18  ;;  %v5288_v51 = vadd.f32 %v5287_v45, %v5286_v1  ;;  %v5399_v15 = vpop.f32.mrb[95].mxu1  ;;  %v4532_v1 = vcombine.high %v276_v23, %v284_v4 }
 0x1b7   : > { %v5400_v55 = vadd.f32 %v5399_v15, %v5398_v44  ;;  %3780 = vmatmul.mubr.bf16.gmra.mrb[200].mxu0 %v4497_v39  ;;  %v4530_v39 = vcombine.high %v275_v41, %v283_v34 }
 0x1b8   : > { %v6839_v54 = vadd.f32 %v5397_v52, %v3178_v47  ;;  %v3181_v2 = vadd.f32 %v5288_v51, %v6651_v26  ;;  %3941 = vmatmul.mubr.bf16.gmra.mrb[200].mxu1 %v4499_v10  ;;  %3787 = vmatprep.mubr.bf16.mxu0 %v4514_v5  ;;  %v292_v47 = vld [vmem:[%s6172_s7 + $0x2b8] sm:$0xff] }
 0x1b9   : > { %3948 = vmatprep.mubr.bf16.mxu1 %v4516_v43  ;;  %v300_v51 = vld [vmem:[%s6172_s7 + $0x2f8] sm:$0xff] }
 0x1ba   : > { %v6844_v56 = vadd.f32 %v5400_v55, %v3181_v2  ;;  %v5289_v21 = vpop.f32.mrb[96].mxu0  ;;  %v4529_v55 = vcombine.low %v275_v41, %v283_v34 }
 0x1bb   : > { %v5401_v49 = vpop.f32.mrb[96].mxu1  ;;  %v5290_v18 = vpop.f32.mrb[97].mxu0 }
 0x1bc   : > { %v5291_v6 = vadd.f32 %v5290_v18, %v5289_v21  ;;  %v5402_v14 = vpop.f32.mrb[97].mxu1  ;;  %v5292_v25 = vpop.f32.mrb[98].mxu0  ;;  %v4531_v18 = vcombine.low %v276_v23, %v284_v4  ;;  %v307_v23 = vld [vmem:[%s6172_s7 + $0x330] sm:$0xff] }
 0x1bd   : > { %v5403_v26 = vadd.f32 %v5402_v14, %v5401_v49  ;;  %v5404_v29 = vpop.f32.mrb[98].mxu1  ;;  %v5293_v32 = vpop.f32.mrb[99].mxu0  ;;  %v315_v4 = vld [vmem:[%s6172_s7 + $0x370] sm:$0xff] }
 0x1be   : > { %v3186_v10 = vadd.f32 %v5291_v6, %v6691_v58  ;;  %v5294_v5 = vadd.f32 %v5293_v32, %v5292_v25  ;;  %v5405_v52 = vpop.f32.mrb[99].mxu1  ;;  %v4548_v25 = vcombine.high %v292_v47, %v300_v51 }
 0x1bf   : > { %v5406_v44 = vadd.f32 %v5405_v52, %v5404_v29  ;;  %3788 = vmatmul.mubr.bf16.gmra.mrb[204].mxu0 %v4513_v13  ;;  %v4546_v13 = vcombine.high %v291_v63, %v299_v16 }
 0x1c0   : > { %v6849_v19 = vadd.f32 %v5403_v26, %v3186_v10  ;;  %v3189_v48 = vadd.f32 %v5294_v5, %v6696_v61  ;;  %3949 = vmatmul.mubr.bf16.gmra.mrb[204].mxu1 %v4515_v46  ;;  %3795 = vmatprep.mubr.bf16.mxu0 %v4530_v39  ;;  %v308_v10 = vld [vmem:[%s6172_s7 + $0x338] sm:$0xff] }
 0x1c1   : > { %3956 = vmatprep.mubr.bf16.mxu1 %v4532_v1  ;;  %v316_v5 = vld [vmem:[%s6172_s7 + $0x378] sm:$0xff] }
 0x1c2   : > { %v6854_v45 = vadd.f32 %v5406_v44, %v3189_v48  ;;  %v5295_v43 = vpop.f32.mrb[100].mxu0  ;;  %v4545_v44 = vcombine.low %v291_v63, %v299_v16 }
 0x1c3   : > { %v5407_v15 = vpop.f32.mrb[100].mxu1  ;;  %v5296_v58 = vpop.f32.mrb[101].mxu0 }
 0x1c4   : > { %v5297_v2 = vadd.f32 %v5296_v58, %v5295_v43  ;;  %v5408_v21 = vpop.f32.mrb[101].mxu1  ;;  %v5298_v49 = vpop.f32.mrb[102].mxu0  ;;  %v4547_v58 = vcombine.low %v292_v47, %v300_v51  ;;  %v323_v47 = vld [vmem:[%s6172_s7 + $0x3b0] sm:$0xff] }
 0x1c5   : > { %v5409_v61 = vadd.f32 %v5408_v21, %v5407_v15  ;;  %v5410_v6 = vpop.f32.mrb[102].mxu1  ;;  %v5299_v14 = vpop.f32.mrb[103].mxu0  ;;  %v331_v51 = vld [vmem:[%s6172_s7 + $0x3f0] sm:$0xff] }
 0x1c6   : > { %v3194_v46 = vadd.f32 %v5297_v2, %v6712_v24  ;;  %v5300_v39 = vadd.f32 %v5299_v14, %v5298_v49  ;;  %v5411_v26 = vpop.f32.mrb[103].mxu1  ;;  %v4564_v49 = vcombine.high %v308_v10, %v316_v5 }
 0x1c7   : > { %v5412_v29 = vadd.f32 %v5411_v26, %v5410_v6  ;;  %3796 = vmatmul.mubr.bf16.gmra.mrb[208].mxu0 %v4529_v55  ;;  %v4562_v55 = vcombine.high %v307_v23, %v315_v4 }
 0x1c8   : > { %v6859_v41 = vadd.f32 %v5409_v61, %v3194_v46  ;;  %v3197_v34 = vadd.f32 %v5300_v39, %v6714_v28  ;;  %3957 = vmatmul.mubr.bf16.gmra.mrb[208].mxu1 %v4531_v18  ;;  %3803 = vmatprep.mubr.bf16.mxu0 %v4546_v13  ;;  %v324_v46 = vld [vmem:[%s6172_s7 + $0x3b8] sm:$0xff] }
 0x1c9   : > { %3964 = vmatprep.mubr.bf16.mxu1 %v4548_v25  ;;  %v332_v39 = vld [vmem:[%s6172_s7 + $0x3f8] sm:$0xff] }
 0x1ca   : > { %v6864_v32 = vadd.f32 %v5412_v29, %v3197_v34  ;;  %v5301_v1 = vpop.f32.mrb[104].mxu0  ;;  %v4561_v29 = vcombine.low %v307_v23, %v315_v4 }
 0x1cb   : > { %v5413_v52 = vpop.f32.mrb[104].mxu1  ;;  %v5302_v24 = vpop.f32.mrb[105].mxu0 }
 0x1cc   : > { %v5303_v48 = vadd.f32 %v5302_v24, %v5301_v1  ;;  %v5414_v43 = vpop.f32.mrb[105].mxu1  ;;  %v5304_v15 = vpop.f32.mrb[106].mxu0  ;;  %v4563_v24 = vcombine.low %v308_v10, %v316_v5  ;;  %v339_v10 = vld [vmem:[%s6172_s7 + $0x430] sm:$0xff] }
 0x1cd   : > { %v5415_v28 = vadd.f32 %v5414_v43, %v5413_v52  ;;  %v5416_v2 = vpop.f32.mrb[106].mxu1  ;;  %v5305_v21 = vpop.f32.mrb[107].mxu0  ;;  %v347_v5 = vld [vmem:[%s6172_s7 + $0x470] sm:$0xff] }
 0x1ce   : > { %v3202_v18 = vadd.f32 %v5303_v48, %v6720_v57  ;;  %v5306_v13 = vadd.f32 %v5305_v21, %v5304_v15  ;;  %v5417_v61 = vpop.f32.mrb[107].mxu1  ;;  %v4580_v15 = vcombine.high %v324_v46, %v332_v39 }
 0x1cf   : > { %v5418_v6 = vadd.f32 %v5417_v61, %v5416_v2  ;;  %3804 = vmatmul.mubr.bf16.gmra.mrb[212].mxu0 %v4545_v44  ;;  %v4578_v44 = vcombine.high %v323_v47, %v331_v51 }
 0x1d0   : > { %v6869_v63 = vadd.f32 %v5415_v28, %v3202_v18  ;;  %v3205_v16 = vadd.f32 %v5306_v13, %v6722_v60  ;;  %3965 = vmatmul.mubr.bf16.gmra.mrb[212].mxu1 %v4547_v58  ;;  %3811 = vmatprep.mubr.bf16.mxu0 %v4562_v55  ;;  %v340_v18 = vld [vmem:[%s6172_s7 + $0x438] sm:$0xff] }
 0x1d1   : > { %3972 = vmatprep.mubr.bf16.mxu1 %v4564_v49  ;;  %v348_v13 = vld [vmem:[%s6172_s7 + $0x478] sm:$0xff] }
 0x1d2   : > { %v6874_v14 = vadd.f32 %v5418_v6, %v3205_v16  ;;  %v5307_v25 = vpop.f32.mrb[108].mxu0  ;;  %v4577_v6 = vcombine.low %v323_v47, %v331_v51 }
 0x1d3   : > { %v5419_v26 = vpop.f32.mrb[108].mxu1  ;;  %v5308_v57 = vpop.f32.mrb[109].mxu0 }
 0x1d4   : > { %v5309_v34 = vadd.f32 %v5308_v57, %v5307_v25  ;;  %v5420_v1 = vpop.f32.mrb[109].mxu1  ;;  %v5310_v52 = vpop.f32.mrb[110].mxu0  ;;  %v4579_v57 = vcombine.low %v324_v46, %v332_v39  ;;  %v355_v46 = vld [vmem:[%s6172_s7 + $0x4b0] sm:$0xff] }
 0x1d5   : > { %v5421_v60 = vadd.f32 %v5420_v1, %v5419_v26  ;;  %v5422_v48 = vpop.f32.mrb[110].mxu1  ;;  %v5311_v43 = vpop.f32.mrb[111].mxu0  ;;  %v363_v39 = vld [vmem:[%s6172_s7 + $0x4f0] sm:$0xff] }
 0x1d6   : > { %v3210_v58 = vadd.f32 %v5309_v34, %v6728_v30  ;;  %v5312_v55 = vadd.f32 %v5311_v43, %v5310_v52  ;;  %v5423_v28 = vpop.f32.mrb[111].mxu1  ;;  %v4596_v52 = vcombine.high %v340_v18, %v348_v13 }
 0x1d7   : > { %v5424_v2 = vadd.f32 %v5423_v28, %v5422_v48  ;;  %3812 = vmatmul.mubr.bf16.gmra.mrb[216].mxu0 %v4561_v29  ;;  %v4594_v29 = vcombine.high %v339_v10, %v347_v5 }
 0x1d8   : > { %v6879_v23 = vadd.f32 %v5421_v60, %v3210_v58  ;;  %v3213_v4 = vadd.f32 %v5312_v55, %v6730_v27  ;;  %3973 = vmatmul.mubr.bf16.gmra.mrb[216].mxu1 %v4563_v24  ;;  %3819 = vmatprep.mubr.bf16.mxu0 %v4578_v44  ;;  %v356_v58 = vld [vmem:[%s6172_s7 + $0x4b8] sm:$0xff] }
 0x1d9   : > { %3980 = vmatprep.mubr.bf16.mxu1 %v4580_v15  ;;  %v364_v55 = vld [vmem:[%s6172_s7 + $0x4f8] sm:$0xff] }
 0x1da   : > { %v6884_v21 = vadd.f32 %v5424_v2, %v3213_v4  ;;  %v5313_v49 = vpop.f32.mrb[112].mxu0  ;;  %v4593_v2 = vcombine.low %v339_v10, %v347_v5 }
 0x1db   : > { %v5425_v61 = vpop.f32.mrb[112].mxu1  ;;  %v5314_v30 = vpop.f32.mrb[113].mxu0 }
 0x1dc   : > { %v5315_v16 = vadd.f32 %v5314_v30, %v5313_v49  ;;  %v5426_v25 = vpop.f32.mrb[113].mxu1  ;;  %v5316_v26 = vpop.f32.mrb[114].mxu0  ;;  %v4595_v30 = vcombine.low %v340_v18, %v348_v13  ;;  %v371_v18 = vld [vmem:[%s6172_s7 + $0x530] sm:$0xff] }
 0x1dd   : > { %v5427_v27 = vadd.f32 %v5426_v25, %v5425_v61  ;;  %v5428_v34 = vpop.f32.mrb[114].mxu1  ;;  %v5317_v1 = vpop.f32.mrb[115].mxu0  ;;  %v379_v13 = vld [vmem:[%s6172_s7 + $0x570] sm:$0xff] }
 0x1de   : > { %v3218_v24 = vadd.f32 %v5315_v16, %v6736_v59  ;;  %v5318_v44 = vadd.f32 %v5317_v1, %v5316_v26  ;;  %v5429_v60 = vpop.f32.mrb[115].mxu1  ;;  %v4612_v26 = vcombine.high %v356_v58, %v364_v55 }
 0x1df   : > { %v5430_v48 = vadd.f32 %v5429_v60, %v5428_v34  ;;  %3820 = vmatmul.mubr.bf16.gmra.mrb[220].mxu0 %v4577_v6  ;;  %v4610_v6 = vcombine.high %v355_v46, %v363_v39 }
 0x1e0   : > { %v6889_v47 = vadd.f32 %v5427_v27, %v3218_v24  ;;  %v3221_v51 = vadd.f32 %v5318_v44, %v6738_v62  ;;  %3981 = vmatmul.mubr.bf16.gmra.mrb[220].mxu1 %v4579_v57  ;;  %3827 = vmatprep.mubr.bf16.mxu0 %v4594_v29  ;;  %v372_v24 = vld [vmem:[%s6172_s7 + $0x538] sm:$0xff] }
 0x1e1   : > { %3988 = vmatprep.mubr.bf16.mxu1 %v4596_v52  ;;  %v380_v44 = vld [vmem:[%s6172_s7 + $0x578] sm:$0xff] }
 0x1e2   : > { %v6894_v43 = vadd.f32 %v5430_v48, %v3221_v51  ;;  %v5319_v15 = vpop.f32.mrb[116].mxu0  ;;  %v4609_v48 = vcombine.low %v355_v46, %v363_v39 }
 0x1e3   : > { %v5431_v28 = vpop.f32.mrb[116].mxu1  ;;  %v5320_v59 = vpop.f32.mrb[117].mxu0 }
 0x1e4   : > { %v5321_v4 = vadd.f32 %v5320_v59, %v5319_v15  ;;  %v5432_v49 = vpop.f32.mrb[117].mxu1  ;;  %v5322_v61 = vpop.f32.mrb[118].mxu0  ;;  %v4611_v59 = vcombine.low %v356_v58, %v364_v55  ;;  %v387_v58 = vld [vmem:[%s6172_s7 + $0x5b0] sm:$0xff] }
 0x1e5   : > { %v5433_v62 = vadd.f32 %v5432_v49, %v5431_v28  ;;  %v5434_v16 = vpop.f32.mrb[118].mxu1  ;;  %v5323_v25 = vpop.f32.mrb[119].mxu0  ;;  %v395_v55 = vld [vmem:[%s6172_s7 + $0x5f0] sm:$0xff] }
 0x1e6   : > { %v3226_v57 = vadd.f32 %v5321_v4, %v6744_v37  ;;  %v5324_v29 = vadd.f32 %v5323_v25, %v5322_v61  ;;  %v5435_v27 = vpop.f32.mrb[119].mxu1  ;;  %v4628_v61 = vcombine.high %v372_v24, %v380_v44 }
 0x1e7   : > { %v5436_v34 = vadd.f32 %v5435_v27, %v5434_v16  ;;  %3828 = vmatmul.mubr.bf16.gmra.mrb[224].mxu0 %v4593_v2  ;;  %v4626_v2 = vcombine.high %v371_v18, %v379_v13 }
 0x1e8   : > { %v6899_v10 = vadd.f32 %v5433_v62, %v3226_v57  ;;  %v3229_v5 = vadd.f32 %v5324_v29, %v6746_v31  ;;  %3989 = vmatmul.mubr.bf16.gmra.mrb[224].mxu1 %v4595_v30  ;;  %3835 = vmatprep.mubr.bf16.mxu0 %v4610_v6  ;;  %v388_v57 = vld [vmem:[%s6172_s7 + $0x5b8] sm:$0xff] }
 0x1e9   : > { %3996 = vmatprep.mubr.bf16.mxu1 %v4612_v26  ;;  %v396_v29 = vld [vmem:[%s6172_s7 + $0x5f8] sm:$0xff] }
 0x1ea   : > { %v6904_v1 = vadd.f32 %v5436_v34, %v3229_v5  ;;  %v5325_v52 = vpop.f32.mrb[120].mxu0  ;;  %v4625_v34 = vcombine.low %v371_v18, %v379_v13 }
 0x1eb   : > { %v5437_v60 = vpop.f32.mrb[120].mxu1  ;;  %v5326_v37 = vpop.f32.mrb[121].mxu0 }
 0x1ec   : > { %v5327_v51 = vadd.f32 %v5326_v37, %v5325_v52  ;;  %v5438_v15 = vpop.f32.mrb[121].mxu1  ;;  %v5328_v28 = vpop.f32.mrb[122].mxu0  ;;  %v4627_v37 = vcombine.low %v372_v24, %v380_v44  ;;  %v403_v24 = vld [vmem:[%s6172_s7 + $0x630] sm:$0xff] }
 0x1ed   : > { %v5439_v31 = vadd.f32 %v5438_v15, %v5437_v60  ;;  %v5440_v4 = vpop.f32.mrb[122].mxu1  ;;  %v5329_v49 = vpop.f32.mrb[123].mxu0  ;;  %v411_v44 = vld [vmem:[%s6172_s7 + $0x670] sm:$0xff] }
 0x1ee   : > { %v3234_v30 = vadd.f32 %v5327_v51, %v6752_v9  ;;  %v5330_v6 = vadd.f32 %v5329_v49, %v5328_v28  ;;  %v5441_v62 = vpop.f32.mrb[123].mxu1  ;;  %v4644_v28 = vcombine.high %v388_v57, %v396_v29 }
 0x1ef   : > { %v5442_v16 = vadd.f32 %v5441_v62, %v5440_v4  ;;  %3836 = vmatmul.mubr.bf16.gmra.mrb[228].mxu0 %v4609_v48  ;;  %v4642_v48 = vcombine.high %v387_v58, %v395_v55 }
 0x1f0   : > { %v6909_v46 = vadd.f32 %v5439_v31, %v3234_v30  ;;  %v3237_v39 = vadd.f32 %v5330_v6, %v6754_v0  ;;  %3997 = vmatmul.mubr.bf16.gmra.mrb[228].mxu1 %v4611_v59  ;;  %3843 = vmatprep.mubr.bf16.mxu0 %v4626_v2  ;;  %v404_v30 = vld [vmem:[%s6172_s7 + $0x638] sm:$0xff] }
 0x1f1   : > { %4004 = vmatprep.mubr.bf16.mxu1 %v4628_v61  ;;  %v412_v6 = vld [vmem:[%s6172_s7 + $0x678] sm:$0xff] }
 0x1f2   : > { %v6914_v25 = vadd.f32 %v5442_v16, %v3237_v39  ;;  %v5331_v26 = vpop.f32.mrb[124].mxu0  ;;  %v4641_v16 = vcombine.low %v387_v58, %v395_v55 }
 0x1f3   : > { %v5443_v27 = vpop.f32.mrb[124].mxu1  ;;  %v5332_v9 = vpop.f32.mrb[125].mxu0 }
 0x1f4   : > { %v5333_v5 = vadd.f32 %v5332_v9, %v5331_v26  ;;  %v5444_v52 = vpop.f32.mrb[125].mxu1  ;;  %v5334_v60 = vpop.f32.mrb[126].mxu0  ;;  %v4643_v9 = vcombine.low %v388_v57, %v396_v29  ;;  %v419_v57 = vld [vmem:[%s6172_s7 + $0x6b0] sm:$0xff] }
 0x1f5   : > { %v5445_v0 = vadd.f32 %v5444_v52, %v5443_v27  ;;  %v5446_v51 = vpop.f32.mrb[126].mxu1  ;;  %v5335_v15 = vpop.f32.mrb[127].mxu0  ;;  %v427_v29 = vld [vmem:[%s6172_s7 + $0x6f0] sm:$0xff] }
 0x1f6   : > { %v3242_v59 = vadd.f32 %v5333_v5, %v6760_v50  ;;  %v5336_v2 = vadd.f32 %v5335_v15, %v5334_v60  ;;  %v5447_v31 = vpop.f32.mrb[127].mxu1  ;;  %v4660_v60 = vcombine.high %v404_v30, %v412_v6 }
 0x1f7   : > { %v5448_v4 = vadd.f32 %v5447_v31, %v5446_v51  ;;  %3844 = vmatmul.mubr.bf16.gmra.mrb[232].mxu0 %v4625_v34  ;;  %v4658_v34 = vcombine.high %v403_v24, %v411_v44 }
 0x1f8   : > { %v6919_v18 = vadd.f32 %v5445_v0, %v3242_v59  ;;  %v3245_v13 = vadd.f32 %v5336_v2, %v6762_v33  ;;  %4005 = vmatmul.mubr.bf16.gmra.mrb[232].mxu1 %v4627_v37  ;;  %3851 = vmatprep.mubr.bf16.mxu0 %v4642_v48  ;;  %v420_v59 = vld [vmem:[%s6172_s7 + $0x6b8] sm:$0xff] }
 0x1f9   : > { %4012 = vmatprep.mubr.bf16.mxu1 %v4644_v28  ;;  %v428_v2 = vld [vmem:[%s6172_s7 + $0x6f8] sm:$0xff] }
 0x1fa   : > { %v6924_v49 = vadd.f32 %v5448_v4, %v3245_v13  ;;  %v5465_v61 = vpop.f32.mrb[128].mxu0  ;;  %v4657_v4 = vcombine.low %v403_v24, %v411_v44 }
 0x1fb   : > { %v5577_v62 = vpop.f32.mrb[128].mxu1  ;;  %v5466_v50 = vpop.f32.mrb[129].mxu0 }
 0x1fc   : > { %v5467_v39 = vadd.f32 %v5466_v50, %v5465_v61  ;;  %v5578_v26 = vpop.f32.mrb[129].mxu1  ;;  %v5468_v27 = vpop.f32.mrb[130].mxu0  ;;  %v4659_v50 = vcombine.low %v404_v30, %v412_v6  ;;  %v435_v30 = vld [vmem:[%s6172_s7 + $0x730] sm:$0xff] }
 0x1fd   : > { %v5579_v33 = vadd.f32 %v5578_v26, %v5577_v62  ;;  %v5580_v5 = vpop.f32.mrb[130].mxu1  ;;  %v5469_v52 = vpop.f32.mrb[131].mxu0  ;;  %v443_v6 = vld [vmem:[%s6172_s7 + $0x770] sm:$0xff] }
 0x1fe   : > { %v3444_v37 = vadd.f32 %v5467_v39, %v6769_v3  ;;  %v5470_v48 = vadd.f32 %v5469_v52, %v5468_v27  ;;  %v5581_v0 = vpop.f32.mrb[131].mxu1  ;;  %v4676_v27 = vcombine.high %v420_v59, %v428_v2 }
 0x1ff   : > { %v5582_v51 = vadd.f32 %v5581_v0, %v5580_v5  ;;  %3852 = vmatmul.mubr.bf16.gmra.mrb[236].mxu0 %v4641_v16  ;;  %v4674_v16 = vcombine.high %v419_v57, %v427_v29 }
 0x200   : > { %v6929_v58 = vadd.f32 %v5579_v33, %v3444_v37  ;;  %v3447_v55 = vadd.f32 %v5470_v48, %v6774_v38  ;;  %4013 = vmatmul.mubr.bf16.gmra.mrb[236].mxu1 %v4643_v9  ;;  %3859 = vmatprep.mubr.bf16.mxu0 %v4658_v34  ;;  %v436_v37 = vld [vmem:[%s6172_s7 + $0x738] sm:$0xff] }
 0x201   : > { %4020 = vmatprep.mubr.bf16.mxu1 %v4660_v60  ;;  %v444_v48 = vld [vmem:[%s6172_s7 + $0x778] sm:$0xff] }
 0x202   : > { %v6934_v15 = vadd.f32 %v5582_v51, %v3447_v55  ;;  %v5471_v28 = vpop.f32.mrb[132].mxu0  ;;  %v4673_v51 = vcombine.low %v419_v57, %v427_v29 }
 0x203   : > { %v5583_v31 = vpop.f32.mrb[132].mxu1  ;;  %v5472_v3 = vpop.f32.mrb[133].mxu0 }
 0x204   : > { %v5473_v13 = vadd.f32 %v5472_v3, %v5471_v28  ;;  %v5584_v61 = vpop.f32.mrb[133].mxu1  ;;  %v5474_v62 = vpop.f32.mrb[134].mxu0  ;;  %v4675_v3 = vcombine.low %v420_v59, %v428_v2  ;;  %v451_v59 = vld [vmem:[%s6172_s7 + $0x7b0] sm:$0xff] }
 0x205   : > { %v5585_v38 = vadd.f32 %v5584_v61, %v5583_v31  ;;  %v5586_v39 = vpop.f32.mrb[134].mxu1  ;;  %v5475_v26 = vpop.f32.mrb[135].mxu0  ;;  %v459_v2 = vld [vmem:[%s6172_s7 + $0x7f0] sm:$0xff] }
 0x206   : > { %v3452_v9 = vadd.f32 %v5473_v13, %v6779_v35  ;;  %v5476_v34 = vadd.f32 %v5475_v26, %v5474_v62  ;;  %v5587_v33 = vpop.f32.mrb[135].mxu1  ;;  %v4692_v62 = vcombine.high %v436_v37, %v444_v48 }
 0x207   : > { %v5588_v5 = vadd.f32 %v5587_v33, %v5586_v39  ;;  %3860 = vmatmul.mubr.bf16.gmra.mrb[240].mxu0 %v4657_v4  ;;  %v4690_v4 = vcombine.high %v435_v30, %v443_v6 }
 0x208   : > { %v6939_v24 = vadd.f32 %v5585_v38, %v3452_v9  ;;  %v3455_v44 = vadd.f32 %v5476_v34, %v6784_v17  ;;  %4021 = vmatmul.mubr.bf16.gmra.mrb[240].mxu1 %v4659_v50  ;;  %3867 = vmatprep.mubr.bf16.mxu0 %v4674_v16  ;;  %v452_v9 = vld [vmem:[%s6172_s7 + $0x7b8] sm:$0xff] }
 0x209   : > { %4028 = vmatprep.mubr.bf16.mxu1 %v4676_v27  ;;  %v460_v34 = vld [vmem:[%s6172_s7 + $0x7f8] sm:$0xff] }
 0x20a   : > { %v6944_v52 = vadd.f32 %v5588_v5, %v3455_v44  ;;  %v5477_v60 = vpop.f32.mrb[136].mxu0  ;;  %v4689_v5 = vcombine.low %v435_v30, %v443_v6 }
 0x20b   : > { %v5589_v0 = vpop.f32.mrb[136].mxu1  ;;  %v5478_v35 = vpop.f32.mrb[137].mxu0 }
 0x20c   : > { %v5479_v55 = vadd.f32 %v5478_v35, %v5477_v60  ;;  %v5590_v28 = vpop.f32.mrb[137].mxu1  ;;  %v5480_v31 = vpop.f32.mrb[138].mxu0  ;;  %v4691_v35 = vcombine.low %v436_v37, %v444_v48 }
 0x20d   : > { %v5591_v17 = vadd.f32 %v5590_v28, %v5589_v0  ;;  %v5592_v13 = vpop.f32.mrb[138].mxu1  ;;  %v5481_v61 = vpop.f32.mrb[139].mxu0 }
 0x20e   : > { %v3460_v50 = vadd.f32 %v5479_v55, %v6789_v12  ;;  %v5482_v16 = vadd.f32 %v5481_v61, %v5480_v31  ;;  %v5593_v38 = vpop.f32.mrb[139].mxu1  ;;  %v4708_v31 = vcombine.high %v452_v9, %v460_v34 }
 0x20f   : > { %v5594_v39 = vadd.f32 %v5593_v38, %v5592_v13  ;;  %3868 = vmatmul.mubr.bf16.gmra.mrb[244].mxu0 %v4673_v51  ;;  %v4706_v51 = vcombine.high %v451_v59, %v459_v2 }
 0x210   : > { %v6949_v57 = vadd.f32 %v5591_v17, %v3460_v50  ;;  %v3463_v29 = vadd.f32 %v5482_v16, %v6794_v7  ;;  %4029 = vmatmul.mubr.bf16.gmra.mrb[244].mxu1 %v4675_v3  ;;  %3875 = vmatprep.mubr.bf16.mxu0 %v4690_v4  ;;  %v4705_v50 = vcombine.low %v451_v59, %v459_v2 }
 0x211   : > { %4036 = vmatprep.mubr.bf16.mxu1 %v4692_v62 }
 0x212   : > { %v6954_v26 = vadd.f32 %v5594_v39, %v3463_v29  ;;  %v5483_v27 = vpop.f32.mrb[140].mxu0  ;;  %v4707_v39 = vcombine.low %v452_v9, %v460_v34 }
 0x213   : > { %v5595_v33 = vpop.f32.mrb[140].mxu1  ;;  %v5484_v12 = vpop.f32.mrb[141].mxu0 }
 0x214   : > { %v5485_v44 = vadd.f32 %v5484_v12, %v5483_v27  ;;  %v5596_v60 = vpop.f32.mrb[141].mxu1  ;;  %v5486_v0 = vpop.f32.mrb[142].mxu0 }
 0x215   : > { %v5597_v55 = vadd.f32 %v5596_v60, %v5595_v33  ;;  %v5598_v7 = vpop.f32.mrb[142].mxu1  ;;  %v5487_v28 = vpop.f32.mrb[143].mxu0 }
 0x216   : > { %v3468_v3 = vadd.f32 %v5485_v44, %v6799_v53  ;;  %v5488_v4 = vadd.f32 %v5487_v28, %v5486_v0  ;;  %v5599_v17 = vpop.f32.mrb[143].mxu1 }
 0x217   : > { %v5600_v13 = vadd.f32 %v5599_v17, %v5598_v7  ;;  %3876 = vmatmul.mubr.bf16.gmra.mrb[248].mxu0 %v4689_v5 }
 0x218   : > { %v6959_v61 = vadd.f32 %v5597_v55, %v3468_v3  ;;  %v3471_v62 = vadd.f32 %v5488_v4, %v6804_v40  ;;  %4037 = vmatmul.mubr.bf16.gmra.mrb[248].mxu1 %v4691_v35  ;;  %3883 = vmatprep.mubr.bf16.mxu0 %v4706_v51 }
 0x219   : > { %4044 = vmatprep.mubr.bf16.mxu1 %v4708_v31 }
 0x21a   : > { %v6962_v30 = vadd.f32 %v5600_v13, %v3471_v62  ;;  %v5489_v6 = vpop.f32.mrb[144].mxu0 }
 0x21b   : > { %v5601_v37 = vpop.f32.mrb[144].mxu1  ;;  %v5490_v48 = vpop.f32.mrb[145].mxu0 }
 0x21c   : > { %v5491_v16 = vadd.f32 %v5490_v48, %v5489_v6  ;;  %v5602_v38 = vpop.f32.mrb[145].mxu1  ;;  %v5492_v53 = vpop.f32.mrb[146].mxu0 }
 0x21d   : > { %v5603_v29 = vadd.f32 %v5602_v38, %v5601_v37  ;;  %v5604_v27 = vpop.f32.mrb[146].mxu1  ;;  %v5493_v33 = vpop.f32.mrb[147].mxu0 }
 0x21e   : > { %v3476_v12 = vadd.f32 %v5491_v16, %v6809_v42  ;;  %v5494_v5 = vadd.f32 %v5493_v33, %v5492_v53  ;;  %v5605_v40 = vpop.f32.mrb[147].mxu1 }
 0x21f   : > { %v5606_v44 = vadd.f32 %v5605_v40, %v5604_v27  ;;  %3884 = vmatmul.mubr.bf16.gmra.mrb[252].mxu0 %v4705_v50 }
 0x220   : > { %v6965_v60 = vadd.f32 %v5603_v29, %v3476_v12  ;;  %v3479_v0 = vadd.f32 %v5494_v5, %v6814_v36  ;;  %4045 = vmatmul.mubr.bf16.gmra.mrb[252].mxu1 %v4707_v39 }
 0x222   : > { %v6968_v35 = vadd.f32 %v5606_v44, %v3479_v0  ;;  %v5495_v59 = vpop.f32.mrb[148].mxu0 }
 0x223   : > { %v5607_v2 = vpop.f32.mrb[148].mxu1  ;;  %v5496_v51 = vpop.f32.mrb[149].mxu0 }
 0x224   : > { %v5497_v9 = vadd.f32 %v5496_v51, %v5495_v59  ;;  %v5608_v34 = vpop.f32.mrb[149].mxu1  ;;  %v5498_v55 = vpop.f32.mrb[150].mxu0 }
 0x225   : > { %v5609_v7 = vadd.f32 %v5608_v34, %v5607_v2  ;;  %v5610_v28 = vpop.f32.mrb[150].mxu1  ;;  %v5499_v42 = vpop.f32.mrb[151].mxu0 }
 0x226   : > { %v3484_v31 = vadd.f32 %v5497_v9, %v6819_v22  ;;  %v5500_v3 = vadd.f32 %v5499_v42, %v5498_v55  ;;  %v5611_v4 = vpop.f32.mrb[151].mxu1 }
 0x227   : > { %v5612_v17 = vadd.f32 %v5611_v4, %v5610_v28 }
 0x228   : > { %v6971_v13 = vadd.f32 %v5609_v7, %v3484_v31  ;;  %v3487_v36 = vadd.f32 %v5500_v3, %v6824_v20 }
 0x22a   : > { %v6974_v62 = vadd.f32 %v5612_v17, %v3487_v36  ;;  %v5501_v6 = vpop.f32.mrb[152].mxu0 }
 0x22b   : > { %v5613_v37 = vpop.f32.mrb[152].mxu1  ;;  %v5502_v48 = vpop.f32.mrb[153].mxu0 }
 0x22c   : > { %v5503_v50 = vadd.f32 %v5502_v48, %v5501_v6  ;;  %v5614_v16 = vpop.f32.mrb[153].mxu1  ;;  %v5504_v38 = vpop.f32.mrb[154].mxu0 }
 0x22d   : > { %v5615_v53 = vadd.f32 %v5614_v16, %v5613_v37  ;;  %v5616_v39 = vpop.f32.mrb[154].mxu1  ;;  %v5505_v29 = vpop.f32.mrb[155].mxu0 }
 0x22e   : > { %v3492_v22 = vadd.f32 %v5503_v50, %v6829_v11  ;;  %v5506_v27 = vadd.f32 %v5505_v29, %v5504_v38  ;;  %v5617_v33 = vpop.f32.mrb[155].mxu1 }
 0x22f   : > { %v5618_v12 = vadd.f32 %v5617_v33, %v5616_v39 }
 0x230   : > { %v6977_v5 = vadd.f32 %v5615_v53, %v3492_v22  ;;  %v3495_v20 = vadd.f32 %v5506_v27, %v6834_v8 }
 0x232   : > { %v6980_v40 = vadd.f32 %v5618_v12, %v3495_v20  ;;  %v5507_v44 = vpop.f32.mrb[156].mxu0 }
 0x233   : > { %v5619_v0 = vpop.f32.mrb[156].mxu1  ;;  %v5508_v59 = vpop.f32.mrb[157].mxu0 }
 0x234   : > { %v5509_v2 = vadd.f32 %v5508_v59, %v5507_v44  ;;  %v5620_v51 = vpop.f32.mrb[157].mxu1  ;;  %v5510_v9 = vpop.f32.mrb[158].mxu0 }
 0x235   : > { %v5621_v34 = vadd.f32 %v5620_v51, %v5619_v0  ;;  %v5622_v55 = vpop.f32.mrb[158].mxu1  ;;  %v5511_v7 = vpop.f32.mrb[159].mxu0 }
 0x236   : > { %v3500_v11 = vadd.f32 %v5509_v2, %v6839_v54  ;;  %v5512_v28 = vadd.f32 %v5511_v7, %v5510_v9  ;;  %v5623_v42 = vpop.f32.mrb[159].mxu1 }
 0x237   : > { %v5624_v31 = vadd.f32 %v5623_v42, %v5622_v55 }
 0x238   : > { %v6983_v3 = vadd.f32 %v5621_v34, %v3500_v11  ;;  %v3503_v8 = vadd.f32 %v5512_v28, %v6844_v56 }
 0x23a   : > { %v6986_v4 = vadd.f32 %v5624_v31, %v3503_v8  ;;  %v5513_v17 = vpop.f32.mrb[160].mxu0 }
 0x23b   : > { %v5625_v36 = vpop.f32.mrb[160].mxu1  ;;  %v5514_v6 = vpop.f32.mrb[161].mxu0 }
 0x23c   : > { %v5515_v37 = vadd.f32 %v5514_v6, %v5513_v17  ;;  %v5626_v48 = vpop.f32.mrb[161].mxu1  ;;  %v5516_v50 = vpop.f32.mrb[162].mxu0 }
 0x23d   : > { %v5627_v16 = vadd.f32 %v5626_v48, %v5625_v36  ;;  %v5628_v38 = vpop.f32.mrb[162].mxu1  ;;  %v5517_v53 = vpop.f32.mrb[163].mxu0 }
 0x23e   : > { %v3508_v54 = vadd.f32 %v5515_v37, %v6849_v19  ;;  %v5518_v39 = vadd.f32 %v5517_v53, %v5516_v50  ;;  %v5629_v29 = vpop.f32.mrb[163].mxu1 }
 0x23f   : > { %v5630_v22 = vadd.f32 %v5629_v29, %v5628_v38 }
 0x240   : > { %v6989_v27 = vadd.f32 %v5627_v16, %v3508_v54  ;;  %v3511_v56 = vadd.f32 %v5518_v39, %v6854_v45 }
 0x242   : > { %v6992_v33 = vadd.f32 %v5630_v22, %v3511_v56  ;;  %v5519_v12 = vpop.f32.mrb[164].mxu0 }
 0x243   : > { %v5631_v20 = vpop.f32.mrb[164].mxu1  ;;  %v5520_v44 = vpop.f32.mrb[165].mxu0 }
 0x244   : > { %v5521_v0 = vadd.f32 %v5520_v44, %v5519_v12  ;;  %v5632_v59 = vpop.f32.mrb[165].mxu1  ;;  %v5522_v2 = vpop.f32.mrb[166].mxu0 }
 0x245   : > { %v5633_v51 = vadd.f32 %v5632_v59, %v5631_v20  ;;  %v5634_v9 = vpop.f32.mrb[166].mxu1  ;;  %v5523_v34 = vpop.f32.mrb[167].mxu0 }
 0x246   : > { %v3516_v19 = vadd.f32 %v5521_v0, %v6859_v41  ;;  %v5524_v55 = vadd.f32 %v5523_v34, %v5522_v2  ;;  %v5635_v7 = vpop.f32.mrb[167].mxu1 }
 0x247   : > { %v5636_v11 = vadd.f32 %v5635_v7, %v5634_v9 }
 0x248   : > { %v6995_v28 = vadd.f32 %v5633_v51, %v3516_v19  ;;  %v3519_v45 = vadd.f32 %v5524_v55, %v6864_v32 }
 0x24a   : > { %v6998_v42 = vadd.f32 %v5636_v11, %v3519_v45  ;;  %v5525_v31 = vpop.f32.mrb[168].mxu0 }
 0x24b   : > { %v5637_v8 = vpop.f32.mrb[168].mxu1  ;;  %v5526_v17 = vpop.f32.mrb[169].mxu0 }
 0x24c   : > { %v5527_v36 = vadd.f32 %v5526_v17, %v5525_v31  ;;  %v5638_v6 = vpop.f32.mrb[169].mxu1  ;;  %v5528_v37 = vpop.f32.mrb[170].mxu0 }
 0x24d   : > { %v5639_v48 = vadd.f32 %v5638_v6, %v5637_v8  ;;  %v5640_v50 = vpop.f32.mrb[170].mxu1  ;;  %v5529_v16 = vpop.f32.mrb[171].mxu0 }
 0x24e   : > { %v3524_v41 = vadd.f32 %v5527_v36, %v6869_v63  ;;  %v5530_v38 = vadd.f32 %v5529_v16, %v5528_v37  ;;  %v5641_v53 = vpop.f32.mrb[171].mxu1 }
 0x24f   : > { %v5642_v54 = vadd.f32 %v5641_v53, %v5640_v50 }
 0x250   : > { %v7001_v39 = vadd.f32 %v5639_v48, %v3524_v41  ;;  %v3527_v32 = vadd.f32 %v5530_v38, %v6874_v14 }
 0x252   : > { %v7004_v29 = vadd.f32 %v5642_v54, %v3527_v32  ;;  %v5531_v22 = vpop.f32.mrb[172].mxu0 }
 0x253   : > { %v5643_v56 = vpop.f32.mrb[172].mxu1  ;;  %v5532_v12 = vpop.f32.mrb[173].mxu0 }
 0x254   : > { %v5533_v20 = vadd.f32 %v5532_v12, %v5531_v22  ;;  %v5644_v44 = vpop.f32.mrb[173].mxu1  ;;  %v5534_v0 = vpop.f32.mrb[174].mxu0 }
 0x255   : > { %v5645_v59 = vadd.f32 %v5644_v44, %v5643_v56  ;;  %v5646_v2 = vpop.f32.mrb[174].mxu1  ;;  %v5535_v51 = vpop.f32.mrb[175].mxu0 }
 0x256   : > { %v3532_v63 = vadd.f32 %v5533_v20, %v6879_v23  ;;  %v5536_v9 = vadd.f32 %v5535_v51, %v5534_v0  ;;  %v5647_v34 = vpop.f32.mrb[175].mxu1 }
 0x257   : > { %v5648_v19 = vadd.f32 %v5647_v34, %v5646_v2 }
 0x258   : > { %v7007_v55 = vadd.f32 %v5645_v59, %v3532_v63  ;;  %v3535_v14 = vadd.f32 %v5536_v9, %v6884_v21 }
 0x25a   : > { %v7010_v7 = vadd.f32 %v5648_v19, %v3535_v14  ;;  %v5537_v11 = vpop.f32.mrb[176].mxu0 }
 0x25b   : > { %v5649_v45 = vpop.f32.mrb[176].mxu1  ;;  %v5538_v31 = vpop.f32.mrb[177].mxu0 }
 0x25c   : > { %v5539_v8 = vadd.f32 %v5538_v31, %v5537_v11  ;;  %v5650_v17 = vpop.f32.mrb[177].mxu1  ;;  %v5540_v36 = vpop.f32.mrb[178].mxu0 }
 0x25d   : > { %v5651_v6 = vadd.f32 %v5650_v17, %v5649_v45  ;;  %v5652_v37 = vpop.f32.mrb[178].mxu1  ;;  %v5541_v48 = vpop.f32.mrb[179].mxu0 }
 0x25e   : > { %v3540_v23 = vadd.f32 %v5539_v8, %v6889_v47  ;;  %v5542_v50 = vadd.f32 %v5541_v48, %v5540_v36  ;;  %v5653_v16 = vpop.f32.mrb[179].mxu1 }
 0x25f   : > { %v5654_v41 = vadd.f32 %v5653_v16, %v5652_v37 }
 0x260   : > { %v7013_v38 = vadd.f32 %v5651_v6, %v3540_v23  ;;  %v3543_v21 = vadd.f32 %v5542_v50, %v6894_v43 }
 0x262   : > { %v7016_v53 = vadd.f32 %v5654_v41, %v3543_v21  ;;  %v5543_v54 = vpop.f32.mrb[180].mxu0 }
 0x263   : > { %v5655_v32 = vpop.f32.mrb[180].mxu1  ;;  %v5544_v22 = vpop.f32.mrb[181].mxu0 }
 0x264   : > { %v5545_v56 = vadd.f32 %v5544_v22, %v5543_v54  ;;  %v5656_v12 = vpop.f32.mrb[181].mxu1  ;;  %v5546_v20 = vpop.f32.mrb[182].mxu0 }
 0x265   : > { %v5657_v44 = vadd.f32 %v5656_v12, %v5655_v32  ;;  %v5658_v0 = vpop.f32.mrb[182].mxu1  ;;  %v5547_v59 = vpop.f32.mrb[183].mxu0 }
 0x266   : > { %v3548_v47 = vadd.f32 %v5545_v56, %v6899_v10  ;;  %v5548_v2 = vadd.f32 %v5547_v59, %v5546_v20  ;;  %v5659_v51 = vpop.f32.mrb[183].mxu1 }
 0x267   : > { %v5660_v63 = vadd.f32 %v5659_v51, %v5658_v0 }
 0x268   : > { %v7019_v9 = vadd.f32 %v5657_v44, %v3548_v47  ;;  %v3551_v43 = vadd.f32 %v5548_v2, %v6904_v1 }
 0x26a   : > { %v7022_v34 = vadd.f32 %v5660_v63, %v3551_v43  ;;  %v5549_v19 = vpop.f32.mrb[184].mxu0 }
 0x26b   : > { %v5661_v14 = vpop.f32.mrb[184].mxu1  ;;  %v5550_v11 = vpop.f32.mrb[185].mxu0 }
 0x26c   : > { %v5551_v45 = vadd.f32 %v5550_v11, %v5549_v19  ;;  %v5662_v31 = vpop.f32.mrb[185].mxu1  ;;  %v5552_v8 = vpop.f32.mrb[186].mxu0 }
 0x26d   : > { %v5663_v17 = vadd.f32 %v5662_v31, %v5661_v14  ;;  %v5664_v36 = vpop.f32.mrb[186].mxu1  ;;  %v5553_v6 = vpop.f32.mrb[187].mxu0 }
 0x26e   : > { %v3556_v10 = vadd.f32 %v5551_v45, %v6909_v46  ;;  %v5554_v37 = vadd.f32 %v5553_v6, %v5552_v8  ;;  %v5665_v48 = vpop.f32.mrb[187].mxu1 }
 0x26f   : > { %v5666_v23 = vadd.f32 %v5665_v48, %v5664_v36 }
 0x270   : > { %v7025_v50 = vadd.f32 %v5663_v17, %v3556_v10  ;;  %v3559_v1 = vadd.f32 %v5554_v37, %v6914_v25  ;;  %v7040_v10 = vld [vmem:[%s7169_s2] ss:$0 sm:$0xff] }
 0x272   : > { %v7028_v16 = vadd.f32 %v5666_v23, %v3559_v1  ;;  %v5555_v41 = vpop.f32.mrb[188].mxu0  ;;  %v7046_v23 = vld [vmem:[%s7170_s3] ss:$0 sm:$0xff] }
 0x273   : > { %v5667_v21 = vpop.f32.mrb[188].mxu1  ;;  %v5556_v54 = vpop.f32.mrb[189].mxu0 }
 0x274   : > { %v5557_v32 = vadd.f32 %v5556_v54, %v5555_v41  ;;  %v5668_v22 = vpop.f32.mrb[189].mxu1  ;;  %v5558_v56 = vpop.f32.mrb[190].mxu0 }
 0x275   : > { %v5669_v12 = vadd.f32 %v5668_v22, %v5667_v21  ;;  %v5670_v20 = vpop.f32.mrb[190].mxu1  ;;  %v5559_v44 = vpop.f32.mrb[191].mxu0 }
 0x276   : > { %v3564_v46 = vadd.f32 %v5557_v32, %v6919_v18  ;;  %v5560_v0 = vadd.f32 %v5559_v44, %v5558_v56  ;;  %v5671_v59 = vpop.f32.mrb[191].mxu1 }
 0x277   : > { %v5672_v47 = vadd.f32 %v5671_v59, %v5670_v20 }
 0x278   : > { %v7031_v2 = vadd.f32 %v5669_v12, %v3564_v46  ;;  %v3567_v25 = vadd.f32 %v5560_v0, %v6924_v49 }
 0x27a   : > { %v7034_v51 = vadd.f32 %v5672_v47, %v3567_v25  ;;  %v5689_v63 = vpop.f32.mrb[192].mxu0 }
 0x27b   : > { %v5801_v43 = vpop.f32.mrb[192].mxu1  ;;  %v5690_v19 = vpop.f32.mrb[193].mxu0 }
 0x27c   : > { %v5691_v14 = vadd.f32 %v5690_v19, %v5689_v63  ;;  %v5802_v11 = vpop.f32.mrb[193].mxu1  ;;  %v5692_v45 = vpop.f32.mrb[194].mxu0 }
 0x27d   : > { %v5803_v31 = vadd.f32 %v5802_v11, %v5801_v43  ;;  %v5804_v8 = vpop.f32.mrb[194].mxu1  ;;  %v5693_v17 = vpop.f32.mrb[195].mxu0 }
 0x27e   : > { %v3766_v18 = vadd.f32 %v5691_v14, %v6929_v58  ;;  %v5694_v36 = vadd.f32 %v5693_v17, %v5692_v45  ;;  %v5805_v6 = vpop.f32.mrb[195].mxu1 }
 0x27f   : > { %v5806_v49 = vadd.f32 %v5805_v6, %v5804_v8 }
 0x280   : > { %v3927_v37 = vadd.f32 %v5803_v31, %v3766_v18  ;;  %v3769_v48 = vadd.f32 %v5694_v36, %v6934_v15 }
 0x282   : > { %v4060_v1 = vmul.f32 %v7040_v10, %v3927_v37  ;;  %v3930_v41 = vadd.f32 %v5806_v49, %v3769_v48  ;;  %v5695_v58 = vpop.f32.mrb[196].mxu0 }
 0x283   : > { %v5807_v21 = vpop.f32.mrb[196].mxu1  ;;  %v5696_v54 = vpop.f32.mrb[197].mxu0 }
 0x284   : > { %v4099_v32 = vadd.f32 %v7046_v23, %v4060_v1  ;;  %v4061_v22 = vmul.f32 %v7040_v10, %v3930_v41  ;;  %v5697_v56 = vadd.f32 %v5696_v54, %v5695_v58  ;;  %v5808_v12 = vpop.f32.mrb[197].mxu1  ;;  %v5698_v20 = vpop.f32.mrb[198].mxu0 }
 0x285   : > { %v5809_v15 = vadd.f32 %v5808_v12, %v5807_v21  ;;  %v5810_v44 = vpop.f32.mrb[198].mxu1  ;;  %v5699_v46 = vpop.f32.mrb[199].mxu0 }
 0x286   : > { %v4163_v0 = vmul.f32 0.2, %v4099_v32  ;;  %v4100_v59 = vadd.f32 %v7046_v23, %v4061_v22  ;;  %v3774_v47 = vadd.f32 %v5697_v56, %v6939_v24  ;;  %v5811_v25 = vpop.f32.mrb[199].mxu1  ;;  %vm4131_vm0 = vcmp.gt.f32.partialorder %v4099_v32, 0.0 }
 0x287   : > { %v5700_v63 = vadd.f32 %v5699_v46, %v5698_v20  ;;  %v5812_v43 = vadd.f32 %v5811_v25, %v5810_v44 }
 0x288   : > { %vm4132_vm1 = vcmp.gt.f32.partialorder %v4100_v59, 0.0  ;;  %v4164_v19 = vmul.f32 0.2, %v4100_v59  ;;  %v3935_v14 = vadd.f32 %v5809_v15, %v3774_v47  ;;  %v4195_v45 = vsel %vm4131_vm0, %v4099_v32, %v4163_v0 }
 0x289   : > { %v3777_v11 = vadd.f32 %v5700_v63, %v6944_v52 }
 0x28a   : > { %v4196_v31 = vsel %vm4132_vm1, %v4100_v59, %v4164_v19  ;;  %v4062_v24 = vmul.f32 %v7040_v10, %v3935_v14  ;;  %v5701_v8 = vpop.f32.mrb[200].mxu0 }
 0x28b   : > { %v4909_v17 = vpack.c.bf16 %v4196_v31, %v4195_v45  ;;  %v3938_v18 = vadd.f32 %v5812_v43, %v3777_v11  ;;  %v5813_v36 = vpop.f32.mrb[200].mxu1  ;;  %v5702_v6 = vpop.f32.mrb[201].mxu0 }
 0x28c   : > { %v4101_v49 = vadd.f32 %v7046_v23, %v4062_v24  ;;  %v5703_v37 = vadd.f32 %v5702_v6, %v5701_v8  ;;  %v5814_v48 = vpop.f32.mrb[201].mxu1  ;;  %v5704_v52 = vpop.f32.mrb[202].mxu0 }
 0x28d   : > { %4910 = vst [vmem:[%s7058_s28] sm:$0xff] %v4909_v17   ;;  %v4063_v1 = vmul.f32 %v7040_v10, %v3938_v18  ;;  %v5815_v41 = vadd.f32 %v5814_v48, %v5813_v36  ;;  %v5816_v58 = vpop.f32.mrb[202].mxu1  ;;  %v5705_v21 = vpop.f32.mrb[203].mxu0 }
 0x28e   : > { %v3782_v54 = vadd.f32 %v5703_v37, %v6949_v57  ;;  %v5706_v32 = vadd.f32 %v5705_v21, %v5704_v52  ;;  %v5817_v22 = vpop.f32.mrb[203].mxu1  ;;  %v4165_v56 = vmul.f32 0.2, %v4101_v49  ;;  %vm4133_vm2 = vcmp.gt.f32.partialorder %v4101_v49, 0.0 }
 0x28f   : > { %v4102_v12 = vadd.f32 %v7046_v23, %v4063_v1  ;;  %v5818_v20 = vadd.f32 %v5817_v22, %v5816_v58 }
 0x290   : > { %v3943_v15 = vadd.f32 %v5815_v41, %v3782_v54  ;;  %v3785_v44 = vadd.f32 %v5706_v32, %v6954_v26  ;;  %v4197_v25 = vsel %vm4133_vm2, %v4101_v49, %v4165_v56 }
 0x291   : > { %vm4134_vm3 = vcmp.gt.f32.partialorder %v4102_v12, 0.0  ;;  %v4166_v46 = vmul.f32 0.2, %v4102_v12 }
 0x292   : > { %v4064_v0 = vmul.f32 %v7040_v10, %v3943_v15  ;;  %v3946_v59 = vadd.f32 %v5818_v20, %v3785_v44  ;;  %v5707_v47 = vpop.f32.mrb[204].mxu0 }
 0x293   : > { %v4198_v63 = vsel %vm4134_vm3, %v4102_v12, %v4166_v46  ;;  %v5819_v57 = vpop.f32.mrb[204].mxu1  ;;  %v5708_v43 = vpop.f32.mrb[205].mxu0 }
 0x294   : > { %v4914_v19 = vpack.c.bf16 %v4198_v63, %v4197_v25  ;;  %v4103_v14 = vadd.f32 %v7046_v23, %v4064_v0  ;;  %v4065_v11 = vmul.f32 %v7040_v10, %v3946_v59  ;;  %v5709_v45 = vadd.f32 %v5708_v43, %v5707_v47  ;;  %v5820_v31 = vpop.f32.mrb[205].mxu1  ;;  %v5710_v24 = vpop.f32.mrb[206].mxu0 }
 0x295   : > { %v5821_v26 = vadd.f32 %v5820_v31, %v5819_v57  ;;  %v5822_v8 = vpop.f32.mrb[206].mxu1  ;;  %v5711_v17 = vpop.f32.mrb[207].mxu0 }
 0x296   : > { %4986 = vst [vmem:[%s7058_s28 + $0x8] sm:$0xff] %v4914_v19   ;;  %v4167_v18 = vmul.f32 0.2, %v4103_v14  ;;  %v4104_v36 = vadd.f32 %v7046_v23, %v4065_v11  ;;  %v3790_v6 = vadd.f32 %v5709_v45, %v6959_v61  ;;  %v5823_v49 = vpop.f32.mrb[207].mxu1  ;;  %vm4135_vm4 = vcmp.gt.f32.partialorder %v4103_v14, 0.0 }
 0x297   : > { %v5712_v37 = vadd.f32 %v5711_v17, %v5710_v24  ;;  %v5824_v48 = vadd.f32 %v5823_v49, %v5822_v8 }
 0x298   : > { %vm4136_vm5 = vcmp.gt.f32.partialorder %v4104_v36, 0.0  ;;  %v4168_v52 = vmul.f32 0.2, %v4104_v36  ;;  %v3951_v1 = vadd.f32 %v5821_v26, %v3790_v6  ;;  %v4199_v58 = vsel %vm4135_vm4, %v4103_v14, %v4167_v18 }
 0x299   : > { %v3793_v41 = vadd.f32 %v5712_v37, %v6962_v30 }
 0x29a   : > { %v4200_v21 = vsel %vm4136_vm5, %v4104_v36, %v4168_v52  ;;  %v4066_v54 = vmul.f32 %v7040_v10, %v3951_v1  ;;  %v5713_v32 = vpop.f32.mrb[208].mxu0 }
 0x29b   : > { %v4919_v22 = vpack.c.bf16 %v4200_v21, %v4199_v58  ;;  %v3954_v56 = vadd.f32 %v5824_v48, %v3793_v41  ;;  %v5825_v12 = vpop.f32.mrb[208].mxu1  ;;  %v5714_v20 = vpop.f32.mrb[209].mxu0 }
 0x29c   : > { %v4105_v61 = vadd.f32 %v7046_v23, %v4066_v54  ;;  %v5715_v15 = vadd.f32 %v5714_v20, %v5713_v32  ;;  %v5826_v44 = vpop.f32.mrb[209].mxu1  ;;  %v5716_v46 = vpop.f32.mrb[210].mxu0 }
 0x29d   : > { %4987 = vst [vmem:[%s7058_s28 + $0x10] sm:$0xff] %v4919_v22   ;;  %v4067_v0 = vmul.f32 %v7040_v10, %v3954_v56  ;;  %v5827_v59 = vadd.f32 %v5826_v44, %v5825_v12  ;;  %v5828_v47 = vpop.f32.mrb[210].mxu1  ;;  %v5717_v30 = vpop.f32.mrb[211].mxu0 }
 0x29e   : > { %v3798_v25 = vadd.f32 %v5715_v15, %v6965_v60  ;;  %v5718_v63 = vadd.f32 %v5717_v30, %v5716_v46  ;;  %v5829_v57 = vpop.f32.mrb[211].mxu1  ;;  %v4169_v43 = vmul.f32 0.2, %v4105_v61  ;;  %vm4137_vm6 = vcmp.gt.f32.partialorder %v4105_v61, 0.0 }
 0x29f   : > { %v4106_v19 = vadd.f32 %v7046_v23, %v4067_v0  ;;  %v5830_v14 = vadd.f32 %v5829_v57, %v5828_v47 }
 0x2a0   : > { %v3959_v11 = vadd.f32 %v5827_v59, %v3798_v25  ;;  %v3801_v45 = vadd.f32 %v5718_v63, %v6968_v35  ;;  %v4201_v17 = vsel %vm4137_vm6, %v4105_v61, %v4169_v43 }
 0x2a1   : > { %vm4138_vm7 = vcmp.gt.f32.partialorder %v4106_v19, 0.0  ;;  %v4170_v31 = vmul.f32 0.2, %v4106_v19 }
 0x2a2   : > { %v4068_v24 = vmul.f32 %v7040_v10, %v3959_v11  ;;  %v3962_v26 = vadd.f32 %v5830_v14, %v3801_v45  ;;  %v5719_v8 = vpop.f32.mrb[212].mxu0 }
 0x2a3   : > { %v4202_v18 = vsel %vm4138_vm7, %v4106_v19, %v4170_v31  ;;  %v5831_v60 = vpop.f32.mrb[212].mxu1  ;;  %v5720_v36 = vpop.f32.mrb[213].mxu0 }
 0x2a4   : > { %v4924_v6 = vpack.c.bf16 %v4202_v18, %v4201_v17  ;;  %v4107_v49 = vadd.f32 %v7046_v23, %v4068_v24  ;;  %v4069_v37 = vmul.f32 %v7040_v10, %v3962_v26  ;;  %v5721_v48 = vadd.f32 %v5720_v36, %v5719_v8  ;;  %v5832_v52 = vpop.f32.mrb[213].mxu1  ;;  %v5722_v1 = vpop.f32.mrb[214].mxu0 }
 0x2a5   : > { %v5833_v35 = vadd.f32 %v5832_v52, %v5831_v60  ;;  %v5834_v41 = vpop.f32.mrb[214].mxu1  ;;  %v5723_v58 = vpop.f32.mrb[215].mxu0 }
 0x2a6   : > { %4988 = vst [vmem:[%s7058_s28 + $0x18] sm:$0xff] %v4924_v6   ;;  %v4171_v21 = vmul.f32 0.2, %v4107_v49  ;;  %v4108_v54 = vadd.f32 %v7046_v23, %v4069_v37  ;;  %v3806_v32 = vadd.f32 %v5721_v48, %v6971_v13  ;;  %v5835_v22 = vpop.f32.mrb[215].mxu1  ;;  %vm4139_vm8 = vcmp.gt.f32.partialorder %v4107_v49, 0.0 }
 0x2a7   : > { %v5724_v56 = vadd.f32 %v5723_v58, %v5722_v1  ;;  %v5836_v12 = vadd.f32 %v5835_v22, %v5834_v41 }
 0x2a8   : > { %vm4140_vm9 = vcmp.gt.f32.partialorder %v4108_v54, 0.0  ;;  %v4172_v20 = vmul.f32 0.2, %v4108_v54  ;;  %v3967_v61 = vadd.f32 %v5833_v35, %v3806_v32  ;;  %v4203_v44 = vsel %vm4139_vm8, %v4107_v49, %v4171_v21 }
 0x2a9   : > { %v3809_v15 = vadd.f32 %v5724_v56, %v6974_v62 }
 0x2aa   : > { %v4204_v46 = vsel %vm4140_vm9, %v4108_v54, %v4172_v20  ;;  %v4070_v0 = vmul.f32 %v7040_v10, %v3967_v61  ;;  %v5725_v59 = vpop.f32.mrb[216].mxu0 }
 0x2ab   : > { %v4929_v47 = vpack.c.bf16 %v4204_v46, %v4203_v44  ;;  %v3970_v30 = vadd.f32 %v5836_v12, %v3809_v15  ;;  %v5837_v25 = vpop.f32.mrb[216].mxu1  ;;  %v5726_v63 = vpop.f32.mrb[217].mxu0 }
 0x2ac   : > { %v4109_v13 = vadd.f32 %v7046_v23, %v4070_v0  ;;  %v5727_v57 = vadd.f32 %v5726_v63, %v5725_v59  ;;  %v5838_v43 = vpop.f32.mrb[217].mxu1  ;;  %v5728_v19 = vpop.f32.mrb[218].mxu0 }
 0x2ad   : > { %4989 = vst [vmem:[%s7058_s28 + $0x20] sm:$0xff] %v4929_v47   ;;  %v4071_v14 = vmul.f32 %v7040_v10, %v3970_v30  ;;  %v5839_v11 = vadd.f32 %v5838_v43, %v5837_v25  ;;  %v5840_v45 = vpop.f32.mrb[218].mxu1  ;;  %v5729_v62 = vpop.f32.mrb[219].mxu0 }
 0x2ae   : > { %v3814_v31 = vadd.f32 %v5727_v57, %v6977_v5  ;;  %v5730_v24 = vadd.f32 %v5729_v62, %v5728_v19  ;;  %v5841_v26 = vpop.f32.mrb[219].mxu1  ;;  %v4173_v8 = vmul.f32 0.2, %v4109_v13  ;;  %vm4141_vm10 = vcmp.gt.f32.partialorder %v4109_v13, 0.0 }
 0x2af   : > { %v4110_v17 = vadd.f32 %v7046_v23, %v4071_v14  ;;  %v5842_v18 = vadd.f32 %v5841_v26, %v5840_v45 }
 0x2b0   : > { %v3975_v60 = vadd.f32 %v5839_v11, %v3814_v31  ;;  %v3817_v36 = vadd.f32 %v5730_v24, %v6980_v40  ;;  %v4205_v52 = vsel %vm4141_vm10, %v4109_v13, %v4173_v8 }
 0x2b1   : > { %vm4142_vm11 = vcmp.gt.f32.partialorder %v4110_v17, 0.0  ;;  %v4174_v6 = vmul.f32 0.2, %v4110_v17 }
 0x2b2   : > { %v4072_v49 = vmul.f32 %v7040_v10, %v3975_v60  ;;  %v3978_v37 = vadd.f32 %v5842_v18, %v3817_v36  ;;  %v5731_v48 = vpop.f32.mrb[220].mxu0 }
 0x2b3   : > { %v4206_v1 = vsel %vm4142_vm11, %v4110_v17, %v4174_v6  ;;  %v5843_v5 = vpop.f32.mrb[220].mxu1  ;;  %v5732_v35 = vpop.f32.mrb[221].mxu0 }
 0x2b4   : > { %v4934_v41 = vpack.c.bf16 %v4206_v1, %v4205_v52  ;;  %v4111_v58 = vadd.f32 %v7046_v23, %v4072_v49  ;;  %v4073_v21 = vmul.f32 %v7040_v10, %v3978_v37  ;;  %v5733_v54 = vadd.f32 %v5732_v35, %v5731_v48  ;;  %v5844_v32 = vpop.f32.mrb[221].mxu1  ;;  %v5734_v22 = vpop.f32.mrb[222].mxu0 }
 0x2b5   : > { %v5845_v40 = vadd.f32 %v5844_v32, %v5843_v5  ;;  %v5846_v56 = vpop.f32.mrb[222].mxu1  ;;  %v5735_v12 = vpop.f32.mrb[223].mxu0 }
 0x2b6   : > { %4990 = vst [vmem:[%s7058_s28 + $0x28] sm:$0xff] %v4934_v41   ;;  %v4175_v20 = vmul.f32 0.2, %v4111_v58  ;;  %v4112_v61 = vadd.f32 %v7046_v23, %v4073_v21  ;;  %v3822_v15 = vadd.f32 %v5733_v54, %v6983_v3  ;;  %v5847_v44 = vpop.f32.mrb[223].mxu1  ;;  %vm4143_vm12 = vcmp.gt.f32.partialorder %v4111_v58, 0.0 }
 0x2b7   : > { %v5736_v46 = vadd.f32 %v5735_v12, %v5734_v22  ;;  %v5848_v0 = vadd.f32 %v5847_v44, %v5846_v56 }
 0x2b8   : > { %vm4144_vm13 = vcmp.gt.f32.partialorder %v4112_v61, 0.0  ;;  %v4176_v59 = vmul.f32 0.2, %v4112_v61  ;;  %v3983_v47 = vadd.f32 %v5845_v40, %v3822_v15  ;;  %v4207_v25 = vsel %vm4143_vm12, %v4111_v58, %v4175_v20 }
 0x2b9   : > { %v3825_v30 = vadd.f32 %v5736_v46, %v6986_v4 }
 0x2ba   : > { %v4208_v63 = vsel %vm4144_vm13, %v4112_v61, %v4176_v59  ;;  %v4074_v13 = vmul.f32 %v7040_v10, %v3983_v47  ;;  %v5737_v57 = vpop.f32.mrb[224].mxu0 }
 0x2bb   : > { %v4939_v43 = vpack.c.bf16 %v4208_v63, %v4207_v25  ;;  %v3986_v19 = vadd.f32 %v5848_v0, %v3825_v30  ;;  %v5849_v14 = vpop.f32.mrb[224].mxu1  ;;  %v5738_v11 = vpop.f32.mrb[225].mxu0 }
 0x2bc   : > { %v4113_v3 = vadd.f32 %v7046_v23, %v4074_v13  ;;  %v5739_v45 = vadd.f32 %v5738_v11, %v5737_v57  ;;  %v5850_v62 = vpop.f32.mrb[225].mxu1  ;;  %v5740_v31 = vpop.f32.mrb[226].mxu0 }
 0x2bd   : > { %4991 = vst [vmem:[%s7058_s28 + $0x30] sm:$0xff] %v4939_v43   ;;  %v4075_v24 = vmul.f32 %v7040_v10, %v3986_v19  ;;  %v5851_v26 = vadd.f32 %v5850_v62, %v5849_v14  ;;  %v5852_v8 = vpop.f32.mrb[226].mxu1  ;;  %v5741_v4 = vpop.f32.mrb[227].mxu0 }
 0x2be   : > { %v3830_v17 = vadd.f32 %v5739_v45, %v6989_v27  ;;  %v5742_v18 = vadd.f32 %v5741_v4, %v5740_v31  ;;  %v5853_v60 = vpop.f32.mrb[227].mxu1  ;;  %v4177_v36 = vmul.f32 0.2, %v4113_v3  ;;  %vm4145_vm14 = vcmp.gt.f32.partialorder %v4113_v3, 0.0 }
 0x2bf   : > { %v4114_v6 = vadd.f32 %v7046_v23, %v4075_v24  ;;  %v5854_v49 = vadd.f32 %v5853_v60, %v5852_v8 }
 0x2c0   : > { %v3991_v37 = vadd.f32 %v5851_v26, %v3830_v17  ;;  %v3833_v48 = vadd.f32 %v5742_v18, %v6992_v33  ;;  %v4209_v41 = vsel %vm4145_vm14, %v4113_v3, %v4177_v36 }
 0x2c1   : > { %vm4146_vm15 = vcmp.gt.f32.partialorder %v4114_v6, 0.0  ;;  %v4178_v52 = vmul.f32 0.2, %v4114_v6 }
 0x2c2   : > { %v4076_v1 = vmul.f32 %v7040_v10, %v3991_v37  ;;  %v3994_v5 = vadd.f32 %v5854_v49, %v3833_v48  ;;  %v5743_v35 = vpop.f32.mrb[228].mxu0 }
 0x2c3   : > { %v4210_v58 = vsel %vm4146_vm15, %v4114_v6, %v4178_v52  ;;  %v5855_v27 = vpop.f32.mrb[228].mxu1  ;;  %v5744_v21 = vpop.f32.mrb[229].mxu0 }
 0x2c4   : > { %v4944_v54 = vpack.c.bf16 %v4210_v58, %v4209_v41  ;;  %v4115_v32 = vadd.f32 %v7046_v23, %v4076_v1  ;;  %v4077_v22 = vmul.f32 %v7040_v10, %v3994_v5  ;;  %v5745_v40 = vadd.f32 %v5744_v21, %v5743_v35  ;;  %v5856_v56 = vpop.f32.mrb[229].mxu1  ;;  %v5746_v12 = vpop.f32.mrb[230].mxu0 }
 0x2c5   : > { %v5857_v33 = vadd.f32 %v5856_v56, %v5855_v27  ;;  %v5858_v20 = vpop.f32.mrb[230].mxu1  ;;  %v5747_v61 = vpop.f32.mrb[231].mxu0 }
 0x2c6   : > { %4992 = vst [vmem:[%s7058_s28 + $0x38] sm:$0xff] %v4944_v54   ;;  %v4179_v15 = vmul.f32 0.2, %v4115_v32  ;;  %v4116_v44 = vadd.f32 %v7046_v23, %v4077_v22  ;;  %v3838_v46 = vadd.f32 %v5745_v40, %v6995_v28  ;;  %v5859_v0 = vpop.f32.mrb[231].mxu1  ;;  %vm4147_vm0 = vcmp.gt.f32.partialorder %v4115_v32, 0.0 }
 0x2c7   : > { %v5748_v59 = vadd.f32 %v5747_v61, %v5746_v12  ;;  %v5860_v47 = vadd.f32 %v5859_v0, %v5858_v20 }
 0x2c8   : > { %vm4148_vm1 = vcmp.gt.f32.partialorder %v4116_v44, 0.0  ;;  %v4180_v30 = vmul.f32 0.2, %v4116_v44  ;;  %v3999_v25 = vadd.f32 %v5857_v33, %v3838_v46  ;;  %v4211_v13 = vsel %vm4147_vm0, %v4115_v32, %v4179_v15 }
 0x2c9   : > { %v3841_v63 = vadd.f32 %v5748_v59, %v6998_v42 }
 0x2ca   : > { %v4212_v57 = vsel %vm4148_vm1, %v4116_v44, %v4180_v30  ;;  %v4078_v43 = vmul.f32 %v7040_v10, %v3999_v25  ;;  %v5749_v19 = vpop.f32.mrb[232].mxu0 }
 0x2cb   : > { %v4949_v14 = vpack.c.bf16 %v4212_v57, %v4211_v13  ;;  %v4002_v11 = vadd.f32 %v5860_v47, %v3841_v63  ;;  %v5861_v3 = vpop.f32.mrb[232].mxu1  ;;  %v5750_v45 = vpop.f32.mrb[233].mxu0 }
 0x2cc   : > { %v4117_v28 = vadd.f32 %v7046_v23, %v4078_v43  ;;  %v5751_v62 = vadd.f32 %v5750_v45, %v5749_v19  ;;  %v5862_v31 = vpop.f32.mrb[233].mxu1  ;;  %v5752_v24 = vpop.f32.mrb[234].mxu0 }
 0x2cd   : > { %4993 = vst [vmem:[%s7058_s28 + $0x40] sm:$0xff] %v4949_v14   ;;  %v4079_v26 = vmul.f32 %v7040_v10, %v4002_v11  ;;  %v5863_v8 = vadd.f32 %v5862_v31, %v5861_v3  ;;  %v5864_v4 = vpop.f32.mrb[234].mxu1  ;;  %v5753_v42 = vpop.f32.mrb[235].mxu0 }
 0x2ce   : > { %v3846_v17 = vadd.f32 %v5751_v62, %v7001_v39  ;;  %v5754_v18 = vadd.f32 %v5753_v42, %v5752_v24  ;;  %v5865_v60 = vpop.f32.mrb[235].mxu1  ;;  %v4181_v36 = vmul.f32 0.2, %v4117_v28  ;;  %vm4149_vm2 = vcmp.gt.f32.partialorder %v4117_v28, 0.0 }
 0x2cf   : > { %v4118_v6 = vadd.f32 %v7046_v23, %v4079_v26  ;;  %v5866_v49 = vadd.f32 %v5865_v60, %v5864_v4 }
 0x2d0   : > { %v4007_v37 = vadd.f32 %v5863_v8, %v3846_v17  ;;  %v3849_v48 = vadd.f32 %v5754_v18, %v7004_v29  ;;  %v4213_v41 = vsel %vm4149_vm2, %v4117_v28, %v4181_v36 }
 0x2d1   : > { %vm4150_vm3 = vcmp.gt.f32.partialorder %v4118_v6, 0.0  ;;  %v4182_v52 = vmul.f32 0.2, %v4118_v6 }
 0x2d2   : > { %v4080_v1 = vmul.f32 %v7040_v10, %v4007_v37  ;;  %v4010_v5 = vadd.f32 %v5866_v49, %v3849_v48  ;;  %v5755_v35 = vpop.f32.mrb[236].mxu0 }
 0x2d3   : > { %v4214_v58 = vsel %vm4150_vm3, %v4118_v6, %v4182_v52  ;;  %v5867_v39 = vpop.f32.mrb[236].mxu1  ;;  %v5756_v27 = vpop.f32.mrb[237].mxu0 }
 0x2d4   : > { %v4954_v21 = vpack.c.bf16 %v4214_v58, %v4213_v41  ;;  %v4119_v54 = vadd.f32 %v7046_v23, %v4080_v1  ;;  %v4081_v32 = vmul.f32 %v7040_v10, %v4010_v5  ;;  %v5757_v22 = vadd.f32 %v5756_v27, %v5755_v35  ;;  %v5868_v40 = vpop.f32.mrb[237].mxu1  ;;  %v5758_v56 = vpop.f32.mrb[238].mxu0 }
 0x2d5   : > { %v5869_v29 = vadd.f32 %v5868_v40, %v5867_v39  ;;  %v5870_v12 = vpop.f32.mrb[238].mxu1  ;;  %v5759_v33 = vpop.f32.mrb[239].mxu0 }
 0x2d6   : > { %4994 = vst [vmem:[%s7058_s28 + $0x48] sm:$0xff] %v4954_v21   ;;  %v4183_v20 = vmul.f32 0.2, %v4119_v54  ;;  %v4120_v61 = vadd.f32 %v7046_v23, %v4081_v32  ;;  %v3854_v15 = vadd.f32 %v5757_v22, %v7007_v55  ;;  %v5871_v44 = vpop.f32.mrb[239].mxu1  ;;  %vm4151_vm4 = vcmp.gt.f32.partialorder %v4119_v54, 0.0 }
 0x2d7   : > { %v5760_v46 = vadd.f32 %v5759_v33, %v5758_v56  ;;  %v5872_v0 = vadd.f32 %v5871_v44, %v5870_v12 }
 0x2d8   : > { %vm4152_vm5 = vcmp.gt.f32.partialorder %v4120_v61, 0.0  ;;  %v4184_v59 = vmul.f32 0.2, %v4120_v61  ;;  %v4015_v47 = vadd.f32 %v5869_v29, %v3854_v15  ;;  %v4215_v25 = vsel %vm4151_vm4, %v4119_v54, %v4183_v20 }
 0x2d9   : > { %v3857_v30 = vadd.f32 %v5760_v46, %v7010_v7 }
 0x2da   : > { %v4216_v63 = vsel %vm4152_vm5, %v4120_v61, %v4184_v59  ;;  %v4082_v13 = vmul.f32 %v7040_v10, %v4015_v47  ;;  %v5761_v57 = vpop.f32.mrb[240].mxu0 }
 0x2db   : > { %v4959_v43 = vpack.c.bf16 %v4216_v63, %v4215_v25  ;;  %v4018_v19 = vadd.f32 %v5872_v0, %v3857_v30  ;;  %v5873_v14 = vpop.f32.mrb[240].mxu1  ;;  %v5762_v11 = vpop.f32.mrb[241].mxu0 }
 0x2dc   : > { %v4121_v55 = vadd.f32 %v7046_v23, %v4082_v13  ;;  %v5763_v3 = vadd.f32 %v5762_v11, %v5761_v57  ;;  %v5874_v45 = vpop.f32.mrb[241].mxu1  ;;  %v5764_v28 = vpop.f32.mrb[242].mxu0 }
 0x2dd   : > { %4995 = vst [vmem:[%s7058_s28 + $0x50] sm:$0xff] %v4959_v43   ;;  %v4083_v62 = vmul.f32 %v7040_v10, %v4018_v19  ;;  %v5875_v31 = vadd.f32 %v5874_v45, %v5873_v14  ;;  %v5876_v24 = vpop.f32.mrb[242].mxu1  ;;  %v5765_v7 = vpop.f32.mrb[243].mxu0 }
 0x2de   : > { %v3862_v26 = vadd.f32 %v5763_v3, %v7013_v38  ;;  %v5766_v8 = vadd.f32 %v5765_v7, %v5764_v28  ;;  %v5877_v4 = vpop.f32.mrb[243].mxu1  ;;  %v4185_v42 = vmul.f32 0.2, %v4121_v55  ;;  %vm4153_vm6 = vcmp.gt.f32.partialorder %v4121_v55, 0.0 }
 0x2df   : > { %v4122_v17 = vadd.f32 %v7046_v23, %v4083_v62  ;;  %v5878_v18 = vadd.f32 %v5877_v4, %v5876_v24 }
 0x2e0   : > { %v4023_v60 = vadd.f32 %v5875_v31, %v3862_v26  ;;  %v3865_v36 = vadd.f32 %v5766_v8, %v7016_v53  ;;  %v4217_v52 = vsel %vm4153_vm6, %v4121_v55, %v4185_v42 }
 0x2e1   : > { %vm4154_vm7 = vcmp.gt.f32.partialorder %v4122_v17, 0.0  ;;  %v4186_v6 = vmul.f32 0.2, %v4122_v17 }
 0x2e2   : > { %v4084_v49 = vmul.f32 %v7040_v10, %v4023_v60  ;;  %v4026_v37 = vadd.f32 %v5878_v18, %v3865_v36  ;;  %v5767_v48 = vpop.f32.mrb[244].mxu0 }
 0x2e3   : > { %v4218_v1 = vsel %vm4154_vm7, %v4122_v17, %v4186_v6  ;;  %v5879_v38 = vpop.f32.mrb[244].mxu1  ;;  %v5768_v5 = vpop.f32.mrb[245].mxu0 }
 0x2e4   : > { %v4964_v35 = vpack.c.bf16 %v4218_v1, %v4217_v52  ;;  %v4123_v41 = vadd.f32 %v7046_v23, %v4084_v49  ;;  %v4085_v58 = vmul.f32 %v7040_v10, %v4026_v37  ;;  %v5769_v39 = vadd.f32 %v5768_v5, %v5767_v48  ;;  %v5880_v27 = vpop.f32.mrb[245].mxu1  ;;  %v5770_v21 = vpop.f32.mrb[246].mxu0 }
 0x2e5   : > { %v5881_v53 = vadd.f32 %v5880_v27, %v5879_v38  ;;  %v5882_v54 = vpop.f32.mrb[246].mxu1  ;;  %v5771_v32 = vpop.f32.mrb[247].mxu0 }
 0x2e6   : > { %4996 = vst [vmem:[%s7058_s28 + $0x58] sm:$0xff] %v4964_v35   ;;  %v4187_v22 = vmul.f32 0.2, %v4123_v41  ;;  %v4124_v40 = vadd.f32 %v7046_v23, %v4085_v58  ;;  %v3870_v56 = vadd.f32 %v5769_v39, %v7019_v9  ;;  %v5883_v29 = vpop.f32.mrb[247].mxu1  ;;  %vm4155_vm8 = vcmp.gt.f32.partialorder %v4123_v41, 0.0 }
 0x2e7   : > { %v5772_v12 = vadd.f32 %v5771_v32, %v5770_v21  ;;  %v5884_v33 = vadd.f32 %v5883_v29, %v5882_v54 }
 0x2e8   : > { %vm4156_vm9 = vcmp.gt.f32.partialorder %v4124_v40, 0.0  ;;  %v4188_v20 = vmul.f32 0.2, %v4124_v40  ;;  %v4031_v61 = vadd.f32 %v5881_v53, %v3870_v56  ;;  %v4219_v44 = vsel %vm4155_vm8, %v4123_v41, %v4187_v22 }
 0x2e9   : > { %v3873_v15 = vadd.f32 %v5772_v12, %v7022_v34 }
 0x2ea   : > { %v4220_v46 = vsel %vm4156_vm9, %v4124_v40, %v4188_v20  ;;  %v4086_v0 = vmul.f32 %v7040_v10, %v4031_v61  ;;  %v5773_v59 = vpop.f32.mrb[248].mxu0 }
 0x2eb   : > { %v4969_v47 = vpack.c.bf16 %v4220_v46, %v4219_v44  ;;  %v4034_v30 = vadd.f32 %v5884_v33, %v3873_v15  ;;  %v5885_v25 = vpop.f32.mrb[248].mxu1  ;;  %v5774_v63 = vpop.f32.mrb[249].mxu0 }
 0x2ec   : > { %v4125_v9 = vadd.f32 %v7046_v23, %v4086_v0  ;;  %v5775_v13 = vadd.f32 %v5774_v63, %v5773_v59  ;;  %v5886_v57 = vpop.f32.mrb[249].mxu1  ;;  %v5776_v43 = vpop.f32.mrb[250].mxu0 }
 0x2ed   : > { %4997 = vst [vmem:[%s7058_s28 + $0x60] sm:$0xff] %v4969_v47   ;;  %v4087_v19 = vmul.f32 %v7040_v10, %v4034_v30  ;;  %v5887_v14 = vadd.f32 %v5886_v57, %v5885_v25  ;;  %v5888_v11 = vpop.f32.mrb[250].mxu1  ;;  %v5777_v34 = vpop.f32.mrb[251].mxu0 }
 0x2ee   : > { %v3878_v55 = vadd.f32 %v5775_v13, %v7025_v50  ;;  %v5778_v3 = vadd.f32 %v5777_v34, %v5776_v43  ;;  %v5889_v45 = vpop.f32.mrb[251].mxu1  ;;  %v4189_v28 = vmul.f32 0.2, %v4125_v9  ;;  %vm4157_vm10 = vcmp.gt.f32.partialorder %v4125_v9, 0.0 }
 0x2ef   : > { %v4126_v62 = vadd.f32 %v7046_v23, %v4087_v19  ;;  %v5890_v31 = vadd.f32 %v5889_v45, %v5888_v11 }
 0x2f0   : > { %v4039_v24 = vadd.f32 %v5887_v14, %v3878_v55  ;;  %v3881_v7 = vadd.f32 %v5778_v3, %v7028_v16  ;;  %v4221_v17 = vsel %vm4157_vm10, %v4125_v9, %v4189_v28 }
 0x2f1   : > { %vm4158_vm11 = vcmp.gt.f32.partialorder %v4126_v62, 0.0  ;;  %v4190_v26 = vmul.f32 0.2, %v4126_v62 }
 0x2f2   : > { %v4088_v8 = vmul.f32 %v7040_v10, %v4039_v24  ;;  %v4042_v4 = vadd.f32 %v5890_v31, %v3881_v7  ;;  %v5779_v42 = vpop.f32.mrb[252].mxu0 }
 0x2f3   : > { %v4222_v18 = vsel %vm4158_vm11, %v4126_v62, %v4190_v26  ;;  %v5891_v50 = vpop.f32.mrb[252].mxu1  ;;  %v5780_v60 = vpop.f32.mrb[253].mxu0 }
 0x2f4   : > { %v4974_v36 = vpack.c.bf16 %v4222_v18, %v4221_v17  ;;  %v4127_v6 = vadd.f32 %v7046_v23, %v4088_v8  ;;  %v4089_v49 = vmul.f32 %v7040_v10, %v4042_v4  ;;  %v5781_v37 = vadd.f32 %v5780_v60, %v5779_v42  ;;  %v5892_v48 = vpop.f32.mrb[253].mxu1  ;;  %v5782_v52 = vpop.f32.mrb[254].mxu0 }
 0x2f5   : > { %v5893_v16 = vadd.f32 %v5892_v48, %v5891_v50  ;;  %v5894_v1 = vpop.f32.mrb[254].mxu1  ;;  %v5783_v38 = vpop.f32.mrb[255].mxu0 }
 0x2f6   : > { %4998 = vst [vmem:[%s7058_s28 + $0x68] sm:$0xff] %v4974_v36   ;;  %v4191_v5 = vmul.f32 0.2, %v4127_v6  ;;  %v4128_v35 = vadd.f32 %v7046_v23, %v4089_v49  ;;  %v3886_v41 = vadd.f32 %v5781_v37, %v7031_v2  ;;  %v5895_v58 = vpop.f32.mrb[255].mxu1  ;;  %vm4159_vm12 = vcmp.gt.f32.partialorder %v4127_v6, 0.0 }
 0x2f7   : > { %v5784_v39 = vadd.f32 %v5783_v38, %v5782_v52  ;;  %v5896_v27 = vadd.f32 %v5895_v58, %v5894_v1 }
 0x2f8   : > { %vm4160_vm13 = vcmp.gt.f32.partialorder %v4128_v35, 0.0  ;;  %v4192_v21 = vmul.f32 0.2, %v4128_v35  ;;  %v4047_v53 = vadd.f32 %v5893_v16, %v3886_v41  ;;  %v4223_v32 = vsel %vm4159_vm12, %v4127_v6, %v4191_v5 }
 0x2f9   : > { %v3889_v54 = vadd.f32 %v5784_v39, %v7034_v51 }
 0x2fa   : > { %v4224_v22 = vsel %vm4160_vm13, %v4128_v35, %v4192_v21  ;;  %v4090_v40 = vmul.f32 %v7040_v10, %v4047_v53 }
 0x2fb   : > { %v4979_v56 = vpack.c.bf16 %v4224_v22, %v4223_v32  ;;  %v4050_v29 = vadd.f32 %v5896_v27, %v3889_v54 }
 0x2fc   : > { %v4129_v12 = vadd.f32 %v7046_v23, %v4090_v40 }
 0x2fd   : > { %4999 = vst [vmem:[%s7058_s28 + $0x70] sm:$0xff] %v4979_v56   ;;  %v4091_v2 = vmul.f32 %v7040_v10, %v4050_v29 }
 0x2fe   : > { %v4193_v33 = vmul.f32 0.2, %v4129_v12  ;;  %vm4161_vm14 = vcmp.gt.f32.partialorder %v4129_v12, 0.0 }
 0x2ff   : > { %v4130_v20 = vadd.f32 %v7046_v23, %v4091_v2 }
 0x300   : > { %v4225_v15 = vsel %vm4161_vm14, %v4129_v12, %v4193_v33 }
 0x301   : > { %vm4162_vm15 = vcmp.gt.f32.partialorder %v4130_v20, 0.0  ;;  %v4194_v61 = vmul.f32 0.2, %v4130_v20 }
 0x303   : > { %v4226_v51 = vsel %vm4162_vm15, %v4130_v20, %v4194_v61 }
 0x304   : > { %v4984_v44 = vpack.c.bf16 %v4226_v51, %v4225_v15 }
 0x306   : > { %5000 = vst [vmem:[%s7058_s28 + $0x78] sm:$0xff] %v4984_v44  }
 0x307 PF: > { %s14_s15 = sadd.s32 1, %s6039_s15  }
 0x308   : > { %p11_p4 = scmp.ge.s32.totalorder %s14_s15, 4  }
 0x30a   :  { %13 = sbr.rel (!%p11_p4) target bundleno = 1 (0x1), region = 66 }

// kernel: discriminator_forward.6
= control target key start
LH: loop header
LB: loop body
LE: loop exit
PB: predicated region body
PF: predicated region fallthrough
CT: control target
= control target key end

     0   :  { %s2947_s15 = smov 0   ;;  %s3492_s0 = inlined_call_operand.vmem [shape: bf16[128,2048], index: 0, kind: input, shape index: {}]   ;;  %s3493_s1 = inlined_call_operand.vmem [shape: bf16[2048,128], index: 1, kind: input, shape index: {}]   ;;  %s3494_s2 = inlined_call_operand.vmem [shape: f32[1,128], index: 2, kind: input, shape index: {}]   ;;  %s3495_s3 = inlined_call_operand.vmem [shape: f32[1,128], index: 3, kind: input, shape index: {}]   ;;  %s3496_s4 = inlined_call_operand.vmem [shape: f32[128,128], index: 4, kind: output, shape index: {}]  }
   0x1 LB: > { %s2251_s16 = sadd.s32 4294967295, %s2920_s15   ;;  %p2255_p0 = scmp.ge.s32.totalorder %s2920_s15, 1  ;;  %s2920_s15 = sphi %s2947_s15, %s14_s15  }
   0x2   : > { %p164_p1 = scmp.lt.s32.totalorder %s2920_s15, 3 }
   0x4   : > { %p165_p2 = pnand %p2255_p0, %p164_p1 }
   0x5   : > { %v2786_v0 = vld [vmem:[%s3493_s1 + $0x40] sm:$0xff] (!%p165_p2)   ;;  %v2790_v4 = vld [vmem:[%s3493_s1 + $0x48] sm:$0xff] (!%p165_p2)   ;;  %v2794_v8 = vld [vmem:[%s3493_s1 + $0x50] sm:$0xff] (!%p165_p2)   ;;  %s2256_s25 = sshll.u32 (!%p165_p2), %s2251_s16, 3 }
   0x6   : > { %168 = sbr.rel (%p165_p2) target bundleno = 389 (0x185), region = 36  ;;  %v2787_v1 = vld [vmem:[%s3493_s1 + $0xc0] sm:$0xff] (!%p165_p2)   ;;  %2458 = vmatprep.subr.bf16.mxu0 (!%p165_p2), %v2786_v0  ;;  %v2791_v5 = vld [vmem:[%s3493_s1 + $0xc8] sm:$0xff] (!%p165_p2)   ;;  %v2795_v9 = vld [vmem:[%s3493_s1 + $0xd0] sm:$0xff] (!%p165_p2)   ;;  %p192_p3 = scmp.lt.s32.totalorder (!%p165_p2), %s2256_s25, 15 }
   0x7   : > { %v2788_v2 = vld [vmem:[%s3493_s1] sm:$0xff] (!%p165_p2)   ;;  %2498 = vmatprep.subr.bf16.mxu1 (!%p165_p2), %v2787_v1  ;;  %v2792_v6 = vld [vmem:[%s3493_s1 + $0x8] sm:$0xff] (!%p165_p2)   ;;  %v2796_v10 = vld [vmem:[%s3493_s1 + $0x10] sm:$0xff] (!%p165_p2)  }
   0x8   : > { %v2789_v3 = vld [vmem:[%s3493_s1 + $0x80] sm:$0xff] (!%p165_p2)   ;;  %2459 = vmatpush3.bf16.msra.mxu0 (!%p165_p2), %v2788_v2  ;;  %v2793_v7 = vld [vmem:[%s3493_s1 + $0x88] sm:$0xff] (!%p165_p2)   ;;  %v2797_v11 = vld [vmem:[%s3493_s1 + $0x90] sm:$0xff] (!%p165_p2)  }
   0x9   : > { %2499 = vmatpush3.bf16.msra.mxu1 (!%p165_p2), %v2789_v3  ;;  %2460 = vmatprep.subr.bf16.mxu0 (!%p165_p2), %v2790_v4  ;;  %v2798_v12 = vld [vmem:[%s3493_s1 + $0x58] sm:$0xff] (!%p165_p2)   ;;  %v2802_v16 = vld [vmem:[%s3493_s1 + $0x60] sm:$0xff] (!%p165_p2)   ;;  %v2806_v20 = vld [vmem:[%s3493_s1 + $0x68] sm:$0xff] (!%p165_p2)  }
   0xa   : > { %2500 = vmatprep.subr.bf16.mxu1 (!%p165_p2), %v2791_v5  ;;  %v2799_v13 = vld [vmem:[%s3493_s1 + $0xd8] sm:$0xff] (!%p165_p2)   ;;  %v2803_v17 = vld [vmem:[%s3493_s1 + $0xe0] sm:$0xff] (!%p165_p2)   ;;  %v2807_v21 = vld [vmem:[%s3493_s1 + $0xe8] sm:$0xff] (!%p165_p2)  }
   0xb   : > { %v2800_v14 = vld [vmem:[%s3493_s1 + $0x18] sm:$0xff] (!%p165_p2)   ;;  %v2804_v18 = vld [vmem:[%s3493_s1 + $0x20] sm:$0xff] (!%p165_p2)   ;;  %v2808_v22 = vld [vmem:[%s3493_s1 + $0x28] sm:$0xff] (!%p165_p2)  }
   0xc   : > { %2461 = vmatpush3.bf16.msra.mxu0 (!%p165_p2), %v2792_v6  ;;  %v2801_v15 = vld [vmem:[%s3493_s1 + $0x98] sm:$0xff] (!%p165_p2)   ;;  %v2805_v19 = vld [vmem:[%s3493_s1 + $0xa0] sm:$0xff] (!%p165_p2)   ;;  %v2809_v23 = vld [vmem:[%s3493_s1 + $0xa8] sm:$0xff] (!%p165_p2)  }
   0xd   : > { %2501 = vmatpush3.bf16.msra.mxu1 %v2793_v7  ;;  %2462 = vmatprep.subr.bf16.mxu0 %v2794_v8  ;;  %s3498_s25 = smov (!%p192_p3, %s2256_s25), 15  ;;  %v2810_v24 = vld [vmem:[%s3493_s1 + $0x70] sm:$0xff]   ;;  %v2814_v28 = vld [vmem:[%s3493_s1 + $0x78] sm:$0xff]   ;;  %v2818_v40 = vld [vmem:[%s3493_s1 + $0x140] sm:$0xff]  }
   0xe   : > { %2502 = vmatprep.subr.bf16.mxu1 %v2795_v9  ;;  %v2811_v25 = vld [vmem:[%s3493_s1 + $0xf0] sm:$0xff]   ;;  %s2457_s23 = sshll.u32 %s3498_s25, 6  ;;  %v2815_v29 = vld [vmem:[%s3493_s1 + $0xf8] sm:$0xff]   ;;  %v2819_v41 = vld [vmem:[%s3493_s1 + $0x1c0] sm:$0xff]   ;;  %s2260_s24 = sshll.u32 %s3498_s25, 3 }
   0xf   : > { %v2812_v26 = vld [vmem:[%s3493_s1 + $0x30] sm:$0xff]   ;;  %s3053_s7 = scalar_lea.vmem %s3492_s0, %s2457_s23  ;;  %v2816_v30 = vld [vmem:[%s3493_s1 + $0x38] sm:$0xff]   ;;  %v2820_v42 = vld [vmem:[%s3493_s1 + $0x100] sm:$0xff]   ;;  %s3460_s28 = scalar_lea.vmem %s3496_s4, %s2260_s24 }
  0x10   : > { %2463 = vmatpush3.bf16.msra.mxu0 %v2796_v10  ;;  %v2813_v27 = vld [vmem:[%s3493_s1 + $0xb0] sm:$0xff]   ;;  %v2817_v31 = vld [vmem:[%s3493_s1 + $0xb8] sm:$0xff]   ;;  %v205_v32 = vld [vmem:[%s3053_s7] sm:$0xff] }
  0x11   : > { %2503 = vmatpush3.bf16.msra.mxu1 %v2797_v11  ;;  %2464 = vmatprep.subr.bf16.mxu0 %v2798_v12  ;;  %v213_v33 = vld [vmem:[%s3053_s7 + $0x40] sm:$0xff]  ;;  %v206_v34 = vld [vmem:[%s3053_s7 + $0x8] sm:$0xff]  ;;  %v2826_v56 = vld [vmem:[%s3493_s1 + $0x150] sm:$0xff]  }
  0x12   : > { %2504 = vmatprep.subr.bf16.mxu1 %v2799_v13  ;;  %v2261_v35 = vcombine.low %v205_v32, %v213_v33  ;;  %v2262_v36 = vcombine.high %v205_v32, %v213_v33  ;;  %v214_v37 = vld [vmem:[%s3053_s7 + $0x48] sm:$0xff]  ;;  %v2821_v43 = vld [vmem:[%s3493_s1 + $0x180] sm:$0xff]   ;;  %v2827_v57 = vld [vmem:[%s3493_s1 + $0x1d0] sm:$0xff]  }
  0x13   : > { %v2263_v38 = vcombine.low %v206_v34, %v214_v37  ;;  %v2264_v39 = vcombine.high %v206_v34, %v214_v37  ;;  %v2822_v44 = vld [vmem:[%s3493_s1 + $0x148] sm:$0xff]   ;;  %v221_v48 = vld [vmem:[%s3053_s7 + $0x80] sm:$0xff]  ;;  %v2828_v58 = vld [vmem:[%s3493_s1 + $0x110] sm:$0xff]  }
  0x14   : > { %2465 = vmatpush3.bf16.msra.mxu0 %v2800_v14  ;;  %1645 = vmatprep.mubr.bf16.mxu0 %v2262_v36  ;;  %v2823_v45 = vld [vmem:[%s3493_s1 + $0x1c8] sm:$0xff]   ;;  %v229_v49 = vld [vmem:[%s3053_s7 + $0xc0] sm:$0xff]  ;;  %v2829_v59 = vld [vmem:[%s3493_s1 + $0x190] sm:$0xff]  }
  0x15   : > { %2505 = vmatpush3.bf16.msra.mxu1 %v2801_v15  ;;  %2466 = vmatprep.subr.bf16.mxu0 %v2802_v16  ;;  %v2824_v46 = vld [vmem:[%s3493_s1 + $0x108] sm:$0xff]   ;;  %v2278_v50 = vcombine.high %v221_v48, %v229_v49  ;;  %v2277_v53 = vcombine.low %v221_v48, %v229_v49  ;;  %v2830_v60 = vld [vmem:[%s3493_s1 + $0x158] sm:$0xff]   ;;  %v237_v0 = vld [vmem:[%s3053_s7 + $0x100] sm:$0xff] }
  0x16   : > { %2506 = vmatprep.subr.bf16.mxu1 %v2803_v17  ;;  %1710 = vmatprep.mubr.bf16.mxu1 %v2264_v39  ;;  %v2825_v47 = vld [vmem:[%s3493_s1 + $0x188] sm:$0xff]   ;;  %v2831_v61 = vld [vmem:[%s3493_s1 + $0x1d8] sm:$0xff]   ;;  %v245_v1 = vld [vmem:[%s3053_s7 + $0x140] sm:$0xff] }
  0x17   : > { %v222_v51 = vld [vmem:[%s3053_s7 + $0x88] sm:$0xff]  ;;  %v2832_v62 = vld [vmem:[%s3493_s1 + $0x118] sm:$0xff]   ;;  %v2294_v4 = vcombine.high %v237_v0, %v245_v1  ;;  %v2293_v6 = vcombine.low %v237_v0, %v245_v1  ;;  %v2834_v8 = vld [vmem:[%s3493_s1 + $0x160] sm:$0xff]  }
  0x18   : > { %2467 = vmatpush3.bf16.msra.mxu0 %v2804_v18  ;;  %v230_v52 = vld [vmem:[%s3053_s7 + $0xc8] sm:$0xff]  ;;  %v2833_v63 = vld [vmem:[%s3493_s1 + $0x198] sm:$0xff]   ;;  %v2835_v9 = vld [vmem:[%s3493_s1 + $0x1e0] sm:$0xff]  }
  0x19   : > { %2507 = vmatpush3.bf16.msra.mxu1 %v2805_v19  ;;  %2468 = vmatprep.subr.bf16.mxu0 %v2806_v20  ;;  %v2280_v54 = vcombine.high %v222_v51, %v230_v52  ;;  %v2279_v55 = vcombine.low %v222_v51, %v230_v52  ;;  %v238_v2 = vld [vmem:[%s3053_s7 + $0x108] sm:$0xff]  ;;  %v2836_v10 = vld [vmem:[%s3493_s1 + $0x120] sm:$0xff]   ;;  %v207_v32 = vld [vmem:[%s3053_s7 + $0x10] sm:$0xff] }
  0x1a   : > { %2508 = vmatprep.subr.bf16.mxu1 %v2807_v21  ;;  %v246_v3 = vld [vmem:[%s3053_s7 + $0x148] sm:$0xff]  ;;  %v2837_v11 = vld [vmem:[%s3493_s1 + $0x1a0] sm:$0xff]   ;;  %v215_v33 = vld [vmem:[%s3053_s7 + $0x50] sm:$0xff] }
  0x1b   : > { %v2296_v5 = vcombine.high %v238_v2, %v246_v3  ;;  %v2295_v7 = vcombine.low %v238_v2, %v246_v3  ;;  %v2838_v12 = vld [vmem:[%s3493_s1 + $0x168] sm:$0xff]   ;;  %v253_v16 = vld [vmem:[%s3053_s7 + $0x180] sm:$0xff]  ;;  %v2265_v34 = vcombine.low %v207_v32, %v215_v33  ;;  %v208_v36 = vld [vmem:[%s3053_s7 + $0x18] sm:$0xff] }
  0x1c   : > { %2469 = vmatpush3.bf16.msra.mxu0 %v2808_v22  ;;  %v2839_v13 = vld [vmem:[%s3493_s1 + $0x1e8] sm:$0xff]   ;;  %v261_v17 = vld [vmem:[%s3053_s7 + $0x1c0] sm:$0xff]  ;;  %v216_v37 = vld [vmem:[%s3053_s7 + $0x58] sm:$0xff] }
  0x1d   : > { %2509 = vmatpush3.bf16.msra.mxu1 %v2809_v23  ;;  %2470 = vmatprep.subr.bf16.mxu0 %v2810_v24  ;;  %v2840_v14 = vld [vmem:[%s3493_s1 + $0x128] sm:$0xff]   ;;  %v2310_v19 = vcombine.high %v253_v16, %v261_v17  ;;  %v2309_v21 = vcombine.low %v253_v16, %v261_v17  ;;  %v2842_v24 = vld [vmem:[%s3493_s1 + $0x170] sm:$0xff]   ;;  %v2268_v39 = vcombine.high %v208_v36, %v216_v37  ;;  %v232_v51 = vld [vmem:[%s3053_s7 + $0xd8] sm:$0xff] }
  0x1e   : > { %2510 = vmatprep.subr.bf16.mxu1 %v2811_v25  ;;  %v2841_v15 = vld [vmem:[%s3493_s1 + $0x1a8] sm:$0xff]   ;;  %v2843_v25 = vld [vmem:[%s3493_s1 + $0x1f0] sm:$0xff]   ;;  %v240_v2 = vld [vmem:[%s3053_s7 + $0x118] sm:$0xff] }
  0x1f   : > { %v254_v18 = vld [vmem:[%s3053_s7 + $0x188] sm:$0xff]  ;;  %v223_v48 = vld [vmem:[%s3053_s7 + $0x90] sm:$0xff] }
  0x20   : > { %2471 = vmatpush3.bf16.msra.mxu0 %v2812_v26  ;;  %v262_v20 = vld [vmem:[%s3053_s7 + $0x1c8] sm:$0xff]  ;;  %v2844_v26 = vld [vmem:[%s3493_s1 + $0x130] sm:$0xff]  }
  0x21   : > { %2511 = vmatpush3.bf16.msra.mxu1 %v2813_v27  ;;  %2472 = vmatprep.subr.bf16.mxu0 %v2814_v28  ;;  %v2312_v22 = vcombine.high %v254_v18, %v262_v20  ;;  %v2311_v23 = vcombine.low %v254_v18, %v262_v20  ;;  %v2845_v27 = vld [vmem:[%s3493_s1 + $0x1b0] sm:$0xff]   ;;  %v2846_v28 = vld [vmem:[%s3493_s1 + $0x178] sm:$0xff]  }
  0x22   : > { %2512 = vmatprep.subr.bf16.mxu1 %v2815_v29  ;;  %v2847_v29 = vld [vmem:[%s3493_s1 + $0x1f8] sm:$0xff]   ;;  %v231_v49 = vld [vmem:[%s3053_s7 + $0xd0] sm:$0xff] }
  0x23   : > { %v2282_v52 = vcombine.high %v223_v48, %v231_v49  ;;  %v239_v0 = vld [vmem:[%s3053_s7 + $0x110] sm:$0xff]  ;;  %v264_v20 = vld [vmem:[%s3053_s7 + $0x1d8] sm:$0xff] }
  0x24   : > { %2473 = vmatpush3.bf16.msra.mxu0 %v2816_v30  ;;  %v2848_v30 = vld [vmem:[%s3493_s1 + $0x138] sm:$0xff]   ;;  %v247_v1 = vld [vmem:[%s3053_s7 + $0x150] sm:$0xff] }
  0x25   : > { %2513 = vmatpush3.bf16.msra.mxu1 %v2817_v31  ;;  %2538 = vmatprep.subr.bf16.mxu0 %v2818_v40  ;;  %v2849_v31 = vld [vmem:[%s3493_s1 + $0x1b8] sm:$0xff]   ;;  %v2850_v40 = vld [vmem:[%s3493_s1 + $0x240] sm:$0xff]   ;;  %v2298_v3 = vcombine.high %v239_v0, %v247_v1  ;;  %v255_v16 = vld [vmem:[%s3053_s7 + $0x190] sm:$0xff] }
  0x26   : > { %2578 = vmatprep.subr.bf16.mxu1 %v2819_v41  ;;  %v2851_v41 = vld [vmem:[%s3493_s1 + $0x2c0] sm:$0xff]   ;;  %v263_v17 = vld [vmem:[%s3053_s7 + $0x1d0] sm:$0xff] }
  0x27   : > { %1646 = vmatmul.mubr.bf16.vlgmr.msra.gmra.mrb[0].mxu0 %v2261_v35  ;;  %v2266_v35 = vcombine.high %v207_v32, %v215_v33  ;;  %v2314_v18 = vcombine.high %v255_v16, %v263_v17  ;;  %v209_v32 = vld [vmem:[%s3053_s7 + $0x20] sm:$0xff] }
  0x28   : > { %1711 = vmatmul.mubr.bf16.vlgmr.msra.gmra.mrb[0].mxu1 %v2263_v38  ;;  %2539 = vmatpush3.bf16.msra.mxu0 %v2820_v42  ;;  %v2267_v38 = vcombine.low %v208_v36, %v216_v37  ;;  %v2852_v42 = vld [vmem:[%s3493_s1 + $0x200] sm:$0xff]  }
  0x29   : > { %2579 = vmatpush3.bf16.msra.mxu1 %v2821_v43  ;;  %2540 = vmatprep.subr.bf16.mxu0 %v2822_v44  ;;  %v2853_v43 = vld [vmem:[%s3493_s1 + $0x280] sm:$0xff]   ;;  %v2854_v44 = vld [vmem:[%s3493_s1 + $0x248] sm:$0xff]  }
  0x2a   : > { %2580 = vmatprep.subr.bf16.mxu1 %v2823_v45  ;;  %1653 = vmatprep.mubr.bf16.mxu0 %v2278_v50  ;;  %v2855_v45 = vld [vmem:[%s3493_s1 + $0x2c8] sm:$0xff]   ;;  %v224_v50 = vld [vmem:[%s3053_s7 + $0x98] sm:$0xff]  ;;  %v217_v33 = vld [vmem:[%s3053_s7 + $0x60] sm:$0xff] }
  0x2b   : > { %1718 = vmatprep.mubr.bf16.mxu1 %v2280_v54  ;;  %v2281_v54 = vcombine.low %v223_v48, %v231_v49  ;;  %v2269_v36 = vcombine.low %v209_v32, %v217_v33  ;;  %v2270_v37 = vcombine.high %v209_v32, %v217_v33  ;;  %v225_v48 = vld [vmem:[%s3053_s7 + $0xa0] sm:$0xff]  ;;  %v211_v32 = vld [vmem:[%s3053_s7 + $0x30] sm:$0xff] }
  0x2c   : > { %2541 = vmatpush3.bf16.msra.mxu0 %v2824_v46  ;;  %v2856_v46 = vld [vmem:[%s3493_s1 + $0x208] sm:$0xff]   ;;  %v233_v49 = vld [vmem:[%s3053_s7 + $0xe0] sm:$0xff]  ;;  %v219_v33 = vld [vmem:[%s3053_s7 + $0x70] sm:$0xff] }
  0x2d   : > { %2581 = vmatpush3.bf16.msra.mxu1 %v2825_v47  ;;  %2542 = vmatprep.subr.bf16.mxu0 %v2826_v56  ;;  %v2857_v47 = vld [vmem:[%s3493_s1 + $0x288] sm:$0xff]   ;;  %v2858_v56 = vld [vmem:[%s3493_s1 + $0x250] sm:$0xff]  }
  0x2e   : > { %2582 = vmatprep.subr.bf16.mxu1 %v2827_v57  ;;  %v2859_v57 = vld [vmem:[%s3493_s1 + $0x2d0] sm:$0xff]  }
  0x2f   : > { %1654 = vmatmul.mubr.bf16.gmra.mrb[4].mxu0 %v2277_v53  ;;  %v2284_v53 = vcombine.high %v224_v50, %v232_v51 }
  0x30   : > { %1719 = vmatmul.mubr.bf16.gmra.mrb[4].mxu1 %v2279_v55  ;;  %2543 = vmatpush3.bf16.msra.mxu0 %v2828_v58  ;;  %v2283_v55 = vcombine.low %v224_v50, %v232_v51  ;;  %v2860_v58 = vld [vmem:[%s3493_s1 + $0x210] sm:$0xff]   ;;  %v226_v50 = vld [vmem:[%s3053_s7 + $0xa8] sm:$0xff]  ;;  %v2286_v51 = vcombine.high %v225_v48, %v233_v49 }
  0x31   : > { %2583 = vmatpush3.bf16.msra.mxu1 %v2829_v59  ;;  %2544 = vmatprep.subr.bf16.mxu0 %v2830_v60  ;;  %v2861_v59 = vld [vmem:[%s3493_s1 + $0x290] sm:$0xff]   ;;  %v2862_v60 = vld [vmem:[%s3493_s1 + $0x258] sm:$0xff]  }
  0x32   : > { %2584 = vmatprep.subr.bf16.mxu1 %v2831_v61  ;;  %1661 = vmatprep.mubr.bf16.mxu0 %v2294_v4  ;;  %v2863_v61 = vld [vmem:[%s3493_s1 + $0x2d8] sm:$0xff]  }
  0x33   : > { %1726 = vmatprep.mubr.bf16.mxu1 %v2296_v5  ;;  %v248_v4 = vld [vmem:[%s3053_s7 + $0x158] sm:$0xff]  ;;  %v2297_v5 = vcombine.low %v239_v0, %v247_v1  ;;  %v241_v0 = vld [vmem:[%s3053_s7 + $0x120] sm:$0xff] }
  0x34   : > { %2545 = vmatpush3.bf16.msra.mxu0 %v2832_v62  ;;  %v2864_v62 = vld [vmem:[%s3493_s1 + $0x218] sm:$0xff]   ;;  %v249_v1 = vld [vmem:[%s3053_s7 + $0x160] sm:$0xff] }
  0x35   : > { %2585 = vmatpush3.bf16.msra.mxu1 %v2833_v63  ;;  %2546 = vmatprep.subr.bf16.mxu0 %v2834_v8  ;;  %v2865_v63 = vld [vmem:[%s3493_s1 + $0x298] sm:$0xff]   ;;  %v2866_v8 = vld [vmem:[%s3493_s1 + $0x260] sm:$0xff]  }
  0x36   : > { %2586 = vmatprep.subr.bf16.mxu1 %v2835_v9  ;;  %v2867_v9 = vld [vmem:[%s3493_s1 + $0x2e0] sm:$0xff]  }
  0x37   : > { %1662 = vmatmul.mubr.bf16.gmra.mrb[8].mxu0 %v2293_v6  ;;  %v2300_v6 = vcombine.high %v240_v2, %v248_v4 }
  0x38   : > { %1727 = vmatmul.mubr.bf16.gmra.mrb[8].mxu1 %v2295_v7  ;;  %2547 = vmatpush3.bf16.msra.mxu0 %v2836_v10  ;;  %v2299_v7 = vcombine.low %v240_v2, %v248_v4  ;;  %v2868_v10 = vld [vmem:[%s3493_s1 + $0x220] sm:$0xff]   ;;  %v2302_v2 = vcombine.high %v241_v0, %v249_v1  ;;  %v250_v4 = vld [vmem:[%s3053_s7 + $0x168] sm:$0xff] }
  0x39   : > { %2587 = vmatpush3.bf16.msra.mxu1 %v2837_v11  ;;  %2548 = vmatprep.subr.bf16.mxu0 %v2838_v12  ;;  %v2869_v11 = vld [vmem:[%s3493_s1 + $0x2a0] sm:$0xff]   ;;  %v2870_v12 = vld [vmem:[%s3493_s1 + $0x268] sm:$0xff]  }
  0x3a   : > { %2588 = vmatprep.subr.bf16.mxu1 %v2839_v13  ;;  %1669 = vmatprep.mubr.bf16.mxu0 %v2310_v19  ;;  %v2871_v13 = vld [vmem:[%s3493_s1 + $0x2e8] sm:$0xff]   ;;  %v256_v19 = vld [vmem:[%s3053_s7 + $0x198] sm:$0xff] }
  0x3b   : > { %1734 = vmatprep.mubr.bf16.mxu1 %v2312_v22  ;;  %v2316_v22 = vcombine.high %v256_v19, %v264_v20 }
  0x3c   : > { %2549 = vmatpush3.bf16.msra.mxu0 %v2840_v14  ;;  %v2872_v14 = vld [vmem:[%s3493_s1 + $0x228] sm:$0xff]  }
  0x3d   : > { %2589 = vmatpush3.bf16.msra.mxu1 %v2841_v15  ;;  %2550 = vmatprep.subr.bf16.mxu0 %v2842_v24  ;;  %v2873_v15 = vld [vmem:[%s3493_s1 + $0x2a8] sm:$0xff]   ;;  %v2874_v24 = vld [vmem:[%s3493_s1 + $0x270] sm:$0xff]  }
  0x3e   : > { %2590 = vmatprep.subr.bf16.mxu1 %v2843_v25  ;;  %v2875_v25 = vld [vmem:[%s3493_s1 + $0x2f0] sm:$0xff]  }
  0x3f   : > { %1670 = vmatmul.mubr.bf16.gmra.mrb[12].mxu0 %v2309_v21  ;;  %v2313_v21 = vcombine.low %v255_v16, %v263_v17  ;;  %v257_v16 = vld [vmem:[%s3053_s7 + $0x1a0] sm:$0xff] }
  0x40   : > { %1735 = vmatmul.mubr.bf16.gmra.mrb[12].mxu1 %v2311_v23  ;;  %2551 = vmatpush3.bf16.msra.mxu0 %v2844_v26  ;;  %v2315_v23 = vcombine.low %v256_v19, %v264_v20  ;;  %v2876_v26 = vld [vmem:[%s3493_s1 + $0x230] sm:$0xff]   ;;  %v265_v17 = vld [vmem:[%s3053_s7 + $0x1e0] sm:$0xff]  ;;  %v266_v19 = vld [vmem:[%s3053_s7 + $0x1e8] sm:$0xff] }
  0x41   : > { %2591 = vmatpush3.bf16.msra.mxu1 %v2845_v27  ;;  %2552 = vmatprep.subr.bf16.mxu0 %v2846_v28  ;;  %v2877_v27 = vld [vmem:[%s3493_s1 + $0x2b0] sm:$0xff]   ;;  %v2878_v28 = vld [vmem:[%s3493_s1 + $0x278] sm:$0xff]   ;;  %v2318_v20 = vcombine.high %v257_v16, %v265_v17 }
  0x42   : > { %2592 = vmatprep.subr.bf16.mxu1 %v2847_v29  ;;  %1775 = vmatprep.mubr.bf16.mxu0 %v2266_v35  ;;  %v2879_v29 = vld [vmem:[%s3493_s1 + $0x2f8] sm:$0xff]   ;;  %v218_v35 = vld [vmem:[%s3053_s7 + $0x68] sm:$0xff] }
  0x43   : > { %1840 = vmatprep.mubr.bf16.mxu1 %v2268_v39 }
  0x44   : > { %2553 = vmatpush3.bf16.msra.mxu0 %v2848_v30  ;;  %v2880_v30 = vld [vmem:[%s3493_s1 + $0x238] sm:$0xff]  }
  0x45   : > { %2593 = vmatpush3.bf16.msra.mxu1 %v2849_v31  ;;  %2618 = vmatprep.subr.bf16.mxu0 %v2850_v40  ;;  %v2881_v31 = vld [vmem:[%s3493_s1 + $0x2b8] sm:$0xff]   ;;  %v2882_v40 = vld [vmem:[%s3493_s1 + $0x340] sm:$0xff]  }
  0x46   : > { %2658 = vmatprep.subr.bf16.mxu1 %v2851_v41  ;;  %v2883_v41 = vld [vmem:[%s3493_s1 + $0x3c0] sm:$0xff]  }
  0x47   : > { %1776 = vmatmul.mubr.bf16.vlgmr.msra.gmra.mrb[16].mxu0 %v2265_v34  ;;  %v210_v34 = vld [vmem:[%s3053_s7 + $0x28] sm:$0xff] }
  0x48   : > { %1841 = vmatmul.mubr.bf16.vlgmr.msra.gmra.mrb[16].mxu1 %v2267_v38  ;;  %2619 = vmatpush3.bf16.msra.mxu0 %v2852_v42  ;;  %v2271_v38 = vcombine.low %v210_v34, %v218_v35  ;;  %v2272_v39 = vcombine.high %v210_v34, %v218_v35  ;;  %v2884_v42 = vld [vmem:[%s3493_s1 + $0x300] sm:$0xff]   ;;  %v212_v34 = vld [vmem:[%s3053_s7 + $0x38] sm:$0xff]  ;;  %v2273_v35 = vcombine.low %v211_v32, %v219_v33 }
  0x49   : > { %2659 = vmatpush3.bf16.msra.mxu1 %v2853_v43  ;;  %2620 = vmatprep.subr.bf16.mxu0 %v2854_v44  ;;  %v2885_v43 = vld [vmem:[%s3493_s1 + $0x380] sm:$0xff]   ;;  %v2886_v44 = vld [vmem:[%s3493_s1 + $0x348] sm:$0xff]  }
  0x4a   : > { %2660 = vmatprep.subr.bf16.mxu1 %v2855_v45  ;;  %1783 = vmatprep.mubr.bf16.mxu0 %v2282_v52  ;;  %v2887_v45 = vld [vmem:[%s3493_s1 + $0x3c8] sm:$0xff]  }
  0x4b   : > { %1848 = vmatprep.mubr.bf16.mxu1 %v2284_v53  ;;  %v234_v52 = vld [vmem:[%s3053_s7 + $0xe8] sm:$0xff]  ;;  %v2285_v53 = vcombine.low %v225_v48, %v233_v49  ;;  %v244_v48 = vld [vmem:[%s3053_s7 + $0x138] sm:$0xff] }
  0x4c   : > { %2621 = vmatpush3.bf16.msra.mxu0 %v2856_v46  ;;  %v2888_v46 = vld [vmem:[%s3493_s1 + $0x308] sm:$0xff]   ;;  %v252_v49 = vld [vmem:[%s3053_s7 + $0x178] sm:$0xff] }
  0x4d   : > { %2661 = vmatpush3.bf16.msra.mxu1 %v2857_v47  ;;  %2622 = vmatprep.subr.bf16.mxu0 %v2858_v56  ;;  %v2889_v47 = vld [vmem:[%s3493_s1 + $0x388] sm:$0xff]   ;;  %v2890_v56 = vld [vmem:[%s3493_s1 + $0x350] sm:$0xff]  }
  0x4e   : > { %2662 = vmatprep.subr.bf16.mxu1 %v2859_v57  ;;  %v2891_v57 = vld [vmem:[%s3493_s1 + $0x3d0] sm:$0xff]  }
  0x4f   : > { %1784 = vmatmul.mubr.bf16.gmra.mrb[20].mxu0 %v2281_v54  ;;  %v2288_v54 = vcombine.high %v226_v50, %v234_v52 }
  0x50   : > { %1849 = vmatmul.mubr.bf16.gmra.mrb[20].mxu1 %v2283_v55  ;;  %2623 = vmatpush3.bf16.msra.mxu0 %v2860_v58  ;;  %v2287_v55 = vcombine.low %v226_v50, %v234_v52  ;;  %v2892_v58 = vld [vmem:[%s3493_s1 + $0x310] sm:$0xff]  }
  0x51   : > { %2663 = vmatpush3.bf16.msra.mxu1 %v2861_v59  ;;  %2624 = vmatprep.subr.bf16.mxu0 %v2862_v60  ;;  %v2893_v59 = vld [vmem:[%s3493_s1 + $0x390] sm:$0xff]   ;;  %v2894_v60 = vld [vmem:[%s3493_s1 + $0x358] sm:$0xff]  }
  0x52   : > { %2664 = vmatprep.subr.bf16.mxu1 %v2863_v61  ;;  %1791 = vmatprep.mubr.bf16.mxu0 %v2298_v3  ;;  %v2895_v61 = vld [vmem:[%s3493_s1 + $0x3d8] sm:$0xff]   ;;  %v242_v3 = vld [vmem:[%s3053_s7 + $0x128] sm:$0xff] }
  0x53   : > { %1856 = vmatprep.mubr.bf16.mxu1 %v2300_v6  ;;  %v2304_v6 = vcombine.high %v242_v3, %v250_v4 }
  0x54   : > { %2625 = vmatpush3.bf16.msra.mxu0 %v2864_v62  ;;  %v2896_v62 = vld [vmem:[%s3493_s1 + $0x318] sm:$0xff]  }
  0x55   : > { %2665 = vmatpush3.bf16.msra.mxu1 %v2865_v63  ;;  %2626 = vmatprep.subr.bf16.mxu0 %v2866_v8  ;;  %v2897_v63 = vld [vmem:[%s3493_s1 + $0x398] sm:$0xff]   ;;  %v2898_v8 = vld [vmem:[%s3493_s1 + $0x360] sm:$0xff]  }
  0x56   : > { %2666 = vmatprep.subr.bf16.mxu1 %v2867_v9  ;;  %v2899_v9 = vld [vmem:[%s3493_s1 + $0x3e0] sm:$0xff]  }
  0x57   : > { %1792 = vmatmul.mubr.bf16.gmra.mrb[24].mxu0 %v2297_v5  ;;  %v2301_v5 = vcombine.low %v241_v0, %v249_v1 }
  0x58   : > { %1857 = vmatmul.mubr.bf16.gmra.mrb[24].mxu1 %v2299_v7  ;;  %2627 = vmatpush3.bf16.msra.mxu0 %v2868_v10  ;;  %v2303_v7 = vcombine.low %v242_v3, %v250_v4  ;;  %v2900_v10 = vld [vmem:[%s3493_s1 + $0x320] sm:$0xff]  }
  0x59   : > { %2667 = vmatpush3.bf16.msra.mxu1 %v2869_v11  ;;  %2628 = vmatprep.subr.bf16.mxu0 %v2870_v12  ;;  %v2901_v11 = vld [vmem:[%s3493_s1 + $0x3a0] sm:$0xff]   ;;  %v2902_v12 = vld [vmem:[%s3493_s1 + $0x368] sm:$0xff]  }
  0x5a   : > { %2668 = vmatprep.subr.bf16.mxu1 %v2871_v13  ;;  %1799 = vmatprep.mubr.bf16.mxu0 %v2314_v18  ;;  %v2903_v13 = vld [vmem:[%s3493_s1 + $0x3e8] sm:$0xff]  }
  0x5b   : > { %1864 = vmatprep.mubr.bf16.mxu1 %v2316_v22  ;;  %v258_v18 = vld [vmem:[%s3053_s7 + $0x1a8] sm:$0xff]  ;;  %v2317_v22 = vcombine.low %v257_v16, %v265_v17 }
  0x5c   : > { %2629 = vmatpush3.bf16.msra.mxu0 %v2872_v14  ;;  %v2904_v14 = vld [vmem:[%s3493_s1 + $0x328] sm:$0xff]  }
  0x5d   : > { %2669 = vmatpush3.bf16.msra.mxu1 %v2873_v15  ;;  %2630 = vmatprep.subr.bf16.mxu0 %v2874_v24  ;;  %v2905_v15 = vld [vmem:[%s3493_s1 + $0x3a8] sm:$0xff]   ;;  %v2906_v24 = vld [vmem:[%s3493_s1 + $0x370] sm:$0xff]  }
  0x5e   : > { %2670 = vmatprep.subr.bf16.mxu1 %v2875_v25  ;;  %v2907_v25 = vld [vmem:[%s3493_s1 + $0x3f0] sm:$0xff]  }
  0x5f   : > { %1800 = vmatmul.mubr.bf16.gmra.mrb[28].mxu0 %v2313_v21  ;;  %v2320_v21 = vcombine.high %v258_v18, %v266_v19 }
  0x60   : > { %1865 = vmatmul.mubr.bf16.gmra.mrb[28].mxu1 %v2315_v23  ;;  %2631 = vmatpush3.bf16.msra.mxu0 %v2876_v26  ;;  %v2319_v23 = vcombine.low %v258_v18, %v266_v19  ;;  %v2908_v26 = vld [vmem:[%s3493_s1 + $0x330] sm:$0xff]  }
  0x61   : > { %2671 = vmatpush3.bf16.msra.mxu1 %v2877_v27  ;;  %2632 = vmatprep.subr.bf16.mxu0 %v2878_v28  ;;  %v2909_v27 = vld [vmem:[%s3493_s1 + $0x3b0] sm:$0xff]   ;;  %v2910_v28 = vld [vmem:[%s3493_s1 + $0x378] sm:$0xff]  }
  0x62   : > { %2672 = vmatprep.subr.bf16.mxu1 %v2879_v29  ;;  %1905 = vmatprep.mubr.bf16.mxu0 %v2270_v37  ;;  %v2911_v29 = vld [vmem:[%s3493_s1 + $0x3f8] sm:$0xff]  }
  0x63   : > { %1970 = vmatprep.mubr.bf16.mxu1 %v2272_v39  ;;  %v220_v37 = vld [vmem:[%s3053_s7 + $0x78] sm:$0xff]  ;;  %v235_v39 = vld [vmem:[%s3053_s7 + $0xf0] sm:$0xff] }
  0x64   : > { %2633 = vmatpush3.bf16.msra.mxu0 %v2880_v30  ;;  %v2912_v30 = vld [vmem:[%s3493_s1 + $0x338] sm:$0xff]  }
  0x65   : > { %2673 = vmatpush3.bf16.msra.mxu1 %v2881_v31  ;;  %2698 = vmatprep.subr.bf16.mxu0 %v2882_v40  ;;  %v2913_v31 = vld [vmem:[%s3493_s1 + $0x3b8] sm:$0xff]   ;;  %v2275_v40 = vcombine.low %v212_v34, %v220_v37 }
  0x66   : > { %2738 = vmatprep.subr.bf16.mxu1 %v2883_v41  ;;  %v2276_v41 = vcombine.high %v212_v34, %v220_v37 }
  0x67   : > { %1906 = vmatmul.mubr.bf16.vlgmr.msra.gmra.mrb[32].mxu0 %v2269_v36  ;;  %v2274_v36 = vcombine.high %v211_v32, %v219_v33 }
  0x68   : > { %1971 = vmatmul.mubr.bf16.vlgmr.msra.gmra.mrb[32].mxu1 %v2271_v38  ;;  %2699 = vmatpush3.bf16.msra.mxu0 %v2884_v42  ;;  %v227_v38 = vld [vmem:[%s3053_s7 + $0xb0] sm:$0xff] }
  0x69   : > { %2739 = vmatpush3.bf16.msra.mxu1 %v2885_v43  ;;  %2700 = vmatprep.subr.bf16.mxu0 %v2886_v44  ;;  %v2290_v42 = vcombine.high %v227_v38, %v235_v39  ;;  %v228_v43 = vld [vmem:[%s3053_s7 + $0xb8] sm:$0xff]  ;;  %v2289_v50 = vcombine.low %v227_v38, %v235_v39 }
  0x6a   : > { %2740 = vmatprep.subr.bf16.mxu1 %v2887_v45  ;;  %1913 = vmatprep.mubr.bf16.mxu0 %v2286_v51  ;;  %v236_v44 = vld [vmem:[%s3053_s7 + $0xf8] sm:$0xff] }
  0x6b   : > { %1978 = vmatprep.mubr.bf16.mxu1 %v2288_v54  ;;  %v2292_v45 = vcombine.high %v228_v43, %v236_v44  ;;  %v2291_v51 = vcombine.low %v228_v43, %v236_v44  ;;  %v259_v54 = vld [vmem:[%s3053_s7 + $0x1b0] sm:$0xff] }
  0x6c   : > { %2701 = vmatpush3.bf16.msra.mxu0 %v2888_v46  ;;  %v243_v46 = vld [vmem:[%s3053_s7 + $0x130] sm:$0xff] }
  0x6d   : > { %2741 = vmatpush3.bf16.msra.mxu1 %v2889_v47  ;;  %2702 = vmatprep.subr.bf16.mxu0 %v2890_v56  ;;  %v251_v47 = vld [vmem:[%s3053_s7 + $0x170] sm:$0xff]  ;;  %v260_v56 = vld [vmem:[%s3053_s7 + $0x1b8] sm:$0xff] }
  0x6e   : > { %2742 = vmatprep.subr.bf16.mxu1 %v2891_v57  ;;  %v2306_v52 = vcombine.high %v243_v46, %v251_v47  ;;  %v268_v57 = vld [vmem:[%s3053_s7 + $0x1f8] sm:$0xff] }
  0x6f   : > { %1914 = vmatmul.mubr.bf16.gmra.mrb[36].mxu0 %v2285_v53  ;;  %v2308_v53 = vcombine.high %v244_v48, %v252_v49 }
  0x70   : > { %1979 = vmatmul.mubr.bf16.gmra.mrb[36].mxu1 %v2287_v55  ;;  %2703 = vmatpush3.bf16.msra.mxu0 %v2892_v58  ;;  %v267_v55 = vld [vmem:[%s3053_s7 + $0x1f0] sm:$0xff]  ;;  %v2305_v58 = vcombine.low %v243_v46, %v251_v47 }
  0x71   : > { %2743 = vmatpush3.bf16.msra.mxu1 %v2893_v59  ;;  %2704 = vmatprep.subr.bf16.mxu0 %v2894_v60  ;;  %v2307_v59 = vcombine.low %v244_v48, %v252_v49  ;;  %v2322_v60 = vcombine.high %v259_v54, %v267_v55 }
  0x72   : > { %2744 = vmatprep.subr.bf16.mxu1 %v2895_v61  ;;  %1921 = vmatprep.mubr.bf16.mxu0 %v2302_v2  ;;  %v2324_v61 = vcombine.high %v260_v56, %v268_v57 }
  0x73   : > { %1986 = vmatprep.mubr.bf16.mxu1 %v2304_v6 }
  0x74   : > { %2705 = vmatpush3.bf16.msra.mxu0 %v2896_v62  ;;  %v2321_v62 = vcombine.low %v259_v54, %v267_v55 }
  0x75   : > { %2745 = vmatpush3.bf16.msra.mxu1 %v2897_v63  ;;  %2706 = vmatprep.subr.bf16.mxu0 %v2898_v8  ;;  %v2323_v63 = vcombine.low %v260_v56, %v268_v57 }
  0x76   : > { %2746 = vmatprep.subr.bf16.mxu1 %v2899_v9 }
  0x77   : > { %1922 = vmatmul.mubr.bf16.gmra.mrb[40].mxu0 %v2301_v5 }
  0x78   : > { %1987 = vmatmul.mubr.bf16.gmra.mrb[40].mxu1 %v2303_v7  ;;  %2707 = vmatpush3.bf16.msra.mxu0 %v2900_v10 }
  0x79   : > { %2747 = vmatpush3.bf16.msra.mxu1 %v2901_v11  ;;  %2708 = vmatprep.subr.bf16.mxu0 %v2902_v12 }
  0x7a   : > { %2748 = vmatprep.subr.bf16.mxu1 %v2903_v13  ;;  %1929 = vmatprep.mubr.bf16.mxu0 %v2318_v20 }
  0x7b   : > { %1994 = vmatprep.mubr.bf16.mxu1 %v2320_v21 }
  0x7c   : > { %2709 = vmatpush3.bf16.msra.mxu0 %v2904_v14 }
  0x7d   : > { %2749 = vmatpush3.bf16.msra.mxu1 %v2905_v15  ;;  %2710 = vmatprep.subr.bf16.mxu0 %v2906_v24 }
  0x7e   : > { %2750 = vmatprep.subr.bf16.mxu1 %v2907_v25 }
  0x7f   : > { %1930 = vmatmul.mubr.bf16.gmra.mrb[44].mxu0 %v2317_v22 }
  0x80   : > { %1995 = vmatmul.mubr.bf16.gmra.mrb[44].mxu1 %v2319_v23  ;;  %2711 = vmatpush3.bf16.msra.mxu0 %v2908_v26 }
  0x81   : > { %2751 = vmatpush3.bf16.msra.mxu1 %v2909_v27  ;;  %2712 = vmatprep.subr.bf16.mxu0 %v2910_v28 }
  0x82   : > { %2752 = vmatprep.subr.bf16.mxu1 %v2911_v29  ;;  %2035 = vmatprep.mubr.bf16.mxu0 %v2274_v36 }
  0x83   : > { %2100 = vmatprep.mubr.bf16.mxu1 %v2276_v41 }
  0x84   : > { %2713 = vmatpush3.bf16.msra.mxu0 %v2912_v30 }
  0x85   : > { %2753 = vmatpush3.bf16.msra.mxu1 %v2913_v31 }
  0x87   : > { %2036 = vmatmul.mubr.bf16.vlgmr.msra.gmra.mrb[48].mxu0 %v2273_v35 }
  0x88   : > { %2101 = vmatmul.mubr.bf16.vlgmr.msra.gmra.mrb[48].mxu1 %v2275_v40  ;;  %2043 = vmatprep.mubr.bf16.mxu0 %v2290_v42 }
  0x89   : > { %2108 = vmatprep.mubr.bf16.mxu1 %v2292_v45 }
  0x8f   : > { %2044 = vmatmul.mubr.bf16.gmra.mrb[52].mxu0 %v2289_v50 }
  0x90   : > { %2109 = vmatmul.mubr.bf16.gmra.mrb[52].mxu1 %v2291_v51  ;;  %2051 = vmatprep.mubr.bf16.mxu0 %v2306_v52 }
  0x91   : > { %2116 = vmatprep.mubr.bf16.mxu1 %v2308_v53 }
  0x97   : > { %2052 = vmatmul.mubr.bf16.gmra.mrb[56].mxu0 %v2305_v58 }
  0x98   : > { %2117 = vmatmul.mubr.bf16.gmra.mrb[56].mxu1 %v2307_v59  ;;  %2059 = vmatprep.mubr.bf16.mxu0 %v2322_v60 }
  0x99   : > { %2124 = vmatprep.mubr.bf16.mxu1 %v2324_v61 }
  0x9f   : > { %2060 = vmatmul.mubr.bf16.gmra.mrb[60].mxu0 %v2321_v62 }
  0xa0   : > { %2125 = vmatmul.mubr.bf16.gmra.mrb[60].mxu1 %v2323_v63 }
  0xfa   : > { %v2474_v0 = vpop.f32.mrb[0].mxu0 }
  0xfb   : > { %v2514_v1 = vpop.f32.mrb[0].mxu1  ;;  %v2475_v2 = vpop.f32.mrb[1].mxu0 }
  0xfc   : > { %v2476_v3 = vadd.f32 %v2475_v2, %v2474_v0  ;;  %v2515_v4 = vpop.f32.mrb[1].mxu1  ;;  %v2477_v5 = vpop.f32.mrb[2].mxu0 }
  0xfd   : > { %v2516_v6 = vadd.f32 %v2515_v4, %v2514_v1  ;;  %v2517_v7 = vpop.f32.mrb[2].mxu1  ;;  %v2478_v8 = vpop.f32.mrb[3].mxu0 }
  0xfe   : > { %v2479_v9 = vadd.f32 %v2478_v8, %v2477_v5  ;;  %v2518_v10 = vpop.f32.mrb[3].mxu1 }
  0xff   : > { %v1713_v11 = vadd.f32 %v2516_v6, %v2476_v3  ;;  %v2519_v12 = vadd.f32 %v2518_v10, %v2517_v7 }
 0x101   : > { %v1716_v13 = vadd.f32 %v2519_v12, %v2479_v9 }
 0x102   : > { %v2480_v14 = vpop.f32.mrb[4].mxu0 }
 0x103   : > { %v2520_v15 = vpop.f32.mrb[4].mxu1  ;;  %v2481_v16 = vpop.f32.mrb[5].mxu0 }
 0x104   : > { %v2482_v17 = vadd.f32 %v2481_v16, %v2480_v14  ;;  %v2521_v18 = vpop.f32.mrb[5].mxu1  ;;  %v2483_v19 = vpop.f32.mrb[6].mxu0 }
 0x105   : > { %v2522_v20 = vadd.f32 %v2521_v18, %v2520_v15  ;;  %v2523_v21 = vpop.f32.mrb[6].mxu1  ;;  %v2484_v22 = vpop.f32.mrb[7].mxu0 }
 0x106   : > { %v2485_v23 = vadd.f32 %v2484_v22, %v2483_v19  ;;  %v2524_v24 = vpop.f32.mrb[7].mxu1 }
 0x107   : > { %v1721_v25 = vadd.f32 %v2522_v20, %v2482_v17  ;;  %v2525_v26 = vadd.f32 %v2524_v24, %v2523_v21 }
 0x109   : > { %v1724_v27 = vadd.f32 %v2525_v26, %v2485_v23 }
 0x10a   : > { %v2486_v28 = vpop.f32.mrb[8].mxu0 }
 0x10b   : > { %v2526_v29 = vpop.f32.mrb[8].mxu1  ;;  %v2487_v30 = vpop.f32.mrb[9].mxu0 }
 0x10c   : > { %v2527_v31 = vpop.f32.mrb[9].mxu1  ;;  %v2488_v32 = vadd.f32 %v2487_v30, %v2486_v28  ;;  %v2489_v34 = vpop.f32.mrb[10].mxu0 }
 0x10d   : > { %v2528_v33 = vadd.f32 %v2527_v31, %v2526_v29  ;;  %v2529_v35 = vpop.f32.mrb[10].mxu1  ;;  %v2490_v36 = vpop.f32.mrb[11].mxu0 }
 0x10e   : > { %v2530_v37 = vpop.f32.mrb[11].mxu1  ;;  %v2491_v39 = vadd.f32 %v2490_v36, %v2489_v34 }
 0x10f   : > { %v1729_v38 = vadd.f32 %v2528_v33, %v2488_v32  ;;  %v2531_v40 = vadd.f32 %v2530_v37, %v2529_v35 }
 0x111   : > { %v1732_v41 = vadd.f32 %v2531_v40, %v2491_v39 }
 0x112   : > { %v2492_v42 = vpop.f32.mrb[12].mxu0 }
 0x113   : > { %v2532_v43 = vpop.f32.mrb[12].mxu1  ;;  %v2493_v44 = vpop.f32.mrb[13].mxu0 }
 0x114   : > { %v2494_v45 = vadd.f32 %v2493_v44, %v2492_v42  ;;  %v2533_v46 = vpop.f32.mrb[13].mxu1  ;;  %v2495_v47 = vpop.f32.mrb[14].mxu0 }
 0x115   : > { %v2534_v48 = vadd.f32 %v2533_v46, %v2532_v43  ;;  %v2535_v49 = vpop.f32.mrb[14].mxu1  ;;  %v2496_v50 = vpop.f32.mrb[15].mxu0 }
 0x116   : > { %v2497_v51 = vadd.f32 %v2496_v50, %v2495_v47  ;;  %v2536_v52 = vpop.f32.mrb[15].mxu1 }
 0x117   : > { %v1737_v53 = vadd.f32 %v2534_v48, %v2494_v45  ;;  %v2537_v54 = vadd.f32 %v2536_v52, %v2535_v49 }
 0x119   : > { %v3413_v55 = vadd.f32 %v2537_v54, %v2497_v51 }
 0x11a   : > { %v2554_v56 = vpop.f32.mrb[16].mxu0 }
 0x11b   : > { %v2594_v57 = vpop.f32.mrb[16].mxu1  ;;  %v2555_v58 = vpop.f32.mrb[17].mxu0 }
 0x11c   : > { %v2556_v59 = vadd.f32 %v2555_v58, %v2554_v56  ;;  %v2595_v60 = vpop.f32.mrb[17].mxu1  ;;  %v2557_v61 = vpop.f32.mrb[18].mxu0 }
 0x11d   : > { %v2596_v62 = vadd.f32 %v2595_v60, %v2594_v57  ;;  %v2597_v63 = vpop.f32.mrb[18].mxu1  ;;  %v2558_v0 = vpop.f32.mrb[19].mxu0 }
 0x11e   : > { %v1778_v1 = vadd.f32 %v2556_v59, %v1713_v11  ;;  %v2559_v2 = vadd.f32 %v2558_v0, %v2557_v61  ;;  %v2598_v3 = vpop.f32.mrb[19].mxu1 }
 0x11f   : > { %v2599_v4 = vadd.f32 %v2598_v3, %v2597_v63 }
 0x120   : > { %v1843_v5 = vadd.f32 %v2596_v62, %v1778_v1  ;;  %v1781_v6 = vadd.f32 %v2559_v2, %v1716_v13 }
 0x122   : > { %v3415_v7 = vadd.f32 %v2599_v4, %v1781_v6  ;;  %v2560_v8 = vpop.f32.mrb[20].mxu0 }
 0x123   : > { %v2600_v9 = vpop.f32.mrb[20].mxu1  ;;  %v2561_v10 = vpop.f32.mrb[21].mxu0 }
 0x124   : > { %v2601_v12 = vpop.f32.mrb[21].mxu1  ;;  %v2562_v14 = vadd.f32 %v2561_v10, %v2560_v8  ;;  %v2563_v16 = vpop.f32.mrb[22].mxu0 }
 0x125   : > { %v2602_v15 = vadd.f32 %v2601_v12, %v2600_v9  ;;  %v2603_v17 = vpop.f32.mrb[22].mxu1  ;;  %v2564_v18 = vpop.f32.mrb[23].mxu0 }
 0x126   : > { %v2604_v19 = vpop.f32.mrb[23].mxu1  ;;  %v1786_v20 = vadd.f32 %v2562_v14, %v1721_v25  ;;  %v2565_v21 = vadd.f32 %v2564_v18, %v2563_v16 }
 0x127   : > { %v2605_v11 = vadd.f32 %v2604_v19, %v2603_v17 }
 0x128   : > { %v1851_v22 = vadd.f32 %v2602_v15, %v1786_v20  ;;  %v1789_v23 = vadd.f32 %v2565_v21, %v1724_v27 }
 0x12a   : > { %v3417_v24 = vadd.f32 %v2605_v11, %v1789_v23  ;;  %v2566_v13 = vpop.f32.mrb[24].mxu0 }
 0x12b   : > { %v2606_v26 = vpop.f32.mrb[24].mxu1  ;;  %v2567_v28 = vpop.f32.mrb[25].mxu0 }
 0x12c   : > { %v2568_v29 = vadd.f32 %v2567_v28, %v2566_v13  ;;  %v2607_v30 = vpop.f32.mrb[25].mxu1  ;;  %v2569_v31 = vpop.f32.mrb[26].mxu0 }
 0x12d   : > { %v2608_v32 = vadd.f32 %v2607_v30, %v2606_v26  ;;  %v2609_v33 = vpop.f32.mrb[26].mxu1  ;;  %v2570_v34 = vpop.f32.mrb[27].mxu0 }
 0x12e   : > { %v1794_v35 = vadd.f32 %v2568_v29, %v1729_v38  ;;  %v2571_v36 = vadd.f32 %v2570_v34, %v2569_v31  ;;  %v2610_v37 = vpop.f32.mrb[27].mxu1 }
 0x12f   : > { %v2611_v39 = vadd.f32 %v2610_v37, %v2609_v33 }
 0x130   : > { %v1859_v25 = vadd.f32 %v2608_v32, %v1794_v35  ;;  %v1797_v40 = vadd.f32 %v2571_v36, %v1732_v41 }
 0x132   : > { %v3419_v42 = vadd.f32 %v2611_v39, %v1797_v40  ;;  %v2572_v27 = vpop.f32.mrb[28].mxu0 }
 0x133   : > { %v2612_v43 = vpop.f32.mrb[28].mxu1  ;;  %v2573_v44 = vpop.f32.mrb[29].mxu0 }
 0x134   : > { %v2574_v45 = vadd.f32 %v2573_v44, %v2572_v27  ;;  %v2613_v46 = vpop.f32.mrb[29].mxu1  ;;  %v2575_v47 = vpop.f32.mrb[30].mxu0 }
 0x135   : > { %v2614_v48 = vadd.f32 %v2613_v46, %v2612_v43  ;;  %v2615_v49 = vpop.f32.mrb[30].mxu1  ;;  %v2576_v50 = vpop.f32.mrb[31].mxu0 }
 0x136   : > { %v1802_v51 = vadd.f32 %v2574_v45, %v1737_v53  ;;  %v2577_v52 = vadd.f32 %v2576_v50, %v2575_v47  ;;  %v2616_v54 = vpop.f32.mrb[31].mxu1 }
 0x137   : > { %v2617_v38 = vadd.f32 %v2616_v54, %v2615_v49 }
 0x138   : > { %v1867_v56 = vadd.f32 %v2614_v48, %v1802_v51  ;;  %v1805_v57 = vadd.f32 %v2577_v52, %v3413_v55 }
 0x13a   : > { %v3422_v58 = vadd.f32 %v2617_v38, %v1805_v57  ;;  %v2634_v41 = vpop.f32.mrb[32].mxu0 }
 0x13b   : > { %v2674_v59 = vpop.f32.mrb[32].mxu1  ;;  %v2635_v60 = vpop.f32.mrb[33].mxu0 }
 0x13c   : > { %v2675_v61 = vpop.f32.mrb[33].mxu1  ;;  %v2636_v62 = vadd.f32 %v2635_v60, %v2634_v41  ;;  %v2637_v0 = vpop.f32.mrb[34].mxu0 }
 0x13d   : > { %v2676_v63 = vadd.f32 %v2675_v61, %v2674_v59  ;;  %v2677_v1 = vpop.f32.mrb[34].mxu1  ;;  %v2638_v2 = vpop.f32.mrb[35].mxu0 }
 0x13e   : > { %v2678_v3 = vpop.f32.mrb[35].mxu1  ;;  %v1908_v4 = vadd.f32 %v2636_v62, %v1843_v5  ;;  %v2639_v53 = vadd.f32 %v2638_v2, %v2637_v0 }
 0x13f   : > { %v2679_v6 = vadd.f32 %v2678_v3, %v2677_v1 }
 0x140   : > { %v1973_v8 = vadd.f32 %v2676_v63, %v1908_v4  ;;  %v1911_v9 = vadd.f32 %v2639_v53, %v3415_v7 }
 0x142   : > { %v3425_v10 = vadd.f32 %v2679_v6, %v1911_v9  ;;  %v2640_v55 = vpop.f32.mrb[36].mxu0  ;;  %v3445_v9 = vld [vmem:[%s3494_s2] ss:$0 sm:$0xff] }
 0x143   : > { %v2680_v12 = vpop.f32.mrb[36].mxu1  ;;  %v2641_v14 = vpop.f32.mrb[37].mxu0 }
 0x144   : > { %v2642_v15 = vadd.f32 %v2641_v14, %v2640_v55  ;;  %v2681_v16 = vpop.f32.mrb[37].mxu1  ;;  %v2643_v17 = vpop.f32.mrb[38].mxu0  ;;  %v3451_v14 = vld [vmem:[%s3495_s3] ss:$0 sm:$0xff] }
 0x145   : > { %v2682_v18 = vadd.f32 %v2681_v16, %v2680_v12  ;;  %v2683_v19 = vpop.f32.mrb[38].mxu1  ;;  %v2644_v20 = vpop.f32.mrb[39].mxu0 }
 0x146   : > { %v1916_v21 = vadd.f32 %v2642_v15, %v1851_v22  ;;  %v2645_v11 = vadd.f32 %v2644_v20, %v2643_v17  ;;  %v2684_v23 = vpop.f32.mrb[39].mxu1 }
 0x147   : > { %v2685_v5 = vadd.f32 %v2684_v23, %v2683_v19 }
 0x148   : > { %v3427_v13 = vadd.f32 %v2682_v18, %v1916_v21  ;;  %v1919_v26 = vadd.f32 %v2645_v11, %v3417_v24 }
 0x14a   : > { %v3430_v7 = vadd.f32 %v2685_v5, %v1919_v26  ;;  %v2646_v28 = vpop.f32.mrb[40].mxu0 }
 0x14b   : > { %v2686_v29 = vpop.f32.mrb[40].mxu1  ;;  %v2647_v30 = vpop.f32.mrb[41].mxu0 }
 0x14c   : > { %v2648_v31 = vadd.f32 %v2647_v30, %v2646_v28  ;;  %v2687_v32 = vpop.f32.mrb[41].mxu1  ;;  %v2649_v33 = vpop.f32.mrb[42].mxu0 }
 0x14d   : > { %v2688_v34 = vadd.f32 %v2687_v32, %v2686_v29  ;;  %v2689_v35 = vpop.f32.mrb[42].mxu1  ;;  %v2650_v36 = vpop.f32.mrb[43].mxu0 }
 0x14e   : > { %v1924_v37 = vadd.f32 %v2648_v31, %v1859_v25  ;;  %v2651_v22 = vadd.f32 %v2650_v36, %v2649_v33  ;;  %v2690_v39 = vpop.f32.mrb[43].mxu1 }
 0x14f   : > { %v2691_v40 = vadd.f32 %v2690_v39, %v2689_v35 }
 0x150   : > { %v3432_v27 = vadd.f32 %v2688_v34, %v1924_v37  ;;  %v1927_v43 = vadd.f32 %v2651_v22, %v3419_v42 }
 0x152   : > { %v3435_v24 = vadd.f32 %v2691_v40, %v1927_v43  ;;  %v2652_v44 = vpop.f32.mrb[44].mxu0 }
 0x153   : > { %v2692_v45 = vpop.f32.mrb[44].mxu1  ;;  %v2653_v46 = vpop.f32.mrb[45].mxu0 }
 0x154   : > { %v2693_v47 = vpop.f32.mrb[45].mxu1  ;;  %v2654_v48 = vadd.f32 %v2653_v46, %v2652_v44  ;;  %v2655_v50 = vpop.f32.mrb[46].mxu0 }
 0x155   : > { %v2694_v49 = vadd.f32 %v2693_v47, %v2692_v45  ;;  %v2695_v51 = vpop.f32.mrb[46].mxu1  ;;  %v2656_v52 = vpop.f32.mrb[47].mxu0 }
 0x156   : > { %v2696_v54 = vpop.f32.mrb[47].mxu1  ;;  %v1932_v25 = vadd.f32 %v2654_v48, %v1867_v56  ;;  %v2657_v38 = vadd.f32 %v2656_v52, %v2655_v50 }
 0x157   : > { %v2697_v57 = vadd.f32 %v2696_v54, %v2695_v51 }
 0x158   : > { %v3437_v41 = vadd.f32 %v2694_v49, %v1932_v25  ;;  %v1935_v59 = vadd.f32 %v2657_v38, %v3422_v58 }
 0x15a   : > { %v3440_v42 = vadd.f32 %v2697_v57, %v1935_v59  ;;  %v2714_v60 = vpop.f32.mrb[48].mxu0 }
 0x15b   : > { %v2754_v61 = vpop.f32.mrb[48].mxu1  ;;  %v2715_v62 = vpop.f32.mrb[49].mxu0 }
 0x15c   : > { %v2716_v63 = vadd.f32 %v2715_v62, %v2714_v60  ;;  %v2755_v0 = vpop.f32.mrb[49].mxu1  ;;  %v2717_v1 = vpop.f32.mrb[50].mxu0 }
 0x15d   : > { %v2756_v2 = vadd.f32 %v2755_v0, %v2754_v61  ;;  %v2757_v3 = vpop.f32.mrb[50].mxu1  ;;  %v2718_v4 = vpop.f32.mrb[51].mxu0 }
 0x15e   : > { %v2038_v53 = vadd.f32 %v2716_v63, %v1973_v8  ;;  %v2719_v56 = vadd.f32 %v2718_v4, %v2717_v1  ;;  %v2758_v6 = vpop.f32.mrb[51].mxu1 }
 0x15f   : > { %v2759_v58 = vadd.f32 %v2758_v6, %v2757_v3 }
 0x160   : > { %v2103_v55 = vadd.f32 %v2756_v2, %v2038_v53  ;;  %v2041_v12 = vadd.f32 %v2719_v56, %v3425_v10 }
 0x162   : > { %v2140_v15 = vmul.f32 %v3445_v9, %v2103_v55  ;;  %v2106_v16 = vadd.f32 %v2759_v58, %v2041_v12  ;;  %v2720_v8 = vpop.f32.mrb[52].mxu0 }
 0x163   : > { %v2760_v17 = vpop.f32.mrb[52].mxu1  ;;  %v2721_v18 = vpop.f32.mrb[53].mxu0 }
 0x164   : > { %v2155_v19 = vadd.f32 %v3451_v14, %v2140_v15  ;;  %v2141_v20 = vmul.f32 %v3445_v9, %v2106_v16  ;;  %v2722_v21 = vadd.f32 %v2721_v18, %v2720_v8  ;;  %v2761_v11 = vpop.f32.mrb[53].mxu1  ;;  %v2723_v23 = vpop.f32.mrb[54].mxu0 }
 0x165   : > { %v2762_v10 = vadd.f32 %v2761_v11, %v2760_v17  ;;  %v2763_v5 = vpop.f32.mrb[54].mxu1  ;;  %v2724_v26 = vpop.f32.mrb[55].mxu0 }
 0x166   : > { %vm2163_vm0 = vcmp.gt.f32.partialorder %v2155_v19, 0.0  ;;  %v2171_v28 = vmul.f32 0.2, %v2155_v19  ;;  %v2156_v29 = vadd.f32 %v3451_v14, %v2141_v20  ;;  %v2046_v30 = vadd.f32 %v2722_v21, %v3427_v13  ;;  %v2764_v31 = vpop.f32.mrb[55].mxu1 }
 0x167   : > { %v2725_v32 = vadd.f32 %v2724_v26, %v2723_v23  ;;  %v2765_v33 = vadd.f32 %v2764_v31, %v2763_v5 }
 0x168   : > { %v2179_v34 = vsel %vm2163_vm0, %v2155_v19, %v2171_v28  ;;  %vm2164_vm1 = vcmp.gt.f32.partialorder %v2156_v29, 0.0  ;;  %v2172_v35 = vmul.f32 0.2, %v2156_v29  ;;  %v2111_v36 = vadd.f32 %v2762_v10, %v2046_v30 }
 0x169   : > { %2187 = vst [vmem:[%s3460_s28] sm:$0xff] %v2179_v34  ;;  %v2049_v37 = vadd.f32 %v2725_v32, %v3430_v7 }
 0x16a   : > { %v2180_v22 = vsel %vm2164_vm1, %v2156_v29, %v2172_v35  ;;  %v2142_v39 = vmul.f32 %v3445_v9, %v2111_v36  ;;  %v2726_v40 = vpop.f32.mrb[56].mxu0 }
 0x16b   : > { %2188 = vst [vmem:[%s3460_s28 + $0x8] sm:$0xff] %v2180_v22  ;;  %v2114_v43 = vadd.f32 %v2765_v33, %v2049_v37  ;;  %v2766_v44 = vpop.f32.mrb[56].mxu1  ;;  %v2727_v45 = vpop.f32.mrb[57].mxu0 }
 0x16c   : > { %v2157_v13 = vadd.f32 %v3451_v14, %v2142_v39  ;;  %v2728_v46 = vadd.f32 %v2727_v45, %v2726_v40  ;;  %v2767_v47 = vpop.f32.mrb[57].mxu1  ;;  %v2729_v48 = vpop.f32.mrb[58].mxu0 }
 0x16d   : > { %v2143_v49 = vmul.f32 %v3445_v9, %v2114_v43  ;;  %v2768_v50 = vadd.f32 %v2767_v47, %v2766_v44  ;;  %v2769_v51 = vpop.f32.mrb[58].mxu1  ;;  %v2730_v52 = vpop.f32.mrb[59].mxu0 }
 0x16e   : > { %vm2165_vm2 = vcmp.gt.f32.partialorder %v2157_v13, 0.0  ;;  %v2173_v7 = vmul.f32 0.2, %v2157_v13  ;;  %v2054_v54 = vadd.f32 %v2728_v46, %v3432_v27  ;;  %v2731_v25 = vadd.f32 %v2730_v52, %v2729_v48  ;;  %v2770_v38 = vpop.f32.mrb[59].mxu1 }
 0x16f   : > { %v2158_v57 = vadd.f32 %v3451_v14, %v2143_v49  ;;  %v2771_v59 = vadd.f32 %v2770_v38, %v2769_v51 }
 0x170   : > { %v2181_v60 = vsel %vm2165_vm2, %v2157_v13, %v2173_v7  ;;  %v2119_v61 = vadd.f32 %v2768_v50, %v2054_v54  ;;  %v2057_v62 = vadd.f32 %v2731_v25, %v3435_v24 }
 0x171   : > { %2189 = vst [vmem:[%s3460_s28 + $0x10] sm:$0xff] %v2181_v60  ;;  %vm2166_vm3 = vcmp.gt.f32.partialorder %v2158_v57, 0.0  ;;  %v2174_v63 = vmul.f32 0.2, %v2158_v57 }
 0x172   : > { %v2144_v0 = vmul.f32 %v3445_v9, %v2119_v61  ;;  %v2122_v1 = vadd.f32 %v2771_v59, %v2057_v62  ;;  %v2732_v2 = vpop.f32.mrb[60].mxu0 }
 0x173   : > { %v2182_v3 = vsel %vm2166_vm3, %v2158_v57, %v2174_v63  ;;  %v2772_v4 = vpop.f32.mrb[60].mxu1  ;;  %v2733_v27 = vpop.f32.mrb[61].mxu0 }
 0x174   : > { %2190 = vst [vmem:[%s3460_s28 + $0x18] sm:$0xff] %v2182_v3  ;;  %v2159_v53 = vadd.f32 %v3451_v14, %v2144_v0  ;;  %v2145_v56 = vmul.f32 %v3445_v9, %v2122_v1  ;;  %v2734_v6 = vadd.f32 %v2733_v27, %v2732_v2  ;;  %v2773_v58 = vpop.f32.mrb[61].mxu1  ;;  %v2735_v55 = vpop.f32.mrb[62].mxu0 }
 0x175   : > { %v2774_v24 = vadd.f32 %v2773_v58, %v2772_v4  ;;  %v2775_v12 = vpop.f32.mrb[62].mxu1  ;;  %v2736_v15 = vpop.f32.mrb[63].mxu0 }
 0x176   : > { %vm2167_vm4 = vcmp.gt.f32.partialorder %v2159_v53, 0.0  ;;  %v2175_v16 = vmul.f32 0.2, %v2159_v53  ;;  %v2160_v8 = vadd.f32 %v3451_v14, %v2145_v56  ;;  %v2062_v17 = vadd.f32 %v2734_v6, %v3437_v41  ;;  %v2776_v18 = vpop.f32.mrb[63].mxu1 }
 0x177   : > { %v2737_v19 = vadd.f32 %v2736_v15, %v2735_v55  ;;  %v2777_v20 = vadd.f32 %v2776_v18, %v2775_v12 }
 0x178   : > { %v2183_v21 = vsel %vm2167_vm4, %v2159_v53, %v2175_v16  ;;  %vm2168_vm5 = vcmp.gt.f32.partialorder %v2160_v8, 0.0  ;;  %v2176_v11 = vmul.f32 0.2, %v2160_v8  ;;  %v2127_v23 = vadd.f32 %v2774_v24, %v2062_v17 }
 0x179   : > { %2191 = vst [vmem:[%s3460_s28 + $0x20] sm:$0xff] %v2183_v21  ;;  %v2065_v10 = vadd.f32 %v2737_v19, %v3440_v42 }
 0x17a   : > { %v2184_v5 = vsel %vm2168_vm5, %v2160_v8, %v2176_v11  ;;  %v2146_v26 = vmul.f32 %v3445_v9, %v2127_v23 }
 0x17b   : > { %2192 = vst [vmem:[%s3460_s28 + $0x28] sm:$0xff] %v2184_v5  ;;  %v2130_v28 = vadd.f32 %v2777_v20, %v2065_v10 }
 0x17c   : > { %v2161_v29 = vadd.f32 %v3451_v14, %v2146_v26 }
 0x17d   : > { %v2147_v41 = vmul.f32 %v3445_v9, %v2130_v28 }
 0x17e   : > { %vm2169_vm6 = vcmp.gt.f32.partialorder %v2161_v29, 0.0  ;;  %v2177_v30 = vmul.f32 0.2, %v2161_v29 }
 0x17f   : > { %v2162_v31 = vadd.f32 %v3451_v14, %v2147_v41 }
 0x180   : > { %v2185_v32 = vsel %vm2169_vm6, %v2161_v29, %v2177_v30 }
 0x181   : > { %2193 = vst [vmem:[%s3460_s28 + $0x30] sm:$0xff] %v2185_v32  ;;  %vm2170_vm7 = vcmp.gt.f32.partialorder %v2162_v31, 0.0  ;;  %v2178_v33 = vmul.f32 0.2, %v2162_v31 }
 0x183   : > { %v2186_v34 = vsel %vm2170_vm7, %v2162_v31, %v2178_v33 }
 0x184   : > { %2194 = vst [vmem:[%s3460_s28 + $0x38] sm:$0xff] %v2186_v34 }
 0x185 PF: > { %s14_s15 = sadd.s32 1, %s2920_s15  }
 0x186   : > { %p11_p4 = scmp.ge.s32.totalorder %s14_s15, 4  }
 0x188   :  { %13 = sbr.rel (!%p11_p4) target bundleno = 1 (0x1), region = 66 }

// kernel: discriminator_forward.7
= control target key start
LH: loop header
LB: loop body
LE: loop exit
PB: predicated region body
PF: predicated region fallthrough
CT: control target
= control target key end

     0   :  { %v48_v1 = vlaneseq  ;;  %v1117_v4 = vmov 1983009808   ;;  %vm960_vm0 = vcmask 1041408   ;;  %vm1104_vm1 = vcmask 1024   ;;  %s1765_s2 = inlined_call_operand.<no memory space> [shape: f32[1,1], index: 2, kind: input, shape index: {}]   ;;  %s1766_s1 = inlined_call_operand.vmem [shape: f32[1,8192], index: 1, kind: input, shape index: {}]   ;;  %s1767_s0 = inlined_call_operand.vmem [shape: f32[2,8192], index: 0, kind: input, shape index: {}]   ;;  %s1768_s3 = inlined_call_operand.vmem [shape: f32[2,1], index: 3, kind: output, shape index: {}]  }
   0x1   :  { %v8_v0 = vstv %s1765_s2  ;;  %v1144_v3 = vld [vmem:[%s1766_s1 + $0x20] sm:$0xff]  ;;  %v307_v5 = vunpack.c.l.s4 %v1117_v4  ;;  %v1157_v10 = vld [vmem:[%s1766_s1 + $0x28] sm:$0xff]  ;;  %v1178_v19 = vld [vmem:[%s1766_s1 + $0x30] sm:$0xff] }
   0x2   :  { %9 = vst [vmem:[#allocation2] sm:$0x1] %v8_v0  ;;  %v49_v2 = vshrl.u32 %v48_v1, 7  ;;  %v1199_v28 = vld [vmem:[%s1766_s1 + $0x38] sm:$0xff]  ;;  %v1244_v50 = vld [vmem:[%s1766_s1] sm:$0xff]  ;;  %v1249_v51 = vld [vmem:[%s1766_s1 + $0x8] sm:$0xff] }
   0x3   :  { %v308_v49 = vunpack.c.0.s8 %v307_v5  ;;  %v1260_v55 = vld [vmem:[%s1766_s1 + $0x10] sm:$0xff] }
   0x4   :  { %v1146_v6 = vsub.s32 0, %v49_v2  ;;  %v1148_v7 = vsub.s32 1, %v49_v2  ;;  %v1150_v8 = vsub.s32 2, %v49_v2  ;;  %v1152_v9 = vsub.s32 3, %v49_v2 }
   0x5   :  { %v1159_v11 = vsub.s32 4, %v49_v2  ;;  %v1161_v12 = vsub.s32 5, %v49_v2  ;;  %v1163_v13 = vsub.s32 6, %v49_v2  ;;  %v1165_v14 = vsub.s32 7, %v49_v2 }
   0x6   :  { %1782 = vst [vmem:[#allocation3_spill] sm:$0xff] %v1148_v7  ;;  %1783 = vst [vmem:[#allocation4_spill] sm:$0xff] %v1150_v8  ;;  %v179_v15 = vrot.slane %v1144_v3, %v1146_v6  ;;  %v183_v16 = vrot.slane %v1144_v3, %v1148_v7  ;;  %v187_v17 = vrot.slane %v1144_v3, %v1150_v8 }
   0x7   :  { %1784 = vst [vmem:[#allocation5_spill] sm:$0xff] %v1159_v11  ;;  %1785 = vst [vmem:[#allocation6_spill] sm:$0xff] %v1161_v12  ;;  %v191_v18 = vrot.slane %v1144_v3, %v1152_v9  ;;  %v195_v20 = vrot.slane %v1144_v3, %v1159_v11  ;;  %v199_v21 = vrot.slane %v1144_v3, %v1161_v12 }
   0x8   :  { %1786 = vst [vmem:[#allocation7_spill] sm:$0xff] %v1163_v13  ;;  %1787 = vst [vmem:[#allocation8_spill] sm:$0xff] %v1165_v14  ;;  %v203_v22 = vrot.slane %v1144_v3, %v1163_v13  ;;  %v207_v23 = vrot.slane %v1144_v3, %v1165_v14  ;;  %v211_v24 = vrot.slane %v1157_v10, %v1146_v6 }
   0x9   :  { %v215_v25 = vrot.slane %v1157_v10, %v1148_v7  ;;  %v219_v26 = vrot.slane %v1157_v10, %v1150_v8  ;;  %v223_v27 = vrot.slane %v1157_v10, %v1152_v9  ;;  %v227_v29 = vrot.slane %v1157_v10, %v1159_v11 }
   0xa   :  { %v231_v30 = vrot.slane %v1157_v10, %v1161_v12  ;;  %v235_v31 = vrot.slane %v1157_v10, %v1163_v13  ;;  %v239_v32 = vrot.slane %v1157_v10, %v1165_v14  ;;  %v243_v33 = vrot.slane %v1178_v19, %v1146_v6 }
   0xb   :  { %v247_v34 = vrot.slane %v1178_v19, %v1148_v7  ;;  %v251_v35 = vrot.slane %v1178_v19, %v1150_v8  ;;  %v255_v36 = vrot.slane %v1178_v19, %v1152_v9  ;;  %v259_v37 = vrot.slane %v1178_v19, %v1159_v11 }
   0xc   :  { %v263_v38 = vrot.slane %v1178_v19, %v1161_v12  ;;  %v267_v39 = vrot.slane %v1178_v19, %v1163_v13  ;;  %v271_v40 = vrot.slane %v1178_v19, %v1165_v14  ;;  %v275_v41 = vrot.slane %v1199_v28, %v1146_v6 }
   0xd   :  { %v279_v42 = vrot.slane %v1199_v28, %v1148_v7  ;;  %v283_v43 = vrot.slane %v1199_v28, %v1150_v8  ;;  %v287_v44 = vrot.slane %v1199_v28, %v1152_v9  ;;  %v291_v45 = vrot.slane %v1199_v28, %v1159_v11 }
   0xe   :  { %v295_v46 = vrot.slane %v1199_v28, %v1161_v12  ;;  %v299_v47 = vrot.slane %v1199_v28, %v1163_v13  ;;  %v303_v48 = vrot.slane %v1199_v28, %v1165_v14  ;;  %v51_v52 = vrot.slane %v1244_v50, %v1146_v6 }
   0xf   :  { %v55_v53 = vrot.slane %v1244_v50, %v1148_v7  ;;  %v1255_v54 = vsub.s32 %v308_v49, %v49_v2  ;;  %v59_v56 = vrot.slane %v1244_v50, %v1150_v8  ;;  %v63_v57 = vrot.slane %v1244_v50, %v1152_v9 }
  0x10   :  { %v67_v58 = vrot.slane %v1244_v50, %v1159_v11  ;;  %v71_v59 = vrot.slane %v1244_v50, %v1161_v12  ;;  %v75_v60 = vrot.slane %v1244_v50, %v1163_v13  ;;  %v79_v61 = vrot.slane %v1244_v50, %v1165_v14 }
  0x11   :  { %v87_v63 = vrot.slane %v1249_v51, %v1148_v7  ;;  %v91_v0 = vrot.slane %v1249_v51, %v1150_v8  ;;  %v95_v1 = vrot.slane %v1249_v51, %v1152_v9  ;;  %v99_v2 = vrot.slane %v1249_v51, %v1159_v11 }
  0x12   :  { %v103_v3 = vrot.slane %v1249_v51, %v1161_v12  ;;  %v111_v5 = vrot.slane %v1249_v51, %v1165_v14  ;;  %v440_v19 = vcombine.low %v179_v15, %v183_v16  ;;  %v441_v62 = vcombine.low %v187_v17, %v191_v18 }
  0x13   :  { %v1298_v12 = vcombine.low %v51_v52, %v55_v53  ;;  %v457_v11 = vcombine.low %v195_v20, %v199_v21  ;;  %v458_v14 = vcombine.low %v203_v22, %v207_v23  ;;  %v1301_v13 = vcombine.low %v59_v56, %v63_v57 }
  0x14   :  { %v448_v4 = vrot.slane %v440_v19, %v1255_v54  ;;  %v455_v15 = vrot.slane %v441_v62, %v1255_v54  ;;  %v474_v16 = vcombine.low %v211_v24, %v215_v25  ;;  %v475_v10 = vcombine.low %v219_v26, %v223_v27  ;;  %v1789_v62 = vld [vmem:[#allocation7_spill] sm:$0xff] }
  0x15   :  { %v465_v28 = vrot.slane %v457_v11, %v1255_v54  ;;  %v472_v49 = vrot.slane %v458_v14, %v1255_v54  ;;  %v491_v8 = vcombine.low %v227_v29, %v231_v30  ;;  %v492_v7 = vcombine.low %v235_v31, %v239_v32 }
  0x16   :  { %v456_v50 = vcombine.low %v448_v4, %v455_v15  ;;  %v482_v17 = vrot.slane %v474_v16, %v1255_v54  ;;  %v489_v18 = vrot.slane %v475_v10, %v1255_v54  ;;  %v508_v52 = vcombine.low %v243_v33, %v247_v34 }
  0x17   :  { %v473_v20 = vcombine.low %v465_v28, %v472_v49  ;;  %v499_v21 = vrot.slane %v491_v8, %v1255_v54  ;;  %v506_v22 = vrot.slane %v492_v7, %v1255_v54  ;;  %v509_v23 = vcombine.low %v251_v35, %v255_v36  ;;  %v24_v7 = vld [vmem:[%s1767_s0 + $0x40] sm:$0xff]  ;;  %v25_v8 = vld [vmem:[%s1767_s0 + $0x48] sm:$0xff] }
  0x18   :  { %v490_v24 = vcombine.low %v482_v17, %v489_v18  ;;  %v516_v25 = vrot.slane %v508_v52, %v1255_v54  ;;  %v525_v11 = vcombine.low %v259_v37, %v263_v38  ;;  %v526_v26 = vcombine.low %v267_v39, %v271_v40  ;;  %v26_v39 = vld [vmem:[%s1767_s0 + $0x50] sm:$0xff]  ;;  %v27_v40 = vld [vmem:[%s1767_s0 + $0x58] sm:$0xff] }
  0x19   :  { %v507_v14 = vcombine.low %v499_v21, %v506_v22  ;;  %v523_v27 = vrot.slane %v509_v23, %v1255_v54  ;;  %v542_v29 = vcombine.low %v275_v41, %v279_v42  ;;  %v543_v30 = vcombine.low %v283_v43, %v287_v44  ;;  %v28_v41 = vld [vmem:[%s1767_s0 + $0x60] sm:$0xff]  ;;  %v1795_v18 = vld [vmem:[#allocation4_spill] sm:$0xff]  ;;  %v1379_v23 = vld [vmem:[%s1766_s1 + $0x18] sm:$0xff] }
  0x1a   :  { %v533_v31 = vrot.slane %v525_v11, %v1255_v54  ;;  %v540_v32 = vrot.slane %v526_v26, %v1255_v54  ;;  %v559_v33 = vcombine.low %v291_v45, %v295_v46  ;;  %v560_v34 = vcombine.low %v299_v47, %v303_v48  ;;  %v29_v46 = vld [vmem:[%s1767_s0 + $0x68] sm:$0xff]  ;;  %v30_v47 = vld [vmem:[%s1767_s0 + $0x70] sm:$0xff]  ;;  %v31_v48 = vld [vmem:[%s1767_s0 + $0x78] sm:$0xff] }
  0x1b   :  { %v321_v35 = vcombine.low %v67_v58, %v71_v59  ;;  %v524_v36 = vcombine.low %v516_v25, %v523_v27  ;;  %v550_v37 = vrot.slane %v542_v29, %v1255_v54  ;;  %v557_v38 = vrot.slane %v543_v30, %v1255_v54  ;;  %v16_v26 = vld [vmem:[%s1767_s0] sm:$0xff] }
  0x1c   :  { %v322_v42 = vcombine.low %v75_v60, %v79_v61  ;;  %v541_v43 = vcombine.low %v533_v31, %v540_v32  ;;  %v567_v44 = vrot.slane %v559_v33, %v1255_v54  ;;  %v574_v45 = vrot.slane %v560_v34, %v1255_v54  ;;  %v1798_v29 = vld [vmem:[#allocation6_spill] sm:$0xff]  ;;  %v17_v32 = vld [vmem:[%s1767_s0 + $0x8] sm:$0xff] }
  0x1d   :  { %v1788_v53 = vrot.slane %v1249_v51, %v1146_v6  ;;  %v339_v57 = vcombine.low %v91_v0, %v95_v1  ;;  %v355_v58 = vcombine.low %v99_v2, %v103_v3  ;;  %v558_v59 = vcombine.low %v550_v37, %v557_v38  ;;  %v1799_v34 = vld [vmem:[#allocation8_spill] sm:$0xff] }
  0x1e   :  { %v312_v60 = vrot.slane %v1298_v12, %v1255_v54  ;;  %v319_v61 = vrot.slane %v1301_v13, %v1255_v54  ;;  %v1790_v4 = vrot.slane %v1249_v51, %v1789_v62  ;;  %v575_v19 = vcombine.low %v567_v44, %v574_v45  ;;  %v1791_v51 = vld [vmem:[#allocation3_spill] sm:$0xff]  ;;  %v18_v38 = vld [vmem:[%s1767_s0 + $0x10] sm:$0xff] }
  0x1f   :  { %v338_v56 = vcombine.low %v1788_v53, %v87_v63  ;;  %v600_v28 = vmul.f32 %v456_v50, %v24_v7  ;;  %v601_v49 = vmul.f32 %v473_v20, %v25_v8  ;;  %v602_v15 = vmul.f32 %v490_v24, %v26_v39 }
  0x20   :  { %v356_v10 = vcombine.low %v1790_v4, %v111_v5  ;;  %v603_v16 = vmul.f32 %v507_v14, %v27_v40  ;;  %v1352_v17 = vmul.f32 %v524_v36, %v28_v41  ;;  %v1354_v63 = vmul.f32 %v541_v43, %v29_v46  ;;  %v1797_v14 = vld [vmem:[#allocation5_spill] sm:$0xff] }
  0x21   :  { %v1356_v0 = vmul.f32 %v558_v59, %v30_v47  ;;  %v1358_v1 = vmul.f32 %v575_v19, %v31_v48  ;;  %v329_v12 = vrot.slane %v321_v35, %v1255_v54  ;;  %v336_v13 = vrot.slane %v322_v42, %v1255_v54  ;;  %v19_v42 = vld [vmem:[%s1767_s0 + $0x18] sm:$0xff] }
  0x22   :  { %v1792_v2 = vrot.slane %v1260_v55, %v1791_v51  ;;  %v1793_v3 = vrot.slane %v1260_v55, %v1146_v6  ;;  %v1794_v50 = vrot.slane %v1260_v55, %v1152_v9  ;;  %v1796_v52 = vrot.slane %v1260_v55, %v1795_v18 }
  0x23   :  { %v346_v21 = vrot.slane %v338_v56, %v1255_v54  ;;  %v353_v22 = vrot.slane %v339_v57, %v1255_v54  ;;  %v320_v24 = vcombine.low %v312_v60, %v319_v61  ;;  %v363_v25 = vrot.slane %v355_v58, %v1255_v54 }
  0x24   :  { %v372_v5 = vcombine.low %v1793_v3, %v1792_v2  ;;  %v373_v20 = vcombine.low %v1796_v52, %v1794_v50  ;;  %v370_v11 = vrot.slane %v356_v10, %v1255_v54  ;;  %v131_v27 = vrot.slane %v1260_v55, %v1797_v14 }
  0x25   :  { %v135_v30 = vrot.slane %v1260_v55, %v1798_v29  ;;  %v337_v31 = vcombine.low %v329_v12, %v336_v13  ;;  %v139_v33 = vrot.slane %v1260_v55, %v1789_v62  ;;  %v143_v7 = vrot.slane %v1260_v55, %v1799_v34 }
  0x26   :  { %v380_v8 = vrot.slane %v372_v5, %v1255_v54  ;;  %v387_v35 = vrot.slane %v373_v20, %v1255_v54  ;;  %v354_v37 = vcombine.low %v346_v21, %v353_v22  ;;  %v371_v41 = vcombine.low %v363_v25, %v370_v11 }
  0x27   :  { %v592_v55 = vmul.f32 %v320_v24, %v16_v26  ;;  %v1413_v44 = vcombine.low %v131_v27, %v135_v30  ;;  %v593_v45 = vmul.f32 %v337_v31, %v17_v32  ;;  %v760_v46 = vcombine.high %v600_v28, %v600_v28  ;;  %v20_v30 = vld [vmem:[%s1767_s0 + $0x20] sm:$0xff] }
  0x28   :  { %v388_v47 = vcombine.low %v380_v8, %v387_v35  ;;  %v1415_v48 = vcombine.low %v139_v33, %v143_v7  ;;  %v1418_v56 = vrot.slane %v600_v28, %v1255_v54  ;;  %v594_v57 = vmul.f32 %v354_v37, %v18_v38 }
  0x29   :  { %v624_v53 = vcombine.high %v592_v55, %v592_v55  ;;  %v1421_v58 = vrot.slane %v760_v46, %v1255_v54  ;;  %v777_v59 = vcombine.high %v601_v49, %v601_v49  ;;  %v1424_v60 = vrot.slane %v601_v49, %v1255_v54 }
  0x2a   :  { %1800 = vst [vmem:[#allocation7_spill] sm:$0xff] %v1418_v56  ;;  %v595_v61 = vmul.f32 %v371_v41, %v19_v42  ;;  %v631_v4 = vrot.slane %v592_v55, %v1255_v54  ;;  %v794_v10 = vcombine.high %v602_v15, %v602_v15  ;;  %v1428_v19 = vrot.slane %v602_v15, %v1255_v54 }
  0x2b   :  { %v641_v12 = vcombine.high %v593_v45, %v593_v45  ;;  %v648_v13 = vrot.slane %v593_v45, %v1255_v54  ;;  %v1432_v28 = vrot.slane %v777_v59, %v1255_v54  ;;  %v811_v2 = vcombine.high %v603_v16, %v603_v16 }
  0x2c   :  { %v638_v3 = vrot.slane %v624_v53, %v1255_v54  ;;  %v1436_v5 = vrot.slane %v794_v10, %v1255_v54  ;;  %v1439_v49 = vrot.slane %v603_v16, %v1255_v54  ;;  %v828_v50 = vcombine.high %v1352_v17, %v1352_v17 }
  0x2d   :  { %v658_v15 = vcombine.high %v594_v57, %v594_v57  ;;  %v1444_v52 = vrot.slane %v811_v2, %v1255_v54  ;;  %v1448_v20 = vrot.slane %v1352_v17, %v1255_v54  ;;  %v845_v21 = vcombine.high %v1354_v63, %v1354_v63 }
  0x2e   :  { %v639_v22 = vcombine.high %v631_v4, %v631_v4  ;;  %v665_v24 = vrot.slane %v594_v57, %v1255_v54  ;;  %v1454_v16 = vrot.slane %v828_v50, %v1255_v54  ;;  %v1458_v25 = vrot.slane %v1354_v63, %v1255_v54 }
  0x2f   :  { %v675_v11 = vcombine.high %v595_v61, %v595_v61  ;;  %v1461_v26 = vrot.slane %v595_v61, %v1255_v54  ;;  %v1464_v17 = vrot.slane %v845_v21, %v1255_v54  ;;  %v862_v27 = vcombine.high %v1356_v0, %v1356_v0 }
  0x30   :  { %v640_v31 = vcombine.high %v638_v3, %v638_v3  ;;  %v655_v32 = vrot.slane %v641_v12, %v1255_v54  ;;  %v1474_v63 = vrot.slane %v1356_v0, %v1255_v54  ;;  %v879_v33 = vcombine.high %v1358_v1, %v1358_v1 }
  0x31   :  { %v672_v7 = vrot.slane %v658_v15, %v1255_v54  ;;  %v1480_v8 = vrot.slane %v862_v27, %v1255_v54  ;;  %v1484_v35 = vrot.slane %v1358_v1, %v1255_v54  ;;  %v961_v37 = vsel %vm960_vm0, %v631_v4, 0.0 }
  0x32   :  { %v1490_v0 = vrot.slane %v879_v33, %v1255_v54  ;;  %v962_v41 = vsel %vm960_vm0, %v639_v22, 0.0  ;;  %v964_v55 = vsel %vm960_vm0, %v638_v3, 0.0  ;;  %v1496_v45 = vmul.f32 %v388_v47, %v20_v30 }
  0x33   :  { %v656_v46 = vcombine.high %v648_v13, %v648_v13  ;;  %v963_v1 = vadd.f32 %v962_v41, %v961_v37  ;;  %v673_v53 = vcombine.high %v665_v24, %v665_v24  ;;  %v1499_v57 = vrot.slane %v675_v11, %v1255_v54 }
  0x34   :  { %v966_v61 = vsel %vm960_vm0, %v640_v31, 0.0  ;;  %v657_v4 = vcombine.high %v655_v32, %v655_v32  ;;  %v674_v10 = vcombine.high %v672_v7, %v672_v7  ;;  %v775_v12 = vcombine.high %v1418_v56, %v1418_v56 }
  0x35   :  { %v965_v2 = vadd.f32 %v964_v55, %v963_v1  ;;  %v776_v47 = vcombine.high %v1421_v58, %v1421_v58  ;;  %v792_v3 = vcombine.high %v1424_v60, %v1424_v60  ;;  %v809_v50 = vcombine.high %v1428_v19, %v1428_v19 }
  0x36   :  { %v968_v15 = vsel %vm960_vm0, %v648_v13, 0.0  ;;  %v793_v21 = vcombine.high %v1432_v28, %v1432_v28  ;;  %v810_v22 = vcombine.high %v1436_v5, %v1436_v5  ;;  %v826_v11 = vcombine.high %v1439_v49, %v1439_v49 }
  0x37   :  { %v967_v27 = vadd.f32 %v966_v61, %v965_v2  ;;  %v827_v30 = vcombine.high %v1444_v52, %v1444_v52  ;;  %v843_v31 = vcombine.high %v1448_v20, %v1448_v20  ;;  %v844_v33 = vcombine.high %v1454_v16, %v1454_v16 }
  0x38   :  { %v970_v13 = vsel %vm960_vm0, %v656_v46, 0.0  ;;  %v860_v37 = vcombine.high %v1458_v25, %v1458_v25  ;;  %v861_v41 = vcombine.high %v1464_v17, %v1464_v17  ;;  %v877_v55 = vcombine.high %v1474_v63, %v1474_v63 }
  0x39   :  { %v969_v1 = vadd.f32 %v968_v15, %v967_v27  ;;  %v878_v61 = vcombine.high %v1480_v8, %v1480_v8  ;;  %v894_v2 = vcombine.high %v1484_v35, %v1484_v35  ;;  %v895_v59 = vcombine.high %v1490_v0, %v1490_v0 }
  0x3a   :  { %v972_v46 = vsel %vm960_vm0, %v655_v32, 0.0  ;;  %v974_v43 = vsel %vm960_vm0, %v657_v4, 0.0  ;;  %v976_v36 = vsel %vm960_vm0, %v665_v24, 0.0  ;;  %v978_v39 = vsel %vm960_vm0, %v673_v53, 0.0 }
  0x3b   :  { %v971_v40 = vadd.f32 %v970_v13, %v969_v1  ;;  %v980_v15 = vsel %vm960_vm0, %v672_v7, 0.0  ;;  %v982_v27 = vsel %vm960_vm0, %v674_v10, 0.0  ;;  %v1545_v38 = vsel %vm960_vm0, %v775_v12, 0.0 }
  0x3c   :  { %v1549_v42 = vsel %vm960_vm0, %v1421_v58, 0.0  ;;  %v1552_v32 = vsel %vm960_vm0, %v776_v47, 0.0  ;;  %v1556_v24 = vsel %vm960_vm0, %v1424_v60, 0.0  ;;  %v1559_v53 = vsel %vm960_vm0, %v792_v3, 0.0 }
  0x3d   :  { %v973_v56 = vadd.f32 %v972_v46, %v971_v40  ;;  %v1563_v7 = vsel %vm960_vm0, %v1432_v28, 0.0  ;;  %v1566_v4 = vsel %vm960_vm0, %v793_v21, 0.0  ;;  %v1570_v40 = vsel %vm960_vm0, %v1428_v19, 0.0 }
  0x3e   :  { %v1573_v58 = vsel %vm960_vm0, %v809_v50, 0.0  ;;  %v1577_v60 = vsel %vm960_vm0, %v1436_v5, 0.0  ;;  %v1580_v12 = vsel %vm960_vm0, %v810_v22, 0.0  ;;  %v1584_v28 = vsel %vm960_vm0, %v1439_v49, 0.0 }
  0x3f   :  { %v975_v10 = vadd.f32 %v974_v43, %v973_v56  ;;  %v1587_v47 = vsel %vm960_vm0, %v826_v11, 0.0  ;;  %v1591_v19 = vsel %vm960_vm0, %v1444_v52, 0.0  ;;  %v1594_v43 = vsel %vm960_vm0, %v827_v30, 0.0 }
  0x40   :  { %v1598_v56 = vsel %vm960_vm0, %v1448_v20, 0.0  ;;  %v1601_v3 = vsel %vm960_vm0, %v843_v31, 0.0  ;;  %v1605_v49 = vsel %vm960_vm0, %v1454_v16, 0.0  ;;  %v1608_v50 = vsel %vm960_vm0, %v844_v33, 0.0 }
  0x41   :  { %v977_v5 = vadd.f32 %v976_v36, %v975_v10  ;;  %v1612_v52 = vsel %vm960_vm0, %v1458_v25, 0.0  ;;  %v1615_v21 = vsel %vm960_vm0, %v860_v37, 0.0  ;;  %v1619_v36 = vsel %vm960_vm0, %v1464_v17, 0.0 }
  0x42   :  { %v1622_v20 = vsel %vm960_vm0, %v861_v41, 0.0  ;;  %v1626_v16 = vsel %vm960_vm0, %v1474_v63, 0.0  ;;  %v1629_v11 = vsel %vm960_vm0, %v877_v55, 0.0  ;;  %v1633_v25 = vsel %vm960_vm0, %v1480_v8, 0.0 }
  0x43   :  { %v979_v22 = vadd.f32 %v978_v39, %v977_v5  ;;  %v1636_v30 = vsel %vm960_vm0, %v878_v61, 0.0  ;;  %v1640_v17 = vsel %vm960_vm0, %v1484_v35, 0.0  ;;  %v1643_v39 = vsel %vm960_vm0, %v894_v2, 0.0 }
  0x44   :  { %v1647_v63 = vsel %vm960_vm0, %v1490_v0, 0.0  ;;  %v1650_v33 = vsel %vm960_vm0, %v895_v59, 0.0  ;;  %v984_v8 = vsel %vm960_vm0, %v1461_v26, 0.0  ;;  %v1801_v13 = vrot.slane %v1415_v48, %v1255_v54 }
  0x45   :  { %v981_v31 = vadd.f32 %v980_v15, %v979_v22  ;;  %v1802_v35 = vrot.slane %v1413_v44, %v1255_v54  ;;  %v1803_v41 = vrot.slane %v1379_v23, %v1791_v51  ;;  %v1804_v0 = vrot.slane %v1379_v23, %v1146_v6 }
  0x46   :  { %v1805_v59 = vrot.slane %v1379_v23, %v1152_v9  ;;  %v1806_v1 = vrot.slane %v1379_v23, %v1795_v18  ;;  %v691_v48 = vcombine.high %v1499_v57, %v1499_v57  ;;  %v692_v44 = vcombine.high %v1496_v45, %v1496_v45  ;;  %v21_v9 = vld [vmem:[%s1767_s0 + $0x28] sm:$0xff] }
  0x47   :  { %v405_v37 = vcombine.low %v1802_v35, %v1801_v13  ;;  %v406_v55 = vcombine.low %v1804_v0, %v1803_v41  ;;  %v983_v2 = vadd.f32 %v982_v27, %v981_v31  ;;  %v699_v51 = vrot.slane %v1496_v45, %v1255_v54 }
  0x48   :  { %v407_v61 = vcombine.low %v1806_v1, %v1805_v59  ;;  %v1807_v6 = vcombine.high %v1461_v26, %v1461_v26  ;;  %v163_v15 = vrot.slane %v1379_v23, %v1797_v14  ;;  %v167_v27 = vrot.slane %v1379_v23, %v1798_v29 }
  0x49   :  { %v985_v18 = vadd.f32 %v984_v8, %v983_v2  ;;  %v171_v10 = vrot.slane %v1379_v23, %v1789_v62  ;;  %v988_v45 = vsel %vm960_vm0, %v1499_v57, 0.0  ;;  %v175_v26 = vrot.slane %v1379_v23, %v1799_v34 }
  0x4a   :  { %v986_v46 = vsel %vm960_vm0, %v1807_v6, 0.0  ;;  %v414_v5 = vrot.slane %v406_v55, %v1255_v54  ;;  %v421_v22 = vrot.slane %v407_v61, %v1255_v54  ;;  %v597_v8 = vmul.f32 %v405_v37, %v21_v9  ;;  %v22_v37 = vld [vmem:[%s1767_s0 + $0x30] sm:$0xff] }
  0x4b   :  { %v987_v31 = vadd.f32 %v986_v46, %v985_v18  ;;  %v706_v14 = vrot.slane %v692_v44, %v1255_v54  ;;  %v707_v13 = vcombine.high %v699_v51, %v699_v51  ;;  %v990_v29 = vsel %vm960_vm0, %v691_v48, 0.0 }
  0x4c   :  { %v992_v62 = vsel %vm960_vm0, %v699_v51, 0.0  ;;  %v422_v41 = vcombine.low %v414_v5, %v421_v22  ;;  %v423_v0 = vcombine.low %v163_v15, %v167_v27  ;;  %v424_v57 = vcombine.low %v171_v10, %v175_v26 }
  0x4d   :  { %v989_v35 = vadd.f32 %v988_v45, %v987_v31  ;;  %v708_v1 = vcombine.high %v706_v14, %v706_v14  ;;  %v709_v23 = vcombine.high %v597_v8, %v597_v8  ;;  %v716_v34 = vrot.slane %v597_v8, %v1255_v54  ;;  %v23_v8 = vld [vmem:[%s1767_s0 + $0x38] sm:$0xff] }
  0x4e   :  { %v994_v55 = vsel %vm960_vm0, %v707_v13, 0.0  ;;  %v996_v2 = vsel %vm960_vm0, %v706_v14, 0.0  ;;  %v431_v48 = vrot.slane %v423_v0, %v1255_v54  ;;  %v438_v44 = vrot.slane %v424_v57, %v1255_v54 }
  0x4f   :  { %v991_v59 = vadd.f32 %v990_v29, %v989_v35  ;;  %v598_v6 = vmul.f32 %v422_v41, %v22_v37  ;;  %v723_v46 = vrot.slane %v709_v23, %v1255_v54  ;;  %v724_v9 = vcombine.high %v716_v34, %v716_v34 }
  0x50   :  { %v998_v18 = vsel %vm960_vm0, %v708_v1, 0.0  ;;  %v1000_v27 = vsel %vm960_vm0, %v716_v34, 0.0  ;;  %v439_v10 = vcombine.low %v431_v48, %v438_v44 }
  0x51   :  { %v993_v61 = vadd.f32 %v992_v62, %v991_v59  ;;  %v725_v26 = vcombine.high %v723_v46, %v723_v46  ;;  %v726_v5 = vcombine.high %v598_v6, %v598_v6  ;;  %v733_v22 = vrot.slane %v598_v6, %v1255_v54 }
  0x52   :  { %v1002_v31 = vsel %vm960_vm0, %v724_v9, 0.0  ;;  %v1004_v13 = vsel %vm960_vm0, %v723_v46, 0.0  ;;  %v599_v35 = vmul.f32 %v439_v10, %v23_v8 }
  0x53   :  { %v995_v51 = vadd.f32 %v994_v55, %v993_v61  ;;  %v740_v62 = vrot.slane %v726_v5, %v1255_v54  ;;  %v741_v41 = vcombine.high %v733_v22, %v733_v22  ;;  %v1006_v0 = vsel %vm960_vm0, %v725_v26, 0.0 }
  0x54   :  { %v1008_v59 = vsel %vm960_vm0, %v733_v22, 0.0  ;;  %v743_v34 = vcombine.high %v599_v35, %v599_v35  ;;  %v750_v55 = vrot.slane %v599_v35, %v1255_v54 }
  0x55   :  { %v997_v15 = vadd.f32 %v996_v2, %v995_v51  ;;  %v742_v23 = vcombine.high %v740_v62, %v740_v62  ;;  %v1010_v37 = vsel %vm960_vm0, %v741_v41, 0.0  ;;  %v1012_v2 = vsel %vm960_vm0, %v740_v62, 0.0 }
  0x56   :  { %v757_v44 = vrot.slane %v743_v34, %v1255_v54  ;;  %v758_v51 = vcombine.high %v750_v55, %v750_v55  ;;  %v1016_v9 = vsel %vm960_vm0, %v750_v55, 0.0 }
  0x57   :  { %v999_v45 = vadd.f32 %v998_v18, %v997_v15  ;;  %v1014_v6 = vsel %vm960_vm0, %v742_v23, 0.0 }
  0x58   :  { %v759_v15 = vcombine.high %v757_v44, %v757_v44 }
  0x59   :  { %v1001_v14 = vadd.f32 %v1000_v27, %v999_v45  ;;  %v1018_v27 = vsel %vm960_vm0, %v758_v51, 0.0  ;;  %v1020_v45 = vsel %vm960_vm0, %v757_v44, 0.0 }
  0x5a   :  { %v1022_v5 = vsel %vm960_vm0, %v759_v15, 0.0 }
  0x5b   :  { %v1003_v29 = vadd.f32 %v1002_v31, %v1001_v14  ;;  %v1808_v31 = vld [vmem:[#allocation7_spill] sm:$0xff] }
  0x5c   :  { %v1024_v54 = vsel %vm960_vm0, %v1808_v31, 0.0 }
  0x5d   :  { %v1005_v57 = vadd.f32 %v1004_v13, %v1003_v29 }
  0x5f   :  { %v1007_v1 = vadd.f32 %v1006_v0, %v1005_v57 }
  0x61   :  { %v1009_v61 = vadd.f32 %v1008_v59, %v1007_v1 }
  0x63   :  { %v1011_v48 = vadd.f32 %v1010_v37, %v1009_v61 }
  0x65   :  { %v1013_v46 = vadd.f32 %v1012_v2, %v1011_v48 }
  0x67   :  { %v1015_v18 = vadd.f32 %v1014_v6, %v1013_v46 }
  0x69   :  { %v1017_v10 = vadd.f32 %v1016_v9, %v1015_v18 }
  0x6b   :  { %v1019_v26 = vadd.f32 %v1018_v27, %v1017_v10 }
  0x6d   :  { %v1021_v22 = vadd.f32 %v1020_v45, %v1019_v26 }
  0x6f   :  { %v1023_v8 = vadd.f32 %v1022_v5, %v1021_v22 }
  0x71   :  { %v1025_v14 = vadd.f32 %v1024_v54, %v1023_v8 }
  0x73   :  { %v1027_v13 = vadd.f32 %v1545_v38, %v1025_v14 }
  0x75   :  { %v1029_v29 = vadd.f32 %v1549_v42, %v1027_v13 }
  0x77   :  { %v1031_v35 = vadd.f32 %v1552_v32, %v1029_v29 }
  0x79   :  { %v1033_v62 = vadd.f32 %v1556_v24, %v1031_v35 }
  0x7b   :  { %v1035_v41 = vadd.f32 %v1559_v53, %v1033_v62 }
  0x7d   :  { %v1037_v0 = vadd.f32 %v1563_v7, %v1035_v41 }
  0x7f   :  { %v1039_v57 = vadd.f32 %v1566_v4, %v1037_v0 }
  0x81   :  { %v1041_v59 = vadd.f32 %v1570_v40, %v1039_v57 }
  0x83   :  { %v1043_v1 = vadd.f32 %v1573_v58, %v1041_v59 }
  0x85   :  { %v1045_v23 = vadd.f32 %v1577_v60, %v1043_v1 }
  0x87   :  { %v1047_v38 = vadd.f32 %v1580_v12, %v1045_v23 }
  0x89   :  { %v1049_v42 = vadd.f32 %v1584_v28, %v1047_v38 }
  0x8b   :  { %v1051_v32 = vadd.f32 %v1587_v47, %v1049_v42 }
  0x8d   :  { %v1053_v24 = vadd.f32 %v1591_v19, %v1051_v32 }
  0x8f   :  { %v1055_v53 = vadd.f32 %v1594_v43, %v1053_v24 }
  0x91   :  { %v1057_v7 = vadd.f32 %v1598_v56, %v1055_v53 }
  0x93   :  { %v1059_v4 = vadd.f32 %v1601_v3, %v1057_v7 }
  0x95   :  { %v1061_v40 = vadd.f32 %v1605_v49, %v1059_v4 }
  0x97   :  { %v1063_v58 = vadd.f32 %v1608_v50, %v1061_v40 }
  0x99   :  { %v1065_v60 = vadd.f32 %v1612_v52, %v1063_v58 }
  0x9b   :  { %v1067_v12 = vadd.f32 %v1615_v21, %v1065_v60 }
  0x9d   :  { %v1069_v28 = vadd.f32 %v1619_v36, %v1067_v12  ;;  %v1110_v36 = vld [vmem:[#allocation2] ss:$0 sm:$0xff] }
  0x9f   :  { %v1071_v47 = vadd.f32 %v1622_v20, %v1069_v28 }
  0xa1   :  { %v1073_v19 = vadd.f32 %v1626_v16, %v1071_v47 }
  0xa3   :  { %v1075_v43 = vadd.f32 %v1629_v11, %v1073_v19 }
  0xa5   :  { %v1077_v56 = vadd.f32 %v1633_v25, %v1075_v43 }
  0xa7   :  { %v1079_v3 = vadd.f32 %v1636_v30, %v1077_v56 }
  0xa9   :  { %v1081_v49 = vadd.f32 %v1640_v17, %v1079_v3 }
  0xab   :  { %v1083_v50 = vadd.f32 %v1643_v39, %v1081_v49 }
  0xad   :  { %v1085_v52 = vadd.f32 %v1647_v63, %v1083_v50 }
  0xaf   :  { %v1087_v21 = vadd.f32 %v1650_v33, %v1085_v52 }
  0xb1   :  { %1088 = vadd.xlane.f32.xlu0 %v1087_v21 }
 0x13e   :  { %v1089_v34 = vpop.xlane.xlu0 %1088 }
 0x13f   :  { %v1097_v20 = vadd.f32 %v1110_v36, %v1089_v34 }
 0x141   :  { %v1111_v55 = vmul.f32 -1.442695, %v1097_v20 }
 0x143   :  { %1113 = vpow2.f32 %v1111_v55 }
 0x14d   :  { %v1114_v16 = vpop.eup %1113 }
 0x14e   :  { %v1101_v11 = vadd.f32 1.0, %v1114_v16 }
 0x150   :  { %1115 = vrcp.f32 %v1101_v11 }
 0x15a   :  { %v1116_v25 = vpop.eup %1115 }
 0x15b   :  { %1105 = vst.msk [vmem:[%s1768_s3] sm:$0x3] %vm1104_vm1, %v1116_v25 }

</bundles_post_ra>
